<compile_context>
chip_gen: v7x
topology: tpu7x:2x2x1
jax: 0.10.0
libtpu: 0.0.40
codegen_flags: <defaults>
</compile_context>

<pallas_src>
import numpy as np
import jax
import jax.numpy as jnp
from jax import lax
from jax.experimental import pallas as pl
from jax.experimental.pallas import tpu as pltpu

BN_EPS = 1e-5
N_BATCH = 2            # kernel / scatter constants are specialized for this batch
Z_DIM = 100
Z_PAD = 128            # latent (contraction) dim padded to a lane multiple
M_PAD = 8              # latent rows padded to a sublane multiple


# --------------- host-built constant 0/1 select / scatter / gather matrices ----------

def _make_p1(n):
    # Layer-1 relayout: output row (b*16 + s) selects staging-buffer row (s*8 + b).
    p1 = np.zeros((16 * n, 16 * M_PAD), np.float32)
    for b in range(n):
        for s in range(16):
            p1[b * 16 + s, s * M_PAD + b] = 1.0
    return p1


def _make_s2cat(n):
    # Layer-2 (2x2, stride 2, no overlap): all 4 taps K-stacked, batch block-diagonal.
    # rows: (b, oy*8+ox); cols: k*16n + b*16 + iy*4+ix.
    m = np.zeros((64 * n, 64 * n), np.float32)
    for b in range(n):
        for oy in range(8):
            for ox in range(8):
                iy, ky = oy // 2, oy % 2
                ix, kx = ox // 2, ox % 2
                k = ky * 2 + kx
                m[b * 64 + oy * 8 + ox, k * 16 * n + b * 16 + iy * 4 + ix] = 1.0
    return m


def _make_s3cat():
    # Layer-3 (3x3, stride 2): 9 taps K-stacked, per-batch. (296, 576);
    # output rows >= 289 are zero padding (sublane alignment only).
    m = np.zeros((296, 576), np.float32)
    for ky in range(3):
        for kx in range(3):
            k = ky * 3 + kx
            for iy in range(8):
                for ix in range(8):
                    m[(2 * iy + ky) * 17 + (2 * ix + kx), k * 64 + iy * 8 + ix] = 1.0
    return m


def _make_g4t():
    # Layer-4 gather, transposed: (4, 296, 256); row = input pixel iy*17+ix (rows
    # >= 289 zero, so H3 pad rows never contribute), col = macro pixel my*16+mx.
    g = np.zeros((4, 296, 256), np.float32)
    for a in range(2):
        for c in range(2):
            t = a * 2 + c
            for my in range(16):
                for mx in range(16):
                    g[t, (my + a) * 17 + (mx + c), my * 16 + mx] = 1.0
    return g


# ------------------------------------- the kernel -------------------------------------

def _generator_kernel(x_ref, w1_ref, p1_ref, w2_ref, s2_ref, w3_ref, s3_ref,
                      w4_ref, g4_ref,
                      g1_ref, be1_ref, g2_ref, be2_ref, g3_ref, be3_ref,
                      b4_ref, o_ref, h1buf):
    f32, bf16 = jnp.float32, jnp.bfloat16
    n = N_BATCH

    def bn_relu(h, gamma, beta, count):
        # training-mode BatchNorm (batch statistics, biased variance) + ReLU.
        # `count` = number of REAL rows; zero padding rows contribute 0 to both sums.
        inv = 1.0 / count
        mean = jnp.sum(h, axis=0, keepdims=True) * inv
        var = jnp.sum(h * h, axis=0, keepdims=True) * inv - mean * mean
        return jnp.maximum((h - mean) * lax.rsqrt(var + BN_EPS) * gamma + beta, 0.0)

    # ---- Layer 1: ConvT(100->256, 4x4, s1) on a 1x1 input == one matmul ------------
    y1 = jnp.dot(x_ref[...], w1_ref[...], preferred_element_type=f32)     # (8, 4096)
    # 16 full (8,256) unmasked stores into an 8-row-aligned staging buffer, then one
    # constant select matmul compacts the (batch, pixel) rows.
    for s in range(16):
        h1buf[s * 8:(s + 1) * 8, :] = y1[:, s * 256:(s + 1) * 256]
    h1_pre = jnp.dot(p1_ref[...], h1buf[...].astype(bf16),
                     preferred_element_type=f32)                          # (16n, 256)
    h1 = bn_relu(h1_pre, g1_ref[...], be1_ref[...], 16.0 * n).astype(bf16)

    # ---- Layer 2: ConvT(256->128, 2x2, s2): dense matmul + one K-stacked scatter ----
    y2 = jnp.dot(h1, w2_ref[...], preferred_element_type=f32)             # (16n, 512)
    y2s = jnp.concatenate([y2[:, k * 128:(k + 1) * 128] for k in range(4)],
                          axis=0).astype(bf16)                            # (64n, 128)
    h2_pre = jnp.dot(s2_ref[...], y2s, preferred_element_type=f32)        # (64n, 128)
    h2 = bn_relu(h2_pre, g2_ref[...], be2_ref[...], 64.0 * n).astype(bf16)

    # ---- Layer 3: ConvT(128->64, 3x3, s2): dense matmul (cout padded to 128 so all
    # per-tap lane slices stay 128-aligned) + one K=576 scatter matmul per batch -----
    y3 = jnp.dot(h2, w3_ref[...], preferred_element_type=f32)             # (64n, 1152)
    h3_blocks = []
    for b in range(n):
        y3s = jnp.concatenate(
            [y3[b * 64:(b + 1) * 64, k * 128:(k + 1) * 128] for k in range(9)],
            axis=0).astype(bf16)                                          # (576, 128)
        h3_blocks.append(jnp.dot(s3_ref[...], y3s,
                                 preferred_element_type=f32))             # (296, 128)
    h3_pre = jnp.concatenate(h3_blocks, axis=0)                           # (296n, 128)
    h3 = bn_relu(h3_pre, g3_ref[...], be3_ref[...], 289.0 * n).astype(bf16)

    # ---- Layer 4: ConvT(64->3, 4x4, s2, p2) + bias + tanh, computed transposed so
    # the store is a single lane-dense (12n, 256) block -------------------------------
    out_blocks = []
    for b in range(n):
        h3b = h3[b * 296:(b + 1) * 296, :]                                # (296, 128)
        acc = jnp.zeros((12, 256), f32)
        for t in range(4):                                                # t = a*2 + c
            # rhs[(phy,phx,co), pixel] = sum_ci W4[ci, co, ky, kx] * H3[b, ci, pixel]
            rhs = lax.dot_general(w4_ref[t], h3b, (((1,), (1,)), ((), ())),
                                  preferred_element_type=f32)             # (12, 296)
            acc = acc + jnp.dot(rhs.astype(bf16), g4_ref[t],
                                preferred_element_type=f32)               # (12, 256)
        out_blocks.append(acc)
    out = jnp.concatenate(out_blocks, axis=0)                             # (12n, 256)
    o_ref[...] = jnp.tanh(out + b4_ref[...])


# ---------------------------------- host-side wrapper ----------------------------------

@jax.jit
def generator_forward(x_nchw, p):
    n = x_nchw.shape[0]
    assert n == N_BATCH, "kernel and scatter constants are specialized for N_BATCH"
    bf16, f32 = jnp.bfloat16, jnp.float32

    # latent (n, 100, 1, 1) -> (8, 128) bf16, zero padded
    x2d = x_nchw.reshape(n, Z_DIM).astype(f32)
    x_pad = jnp.pad(x2d, ((0, M_PAD - n), (0, Z_PAD - Z_DIM))).astype(bf16)

    def wflat(w):      # (Cin, Cout, Kh, Kw) -> (Cin, Kh*Kw*Cout), cols (ky, kx, co)
        cin, cout, kh, kw = w.shape
        return jnp.transpose(w, (0, 2, 3, 1)).reshape(cin, kh * kw * cout)

    w1f = jnp.pad(wflat(p["w1"]), ((0, Z_PAD - Z_DIM), (0, 0))).astype(bf16)  # (128,4096)
    w2f = wflat(p["w2"]).astype(bf16)                                         # (256, 512)
    # layer-3 weight with cout padded 64 -> 128 (zero channels) for lane alignment
    w3p = jnp.transpose(p["w3"], (0, 2, 3, 1))                                # (128,3,3,64)
    w3p = jnp.pad(w3p, ((0, 0), (0, 0), (0, 0), (0, 64))).reshape(128, 1152).astype(bf16)
    # layer-4 per-shift weight blocks: rows (phy,phx,co), cols ci (padded 64 -> 128)
    w4perm = jnp.transpose(p["w4"], (2, 3, 1, 0))                             # (ky,kx,co,ci)
    blks = []
    for a in range(2):
        for c in range(2):
            blk = w4perm[2 - 2 * a:4 - 2 * a, 2 - 2 * c:4 - 2 * c]            # (2,2,3,64)
            blks.append(jnp.pad(blk.reshape(12, 64), ((0, 0), (0, 64))))
    w4p = jnp.stack(blks, axis=0).astype(bf16)                                # (4,12,128)

    p1c = jnp.asarray(_make_p1(n), bf16)          # (32, 128)
    s2c = jnp.asarray(_make_s2cat(n), bf16)       # (128, 128)
    s3c = jnp.asarray(_make_s3cat(), bf16)        # (296, 576)
    g4c = jnp.asarray(_make_g4t(), bf16)          # (4, 296, 256)

    g1, be1 = p["g1"].reshape(1, 256), p["be1"].reshape(1, 256)
    g2, be2 = p["g2"].reshape(1, 128), p["be2"].reshape(1, 128)
    g3 = jnp.pad(p["g3"], (0, 64)).reshape(1, 128)     # zero-padded channels stay 0
    be3 = jnp.pad(p["be3"], (0, 64)).reshape(1, 128)
    b4col = jnp.tile(p["b4"], 4 * n).reshape(12 * n, 1).astype(f32)          # (12n, 1)

    inputs = (x_pad, w1f, p1c, w2f, s2c, w3p, s3c, w4p, g4c,
              g1, be1, g2, be2, g3, be3, b4col)

    def full_spec(a):
        return pl.BlockSpec(a.shape, lambda i, _nd=a.ndim: (0,) * _nd)

    o = pl.pallas_call(
        _generator_kernel,
        out_shape=jax.ShapeDtypeStruct((12 * n, 256), jnp.float32),
        grid=(1,),
        in_specs=[full_spec(a) for a in inputs],
        out_specs=pl.BlockSpec((12 * n, 256), lambda i: (0, 0)),
        scratch_shapes=[pltpu.VMEM((16 * M_PAD, 256), jnp.float32)],
        compiler_params=pltpu.CompilerParams(
            dimension_semantics=("arbitrary",),
            vmem_limit_bytes=32 * 1024 * 1024),
    )(*inputs)

    # lane-dense kernel output: rows (b, phy, phx, co), lanes (my, mx)  ->  NCHW
    o = o.reshape(n, 2, 2, 3, 16, 16)
    o = jnp.transpose(o, (0, 3, 4, 1, 5, 2))      # (b, co, my, phy, mx, phx)
    return o.reshape(n, 3, 32, 32)


# -------------------------- pure-JAX f32 reference (PyTorch semantics) -----------------

def _reference_forward(x, p):
    def convt(h, w, stride, pad):
        nb, _, hh, ww = h.shape
        _, cout, kh, kw = w.shape
        fh, fw = (hh - 1) * stride + kh, (ww - 1) * stride + kw
        full = jnp.zeros((nb, cout, fh, fw), jnp.float32)
        for ky in range(kh):
            for kx in range(kw):
                contrib = jnp.einsum('nihw,io->nohw', h, w[:, :, ky, kx],
                                     precision='highest')
                full = full.at[:, :, ky:ky + (hh - 1) * stride + 1:stride,
                                     kx:kx + (ww - 1) * stride + 1:stride].add(contrib)
        return full[:, :, pad:fh - pad, pad:fw - pad]

    def bn_relu(h, g, b):
        mean = jnp.mean(h, axis=(0, 2, 3), keepdims=True)
        var = jnp.mean((h - mean) ** 2, axis=(0, 2, 3), keepdims=True)
        y = (h - mean) * lax.rsqrt(var + BN_EPS) * g.reshape(1, -1, 1, 1) \
            + b.reshape(1, -1, 1, 1)
        return jnp.maximum(y, 0.0)

    h = bn_relu(convt(x, p["w1"], 1, 0), p["g1"], p["be1"])
    h = bn_relu(convt(h, p["w2"], 2, 0), p["g2"], p["be2"])
    h = bn_relu(convt(h, p["w3"], 2, 0), p["g3"], p["be3"])
    h = convt(h, p["w4"], 2, 2) + p["b4"].reshape(1, 3, 1, 1)
    return jnp.tanh(h)


def init_params(key):
    ks = jax.random.split(key, 11)
    p = {}
    p["w1"] = 0.02 * jax.random.normal(ks[0], (100, 256, 4, 4), jnp.float32)
    p["g1"] = 1.0 + 0.02 * jax.random.normal(ks[1], (256,), jnp.float32)
    p["be1"] = 0.01 * jax.random.normal(ks[2], (256,), jnp.float32)
    p["w2"] = 0.02 * jax.random.normal(ks[3], (256, 128, 2, 2), jnp.float32)
    p["g2"] = 1.0 + 0.02 * jax.random.normal(ks[4], (128,), jnp.float32)
    p["be2"] = 0.01 * jax.random.normal(ks[5], (128,), jnp.float32)
    p["w3"] = 0.02 * jax.random.normal(ks[6], (128, 64, 3, 3), jnp.float32)
    p["g3"] = 1.0 + 0.02 * jax.random.normal(ks[7], (64,), jnp.float32)
    p["be3"] = 0.01 * jax.random.normal(ks[8], (64,), jnp.float32)
    p["w4"] = 0.02 * jax.random.normal(ks[9], (64, 3, 4, 4), jnp.float32)
    p["b4"] = 0.01 * jax.random.normal(ks[10], (3,), jnp.float32)
    # ConvTranspose biases of layers 1-3 are omitted on purpose: a per-channel
    # constant added before training-mode BatchNorm (batch statistics) is exactly
    # cancelled by the mean subtraction, so the forward output is unchanged.
    return p


if __name__ == "__main__":
    key = jax.random.PRNGKey(0)
    k_params, k_x = jax.random.split(key)
    params = init_params(k_params)

    # DCGAN latent input: (batch=2, 100, 1, 1) -> output (2, 3, 32, 32)
    x = jax.random.normal(k_x, (N_BATCH, Z_DIM, 1, 1), jnp.float32)

    out = generator_forward(x, params)
    out = jax.block_until_ready(out)

    assert out.shape == (N_BATCH, 3, 32, 32), out.shape
    assert out.dtype == jnp.float32
    assert bool(jnp.all(jnp.isfinite(out)))
    assert bool(jnp.all(jnp.abs(out) <= 1.0))      # tanh output range

    ref = _reference_forward(x, params)
    max_err = float(jnp.max(jnp.abs(out - ref)))
    assert max_err < 0.1, f"max abs error vs f32 reference too large: {max_err}"

    print("KERNEL_OK")
</pallas_src>

<mosaic_0001>
module attributes {stable_mosaic.version = 11 : i64} {
  func.func @_generator_kernel(%arg0: i32, %arg1: memref<8x128xbf16, #tpu.memory_space<vmem>>, %arg2: memref<128x4096xbf16, #tpu.memory_space<vmem>>, %arg3: memref<32x128xbf16, #tpu.memory_space<vmem>>, %arg4: memref<256x512xbf16, #tpu.memory_space<vmem>>, %arg5: memref<128x128xbf16, #tpu.memory_space<vmem>>, %arg6: memref<128x1152xbf16, #tpu.memory_space<vmem>>, %arg7: memref<296x576xbf16, #tpu.memory_space<vmem>>, %arg8: memref<4x12x128xbf16, #tpu.memory_space<vmem>>, %arg9: memref<4x296x256xbf16, #tpu.memory_space<vmem>>, %arg10: memref<1x256xf32, #tpu.memory_space<vmem>>, %arg11: memref<1x256xf32, #tpu.memory_space<vmem>>, %arg12: memref<1x128xf32, #tpu.memory_space<vmem>>, %arg13: memref<1x128xf32, #tpu.memory_space<vmem>>, %arg14: memref<1x128xf32, #tpu.memory_space<vmem>>, %arg15: memref<1x128xf32, #tpu.memory_space<vmem>>, %arg16: memref<24x1xf32, #tpu.memory_space<vmem>>, %arg17: memref<24x256xf32, #tpu.memory_space<vmem>>, %arg18: memref<128x256xf32, #tpu.memory_space<vmem>>) attributes {dimension_semantics = [#tpu.dimension_semantics<arbitrary>], iteration_bounds = array<i64: 1>, scalar_prefetch = 0 : i64, scratch_operands = 1 : i64, tpu.core_type = #tpu.core_type<tc>, window_params = [{pipeline_mode = #tpu.pipeline_mode<synchronous>, transform_indices = @transform_0, window_bounds = array<i64: 8, 128>}, {pipeline_mode = #tpu.pipeline_mode<synchronous>, transform_indices = @transform_1, window_bounds = array<i64: 128, 4096>}, {pipeline_mode = #tpu.pipeline_mode<synchronous>, transform_indices = @transform_2, window_bounds = array<i64: 32, 128>}, {pipeline_mode = #tpu.pipeline_mode<synchronous>, transform_indices = @transform_3, window_bounds = array<i64: 256, 512>}, {pipeline_mode = #tpu.pipeline_mode<synchronous>, transform_indices = @transform_4, window_bounds = array<i64: 128, 128>}, {pipeline_mode = #tpu.pipeline_mode<synchronous>, transform_indices = @transform_5, window_bounds = array<i64: 128, 1152>}, {pipeline_mode = #tpu.pipeline_mode<synchronous>, transform_indices = @transform_6, window_bounds = array<i64: 296, 576>}, {pipeline_mode = #tpu.pipeline_mode<synchronous>, transform_indices = @transform_7, window_bounds = array<i64: 4, 12, 128>}, {pipeline_mode = #tpu.pipeline_mode<synchronous>, transform_indices = @transform_8, window_bounds = array<i64: 4, 296, 256>}, {pipeline_mode = #tpu.pipeline_mode<synchronous>, transform_indices = @transform_9, window_bounds = array<i64: 1, 256>}, {pipeline_mode = #tpu.pipeline_mode<synchronous>, transform_indices = @transform_10, window_bounds = array<i64: 1, 256>}, {pipeline_mode = #tpu.pipeline_mode<synchronous>, transform_indices = @transform_11, window_bounds = array<i64: 1, 128>}, {pipeline_mode = #tpu.pipeline_mode<synchronous>, transform_indices = @transform_12, window_bounds = array<i64: 1, 128>}, {pipeline_mode = #tpu.pipeline_mode<synchronous>, transform_indices = @transform_13, window_bounds = array<i64: 1, 128>}, {pipeline_mode = #tpu.pipeline_mode<synchronous>, transform_indices = @transform_14, window_bounds = array<i64: 1, 128>}, {pipeline_mode = #tpu.pipeline_mode<synchronous>, transform_indices = @transform_15, window_bounds = array<i64: 24, 1>}, {pipeline_mode = #tpu.pipeline_mode<synchronous>, transform_indices = @transform_16, window_bounds = array<i64: 24, 256>}]} {
    %c0 = arith.constant 0 : index
    %c0_0 = arith.constant 0 : index
    %0 = vector.load %arg1[%c0, %c0_0] : memref<8x128xbf16, #tpu.memory_space<vmem>>, vector<8x128xbf16>
    %c0_1 = arith.constant 0 : index
    %c0_2 = arith.constant 0 : index
    %1 = vector.load %arg2[%c0_1, %c0_2] : memref<128x4096xbf16, #tpu.memory_space<vmem>>, vector<128x4096xbf16>
    %cst = arith.constant dense<0.000000e+00> : vector<8x4096xf32>
    %2 = tpu.matmul %0, %1, %cst {dimension_numbers = #tpu.dot_dimension_numbers<[1], [0], [0], [1], [0, 0, 1, 1], [], []>} : vector<8x128xbf16>, vector<128x4096xbf16>, vector<8x4096xf32> -> vector<8x4096xf32>
    %3 = vector.extract_strided_slice %2 {offsets = [0, 0], sizes = [8, 256], strides = [1, 1]} : vector<8x4096xf32> to vector<8x256xf32>
    %c0_3 = arith.constant 0 : index
    %c0_4 = arith.constant 0 : index
    %4 = vector.load %arg18[%c0_3, %c0_4] : memref<128x256xf32, #tpu.memory_space<vmem>>, vector<8x256xf32>
    tpu.vector_store %arg18[%c0_3, %c0_4], %3 {strides = array<i32>} : memref<128x256xf32, #tpu.memory_space<vmem>>, vector<8x256xf32>,
    %5 = vector.extract_strided_slice %2 {offsets = [0, 256], sizes = [8, 256], strides = [1, 1]} : vector<8x4096xf32> to vector<8x256xf32>
    %c8 = arith.constant 8 : index
    %c0_5 = arith.constant 0 : index
    %6 = vector.load %arg18[%c8, %c0_5] : memref<128x256xf32, #tpu.memory_space<vmem>>, vector<8x256xf32>
    tpu.vector_store %arg18[%c8, %c0_5], %5 {strides = array<i32>} : memref<128x256xf32, #tpu.memory_space<vmem>>, vector<8x256xf32>,
    %7 = vector.extract_strided_slice %2 {offsets = [0, 512], sizes = [8, 256], strides = [1, 1]} : vector<8x4096xf32> to vector<8x256xf32>
    %c16 = arith.constant 16 : index
    %c0_6 = arith.constant 0 : index
    %8 = vector.load %arg18[%c16, %c0_6] : memref<128x256xf32, #tpu.memory_space<vmem>>, vector<8x256xf32>
    tpu.vector_store %arg18[%c16, %c0_6], %7 {strides = array<i32>} : memref<128x256xf32, #tpu.memory_space<vmem>>, vector<8x256xf32>,
    %9 = vector.extract_strided_slice %2 {offsets = [0, 768], sizes = [8, 256], strides = [1, 1]} : vector<8x4096xf32> to vector<8x256xf32>
    %c24 = arith.constant 24 : index
    %c0_7 = arith.constant 0 : index
    %10 = vector.load %arg18[%c24, %c0_7] : memref<128x256xf32, #tpu.memory_space<vmem>>, vector<8x256xf32>
    tpu.vector_store %arg18[%c24, %c0_7], %9 {strides = array<i32>} : memref<128x256xf32, #tpu.memory_space<vmem>>, vector<8x256xf32>,
    %11 = vector.extract_strided_slice %2 {offsets = [0, 1024], sizes = [8, 256], strides = [1, 1]} : vector<8x4096xf32> to vector<8x256xf32>
    %c32 = arith.constant 32 : index
    %c0_8 = arith.constant 0 : index
    %12 = vector.load %arg18[%c32, %c0_8] : memref<128x256xf32, #tpu.memory_space<vmem>>, vector<8x256xf32>
    tpu.vector_store %arg18[%c32, %c0_8], %11 {strides = array<i32>} : memref<128x256xf32, #tpu.memory_space<vmem>>, vector<8x256xf32>,
    %13 = vector.extract_strided_slice %2 {offsets = [0, 1280], sizes = [8, 256], strides = [1, 1]} : vector<8x4096xf32> to vector<8x256xf32>
    %c40 = arith.constant 40 : index
    %c0_9 = arith.constant 0 : index
    %14 = vector.load %arg18[%c40, %c0_9] : memref<128x256xf32, #tpu.memory_space<vmem>>, vector<8x256xf32>
    tpu.vector_store %arg18[%c40, %c0_9], %13 {strides = array<i32>} : memref<128x256xf32, #tpu.memory_space<vmem>>, vector<8x256xf32>,
    %15 = vector.extract_strided_slice %2 {offsets = [0, 1536], sizes = [8, 256], strides = [1, 1]} : vector<8x4096xf32> to vector<8x256xf32>
    %c48 = arith.constant 48 : index
    %c0_10 = arith.constant 0 : index
    %16 = vector.load %arg18[%c48, %c0_10] : memref<128x256xf32, #tpu.memory_space<vmem>>, vector<8x256xf32>
    tpu.vector_store %arg18[%c48, %c0_10], %15 {strides = array<i32>} : memref<128x256xf32, #tpu.memory_space<vmem>>, vector<8x256xf32>,
    %17 = vector.extract_strided_slice %2 {offsets = [0, 1792], sizes = [8, 256], strides = [1, 1]} : vector<8x4096xf32> to vector<8x256xf32>
    %c56 = arith.constant 56 : index
    %c0_11 = arith.constant 0 : index
    %18 = vector.load %arg18[%c56, %c0_11] : memref<128x256xf32, #tpu.memory_space<vmem>>, vector<8x256xf32>
    tpu.vector_store %arg18[%c56, %c0_11], %17 {strides = array<i32>} : memref<128x256xf32, #tpu.memory_space<vmem>>, vector<8x256xf32>,
    %19 = vector.extract_strided_slice %2 {offsets = [0, 2048], sizes = [8, 256], strides = [1, 1]} : vector<8x4096xf32> to vector<8x256xf32>
    %c64 = arith.constant 64 : index
    %c0_12 = arith.constant 0 : index
    %20 = vector.load %arg18[%c64, %c0_12] : memref<128x256xf32, #tpu.memory_space<vmem>>, vector<8x256xf32>
    tpu.vector_store %arg18[%c64, %c0_12], %19 {strides = array<i32>} : memref<128x256xf32, #tpu.memory_space<vmem>>, vector<8x256xf32>,
    %21 = vector.extract_strided_slice %2 {offsets = [0, 2304], sizes = [8, 256], strides = [1, 1]} : vector<8x4096xf32> to vector<8x256xf32>
    %c72 = arith.constant 72 : index
    %c0_13 = arith.constant 0 : index
    %22 = vector.load %arg18[%c72, %c0_13] : memref<128x256xf32, #tpu.memory_space<vmem>>, vector<8x256xf32>
    tpu.vector_store %arg18[%c72, %c0_13], %21 {strides = array<i32>} : memref<128x256xf32, #tpu.memory_space<vmem>>, vector<8x256xf32>,
    %23 = vector.extract_strided_slice %2 {offsets = [0, 2560], sizes = [8, 256], strides = [1, 1]} : vector<8x4096xf32> to vector<8x256xf32>
    %c80 = arith.constant 80 : index
    %c0_14 = arith.constant 0 : index
    %24 = vector.load %arg18[%c80, %c0_14] : memref<128x256xf32, #tpu.memory_space<vmem>>, vector<8x256xf32>
    tpu.vector_store %arg18[%c80, %c0_14], %23 {strides = array<i32>} : memref<128x256xf32, #tpu.memory_space<vmem>>, vector<8x256xf32>,
    %25 = vector.extract_strided_slice %2 {offsets = [0, 2816], sizes = [8, 256], strides = [1, 1]} : vector<8x4096xf32> to vector<8x256xf32>
    %c88 = arith.constant 88 : index
    %c0_15 = arith.constant 0 : index
    %26 = vector.load %arg18[%c88, %c0_15] : memref<128x256xf32, #tpu.memory_space<vmem>>, vector<8x256xf32>
    tpu.vector_store %arg18[%c88, %c0_15], %25 {strides = array<i32>} : memref<128x256xf32, #tpu.memory_space<vmem>>, vector<8x256xf32>,
    %27 = vector.extract_strided_slice %2 {offsets = [0, 3072], sizes = [8, 256], strides = [1, 1]} : vector<8x4096xf32> to vector<8x256xf32>
    %c96 = arith.constant 96 : index
    %c0_16 = arith.constant 0 : index
    %28 = vector.load %arg18[%c96, %c0_16] : memref<128x256xf32, #tpu.memory_space<vmem>>, vector<8x256xf32>
    tpu.vector_store %arg18[%c96, %c0_16], %27 {strides = array<i32>} : memref<128x256xf32, #tpu.memory_space<vmem>>, vector<8x256xf32>,
    %29 = vector.extract_strided_slice %2 {offsets = [0, 3328], sizes = [8, 256], strides = [1, 1]} : vector<8x4096xf32> to vector<8x256xf32>
    %c104 = arith.constant 104 : index
    %c0_17 = arith.constant 0 : index
    %30 = vector.load %arg18[%c104, %c0_17] : memref<128x256xf32, #tpu.memory_space<vmem>>, vector<8x256xf32>
    tpu.vector_store %arg18[%c104, %c0_17], %29 {strides = array<i32>} : memref<128x256xf32, #tpu.memory_space<vmem>>, vector<8x256xf32>,
    %31 = vector.extract_strided_slice %2 {offsets = [0, 3584], sizes = [8, 256], strides = [1, 1]} : vector<8x4096xf32> to vector<8x256xf32>
    %c112 = arith.constant 112 : index
    %c0_18 = arith.constant 0 : index
    %32 = vector.load %arg18[%c112, %c0_18] : memref<128x256xf32, #tpu.memory_space<vmem>>, vector<8x256xf32>
    tpu.vector_store %arg18[%c112, %c0_18], %31 {strides = array<i32>} : memref<128x256xf32, #tpu.memory_space<vmem>>, vector<8x256xf32>,
    %33 = vector.extract_strided_slice %2 {offsets = [0, 3840], sizes = [8, 256], strides = [1, 1]} : vector<8x4096xf32> to vector<8x256xf32>
    %c120 = arith.constant 120 : index
    %c0_19 = arith.constant 0 : index
    %34 = vector.load %arg18[%c120, %c0_19] : memref<128x256xf32, #tpu.memory_space<vmem>>, vector<8x256xf32>
    tpu.vector_store %arg18[%c120, %c0_19], %33 {strides = array<i32>} : memref<128x256xf32, #tpu.memory_space<vmem>>, vector<8x256xf32>,
    %c0_20 = arith.constant 0 : index
    %c0_21 = arith.constant 0 : index
    %35 = vector.load %arg3[%c0_20, %c0_21] : memref<32x128xbf16, #tpu.memory_space<vmem>>, vector<32x128xbf16>
    %c0_22 = arith.constant 0 : index
    %c0_23 = arith.constant 0 : index
    %36 = vector.load %arg18[%c0_22, %c0_23] : memref<128x256xf32, #tpu.memory_space<vmem>>, vector<128x256xf32>
    %37 = arith.truncf %36 : vector<128x256xf32> to vector<128x256xbf16>
    %cst_24 = arith.constant dense<0.000000e+00> : vector<32x256xf32>
    %38 = tpu.matmul %35, %37, %cst_24 {dimension_numbers = #tpu.dot_dimension_numbers<[1], [0], [0], [1], [0, 0, 1, 1], [], []>} : vector<32x128xbf16>, vector<128x256xbf16>, vector<32x256xf32> -> vector<32x256xf32>
    %c0_25 = arith.constant 0 : index
    %c0_26 = arith.constant 0 : index
    %39 = vector.load %arg10[%c0_25, %c0_26] : memref<1x256xf32, #tpu.memory_space<vmem>>, vector<1x256xf32>
    %c0_27 = arith.constant 0 : index
    %c0_28 = arith.constant 0 : index
    %40 = vector.load %arg11[%c0_27, %c0_28] : memref<1x256xf32, #tpu.memory_space<vmem>>, vector<1x256xf32>
    %cst_29 = arith.constant dense<0.000000e+00> : vector<256xf32>
    %41 = vector.multi_reduction <add>, %38, %cst_29 [0] : vector<32x256xf32> to vector<256xf32>
    %42 = vector.shape_cast %41 : vector<256xf32> to vector<1x256xf32>
    %cst_30 = arith.constant 3.125000e-02 : f32
    %43 = vector.broadcast %cst_30 : f32 to vector<1x256xf32>
    %44 = arith.mulf %42, %43 : vector<1x256xf32>
    %45 = arith.mulf %38, %38 : vector<32x256xf32>
    %cst_31 = arith.constant dense<0.000000e+00> : vector<256xf32>
    %46 = vector.multi_reduction <add>, %45, %cst_31 [0] : vector<32x256xf32> to vector<256xf32>
    %47 = vector.shape_cast %46 : vector<256xf32> to vector<1x256xf32>
    %cst_32 = arith.constant 3.125000e-02 : f32
    %48 = vector.broadcast %cst_32 : f32 to vector<1x256xf32>
    %49 = arith.mulf %47, %48 : vector<1x256xf32>
    %50 = arith.mulf %44, %44 : vector<1x256xf32>
    %51 = arith.subf %49, %50 : vector<1x256xf32>
    %52 = vector.broadcast %44 : vector<1x256xf32> to vector<32x256xf32>
    %53 = arith.subf %38, %52 : vector<32x256xf32>
    %cst_33 = arith.constant 9.99999974E-6 : f32
    %54 = vector.broadcast %cst_33 : f32 to vector<1x256xf32>
    %55 = arith.addf %51, %54 : vector<1x256xf32>
    %56 = math.rsqrt %55 : vector<1x256xf32>
    %57 = vector.broadcast %56 : vector<1x256xf32> to vector<32x256xf32>
    %58 = arith.mulf %53, %57 : vector<32x256xf32>
    %59 = vector.broadcast %39 : vector<1x256xf32> to vector<32x256xf32>
    %60 = arith.mulf %58, %59 : vector<32x256xf32>
    %61 = vector.broadcast %40 : vector<1x256xf32> to vector<32x256xf32>
    %62 = arith.addf %60, %61 : vector<32x256xf32>
    %cst_34 = arith.constant 0.000000e+00 : f32
    %63 = vector.broadcast %cst_34 : f32 to vector<32x256xf32>
    %64 = arith.maximumf %62, %63 : vector<32x256xf32>
    %65 = arith.truncf %64 : vector<32x256xf32> to vector<32x256xbf16>
    %c0_35 = arith.constant 0 : index
    %c0_36 = arith.constant 0 : index
    %66 = vector.load %arg4[%c0_35, %c0_36] : memref<256x512xbf16, #tpu.memory_space<vmem>>, vector<256x512xbf16>
    %cst_37 = arith.constant dense<0.000000e+00> : vector<32x512xf32>
    %67 = tpu.matmul %65, %66, %cst_37 {dimension_numbers = #tpu.dot_dimension_numbers<[1], [0], [0], [1], [0, 0, 1, 1], [], []>} : vector<32x256xbf16>, vector<256x512xbf16>, vector<32x512xf32> -> vector<32x512xf32>
    %68 = vector.extract_strided_slice %67 {offsets = [0, 0], sizes = [32, 128], strides = [1, 1]} : vector<32x512xf32> to vector<32x128xf32>
    %69 = vector.extract_strided_slice %67 {offsets = [0, 128], sizes = [32, 128], strides = [1, 1]} : vector<32x512xf32> to vector<32x128xf32>
    %70 = vector.extract_strided_slice %67 {offsets = [0, 256], sizes = [32, 128], strides = [1, 1]} : vector<32x512xf32> to vector<32x128xf32>
    %71 = vector.extract_strided_slice %67 {offsets = [0, 384], sizes = [32, 128], strides = [1, 1]} : vector<32x512xf32> to vector<32x128xf32>
    %72 = tpu.concatenate %68, %69, %70, %71 in 0 : vector<32x128xf32>, vector<32x128xf32>, vector<32x128xf32>, vector<32x128xf32> -> vector<128x128xf32>
    %73 = arith.truncf %72 : vector<128x128xf32> to vector<128x128xbf16>
    %c0_38 = arith.constant 0 : index
    %c0_39 = arith.constant 0 : index
    %74 = vector.load %arg5[%c0_38, %c0_39] : memref<128x128xbf16, #tpu.memory_space<vmem>>, vector<128x128xbf16>
    %cst_40 = arith.constant dense<0.000000e+00> : vector<128x128xf32>
    %75 = tpu.matmul %74, %73, %cst_40 {dimension_numbers = #tpu.dot_dimension_numbers<[1], [0], [0], [1], [0, 0, 1, 1], [], []>} : vector<128x128xbf16>, vector<128x128xbf16>, vector<128x128xf32> -> vector<128x128xf32>
    %c0_41 = arith.constant 0 : index
    %c0_42 = arith.constant 0 : index
    %76 = vector.load %arg12[%c0_41, %c0_42] : memref<1x128xf32, #tpu.memory_space<vmem>>, vector<1x128xf32>
    %c0_43 = arith.constant 0 : index
    %c0_44 = arith.constant 0 : index
    %77 = vector.load %arg13[%c0_43, %c0_44] : memref<1x128xf32, #tpu.memory_space<vmem>>, vector<1x128xf32>
    %cst_45 = arith.constant dense<0.000000e+00> : vector<128xf32>
    %78 = vector.multi_reduction <add>, %75, %cst_45 [0] : vector<128x128xf32> to vector<128xf32>
    %79 = vector.shape_cast %78 : vector<128xf32> to vector<1x128xf32>
    %cst_46 = arith.constant 7.812500e-03 : f32
    %80 = vector.broadcast %cst_46 : f32 to vector<1x128xf32>
    %81 = arith.mulf %79, %80 : vector<1x128xf32>
    %82 = arith.mulf %75, %75 : vector<128x128xf32>
    %cst_47 = arith.constant dense<0.000000e+00> : vector<128xf32>
    %83 = vector.multi_reduction <add>, %82, %cst_47 [0] : vector<128x128xf32> to vector<128xf32>
    %84 = vector.shape_cast %83 : vector<128xf32> to vector<1x128xf32>
    %cst_48 = arith.constant 7.812500e-03 : f32
    %85 = vector.broadcast %cst_48 : f32 to vector<1x128xf32>
    %86 = arith.mulf %84, %85 : vector<1x128xf32>
    %87 = arith.mulf %81, %81 : vector<1x128xf32>
    %88 = arith.subf %86, %87 : vector<1x128xf32>
    %89 = vector.broadcast %81 : vector<1x128xf32> to vector<128x128xf32>
    %90 = arith.subf %75, %89 : vector<128x128xf32>
    %cst_49 = arith.constant 9.99999974E-6 : f32
    %91 = vector.broadcast %cst_49 : f32 to vector<1x128xf32>
    %92 = arith.addf %88, %91 : vector<1x128xf32>
    %93 = math.rsqrt %92 : vector<1x128xf32>
    %94 = vector.broadcast %93 : vector<1x128xf32> to vector<128x128xf32>
    %95 = arith.mulf %90, %94 : vector<128x128xf32>
    %96 = vector.broadcast %76 : vector<1x128xf32> to vector<128x128xf32>
    %97 = arith.mulf %95, %96 : vector<128x128xf32>
    %98 = vector.broadcast %77 : vector<1x128xf32> to vector<128x128xf32>
    %99 = arith.addf %97, %98 : vector<128x128xf32>
    %cst_50 = arith.constant 0.000000e+00 : f32
    %100 = vector.broadcast %cst_50 : f32 to vector<128x128xf32>
    %101 = arith.maximumf %99, %100 : vector<128x128xf32>
    %102 = arith.truncf %101 : vector<128x128xf32> to vector<128x128xbf16>
    %c0_51 = arith.constant 0 : index
    %c0_52 = arith.constant 0 : index
    %103 = vector.load %arg6[%c0_51, %c0_52] : memref<128x1152xbf16, #tpu.memory_space<vmem>>, vector<128x1152xbf16>
    %cst_53 = arith.constant dense<0.000000e+00> : vector<128x1152xf32>
    %104 = tpu.matmul %102, %103, %cst_53 {dimension_numbers = #tpu.dot_dimension_numbers<[1], [0], [0], [1], [0, 0, 1, 1], [], []>} : vector<128x128xbf16>, vector<128x1152xbf16>, vector<128x1152xf32> -> vector<128x1152xf32>
    %105 = vector.extract_strided_slice %104 {offsets = [0, 0], sizes = [64, 128], strides = [1, 1]} : vector<128x1152xf32> to vector<64x128xf32>
    %106 = vector.extract_strided_slice %104 {offsets = [0, 128], sizes = [64, 128], strides = [1, 1]} : vector<128x1152xf32> to vector<64x128xf32>
    %107 = vector.extract_strided_slice %104 {offsets = [0, 256], sizes = [64, 128], strides = [1, 1]} : vector<128x1152xf32> to vector<64x128xf32>
    %108 = vector.extract_strided_slice %104 {offsets = [0, 384], sizes = [64, 128], strides = [1, 1]} : vector<128x1152xf32> to vector<64x128xf32>
    %109 = vector.extract_strided_slice %104 {offsets = [0, 512], sizes = [64, 128], strides = [1, 1]} : vector<128x1152xf32> to vector<64x128xf32>
    %110 = vector.extract_strided_slice %104 {offsets = [0, 640], sizes = [64, 128], strides = [1, 1]} : vector<128x1152xf32> to vector<64x128xf32>
    %111 = vector.extract_strided_slice %104 {offsets = [0, 768], sizes = [64, 128], strides = [1, 1]} : vector<128x1152xf32> to vector<64x128xf32>
    %112 = vector.extract_strided_slice %104 {offsets = [0, 896], sizes = [64, 128], strides = [1, 1]} : vector<128x1152xf32> to vector<64x128xf32>
    %113 = vector.extract_strided_slice %104 {offsets = [0, 1024], sizes = [64, 128], strides = [1, 1]} : vector<128x1152xf32> to vector<64x128xf32>
    %114 = tpu.concatenate %105, %106, %107, %108, %109, %110, %111, %112, %113 in 0 : vector<64x128xf32>, vector<64x128xf32>, vector<64x128xf32>, vector<64x128xf32>, vector<64x128xf32>, vector<64x128xf32>, vector<64x128xf32>, vector<64x128xf32>, vector<64x128xf32> -> vector<576x128xf32>
    %115 = arith.truncf %114 : vector<576x128xf32> to vector<576x128xbf16>
    %c0_54 = arith.constant 0 : index
    %c0_55 = arith.constant 0 : index
    %116 = vector.load %arg7[%c0_54, %c0_55] : memref<296x576xbf16, #tpu.memory_space<vmem>>, vector<296x576xbf16>
    %cst_56 = arith.constant dense<0.000000e+00> : vector<296x128xf32>
    %117 = tpu.matmul %116, %115, %cst_56 {dimension_numbers = #tpu.dot_dimension_numbers<[1], [0], [0], [1], [0, 0, 1, 1], [], []>} : vector<296x576xbf16>, vector<576x128xbf16>, vector<296x128xf32> -> vector<296x128xf32>
    %118 = vector.extract_strided_slice %104 {offsets = [64, 0], sizes = [64, 128], strides = [1, 1]} : vector<128x1152xf32> to vector<64x128xf32>
    %119 = vector.extract_strided_slice %104 {offsets = [64, 128], sizes = [64, 128], strides = [1, 1]} : vector<128x1152xf32> to vector<64x128xf32>
    %120 = vector.extract_strided_slice %104 {offsets = [64, 256], sizes = [64, 128], strides = [1, 1]} : vector<128x1152xf32> to vector<64x128xf32>
    %121 = vector.extract_strided_slice %104 {offsets = [64, 384], sizes = [64, 128], strides = [1, 1]} : vector<128x1152xf32> to vector<64x128xf32>
    %122 = vector.extract_strided_slice %104 {offsets = [64, 512], sizes = [64, 128], strides = [1, 1]} : vector<128x1152xf32> to vector<64x128xf32>
    %123 = vector.extract_strided_slice %104 {offsets = [64, 640], sizes = [64, 128], strides = [1, 1]} : vector<128x1152xf32> to vector<64x128xf32>
    %124 = vector.extract_strided_slice %104 {offsets = [64, 768], sizes = [64, 128], strides = [1, 1]} : vector<128x1152xf32> to vector<64x128xf32>
    %125 = vector.extract_strided_slice %104 {offsets = [64, 896], sizes = [64, 128], strides = [1, 1]} : vector<128x1152xf32> to vector<64x128xf32>
    %126 = vector.extract_strided_slice %104 {offsets = [64, 1024], sizes = [64, 128], strides = [1, 1]} : vector<128x1152xf32> to vector<64x128xf32>
    %127 = tpu.concatenate %118, %119, %120, %121, %122, %123, %124, %125, %126 in 0 : vector<64x128xf32>, vector<64x128xf32>, vector<64x128xf32>, vector<64x128xf32>, vector<64x128xf32>, vector<64x128xf32>, vector<64x128xf32>, vector<64x128xf32>, vector<64x128xf32> -> vector<576x128xf32>
    %128 = arith.truncf %127 : vector<576x128xf32> to vector<576x128xbf16>
    %c0_57 = arith.constant 0 : index
    %c0_58 = arith.constant 0 : index
    %129 = vector.load %arg7[%c0_57, %c0_58] : memref<296x576xbf16, #tpu.memory_space<vmem>>, vector<296x576xbf16>
    %cst_59 = arith.constant dense<0.000000e+00> : vector<296x128xf32>
    %130 = tpu.matmul %129, %128, %cst_59 {dimension_numbers = #tpu.dot_dimension_numbers<[1], [0], [0], [1], [0, 0, 1, 1], [], []>} : vector<296x576xbf16>, vector<576x128xbf16>, vector<296x128xf32> -> vector<296x128xf32>
    %131 = tpu.concatenate %117, %130 in 0 : vector<296x128xf32>, vector<296x128xf32> -> vector<592x128xf32>
    %c0_60 = arith.constant 0 : index
    %c0_61 = arith.constant 0 : index
    %132 = vector.load %arg14[%c0_60, %c0_61] : memref<1x128xf32, #tpu.memory_space<vmem>>, vector<1x128xf32>
    %c0_62 = arith.constant 0 : index
    %c0_63 = arith.constant 0 : index
    %133 = vector.load %arg15[%c0_62, %c0_63] : memref<1x128xf32, #tpu.memory_space<vmem>>, vector<1x128xf32>
    %cst_64 = arith.constant dense<0.000000e+00> : vector<128xf32>
    %134 = vector.multi_reduction <add>, %131, %cst_64 [0] : vector<592x128xf32> to vector<128xf32>
    %135 = vector.shape_cast %134 : vector<128xf32> to vector<1x128xf32>
    %cst_65 = arith.constant 0.00173010386 : f32
    %136 = vector.broadcast %cst_65 : f32 to vector<1x128xf32>
    %137 = arith.mulf %135, %136 : vector<1x128xf32>
    %138 = arith.mulf %131, %131 : vector<592x128xf32>
    %cst_66 = arith.constant dense<0.000000e+00> : vector<128xf32>
    %139 = vector.multi_reduction <add>, %138, %cst_66 [0] : vector<592x128xf32> to vector<128xf32>
    %140 = vector.shape_cast %139 : vector<128xf32> to vector<1x128xf32>
    %cst_67 = arith.constant 0.00173010386 : f32
    %141 = vector.broadcast %cst_67 : f32 to vector<1x128xf32>
    %142 = arith.mulf %140, %141 : vector<1x128xf32>
    %143 = arith.mulf %137, %137 : vector<1x128xf32>
    %144 = arith.subf %142, %143 : vector<1x128xf32>
    %145 = vector.broadcast %137 : vector<1x128xf32> to vector<592x128xf32>
    %146 = arith.subf %131, %145 : vector<592x128xf32>
    %cst_68 = arith.constant 9.99999974E-6 : f32
    %147 = vector.broadcast %cst_68 : f32 to vector<1x128xf32>
    %148 = arith.addf %144, %147 : vector<1x128xf32>
    %149 = math.rsqrt %148 : vector<1x128xf32>
    %150 = vector.broadcast %149 : vector<1x128xf32> to vector<592x128xf32>
    %151 = arith.mulf %146, %150 : vector<592x128xf32>
    %152 = vector.broadcast %132 : vector<1x128xf32> to vector<592x128xf32>
    %153 = arith.mulf %151, %152 : vector<592x128xf32>
    %154 = vector.broadcast %133 : vector<1x128xf32> to vector<592x128xf32>
    %155 = arith.addf %153, %154 : vector<592x128xf32>
    %cst_69 = arith.constant 0.000000e+00 : f32
    %156 = vector.broadcast %cst_69 : f32 to vector<592x128xf32>
    %157 = arith.maximumf %155, %156 : vector<592x128xf32>
    %158 = arith.truncf %157 : vector<592x128xf32> to vector<592x128xbf16>
    %159 = vector.extract_strided_slice %158 {offsets = [0, 0], sizes = [296, 128], strides = [1, 1]} : vector<592x128xbf16> to vector<296x128xbf16>
    %cst_70 = arith.constant 0.000000e+00 : f32
    %160 = vector.broadcast %cst_70 : f32 to vector<12x256xf32>
    %c0_71 = arith.constant 0 : index
    %c0_72 = arith.constant 0 : index
    %c0_73 = arith.constant 0 : index
    %161 = vector.load %arg8[%c0_71, %c0_72, %c0_73] : memref<4x12x128xbf16, #tpu.memory_space<vmem>>, vector<1x12x128xbf16>
    %162 = vector.shape_cast %161 : vector<1x12x128xbf16> to vector<12x128xbf16>
    %cst_74 = arith.constant dense<0.000000e+00> : vector<12x296xf32>
    %163 = tpu.matmul %162, %159, %cst_74 {dimension_numbers = #tpu.dot_dimension_numbers<[1], [1], [0], [0], [0, 0, 1, 0], [], []>} : vector<12x128xbf16>, vector<296x128xbf16>, vector<12x296xf32> -> vector<12x296xf32>
    %164 = arith.truncf %163 : vector<12x296xf32> to vector<12x296xbf16>
    %c0_75 = arith.constant 0 : index
    %c0_76 = arith.constant 0 : index
    %c0_77 = arith.constant 0 : index
    %165 = vector.load %arg9[%c0_75, %c0_76, %c0_77] : memref<4x296x256xbf16, #tpu.memory_space<vmem>>, vector<1x296x256xbf16>
    %166 = vector.shape_cast %165 : vector<1x296x256xbf16> to vector<296x256xbf16>
    %cst_78 = arith.constant dense<0.000000e+00> : vector<12x256xf32>
    %167 = tpu.matmul %164, %166, %cst_78 {dimension_numbers = #tpu.dot_dimension_numbers<[1], [0], [0], [1], [0, 0, 1, 1], [], []>} : vector<12x296xbf16>, vector<296x256xbf16>, vector<12x256xf32> -> vector<12x256xf32>
    %168 = arith.addf %160, %167 : vector<12x256xf32>
    %c1 = arith.constant 1 : index
    %c0_79 = arith.constant 0 : index
    %c0_80 = arith.constant 0 : index
    %169 = vector.load %arg8[%c1, %c0_79, %c0_80] : memref<4x12x128xbf16, #tpu.memory_space<vmem>>, vector<1x12x128xbf16>
    %170 = vector.shape_cast %169 : vector<1x12x128xbf16> to vector<12x128xbf16>
    %cst_81 = arith.constant dense<0.000000e+00> : vector<12x296xf32>
    %171 = tpu.matmul %170, %159, %cst_81 {dimension_numbers = #tpu.dot_dimension_numbers<[1], [1], [0], [0], [0, 0, 1, 0], [], []>} : vector<12x128xbf16>, vector<296x128xbf16>, vector<12x296xf32> -> vector<12x296xf32>
    %172 = arith.truncf %171 : vector<12x296xf32> to vector<12x296xbf16>
    %c1_82 = arith.constant 1 : index
    %c0_83 = arith.constant 0 : index
    %c0_84 = arith.constant 0 : index
    %173 = vector.load %arg9[%c1_82, %c0_83, %c0_84] : memref<4x296x256xbf16, #tpu.memory_space<vmem>>, vector<1x296x256xbf16>
    %174 = vector.shape_cast %173 : vector<1x296x256xbf16> to vector<296x256xbf16>
    %cst_85 = arith.constant dense<0.000000e+00> : vector<12x256xf32>
    %175 = tpu.matmul %172, %174, %cst_85 {dimension_numbers = #tpu.dot_dimension_numbers<[1], [0], [0], [1], [0, 0, 1, 1], [], []>} : vector<12x296xbf16>, vector<296x256xbf16>, vector<12x256xf32> -> vector<12x256xf32>
    %176 = arith.addf %168, %175 : vector<12x256xf32>
    %c2 = arith.constant 2 : index
    %c0_86 = arith.constant 0 : index
    %c0_87 = arith.constant 0 : index
    %177 = vector.load %arg8[%c2, %c0_86, %c0_87] : memref<4x12x128xbf16, #tpu.memory_space<vmem>>, vector<1x12x128xbf16>
    %178 = vector.shape_cast %177 : vector<1x12x128xbf16> to vector<12x128xbf16>
    %cst_88 = arith.constant dense<0.000000e+00> : vector<12x296xf32>
    %179 = tpu.matmul %178, %159, %cst_88 {dimension_numbers = #tpu.dot_dimension_numbers<[1], [1], [0], [0], [0, 0, 1, 0], [], []>} : vector<12x128xbf16>, vector<296x128xbf16>, vector<12x296xf32> -> vector<12x296xf32>
    %180 = arith.truncf %179 : vector<12x296xf32> to vector<12x296xbf16>
    %c2_89 = arith.constant 2 : index
    %c0_90 = arith.constant 0 : index
    %c0_91 = arith.constant 0 : index
    %181 = vector.load %arg9[%c2_89, %c0_90, %c0_91] : memref<4x296x256xbf16, #tpu.memory_space<vmem>>, vector<1x296x256xbf16>
    %182 = vector.shape_cast %181 : vector<1x296x256xbf16> to vector<296x256xbf16>
    %cst_92 = arith.constant dense<0.000000e+00> : vector<12x256xf32>
    %183 = tpu.matmul %180, %182, %cst_92 {dimension_numbers = #tpu.dot_dimension_numbers<[1], [0], [0], [1], [0, 0, 1, 1], [], []>} : vector<12x296xbf16>, vector<296x256xbf16>, vector<12x256xf32> -> vector<12x256xf32>
    %184 = arith.addf %176, %183 : vector<12x256xf32>
    %c3 = arith.constant 3 : index
    %c0_93 = arith.constant 0 : index
    %c0_94 = arith.constant 0 : index
    %185 = vector.load %arg8[%c3, %c0_93, %c0_94] : memref<4x12x128xbf16, #tpu.memory_space<vmem>>, vector<1x12x128xbf16>
    %186 = vector.shape_cast %185 : vector<1x12x128xbf16> to vector<12x128xbf16>
    %cst_95 = arith.constant dense<0.000000e+00> : vector<12x296xf32>
    %187 = tpu.matmul %186, %159, %cst_95 {dimension_numbers = #tpu.dot_dimension_numbers<[1], [1], [0], [0], [0, 0, 1, 0], [], []>} : vector<12x128xbf16>, vector<296x128xbf16>, vector<12x296xf32> -> vector<12x296xf32>
    %188 = arith.truncf %187 : vector<12x296xf32> to vector<12x296xbf16>
    %c3_96 = arith.constant 3 : index
    %c0_97 = arith.constant 0 : index
    %c0_98 = arith.constant 0 : index
    %189 = vector.load %arg9[%c3_96, %c0_97, %c0_98] : memref<4x296x256xbf16, #tpu.memory_space<vmem>>, vector<1x296x256xbf16>
    %190 = vector.shape_cast %189 : vector<1x296x256xbf16> to vector<296x256xbf16>
    %cst_99 = arith.constant dense<0.000000e+00> : vector<12x256xf32>
    %191 = tpu.matmul %188, %190, %cst_99 {dimension_numbers = #tpu.dot_dimension_numbers<[1], [0], [0], [1], [0, 0, 1, 1], [], []>} : vector<12x296xbf16>, vector<296x256xbf16>, vector<12x256xf32> -> vector<12x256xf32>
    %192 = arith.addf %184, %191 : vector<12x256xf32>
    %193 = vector.extract_strided_slice %158 {offsets = [296, 0], sizes = [296, 128], strides = [1, 1]} : vector<592x128xbf16> to vector<296x128xbf16>
    %cst_100 = arith.constant 0.000000e+00 : f32
    %194 = vector.broadcast %cst_100 : f32 to vector<12x256xf32>
    %c0_101 = arith.constant 0 : index
    %c0_102 = arith.constant 0 : index
    %c0_103 = arith.constant 0 : index
    %195 = vector.load %arg8[%c0_101, %c0_102, %c0_103] : memref<4x12x128xbf16, #tpu.memory_space<vmem>>, vector<1x12x128xbf16>
    %196 = vector.shape_cast %195 : vector<1x12x128xbf16> to vector<12x128xbf16>
    %cst_104 = arith.constant dense<0.000000e+00> : vector<12x296xf32>
    %197 = tpu.matmul %196, %193, %cst_104 {dimension_numbers = #tpu.dot_dimension_numbers<[1], [1], [0], [0], [0, 0, 1, 0], [], []>} : vector<12x128xbf16>, vector<296x128xbf16>, vector<12x296xf32> -> vector<12x296xf32>
    %198 = arith.truncf %197 : vector<12x296xf32> to vector<12x296xbf16>
    %c0_105 = arith.constant 0 : index
    %c0_106 = arith.constant 0 : index
    %c0_107 = arith.constant 0 : index
    %199 = vector.load %arg9[%c0_105, %c0_106, %c0_107] : memref<4x296x256xbf16, #tpu.memory_space<vmem>>, vector<1x296x256xbf16>
    %200 = vector.shape_cast %199 : vector<1x296x256xbf16> to vector<296x256xbf16>
    %cst_108 = arith.constant dense<0.000000e+00> : vector<12x256xf32>
    %201 = tpu.matmul %198, %200, %cst_108 {dimension_numbers = #tpu.dot_dimension_numbers<[1], [0], [0], [1], [0, 0, 1, 1], [], []>} : vector<12x296xbf16>, vector<296x256xbf16>, vector<12x256xf32> -> vector<12x256xf32>
    %202 = arith.addf %194, %201 : vector<12x256xf32>
    %c1_109 = arith.constant 1 : index
    %c0_110 = arith.constant 0 : index
    %c0_111 = arith.constant 0 : index
    %203 = vector.load %arg8[%c1_109, %c0_110, %c0_111] : memref<4x12x128xbf16, #tpu.memory_space<vmem>>, vector<1x12x128xbf16>
    %204 = vector.shape_cast %203 : vector<1x12x128xbf16> to vector<12x128xbf16>
    %cst_112 = arith.constant dense<0.000000e+00> : vector<12x296xf32>
    %205 = tpu.matmul %204, %193, %cst_112 {dimension_numbers = #tpu.dot_dimension_numbers<[1], [1], [0], [0], [0, 0, 1, 0], [], []>} : vector<12x128xbf16>, vector<296x128xbf16>, vector<12x296xf32> -> vector<12x296xf32>
    %206 = arith.truncf %205 : vector<12x296xf32> to vector<12x296xbf16>
    %c1_113 = arith.constant 1 : index
    %c0_114 = arith.constant 0 : index
    %c0_115 = arith.constant 0 : index
    %207 = vector.load %arg9[%c1_113, %c0_114, %c0_115] : memref<4x296x256xbf16, #tpu.memory_space<vmem>>, vector<1x296x256xbf16>
    %208 = vector.shape_cast %207 : vector<1x296x256xbf16> to vector<296x256xbf16>
    %cst_116 = arith.constant dense<0.000000e+00> : vector<12x256xf32>
    %209 = tpu.matmul %206, %208, %cst_116 {dimension_numbers = #tpu.dot_dimension_numbers<[1], [0], [0], [1], [0, 0, 1, 1], [], []>} : vector<12x296xbf16>, vector<296x256xbf16>, vector<12x256xf32> -> vector<12x256xf32>
    %210 = arith.addf %202, %209 : vector<12x256xf32>
    %c2_117 = arith.constant 2 : index
    %c0_118 = arith.constant 0 : index
    %c0_119 = arith.constant 0 : index
    %211 = vector.load %arg8[%c2_117, %c0_118, %c0_119] : memref<4x12x128xbf16, #tpu.memory_space<vmem>>, vector<1x12x128xbf16>
    %212 = vector.shape_cast %211 : vector<1x12x128xbf16> to vector<12x128xbf16>
    %cst_120 = arith.constant dense<0.000000e+00> : vector<12x296xf32>
    %213 = tpu.matmul %212, %193, %cst_120 {dimension_numbers = #tpu.dot_dimension_numbers<[1], [1], [0], [0], [0, 0, 1, 0], [], []>} : vector<12x128xbf16>, vector<296x128xbf16>, vector<12x296xf32> -> vector<12x296xf32>
    %214 = arith.truncf %213 : vector<12x296xf32> to vector<12x296xbf16>
    %c2_121 = arith.constant 2 : index
    %c0_122 = arith.constant 0 : index
    %c0_123 = arith.constant 0 : index
    %215 = vector.load %arg9[%c2_121, %c0_122, %c0_123] : memref<4x296x256xbf16, #tpu.memory_space<vmem>>, vector<1x296x256xbf16>
    %216 = vector.shape_cast %215 : vector<1x296x256xbf16> to vector<296x256xbf16>
    %cst_124 = arith.constant dense<0.000000e+00> : vector<12x256xf32>
    %217 = tpu.matmul %214, %216, %cst_124 {dimension_numbers = #tpu.dot_dimension_numbers<[1], [0], [0], [1], [0, 0, 1, 1], [], []>} : vector<12x296xbf16>, vector<296x256xbf16>, vector<12x256xf32> -> vector<12x256xf32>
    %218 = arith.addf %210, %217 : vector<12x256xf32>
    %c3_125 = arith.constant 3 : index
    %c0_126 = arith.constant 0 : index
    %c0_127 = arith.constant 0 : index
    %219 = vector.load %arg8[%c3_125, %c0_126, %c0_127] : memref<4x12x128xbf16, #tpu.memory_space<vmem>>, vector<1x12x128xbf16>
    %220 = vector.shape_cast %219 : vector<1x12x128xbf16> to vector<12x128xbf16>
    %cst_128 = arith.constant dense<0.000000e+00> : vector<12x296xf32>
    %221 = tpu.matmul %220, %193, %cst_128 {dimension_numbers = #tpu.dot_dimension_numbers<[1], [1], [0], [0], [0, 0, 1, 0], [], []>} : vector<12x128xbf16>, vector<296x128xbf16>, vector<12x296xf32> -> vector<12x296xf32>
    %222 = arith.truncf %221 : vector<12x296xf32> to vector<12x296xbf16>
    %c3_129 = arith.constant 3 : index
    %c0_130 = arith.constant 0 : index
    %c0_131 = arith.constant 0 : index
    %223 = vector.load %arg9[%c3_129, %c0_130, %c0_131] : memref<4x296x256xbf16, #tpu.memory_space<vmem>>, vector<1x296x256xbf16>
    %224 = vector.shape_cast %223 : vector<1x296x256xbf16> to vector<296x256xbf16>
    %cst_132 = arith.constant dense<0.000000e+00> : vector<12x256xf32>
    %225 = tpu.matmul %222, %224, %cst_132 {dimension_numbers = #tpu.dot_dimension_numbers<[1], [0], [0], [1], [0, 0, 1, 1], [], []>} : vector<12x296xbf16>, vector<296x256xbf16>, vector<12x256xf32> -> vector<12x256xf32>
    %226 = arith.addf %218, %225 : vector<12x256xf32>
    %227 = tpu.concatenate %192, %226 in 0 : vector<12x256xf32>, vector<12x256xf32> -> vector<24x256xf32>
    %c0_133 = arith.constant 0 : index
    %c0_134 = arith.constant 0 : index
    %228 = vector.load %arg16[%c0_133, %c0_134] : memref<24x1xf32, #tpu.memory_space<vmem>>, vector<24x1xf32>
    %229 = vector.broadcast %228 : vector<24x1xf32> to vector<24x256xf32>
    %230 = arith.addf %227, %229 : vector<24x256xf32>
    %231 = math.tanh %230 : vector<24x256xf32>
    %c0_135 = arith.constant 0 : index
    %c0_136 = arith.constant 0 : index
    %232 = vector.load %arg17[%c0_135, %c0_136] : memref<24x256xf32, #tpu.memory_space<vmem>>, vector<24x256xf32>
    tpu.vector_store %arg17[%c0_135, %c0_136], %231 {strides = array<i32>} : memref<24x256xf32, #tpu.memory_space<vmem>>, vector<24x256xf32>,
    return
  }
  func.func @transform_0(%arg0: i32) -> (i32, i32) {
    %c0_i32 = arith.constant 0 : i32
    %c0_i32_0 = arith.constant 0 : i32
    %c0_i32_1 = arith.constant 0 : i32
    return %c0_i32, %c0_i32_0 : i32, i32
  }
  func.func @transform_1(%arg0: i32) -> (i32, i32) {
    %c0_i32 = arith.constant 0 : i32
    %c0_i32_0 = arith.constant 0 : i32
    %c0_i32_1 = arith.constant 0 : i32
    return %c0_i32, %c0_i32_0 : i32, i32
  }
  func.func @transform_2(%arg0: i32) -> (i32, i32) {
    %c0_i32 = arith.constant 0 : i32
    %c0_i32_0 = arith.constant 0 : i32
    %c0_i32_1 = arith.constant 0 : i32
    return %c0_i32, %c0_i32_0 : i32, i32
  }
  func.func @transform_3(%arg0: i32) -> (i32, i32) {
    %c0_i32 = arith.constant 0 : i32
    %c0_i32_0 = arith.constant 0 : i32
    %c0_i32_1 = arith.constant 0 : i32
    return %c0_i32, %c0_i32_0 : i32, i32
  }
  func.func @transform_4(%arg0: i32) -> (i32, i32) {
    %c0_i32 = arith.constant 0 : i32
    %c0_i32_0 = arith.constant 0 : i32
    %c0_i32_1 = arith.constant 0 : i32
    return %c0_i32, %c0_i32_0 : i32, i32
  }
  func.func @transform_5(%arg0: i32) -> (i32, i32) {
    %c0_i32 = arith.constant 0 : i32
    %c0_i32_0 = arith.constant 0 : i32
    %c0_i32_1 = arith.constant 0 : i32
    return %c0_i32, %c0_i32_0 : i32, i32
  }
  func.func @transform_6(%arg0: i32) -> (i32, i32) {
    %c0_i32 = arith.constant 0 : i32
    %c0_i32_0 = arith.constant 0 : i32
    %c0_i32_1 = arith.constant 0 : i32
    return %c0_i32, %c0_i32_0 : i32, i32
  }
  func.func @transform_7(%arg0: i32) -> (i32, i32, i32) {
    %c0_i32 = arith.constant 0 : i32
    %c0_i32_0 = arith.constant 0 : i32
    %c0_i32_1 = arith.constant 0 : i32
    %c0_i32_2 = arith.constant 0 : i32
    return %c0_i32, %c0_i32_0, %c0_i32_1 : i32, i32, i32
  }
  func.func @transform_8(%arg0: i32) -> (i32, i32, i32) {
    %c0_i32 = arith.constant 0 : i32
    %c0_i32_0 = arith.constant 0 : i32
    %c0_i32_1 = arith.constant 0 : i32
    %c0_i32_2 = arith.constant 0 : i32
    return %c0_i32, %c0_i32_0, %c0_i32_1 : i32, i32, i32
  }
  func.func @transform_9(%arg0: i32) -> (i32, i32) {
    %c0_i32 = arith.constant 0 : i32
    %c0_i32_0 = arith.constant 0 : i32
    %c0_i32_1 = arith.constant 0 : i32
    return %c0_i32, %c0_i32_0 : i32, i32
  }
  func.func @transform_10(%arg0: i32) -> (i32, i32) {
    %c0_i32 = arith.constant 0 : i32
    %c0_i32_0 = arith.constant 0 : i32
    %c0_i32_1 = arith.constant 0 : i32
    return %c0_i32, %c0_i32_0 : i32, i32
  }
  func.func @transform_11(%arg0: i32) -> (i32, i32) {
    %c0_i32 = arith.constant 0 : i32
    %c0_i32_0 = arith.constant 0 : i32
    %c0_i32_1 = arith.constant 0 : i32
    return %c0_i32, %c0_i32_0 : i32, i32
  }
  func.func @transform_12(%arg0: i32) -> (i32, i32) {
    %c0_i32 = arith.constant 0 : i32
    %c0_i32_0 = arith.constant 0 : i32
    %c0_i32_1 = arith.constant 0 : i32
    return %c0_i32, %c0_i32_0 : i32, i32
  }
  func.func @transform_13(%arg0: i32) -> (i32, i32) {
    %c0_i32 = arith.constant 0 : i32
    %c0_i32_0 = arith.constant 0 : i32
    %c0_i32_1 = arith.constant 0 : i32
    return %c0_i32, %c0_i32_0 : i32, i32
  }
  func.func @transform_14(%arg0: i32) -> (i32, i32) {
    %c0_i32 = arith.constant 0 : i32
    %c0_i32_0 = arith.constant 0 : i32
    %c0_i32_1 = arith.constant 0 : i32
    return %c0_i32, %c0_i32_0 : i32, i32
  }
  func.func @transform_15(%arg0: i32) -> (i32, i32) {
    %c0_i32 = arith.constant 0 : i32
    %c0_i32_0 = arith.constant 0 : i32
    %c0_i32_1 = arith.constant 0 : i32
    return %c0_i32, %c0_i32_0 : i32, i32
  }
  func.func @transform_16(%arg0: i32) -> (i32, i32) {
    %c0_i32 = arith.constant 0 : i32
    %c0_i32_0 = arith.constant 0 : i32
    %c0_i32_1 = arith.constant 0 : i32
    return %c0_i32, %c0_i32_0 : i32, i32
  }
}

</mosaic_0001>

<bundles_post_ra>
// kernel: tile.8
= control target key start
LH: loop header
LB: loop body
LE: loop exit
PB: predicated region body
PF: predicated region fallthrough
CT: control target
= control target key end

     0   :  { %s22_s0 = inlined_call_operand.vmem [shape: f32[3], index: 0, kind: input, shape index: {}]   ;;  %s23_s1 = inlined_call_operand.vmem [shape: f32[8,3], index: 1, kind: output, shape index: {}]  }
   0x1   :  { %v4_v0 = vld [vmem:[%s22_s0] ss:$0 sm:$0xff] }
   0x2   :  { %5 = vst [vmem:[%s23_s1] sm:$0xff] %v4_v0 }

// kernel: tile.0
= control target key start
LH: loop header
LB: loop body
LE: loop exit
PB: predicated region body
PF: predicated region fallthrough
CT: control target
= control target key end

     0   :  { %vm3_vm0 = vcmask 7168   ;;  %s22_s10 = smov 126   ;;  %s45_s0 = inlined_call_operand.vmem [shape: f32[8,3], index: 0, kind: input, shape index: {}]   ;;  %s46_s1 = inlined_call_operand.vmem [shape: f32[24,1], index: 1, kind: output, shape index: {}]  }
   0x1   :  { %v5_v0 = vld [vmem:[%s45_s0] sm:$0xff]   ;;  %s21_s0 = smov 127  }
   0x2   :  { %6 = vrot.lane.b32.xlu0 %v5_v0, %s21_s0  ;;  %4 = vst.msk [vmem:[%s46_s1] ss:$3 sm:$0xff] %vm3_vm0, %v5_v0  }
   0x6   :  { %12 = vrot.lane.b32.xlu0 %v5_v0, %s22_s10 }
  0x74   :  { %v7_v1 = vpop.permute.xlu0 %6  }
  0x75   :  { %17 = vst.msk [vmem:[%s46_s1 + $0x1] ss:$3 sm:$0xff] %vm3_vm0, %v7_v1  }
  0x78   :  { %v13_v2 = vpop.permute.xlu0 %12  }
  0x79   :  { %18 = vst.msk [vmem:[%s46_s1 + $0x2] ss:$3 sm:$0xff] %vm3_vm0, %v13_v2  }

// kernel: generator_forward.1
= control target key start
LH: loop header
LB: loop body
LE: loop exit
PB: predicated region body
PF: predicated region fallthrough
CT: control target
= control target key end

     0   :  { %v17849_v3 = vmov 0   ;;  %vm11694_vm0 = vmmov 0   ;;  %vm4956_vm1 = vcmask 523264   ;;  %vm7268_vm2 = vcmask 1043456   ;;  %s17815_s1 = inlined_call_operand.vmem [shape: bf16[128,4096], index: 1, kind: input, shape index: {}]   ;;  %s17816_s0 = inlined_call_operand.vmem [shape: bf16[8,128], index: 0, kind: input, shape index: {}]   ;;  %s17817_s2 = inlined_call_operand.vmem [shape: bf16[32,128], index: 2, kind: input, shape index: {}]   ;;  %s17818_s3 = inlined_call_operand.vmem [shape: bf16[256,512], index: 3, kind: input, shape index: {}]   ;;  %s17819_s9 = inlined_call_operand.vmem [shape: f32[1,256], index: 9, kind: input, shape index: {}]   ;;  %s17820_s10 = inlined_call_operand.vmem [shape: f32[1,256], index: 10, kind: input, shape index: {}]   ;;  %s17821_s4 = inlined_call_operand.vmem [shape: bf16[128,128], index: 4, kind: input, shape index: {}]   ;;  %s17822_s5 = inlined_call_operand.vmem [shape: bf16[128,1152], index: 5, kind: input, shape index: {}]   ;;  %s17823_s11 = inlined_call_operand.vmem [shape: f32[1,128], index: 11, kind: input, shape index: {}]   ;;  %s17824_s12 = inlined_call_operand.vmem [shape: f32[1,128], index: 12, kind: input, shape index: {}]   ;;  %s17825_s6 = inlined_call_operand.vmem [shape: bf16[296,576], index: 6, kind: input, shape index: {}]   ;;  %s17826_s13 = inlined_call_operand.vmem [shape: f32[1,128], index: 13, kind: input, shape index: {}]   ;;  %s17827_s14 = inlined_call_operand.vmem [shape: f32[1,128], index: 14, kind: input, shape index: {}]   ;;  %s17828_s7 = inlined_call_operand.vmem [shape: bf16[4,12,128], index: 7, kind: input, shape index: {}]   ;;  %s17829_s8 = inlined_call_operand.vmem [shape: bf16[4,296,256], index: 8, kind: input, shape index: {}]   ;;  %s17830_s15 = inlined_call_operand.vmem [shape: f32[24,1], index: 15, kind: input, shape index: {}]   ;;  %s17831_s16 = inlined_call_operand.vmem [shape: f32[24,256], index: 16, kind: output, shape index: {}]  }
   0x1   :  { %18031 = sst [smem:[#allocation80_spill]] %s17815_s1  ;;  %1623 = vmatprep.mubr.bf16.mxu0 %v17849_v3  ;;  %1664 = vmatprep.mubr.bf16.mxu1 %v17849_v3  ;;  %vm7264_vm3 = vcmask 326656  }
   0x2   :  { %s18032_s23 = sld [smem:[#allocation80_spill]]  ;;  %11068 = vset.pattern.permute.xlu0 %v17849_v3  ;;  %11069 = vset.pattern.permute.xlu1 %v17849_v3 }
   0x8   :  { %v55_v0 = vld [vmem:[%s18032_s23] sm:$0xff]  ;;  %v56_v2 = vld [vmem:[%s18032_s23 + $0x8] sm:$0xff]  ;;  %v57_v63 = vld [vmem:[%s18032_s23 + $0x10] sm:$0xff] }
   0x9   :  { %v71_v1 = vld [vmem:[%s18032_s23 + $0x80] sm:$0xff]  ;;  %v72_v5 = vld [vmem:[%s18032_s23 + $0x88] sm:$0xff] }
   0xa   :  { %v9322_v4 = vcombine.high %v55_v0, %v71_v1  ;;  %v9321_v6 = vcombine.low %v55_v0, %v71_v1  ;;  %v87_v7 = vld [vmem:[%s18032_s23 + $0x100] sm:$0xff]  ;;  %v9324_v9 = vcombine.high %v56_v2, %v72_v5  ;;  %v9323_v10 = vcombine.low %v56_v2, %v72_v5  ;;  %v88_v12 = vld [vmem:[%s18032_s23 + $0x108] sm:$0xff]  ;;  %v73_v0 = vld [vmem:[%s18032_s23 + $0x90] sm:$0xff] }
   0xb   :  { %v103_v8 = vld [vmem:[%s18032_s23 + $0x180] sm:$0xff]  ;;  %v104_v13 = vld [vmem:[%s18032_s23 + $0x188] sm:$0xff]  ;;  %v58_v1 = vld [vmem:[%s18032_s23 + $0x18] sm:$0xff] }
   0xc   :  { %v9354_v11 = vcombine.high %v87_v7, %v103_v8  ;;  %v119_v14 = vld [vmem:[%s18032_s23 + $0x200] sm:$0xff]  ;;  %1591 = vmatprep.subr.bf16.mxu0 %v9322_v4  ;;  %v9356_v15 = vcombine.high %v88_v12, %v104_v13  ;;  %v120_v17 = vld [vmem:[%s18032_s23 + $0x208] sm:$0xff]  ;;  %1632 = vmatprep.subr.bf16.mxu1 %v9324_v9  ;;  %v9353_v19 = vcombine.low %v87_v7, %v103_v8  ;;  %v74_v2 = vld [vmem:[%s18032_s23 + $0x98] sm:$0xff] }
   0xd   :  { %v135_v16 = vld [vmem:[%s18032_s23 + $0x280] sm:$0xff]  ;;  %v136_v18 = vld [vmem:[%s18032_s23 + $0x288] sm:$0xff]  ;;  %1592 = vmatpush1.bf16.msra.mxu0 %v9321_v6  ;;  %1633 = vmatpush1.bf16.msra.mxu1 %v9323_v10  ;;  %v9355_v20 = vcombine.low %v88_v12, %v104_v13  ;;  %v9326_v6 = vcombine.high %v57_v63, %v73_v0  ;;  %v9328_v7 = vcombine.high %v58_v1, %v74_v2  ;;  %v89_v8 = vld [vmem:[%s18032_s23 + $0x110] sm:$0xff] }
   0xe   :  { %1593 = vmatprep.subr.bf16.mxu0 %v9354_v11  ;;  %v9386_v21 = vcombine.high %v119_v14, %v135_v16  ;;  %1634 = vmatprep.subr.bf16.mxu1 %v9356_v15  ;;  %v9388_v22 = vcombine.high %v120_v17, %v136_v18  ;;  %v151_v23 = vld [vmem:[%s18032_s23 + $0x300] sm:$0xff]  ;;  %v152_v25 = vld [vmem:[%s18032_s23 + $0x308] sm:$0xff]  ;;  %v9385_v27 = vcombine.low %v119_v14, %v135_v16  ;;  %v105_v9 = vld [vmem:[%s18032_s23 + $0x190] sm:$0xff] }
   0xf   :  { %v167_v24 = vld [vmem:[%s18032_s23 + $0x380] sm:$0xff]  ;;  %v168_v26 = vld [vmem:[%s18032_s23 + $0x388] sm:$0xff]  ;;  %v9387_v28 = vcombine.low %v120_v17, %v136_v18  ;;  %v90_v10 = vld [vmem:[%s18032_s23 + $0x118] sm:$0xff]  ;;  %v9325_v13 = vcombine.low %v57_v63, %v73_v0  ;;  %v9327_v14 = vcombine.low %v58_v1, %v74_v2  ;;  %v9358_v15 = vcombine.high %v89_v8, %v105_v9 }
  0x10   :  { %v9418_v29 = vcombine.high %v151_v23, %v167_v24  ;;  %v9420_v30 = vcombine.high %v152_v25, %v168_v26  ;;  %v183_v31 = vld [vmem:[%s18032_s23 + $0x400] sm:$0xff]  ;;  %v184_v33 = vld [vmem:[%s18032_s23 + $0x408] sm:$0xff]  ;;  %v9417_v35 = vcombine.low %v151_v23, %v167_v24  ;;  %v9419_v36 = vcombine.low %v152_v25, %v168_v26  ;;  %v106_v11 = vld [vmem:[%s18032_s23 + $0x198] sm:$0xff] }
  0x11   :  { %1594 = vmatpush1.bf16.msra.mxu0 %v9353_v19  ;;  %1635 = vmatpush1.bf16.msra.mxu1 %v9355_v20  ;;  %v199_v32 = vld [vmem:[%s18032_s23 + $0x480] sm:$0xff]  ;;  %v200_v34 = vld [vmem:[%s18032_s23 + $0x488] sm:$0xff]  ;;  %v9360_v16 = vcombine.high %v90_v10, %v106_v11  ;;  %v121_v17 = vld [vmem:[%s18032_s23 + $0x210] sm:$0xff] }
  0x12   :  { %1595 = vmatprep.subr.bf16.mxu0 %v9386_v21  ;;  %1636 = vmatprep.subr.bf16.mxu1 %v9388_v22  ;;  %v9450_v37 = vcombine.high %v183_v31, %v199_v32  ;;  %v9452_v38 = vcombine.high %v184_v33, %v200_v34  ;;  %v215_v39 = vld [vmem:[%s18032_s23 + $0x500] sm:$0xff]  ;;  %v216_v41 = vld [vmem:[%s18032_s23 + $0x508] sm:$0xff]  ;;  %v9449_v43 = vcombine.low %v183_v31, %v199_v32  ;;  %v137_v18 = vld [vmem:[%s18032_s23 + $0x290] sm:$0xff] }
  0x13   :  { %v231_v40 = vld [vmem:[%s18032_s23 + $0x580] sm:$0xff]  ;;  %v232_v42 = vld [vmem:[%s18032_s23 + $0x588] sm:$0xff]  ;;  %v9451_v44 = vcombine.low %v184_v33, %v200_v34  ;;  %v122_v19 = vld [vmem:[%s18032_s23 + $0x218] sm:$0xff]  ;;  %v9357_v21 = vcombine.low %v89_v8, %v105_v9  ;;  %v9359_v22 = vcombine.low %v90_v10, %v106_v11  ;;  %v9390_v23 = vcombine.high %v121_v17, %v137_v18 }
  0x14   :  { %v9482_v45 = vcombine.high %v215_v39, %v231_v40  ;;  %v9484_v46 = vcombine.high %v216_v41, %v232_v42  ;;  %v247_v47 = vld [vmem:[%s18032_s23 + $0x600] sm:$0xff]  ;;  %v248_v49 = vld [vmem:[%s18032_s23 + $0x608] sm:$0xff]  ;;  %v9481_v51 = vcombine.low %v215_v39, %v231_v40  ;;  %v9483_v52 = vcombine.low %v216_v41, %v232_v42  ;;  %v138_v20 = vld [vmem:[%s18032_s23 + $0x298] sm:$0xff] }
  0x15   :  { %1596 = vmatpush1.bf16.msra.mxu0 %v9385_v27  ;;  %1637 = vmatpush1.bf16.msra.mxu1 %v9387_v28  ;;  %v263_v48 = vld [vmem:[%s18032_s23 + $0x680] sm:$0xff]  ;;  %v264_v50 = vld [vmem:[%s18032_s23 + $0x688] sm:$0xff]  ;;  %v9392_v24 = vcombine.high %v122_v19, %v138_v20  ;;  %v153_v25 = vld [vmem:[%s18032_s23 + $0x310] sm:$0xff] }
  0x16   :  { %1597 = vmatprep.subr.bf16.mxu0 %v9418_v29  ;;  %1638 = vmatprep.subr.bf16.mxu1 %v9420_v30  ;;  %v9514_v53 = vcombine.high %v247_v47, %v263_v48  ;;  %v9516_v54 = vcombine.high %v248_v49, %v264_v50  ;;  %v279_v55 = vld [vmem:[%s18032_s23 + $0x700] sm:$0xff]  ;;  %v280_v57 = vld [vmem:[%s18032_s23 + $0x708] sm:$0xff]  ;;  %v9513_v59 = vcombine.low %v247_v47, %v263_v48  ;;  %v169_v26 = vld [vmem:[%s18032_s23 + $0x390] sm:$0xff] }
  0x17   :  { %v295_v56 = vld [vmem:[%s18032_s23 + $0x780] sm:$0xff]  ;;  %v296_v58 = vld [vmem:[%s18032_s23 + $0x788] sm:$0xff]  ;;  %v9515_v60 = vcombine.low %v248_v49, %v264_v50  ;;  %v154_v27 = vld [vmem:[%s18032_s23 + $0x318] sm:$0xff]  ;;  %v9389_v29 = vcombine.low %v121_v17, %v137_v18  ;;  %v9391_v30 = vcombine.low %v122_v19, %v138_v20  ;;  %v9422_v31 = vcombine.high %v153_v25, %v169_v26 }
  0x18   :  { %v9546_v61 = vcombine.high %v279_v55, %v295_v56  ;;  %v9548_v62 = vcombine.high %v280_v57, %v296_v58  ;;  %v9545_v4 = vcombine.low %v279_v55, %v295_v56  ;;  %v9547_v5 = vcombine.low %v280_v57, %v296_v58  ;;  %v11907_v12 = vld [vmem:[%s17816_s0] sm:$0xf]  ;;  %v170_v28 = vld [vmem:[%s18032_s23 + $0x398] sm:$0xff]  ;;  %v185_v33 = vld [vmem:[%s18032_s23 + $0x410] sm:$0xff] }
  0x19   :  { %1598 = vmatpush1.bf16.msra.mxu0 %v9417_v35  ;;  %1639 = vmatpush1.bf16.msra.mxu1 %v9419_v36  ;;  %v9424_v32 = vcombine.high %v154_v27, %v170_v28  ;;  %v201_v34 = vld [vmem:[%s18032_s23 + $0x490] sm:$0xff]  ;;  %v186_v35 = vld [vmem:[%s18032_s23 + $0x418] sm:$0xff]  ;;  %v59_v1 = vld [vmem:[%s18032_s23 + $0x20] sm:$0xff] }
  0x1a   :  { %1599 = vmatprep.subr.bf16.mxu0 %v9450_v37  ;;  %1640 = vmatprep.subr.bf16.mxu1 %v9452_v38  ;;  %v202_v36 = vld [vmem:[%s18032_s23 + $0x498] sm:$0xff]  ;;  %v9421_v37 = vcombine.low %v153_v25, %v169_v26  ;;  %v9423_v38 = vcombine.low %v154_v27, %v170_v28  ;;  %v9454_v39 = vcombine.high %v185_v33, %v201_v34  ;;  %v217_v41 = vld [vmem:[%s18032_s23 + $0x510] sm:$0xff]  ;;  %v75_v2 = vld [vmem:[%s18032_s23 + $0xa0] sm:$0xff] }
  0x1b   :  { %v9456_v40 = vcombine.high %v186_v35, %v202_v36  ;;  %v233_v42 = vld [vmem:[%s18032_s23 + $0x590] sm:$0xff]  ;;  %v9330_v8 = vcombine.high %v59_v1, %v75_v2  ;;  %v91_v10 = vld [vmem:[%s18032_s23 + $0x120] sm:$0xff] }
  0x1c   :  { %v9486_v47 = vcombine.high %v217_v41, %v233_v42  ;;  %v249_v49 = vld [vmem:[%s18032_s23 + $0x610] sm:$0xff]  ;;  %v107_v11 = vld [vmem:[%s18032_s23 + $0x1a0] sm:$0xff] }
  0x1d   :  { %1600 = vmatpush1.bf16.msra.mxu0 %v9449_v43  ;;  %1641 = vmatpush1.bf16.msra.mxu1 %v9451_v44  ;;  %v218_v43 = vld [vmem:[%s18032_s23 + $0x518] sm:$0xff]  ;;  %v265_v50 = vld [vmem:[%s18032_s23 + $0x690] sm:$0xff]  ;;  %v9362_v17 = vcombine.high %v91_v10, %v107_v11  ;;  %v123_v19 = vld [vmem:[%s18032_s23 + $0x220] sm:$0xff] }
  0x1e   :  { %1601 = vmatprep.subr.bf16.mxu0 %v9482_v45  ;;  %1642 = vmatprep.subr.bf16.mxu1 %v9484_v46  ;;  %v234_v44 = vld [vmem:[%s18032_s23 + $0x598] sm:$0xff]  ;;  %v9453_v45 = vcombine.low %v185_v33, %v201_v34  ;;  %v9455_v46 = vcombine.low %v186_v35, %v202_v36  ;;  %v9518_v55 = vcombine.high %v249_v49, %v265_v50  ;;  %v281_v57 = vld [vmem:[%s18032_s23 + $0x710] sm:$0xff]  ;;  %v139_v20 = vld [vmem:[%s18032_s23 + $0x2a0] sm:$0xff] }
  0x1f   :  { %v9488_v48 = vcombine.high %v218_v43, %v234_v44  ;;  %v297_v58 = vld [vmem:[%s18032_s23 + $0x790] sm:$0xff]  ;;  %v9394_v25 = vcombine.high %v123_v19, %v139_v20  ;;  %v155_v27 = vld [vmem:[%s18032_s23 + $0x320] sm:$0xff] }
  0x20   :  { %v9550_v63 = vcombine.high %v281_v57, %v297_v58  ;;  %v171_v28 = vld [vmem:[%s18032_s23 + $0x3a0] sm:$0xff] }
  0x21   :  { %1602 = vmatpush1.bf16.msra.mxu0 %v9481_v51  ;;  %1643 = vmatpush1.bf16.msra.mxu1 %v9483_v52  ;;  %v250_v51 = vld [vmem:[%s18032_s23 + $0x618] sm:$0xff]  ;;  %v9426_v33 = vcombine.high %v155_v27, %v171_v28  ;;  %v187_v35 = vld [vmem:[%s18032_s23 + $0x420] sm:$0xff] }
  0x22   :  { %1603 = vmatprep.subr.bf16.mxu0 %v9514_v53  ;;  %1644 = vmatprep.subr.bf16.mxu1 %v9516_v54  ;;  %v266_v52 = vld [vmem:[%s18032_s23 + $0x698] sm:$0xff]  ;;  %v9485_v53 = vcombine.low %v217_v41, %v233_v42  ;;  %v9487_v54 = vcombine.low %v218_v43, %v234_v44  ;;  %v203_v36 = vld [vmem:[%s18032_s23 + $0x4a0] sm:$0xff] }
  0x23   :  { %v9520_v56 = vcombine.high %v250_v51, %v266_v52  ;;  %v9458_v41 = vcombine.high %v187_v35, %v203_v36  ;;  %v219_v43 = vld [vmem:[%s18032_s23 + $0x520] sm:$0xff] }
  0x24   :  { %v235_v44 = vld [vmem:[%s18032_s23 + $0x5a0] sm:$0xff] }
  0x25   :  { %1604 = vmatpush1.bf16.msra.mxu0 %v9513_v59  ;;  %1645 = vmatpush1.bf16.msra.mxu1 %v9515_v60  ;;  %v282_v59 = vld [vmem:[%s18032_s23 + $0x718] sm:$0xff] }
  0x26   :  { %1605 = vmatprep.subr.bf16.mxu0 %v9546_v61  ;;  %1646 = vmatprep.subr.bf16.mxu1 %v9548_v62  ;;  %v298_v60 = vld [vmem:[%s18032_s23 + $0x798] sm:$0xff]  ;;  %v9517_v61 = vcombine.low %v249_v49, %v265_v50  ;;  %v9519_v62 = vcombine.low %v250_v51, %v266_v52  ;;  %v9490_v49 = vcombine.high %v219_v43, %v235_v44  ;;  %v251_v51 = vld [vmem:[%s18032_s23 + $0x620] sm:$0xff] }
  0x27   :  { %v9552_v0 = vcombine.high %v282_v59, %v298_v60  ;;  %v267_v52 = vld [vmem:[%s18032_s23 + $0x6a0] sm:$0xff] }
  0x29   :  { %1606 = vmatpush1.bf16.msra.mxu0 %v9545_v4  ;;  %1647 = vmatpush1.bf16.msra.mxu1 %v9547_v5  ;;  %v60_v4 = vld [vmem:[%s18032_s23 + $0x28] sm:$0xff] }
  0x2a   :  { %1673 = vmatprep.subr.bf16.mxu0 %v9326_v6  ;;  %1714 = vmatprep.subr.bf16.mxu1 %v9328_v7  ;;  %v76_v5 = vld [vmem:[%s18032_s23 + $0xa8] sm:$0xff]  ;;  %v9549_v6 = vcombine.low %v281_v57, %v297_v58  ;;  %v9551_v7 = vcombine.low %v282_v59, %v298_v60  ;;  %v9522_v57 = vcombine.high %v251_v51, %v267_v52  ;;  %v283_v59 = vld [vmem:[%s18032_s23 + $0x720] sm:$0xff] }
  0x2b   :  { %v9332_v9 = vcombine.high %v60_v4, %v76_v5  ;;  %v299_v60 = vld [vmem:[%s18032_s23 + $0x7a0] sm:$0xff] }
  0x2c   :  { %1624 = vmatmul.mubr.bf16.vlgmr.msra.gmra.mrb[0].mxu0 %v11907_v12  ;;  %1665 = vmatmul.mubr.bf16.vlgmr.msra.gmra.mrb[0].mxu1 %v11907_v12 }
  0x2d   :  { %1674 = vmatpush1.bf16.msra.mxu0 %v9325_v13  ;;  %1715 = vmatpush1.bf16.msra.mxu1 %v9327_v14  ;;  %v92_v13 = vld [vmem:[%s18032_s23 + $0x128] sm:$0xff] }
  0x2e   :  { %1675 = vmatprep.subr.bf16.mxu0 %v9358_v15  ;;  %1716 = vmatprep.subr.bf16.mxu1 %v9360_v16  ;;  %v108_v14 = vld [vmem:[%s18032_s23 + $0x1a8] sm:$0xff]  ;;  %v9329_v15 = vcombine.low %v59_v1, %v75_v2  ;;  %v9331_v16 = vcombine.low %v60_v4, %v76_v5  ;;  %v9554_v1 = vcombine.high %v283_v59, %v299_v60  ;;  %v61_v4 = vld [vmem:[%s18032_s23 + $0x30] sm:$0xff] }
  0x2f   :  { %1705 = vmatprep.mubr.bf16.mxu0 %v17849_v3  ;;  %1746 = vmatprep.mubr.bf16.mxu1 %v17849_v3  ;;  %v9364_v18 = vcombine.high %v92_v13, %v108_v14  ;;  %v77_v5 = vld [vmem:[%s18032_s23 + $0xb0] sm:$0xff] }
  0x31   :  { %1676 = vmatpush1.bf16.msra.mxu0 %v9357_v21  ;;  %1717 = vmatpush1.bf16.msra.mxu1 %v9359_v22  ;;  %v124_v21 = vld [vmem:[%s18032_s23 + $0x228] sm:$0xff] }
  0x32   :  { %1677 = vmatprep.subr.bf16.mxu0 %v9390_v23  ;;  %1718 = vmatprep.subr.bf16.mxu1 %v9392_v24  ;;  %v140_v22 = vld [vmem:[%s18032_s23 + $0x2a8] sm:$0xff]  ;;  %v9361_v23 = vcombine.low %v91_v10, %v107_v11  ;;  %v9363_v24 = vcombine.low %v92_v13, %v108_v14  ;;  %v9334_v10 = vcombine.high %v61_v4, %v77_v5  ;;  %v93_v13 = vld [vmem:[%s18032_s23 + $0x130] sm:$0xff] }
  0x33   :  { %v9396_v26 = vcombine.high %v124_v21, %v140_v22  ;;  %v109_v14 = vld [vmem:[%s18032_s23 + $0x1b0] sm:$0xff] }
  0x35   :  { %1678 = vmatpush1.bf16.msra.mxu0 %v9389_v29  ;;  %1719 = vmatpush1.bf16.msra.mxu1 %v9391_v30  ;;  %v156_v29 = vld [vmem:[%s18032_s23 + $0x328] sm:$0xff] }
  0x36   :  { %1679 = vmatprep.subr.bf16.mxu0 %v9422_v31  ;;  %1720 = vmatprep.subr.bf16.mxu1 %v9424_v32  ;;  %v172_v30 = vld [vmem:[%s18032_s23 + $0x3a8] sm:$0xff]  ;;  %v9393_v31 = vcombine.low %v123_v19, %v139_v20  ;;  %v9395_v32 = vcombine.low %v124_v21, %v140_v22  ;;  %v9366_v19 = vcombine.high %v93_v13, %v109_v14  ;;  %v125_v21 = vld [vmem:[%s18032_s23 + $0x230] sm:$0xff] }
  0x37   :  { %v9428_v34 = vcombine.high %v156_v29, %v172_v30  ;;  %v141_v22 = vld [vmem:[%s18032_s23 + $0x2b0] sm:$0xff] }
  0x39   :  { %1680 = vmatpush1.bf16.msra.mxu0 %v9421_v37  ;;  %1721 = vmatpush1.bf16.msra.mxu1 %v9423_v38  ;;  %v188_v37 = vld [vmem:[%s18032_s23 + $0x428] sm:$0xff] }
  0x3a   :  { %1681 = vmatprep.subr.bf16.mxu0 %v9454_v39  ;;  %1722 = vmatprep.subr.bf16.mxu1 %v9456_v40  ;;  %v204_v38 = vld [vmem:[%s18032_s23 + $0x4a8] sm:$0xff]  ;;  %v9425_v39 = vcombine.low %v155_v27, %v171_v28  ;;  %v9427_v40 = vcombine.low %v156_v29, %v172_v30  ;;  %v9398_v27 = vcombine.high %v125_v21, %v141_v22  ;;  %v157_v29 = vld [vmem:[%s18032_s23 + $0x330] sm:$0xff] }
  0x3b   :  { %v9460_v42 = vcombine.high %v188_v37, %v204_v38  ;;  %v173_v30 = vld [vmem:[%s18032_s23 + $0x3b0] sm:$0xff] }
  0x3d   :  { %1682 = vmatpush1.bf16.msra.mxu0 %v9453_v45  ;;  %1723 = vmatpush1.bf16.msra.mxu1 %v9455_v46  ;;  %v220_v45 = vld [vmem:[%s18032_s23 + $0x528] sm:$0xff] }
  0x3e   :  { %1683 = vmatprep.subr.bf16.mxu0 %v9486_v47  ;;  %1724 = vmatprep.subr.bf16.mxu1 %v9488_v48  ;;  %v236_v46 = vld [vmem:[%s18032_s23 + $0x5a8] sm:$0xff]  ;;  %v9457_v47 = vcombine.low %v187_v35, %v203_v36  ;;  %v9459_v48 = vcombine.low %v188_v37, %v204_v38  ;;  %v9430_v35 = vcombine.high %v157_v29, %v173_v30  ;;  %v189_v37 = vld [vmem:[%s18032_s23 + $0x430] sm:$0xff] }
  0x3f   :  { %v9492_v50 = vcombine.high %v220_v45, %v236_v46  ;;  %v205_v38 = vld [vmem:[%s18032_s23 + $0x4b0] sm:$0xff] }
  0x41   :  { %1684 = vmatpush1.bf16.msra.mxu0 %v9485_v53  ;;  %1725 = vmatpush1.bf16.msra.mxu1 %v9487_v54  ;;  %v252_v53 = vld [vmem:[%s18032_s23 + $0x628] sm:$0xff] }
  0x42   :  { %1685 = vmatprep.subr.bf16.mxu0 %v9518_v55  ;;  %1726 = vmatprep.subr.bf16.mxu1 %v9520_v56  ;;  %v268_v54 = vld [vmem:[%s18032_s23 + $0x6a8] sm:$0xff]  ;;  %v9489_v55 = vcombine.low %v219_v43, %v235_v44  ;;  %v9491_v56 = vcombine.low %v220_v45, %v236_v46  ;;  %v9462_v43 = vcombine.high %v189_v37, %v205_v38  ;;  %v221_v45 = vld [vmem:[%s18032_s23 + $0x530] sm:$0xff] }
  0x43   :  { %v9524_v58 = vcombine.high %v252_v53, %v268_v54  ;;  %v237_v46 = vld [vmem:[%s18032_s23 + $0x5b0] sm:$0xff] }
  0x45   :  { %1686 = vmatpush1.bf16.msra.mxu0 %v9517_v61  ;;  %1727 = vmatpush1.bf16.msra.mxu1 %v9519_v62  ;;  %v284_v61 = vld [vmem:[%s18032_s23 + $0x728] sm:$0xff] }
  0x46   :  { %1687 = vmatprep.subr.bf16.mxu0 %v9550_v63  ;;  %1728 = vmatprep.subr.bf16.mxu1 %v9552_v0  ;;  %v300_v62 = vld [vmem:[%s18032_s23 + $0x7a8] sm:$0xff]  ;;  %v9521_v63 = vcombine.low %v251_v51, %v267_v52  ;;  %v9523_v0 = vcombine.low %v252_v53, %v268_v54  ;;  %v9494_v51 = vcombine.high %v221_v45, %v237_v46  ;;  %v253_v53 = vld [vmem:[%s18032_s23 + $0x630] sm:$0xff] }
  0x47   :  { %v9556_v2 = vcombine.high %v284_v61, %v300_v62  ;;  %v269_v54 = vld [vmem:[%s18032_s23 + $0x6b0] sm:$0xff] }
  0x49   :  { %1688 = vmatpush1.bf16.msra.mxu0 %v9549_v6  ;;  %1729 = vmatpush1.bf16.msra.mxu1 %v9551_v7  ;;  %v62_v6 = vld [vmem:[%s18032_s23 + $0x38] sm:$0xff] }
  0x4a   :  { %1755 = vmatprep.subr.bf16.mxu0 %v9330_v8  ;;  %1796 = vmatprep.subr.bf16.mxu1 %v9332_v9  ;;  %v78_v7 = vld [vmem:[%s18032_s23 + $0xb8] sm:$0xff]  ;;  %v9553_v8 = vcombine.low %v283_v59, %v299_v60  ;;  %v9555_v9 = vcombine.low %v284_v61, %v300_v62  ;;  %v9526_v59 = vcombine.high %v253_v53, %v269_v54  ;;  %v285_v61 = vld [vmem:[%s18032_s23 + $0x730] sm:$0xff] }
  0x4b   :  { %v9336_v11 = vcombine.high %v62_v6, %v78_v7  ;;  %v301_v62 = vld [vmem:[%s18032_s23 + $0x7b0] sm:$0xff] }
  0x4c   :  { %1706 = vmatmul.mubr.bf16.vlgmr.msra.gmra.mrb[4].mxu0 %v11907_v12  ;;  %1747 = vmatmul.mubr.bf16.vlgmr.msra.gmra.mrb[4].mxu1 %v11907_v12 }
  0x4d   :  { %1756 = vmatpush1.bf16.msra.mxu0 %v9329_v15  ;;  %1797 = vmatpush1.bf16.msra.mxu1 %v9331_v16  ;;  %v94_v15 = vld [vmem:[%s18032_s23 + $0x138] sm:$0xff] }
  0x4e   :  { %1757 = vmatprep.subr.bf16.mxu0 %v9362_v17  ;;  %1798 = vmatprep.subr.bf16.mxu1 %v9364_v18  ;;  %v110_v16 = vld [vmem:[%s18032_s23 + $0x1b8] sm:$0xff]  ;;  %v9333_v17 = vcombine.low %v61_v4, %v77_v5  ;;  %v9335_v18 = vcombine.low %v62_v6, %v78_v7  ;;  %v9558_v4 = vcombine.high %v285_v61, %v301_v62  ;;  %v63_v6 = vld [vmem:[%s18032_s23 + $0x40] sm:$0xff] }
  0x4f   :  { %1787 = vmatprep.mubr.bf16.mxu0 %v17849_v3  ;;  %1828 = vmatprep.mubr.bf16.mxu1 %v17849_v3  ;;  %v9368_v20 = vcombine.high %v94_v15, %v110_v16  ;;  %v79_v7 = vld [vmem:[%s18032_s23 + $0xc0] sm:$0xff] }
  0x51   :  { %1758 = vmatpush1.bf16.msra.mxu0 %v9361_v23  ;;  %1799 = vmatpush1.bf16.msra.mxu1 %v9363_v24  ;;  %v126_v23 = vld [vmem:[%s18032_s23 + $0x238] sm:$0xff] }
  0x52   :  { %1759 = vmatprep.subr.bf16.mxu0 %v9394_v25  ;;  %1800 = vmatprep.subr.bf16.mxu1 %v9396_v26  ;;  %v142_v24 = vld [vmem:[%s18032_s23 + $0x2b8] sm:$0xff]  ;;  %v9365_v25 = vcombine.low %v93_v13, %v109_v14  ;;  %v9367_v26 = vcombine.low %v94_v15, %v110_v16  ;;  %v9338_v13 = vcombine.high %v63_v6, %v79_v7  ;;  %v95_v15 = vld [vmem:[%s18032_s23 + $0x140] sm:$0xff] }
  0x53   :  { %v9400_v28 = vcombine.high %v126_v23, %v142_v24  ;;  %v111_v16 = vld [vmem:[%s18032_s23 + $0x1c0] sm:$0xff] }
  0x55   :  { %1760 = vmatpush1.bf16.msra.mxu0 %v9393_v31  ;;  %1801 = vmatpush1.bf16.msra.mxu1 %v9395_v32  ;;  %v158_v31 = vld [vmem:[%s18032_s23 + $0x338] sm:$0xff] }
  0x56   :  { %1761 = vmatprep.subr.bf16.mxu0 %v9426_v33  ;;  %1802 = vmatprep.subr.bf16.mxu1 %v9428_v34  ;;  %v174_v32 = vld [vmem:[%s18032_s23 + $0x3b8] sm:$0xff]  ;;  %v9397_v33 = vcombine.low %v125_v21, %v141_v22  ;;  %v9399_v34 = vcombine.low %v126_v23, %v142_v24  ;;  %v9370_v21 = vcombine.high %v95_v15, %v111_v16  ;;  %v127_v23 = vld [vmem:[%s18032_s23 + $0x240] sm:$0xff] }
  0x57   :  { %v9432_v36 = vcombine.high %v158_v31, %v174_v32  ;;  %v143_v24 = vld [vmem:[%s18032_s23 + $0x2c0] sm:$0xff] }
  0x59   :  { %1762 = vmatpush1.bf16.msra.mxu0 %v9425_v39  ;;  %1803 = vmatpush1.bf16.msra.mxu1 %v9427_v40  ;;  %v190_v39 = vld [vmem:[%s18032_s23 + $0x438] sm:$0xff] }
  0x5a   :  { %1763 = vmatprep.subr.bf16.mxu0 %v9458_v41  ;;  %1804 = vmatprep.subr.bf16.mxu1 %v9460_v42  ;;  %v206_v40 = vld [vmem:[%s18032_s23 + $0x4b8] sm:$0xff]  ;;  %v9429_v41 = vcombine.low %v157_v29, %v173_v30  ;;  %v9431_v42 = vcombine.low %v158_v31, %v174_v32  ;;  %v9402_v29 = vcombine.high %v127_v23, %v143_v24  ;;  %v159_v31 = vld [vmem:[%s18032_s23 + $0x340] sm:$0xff] }
  0x5b   :  { %v9464_v44 = vcombine.high %v190_v39, %v206_v40  ;;  %v175_v32 = vld [vmem:[%s18032_s23 + $0x3c0] sm:$0xff] }
  0x5d   :  { %1764 = vmatpush1.bf16.msra.mxu0 %v9457_v47  ;;  %1805 = vmatpush1.bf16.msra.mxu1 %v9459_v48  ;;  %v222_v47 = vld [vmem:[%s18032_s23 + $0x538] sm:$0xff] }
  0x5e   :  { %1765 = vmatprep.subr.bf16.mxu0 %v9490_v49  ;;  %1806 = vmatprep.subr.bf16.mxu1 %v9492_v50  ;;  %v238_v48 = vld [vmem:[%s18032_s23 + $0x5b8] sm:$0xff]  ;;  %v9461_v49 = vcombine.low %v189_v37, %v205_v38  ;;  %v9463_v50 = vcombine.low %v190_v39, %v206_v40  ;;  %v9434_v37 = vcombine.high %v159_v31, %v175_v32  ;;  %v191_v39 = vld [vmem:[%s18032_s23 + $0x440] sm:$0xff] }
  0x5f   :  { %v9496_v52 = vcombine.high %v222_v47, %v238_v48  ;;  %v207_v40 = vld [vmem:[%s18032_s23 + $0x4c0] sm:$0xff] }
  0x61   :  { %1766 = vmatpush1.bf16.msra.mxu0 %v9489_v55  ;;  %1807 = vmatpush1.bf16.msra.mxu1 %v9491_v56  ;;  %v254_v55 = vld [vmem:[%s18032_s23 + $0x638] sm:$0xff] }
  0x62   :  { %1767 = vmatprep.subr.bf16.mxu0 %v9522_v57  ;;  %1808 = vmatprep.subr.bf16.mxu1 %v9524_v58  ;;  %v270_v56 = vld [vmem:[%s18032_s23 + $0x6b8] sm:$0xff]  ;;  %v9493_v57 = vcombine.low %v221_v45, %v237_v46  ;;  %v9495_v58 = vcombine.low %v222_v47, %v238_v48  ;;  %v9466_v45 = vcombine.high %v191_v39, %v207_v40  ;;  %v223_v47 = vld [vmem:[%s18032_s23 + $0x540] sm:$0xff] }
  0x63   :  { %v9528_v60 = vcombine.high %v254_v55, %v270_v56  ;;  %v239_v48 = vld [vmem:[%s18032_s23 + $0x5c0] sm:$0xff] }
  0x65   :  { %1768 = vmatpush1.bf16.msra.mxu0 %v9521_v63  ;;  %1809 = vmatpush1.bf16.msra.mxu1 %v9523_v0  ;;  %v286_v63 = vld [vmem:[%s18032_s23 + $0x738] sm:$0xff] }
  0x66   :  { %1769 = vmatprep.subr.bf16.mxu0 %v9554_v1  ;;  %1810 = vmatprep.subr.bf16.mxu1 %v9556_v2  ;;  %v302_v0 = vld [vmem:[%s18032_s23 + $0x7b8] sm:$0xff]  ;;  %v9525_v1 = vcombine.low %v253_v53, %v269_v54  ;;  %v9527_v2 = vcombine.low %v254_v55, %v270_v56  ;;  %v9498_v53 = vcombine.high %v223_v47, %v239_v48  ;;  %v255_v55 = vld [vmem:[%s18032_s23 + $0x640] sm:$0xff] }
  0x67   :  { %v9560_v5 = vcombine.high %v286_v63, %v302_v0  ;;  %v271_v56 = vld [vmem:[%s18032_s23 + $0x6c0] sm:$0xff] }
  0x69   :  { %1770 = vmatpush1.bf16.msra.mxu0 %v9553_v8  ;;  %1811 = vmatpush1.bf16.msra.mxu1 %v9555_v9  ;;  %v64_v8 = vld [vmem:[%s18032_s23 + $0x48] sm:$0xff] }
  0x6a   :  { %1837 = vmatprep.subr.bf16.mxu0 %v9334_v10  ;;  %1878 = vmatprep.subr.bf16.mxu1 %v9336_v11  ;;  %v80_v9 = vld [vmem:[%s18032_s23 + $0xc8] sm:$0xff]  ;;  %v9557_v10 = vcombine.low %v285_v61, %v301_v62  ;;  %v9559_v11 = vcombine.low %v286_v63, %v302_v0  ;;  %v9530_v61 = vcombine.high %v255_v55, %v271_v56  ;;  %v287_v63 = vld [vmem:[%s18032_s23 + $0x740] sm:$0xff] }
  0x6b   :  { %v9340_v14 = vcombine.high %v64_v8, %v80_v9  ;;  %v303_v0 = vld [vmem:[%s18032_s23 + $0x7c0] sm:$0xff] }
  0x6c   :  { %1788 = vmatmul.mubr.bf16.vlgmr.msra.gmra.mrb[8].mxu0 %v11907_v12  ;;  %1829 = vmatmul.mubr.bf16.vlgmr.msra.gmra.mrb[8].mxu1 %v11907_v12 }
  0x6d   :  { %1838 = vmatpush1.bf16.msra.mxu0 %v9333_v17  ;;  %1879 = vmatpush1.bf16.msra.mxu1 %v9335_v18  ;;  %v96_v17 = vld [vmem:[%s18032_s23 + $0x148] sm:$0xff] }
  0x6e   :  { %1839 = vmatprep.subr.bf16.mxu0 %v9366_v19  ;;  %1880 = vmatprep.subr.bf16.mxu1 %v9368_v20  ;;  %v112_v18 = vld [vmem:[%s18032_s23 + $0x1c8] sm:$0xff]  ;;  %v9337_v19 = vcombine.low %v63_v6, %v79_v7  ;;  %v9339_v20 = vcombine.low %v64_v8, %v80_v9  ;;  %v9562_v6 = vcombine.high %v287_v63, %v303_v0  ;;  %v65_v8 = vld [vmem:[%s18032_s23 + $0x50] sm:$0xff] }
  0x6f   :  { %1869 = vmatprep.mubr.bf16.mxu0 %v17849_v3  ;;  %1910 = vmatprep.mubr.bf16.mxu1 %v17849_v3  ;;  %v9372_v22 = vcombine.high %v96_v17, %v112_v18  ;;  %v81_v9 = vld [vmem:[%s18032_s23 + $0xd0] sm:$0xff] }
  0x71   :  { %1840 = vmatpush1.bf16.msra.mxu0 %v9365_v25  ;;  %1881 = vmatpush1.bf16.msra.mxu1 %v9367_v26  ;;  %v128_v25 = vld [vmem:[%s18032_s23 + $0x248] sm:$0xff] }
  0x72   :  { %1841 = vmatprep.subr.bf16.mxu0 %v9398_v27  ;;  %1882 = vmatprep.subr.bf16.mxu1 %v9400_v28  ;;  %v144_v26 = vld [vmem:[%s18032_s23 + $0x2c8] sm:$0xff]  ;;  %v9369_v27 = vcombine.low %v95_v15, %v111_v16  ;;  %v9371_v28 = vcombine.low %v96_v17, %v112_v18  ;;  %v9342_v15 = vcombine.high %v65_v8, %v81_v9  ;;  %v97_v17 = vld [vmem:[%s18032_s23 + $0x150] sm:$0xff] }
  0x73   :  { %v9404_v30 = vcombine.high %v128_v25, %v144_v26  ;;  %v113_v18 = vld [vmem:[%s18032_s23 + $0x1d0] sm:$0xff] }
  0x75   :  { %1842 = vmatpush1.bf16.msra.mxu0 %v9397_v33  ;;  %1883 = vmatpush1.bf16.msra.mxu1 %v9399_v34  ;;  %v160_v33 = vld [vmem:[%s18032_s23 + $0x348] sm:$0xff] }
  0x76   :  { %1843 = vmatprep.subr.bf16.mxu0 %v9430_v35  ;;  %1884 = vmatprep.subr.bf16.mxu1 %v9432_v36  ;;  %v176_v34 = vld [vmem:[%s18032_s23 + $0x3c8] sm:$0xff]  ;;  %v9401_v35 = vcombine.low %v127_v23, %v143_v24  ;;  %v9403_v36 = vcombine.low %v128_v25, %v144_v26  ;;  %v9374_v23 = vcombine.high %v97_v17, %v113_v18  ;;  %v129_v25 = vld [vmem:[%s18032_s23 + $0x250] sm:$0xff] }
  0x77   :  { %v9436_v38 = vcombine.high %v160_v33, %v176_v34  ;;  %v145_v26 = vld [vmem:[%s18032_s23 + $0x2d0] sm:$0xff] }
  0x79   :  { %1844 = vmatpush1.bf16.msra.mxu0 %v9429_v41  ;;  %1885 = vmatpush1.bf16.msra.mxu1 %v9431_v42  ;;  %v192_v41 = vld [vmem:[%s18032_s23 + $0x448] sm:$0xff] }
  0x7a   :  { %1845 = vmatprep.subr.bf16.mxu0 %v9462_v43  ;;  %1886 = vmatprep.subr.bf16.mxu1 %v9464_v44  ;;  %v208_v42 = vld [vmem:[%s18032_s23 + $0x4c8] sm:$0xff]  ;;  %v9433_v43 = vcombine.low %v159_v31, %v175_v32  ;;  %v9435_v44 = vcombine.low %v160_v33, %v176_v34  ;;  %v9406_v31 = vcombine.high %v129_v25, %v145_v26  ;;  %v161_v33 = vld [vmem:[%s18032_s23 + $0x350] sm:$0xff] }
  0x7b   :  { %v9468_v46 = vcombine.high %v192_v41, %v208_v42  ;;  %v177_v34 = vld [vmem:[%s18032_s23 + $0x3d0] sm:$0xff] }
  0x7d   :  { %1846 = vmatpush1.bf16.msra.mxu0 %v9461_v49  ;;  %1887 = vmatpush1.bf16.msra.mxu1 %v9463_v50  ;;  %v224_v49 = vld [vmem:[%s18032_s23 + $0x548] sm:$0xff] }
  0x7e   :  { %1847 = vmatprep.subr.bf16.mxu0 %v9494_v51  ;;  %1888 = vmatprep.subr.bf16.mxu1 %v9496_v52  ;;  %v240_v50 = vld [vmem:[%s18032_s23 + $0x5c8] sm:$0xff]  ;;  %v9465_v51 = vcombine.low %v191_v39, %v207_v40  ;;  %v9467_v52 = vcombine.low %v192_v41, %v208_v42  ;;  %v9438_v39 = vcombine.high %v161_v33, %v177_v34  ;;  %v193_v41 = vld [vmem:[%s18032_s23 + $0x450] sm:$0xff] }
  0x7f   :  { %v9500_v54 = vcombine.high %v224_v49, %v240_v50  ;;  %v209_v42 = vld [vmem:[%s18032_s23 + $0x4d0] sm:$0xff] }
  0x81   :  { %1848 = vmatpush1.bf16.msra.mxu0 %v9493_v57  ;;  %1889 = vmatpush1.bf16.msra.mxu1 %v9495_v58  ;;  %v256_v57 = vld [vmem:[%s18032_s23 + $0x648] sm:$0xff] }
  0x82   :  { %1849 = vmatprep.subr.bf16.mxu0 %v9526_v59  ;;  %1890 = vmatprep.subr.bf16.mxu1 %v9528_v60  ;;  %v272_v58 = vld [vmem:[%s18032_s23 + $0x6c8] sm:$0xff]  ;;  %v9497_v59 = vcombine.low %v223_v47, %v239_v48  ;;  %v9499_v60 = vcombine.low %v224_v49, %v240_v50  ;;  %v9470_v47 = vcombine.high %v193_v41, %v209_v42  ;;  %v225_v49 = vld [vmem:[%s18032_s23 + $0x550] sm:$0xff] }
  0x83   :  { %v9532_v62 = vcombine.high %v256_v57, %v272_v58  ;;  %v241_v50 = vld [vmem:[%s18032_s23 + $0x5d0] sm:$0xff] }
  0x85   :  { %1850 = vmatpush1.bf16.msra.mxu0 %v9525_v1  ;;  %1891 = vmatpush1.bf16.msra.mxu1 %v9527_v2  ;;  %v288_v1 = vld [vmem:[%s18032_s23 + $0x748] sm:$0xff] }
  0x86   :  { %1851 = vmatprep.subr.bf16.mxu0 %v9558_v4  ;;  %1892 = vmatprep.subr.bf16.mxu1 %v9560_v5  ;;  %v304_v2 = vld [vmem:[%s18032_s23 + $0x7c8] sm:$0xff]  ;;  %v9529_v4 = vcombine.low %v255_v55, %v271_v56  ;;  %v9531_v5 = vcombine.low %v256_v57, %v272_v58  ;;  %v9502_v55 = vcombine.high %v225_v49, %v241_v50  ;;  %v257_v57 = vld [vmem:[%s18032_s23 + $0x650] sm:$0xff] }
  0x87   :  { %v9564_v7 = vcombine.high %v288_v1, %v304_v2  ;;  %v273_v58 = vld [vmem:[%s18032_s23 + $0x6d0] sm:$0xff] }
  0x89   :  { %1852 = vmatpush1.bf16.msra.mxu0 %v9557_v10  ;;  %1893 = vmatpush1.bf16.msra.mxu1 %v9559_v11  ;;  %v66_v10 = vld [vmem:[%s18032_s23 + $0x58] sm:$0xff] }
  0x8a   :  { %1919 = vmatprep.subr.bf16.mxu0 %v9338_v13  ;;  %1960 = vmatprep.subr.bf16.mxu1 %v9340_v14  ;;  %v82_v11 = vld [vmem:[%s18032_s23 + $0xd8] sm:$0xff]  ;;  %v9561_v13 = vcombine.low %v287_v63, %v303_v0  ;;  %v9563_v14 = vcombine.low %v288_v1, %v304_v2  ;;  %v9534_v63 = vcombine.high %v257_v57, %v273_v58  ;;  %v289_v1 = vld [vmem:[%s18032_s23 + $0x750] sm:$0xff] }
  0x8b   :  { %v9344_v16 = vcombine.high %v66_v10, %v82_v11  ;;  %v305_v2 = vld [vmem:[%s18032_s23 + $0x7d0] sm:$0xff] }
  0x8c   :  { %1870 = vmatmul.mubr.bf16.vlgmr.msra.gmra.mrb[12].mxu0 %v11907_v12  ;;  %1911 = vmatmul.mubr.bf16.vlgmr.msra.gmra.mrb[12].mxu1 %v11907_v12 }
  0x8d   :  { %1920 = vmatpush1.bf16.msra.mxu0 %v9337_v19  ;;  %1961 = vmatpush1.bf16.msra.mxu1 %v9339_v20  ;;  %v98_v19 = vld [vmem:[%s18032_s23 + $0x158] sm:$0xff] }
  0x8e   :  { %1921 = vmatprep.subr.bf16.mxu0 %v9370_v21  ;;  %1962 = vmatprep.subr.bf16.mxu1 %v9372_v22  ;;  %v114_v20 = vld [vmem:[%s18032_s23 + $0x1d8] sm:$0xff]  ;;  %v9341_v21 = vcombine.low %v65_v8, %v81_v9  ;;  %v9343_v22 = vcombine.low %v66_v10, %v82_v11  ;;  %v9566_v8 = vcombine.high %v289_v1, %v305_v2  ;;  %v67_v10 = vld [vmem:[%s18032_s23 + $0x60] sm:$0xff] }
  0x8f   :  { %1951 = vmatprep.mubr.bf16.mxu0 %v17849_v3  ;;  %1992 = vmatprep.mubr.bf16.mxu1 %v17849_v3  ;;  %v9376_v24 = vcombine.high %v98_v19, %v114_v20  ;;  %v83_v11 = vld [vmem:[%s18032_s23 + $0xe0] sm:$0xff] }
  0x91   :  { %1922 = vmatpush1.bf16.msra.mxu0 %v9369_v27  ;;  %1963 = vmatpush1.bf16.msra.mxu1 %v9371_v28  ;;  %v130_v27 = vld [vmem:[%s18032_s23 + $0x258] sm:$0xff] }
  0x92   :  { %1923 = vmatprep.subr.bf16.mxu0 %v9402_v29  ;;  %1964 = vmatprep.subr.bf16.mxu1 %v9404_v30  ;;  %v146_v28 = vld [vmem:[%s18032_s23 + $0x2d8] sm:$0xff]  ;;  %v9373_v29 = vcombine.low %v97_v17, %v113_v18  ;;  %v9375_v30 = vcombine.low %v98_v19, %v114_v20  ;;  %v9346_v17 = vcombine.high %v67_v10, %v83_v11  ;;  %v99_v19 = vld [vmem:[%s18032_s23 + $0x160] sm:$0xff] }
  0x93   :  { %v9408_v32 = vcombine.high %v130_v27, %v146_v28  ;;  %v115_v20 = vld [vmem:[%s18032_s23 + $0x1e0] sm:$0xff] }
  0x95   :  { %1924 = vmatpush1.bf16.msra.mxu0 %v9401_v35  ;;  %1965 = vmatpush1.bf16.msra.mxu1 %v9403_v36  ;;  %v162_v35 = vld [vmem:[%s18032_s23 + $0x358] sm:$0xff] }
  0x96   :  { %1925 = vmatprep.subr.bf16.mxu0 %v9434_v37  ;;  %1966 = vmatprep.subr.bf16.mxu1 %v9436_v38  ;;  %v178_v36 = vld [vmem:[%s18032_s23 + $0x3d8] sm:$0xff]  ;;  %v9405_v37 = vcombine.low %v129_v25, %v145_v26  ;;  %v9407_v38 = vcombine.low %v130_v27, %v146_v28  ;;  %v9378_v25 = vcombine.high %v99_v19, %v115_v20  ;;  %v131_v27 = vld [vmem:[%s18032_s23 + $0x260] sm:$0xff] }
  0x97   :  { %v9440_v40 = vcombine.high %v162_v35, %v178_v36  ;;  %v147_v28 = vld [vmem:[%s18032_s23 + $0x2e0] sm:$0xff] }
  0x99   :  { %1926 = vmatpush1.bf16.msra.mxu0 %v9433_v43  ;;  %1967 = vmatpush1.bf16.msra.mxu1 %v9435_v44  ;;  %v194_v43 = vld [vmem:[%s18032_s23 + $0x458] sm:$0xff] }
  0x9a   :  { %1927 = vmatprep.subr.bf16.mxu0 %v9466_v45  ;;  %1968 = vmatprep.subr.bf16.mxu1 %v9468_v46  ;;  %v210_v44 = vld [vmem:[%s18032_s23 + $0x4d8] sm:$0xff]  ;;  %v9437_v45 = vcombine.low %v161_v33, %v177_v34  ;;  %v9439_v46 = vcombine.low %v162_v35, %v178_v36  ;;  %v9410_v33 = vcombine.high %v131_v27, %v147_v28  ;;  %v163_v35 = vld [vmem:[%s18032_s23 + $0x360] sm:$0xff] }
  0x9b   :  { %v9472_v48 = vcombine.high %v194_v43, %v210_v44  ;;  %v179_v36 = vld [vmem:[%s18032_s23 + $0x3e0] sm:$0xff] }
  0x9d   :  { %1928 = vmatpush1.bf16.msra.mxu0 %v9465_v51  ;;  %1969 = vmatpush1.bf16.msra.mxu1 %v9467_v52  ;;  %v226_v51 = vld [vmem:[%s18032_s23 + $0x558] sm:$0xff] }
  0x9e   :  { %1929 = vmatprep.subr.bf16.mxu0 %v9498_v53  ;;  %1970 = vmatprep.subr.bf16.mxu1 %v9500_v54  ;;  %v242_v52 = vld [vmem:[%s18032_s23 + $0x5d8] sm:$0xff]  ;;  %v9469_v53 = vcombine.low %v193_v41, %v209_v42  ;;  %v9471_v54 = vcombine.low %v194_v43, %v210_v44  ;;  %v9442_v41 = vcombine.high %v163_v35, %v179_v36  ;;  %v195_v43 = vld [vmem:[%s18032_s23 + $0x460] sm:$0xff] }
  0x9f   :  { %v9504_v56 = vcombine.high %v226_v51, %v242_v52  ;;  %v211_v44 = vld [vmem:[%s18032_s23 + $0x4e0] sm:$0xff] }
  0xa1   :  { %1930 = vmatpush1.bf16.msra.mxu0 %v9497_v59  ;;  %1971 = vmatpush1.bf16.msra.mxu1 %v9499_v60  ;;  %v258_v59 = vld [vmem:[%s18032_s23 + $0x658] sm:$0xff] }
  0xa2   :  { %1931 = vmatprep.subr.bf16.mxu0 %v9530_v61  ;;  %1972 = vmatprep.subr.bf16.mxu1 %v9532_v62  ;;  %v274_v60 = vld [vmem:[%s18032_s23 + $0x6d8] sm:$0xff]  ;;  %v9501_v61 = vcombine.low %v225_v49, %v241_v50  ;;  %v9503_v62 = vcombine.low %v226_v51, %v242_v52  ;;  %v9474_v49 = vcombine.high %v195_v43, %v211_v44  ;;  %v227_v51 = vld [vmem:[%s18032_s23 + $0x560] sm:$0xff] }
  0xa3   :  { %v9536_v0 = vcombine.high %v258_v59, %v274_v60  ;;  %v243_v52 = vld [vmem:[%s18032_s23 + $0x5e0] sm:$0xff] }
  0xa5   :  { %1932 = vmatpush1.bf16.msra.mxu0 %v9529_v4  ;;  %1973 = vmatpush1.bf16.msra.mxu1 %v9531_v5  ;;  %v290_v4 = vld [vmem:[%s18032_s23 + $0x758] sm:$0xff] }
  0xa6   :  { %1933 = vmatprep.subr.bf16.mxu0 %v9562_v6  ;;  %1974 = vmatprep.subr.bf16.mxu1 %v9564_v7  ;;  %v306_v5 = vld [vmem:[%s18032_s23 + $0x7d8] sm:$0xff]  ;;  %v9533_v6 = vcombine.low %v257_v57, %v273_v58  ;;  %v9535_v7 = vcombine.low %v258_v59, %v274_v60  ;;  %v9506_v57 = vcombine.high %v227_v51, %v243_v52  ;;  %v259_v59 = vld [vmem:[%s18032_s23 + $0x660] sm:$0xff] }
  0xa7   :  { %v9568_v9 = vcombine.high %v290_v4, %v306_v5  ;;  %v275_v60 = vld [vmem:[%s18032_s23 + $0x6e0] sm:$0xff] }
  0xa9   :  { %1934 = vmatpush1.bf16.msra.mxu0 %v9561_v13  ;;  %1975 = vmatpush1.bf16.msra.mxu1 %v9563_v14  ;;  %v68_v13 = vld [vmem:[%s18032_s23 + $0x68] sm:$0xff] }
  0xaa   :  { %2001 = vmatprep.subr.bf16.mxu0 %v9342_v15  ;;  %2042 = vmatprep.subr.bf16.mxu1 %v9344_v16  ;;  %v84_v14 = vld [vmem:[%s18032_s23 + $0xe8] sm:$0xff]  ;;  %v9565_v15 = vcombine.low %v289_v1, %v305_v2  ;;  %v9567_v16 = vcombine.low %v290_v4, %v306_v5  ;;  %v9538_v1 = vcombine.high %v259_v59, %v275_v60  ;;  %v291_v4 = vld [vmem:[%s18032_s23 + $0x760] sm:$0xff] }
  0xab   :  { %v9348_v18 = vcombine.high %v68_v13, %v84_v14  ;;  %v307_v5 = vld [vmem:[%s18032_s23 + $0x7e0] sm:$0xff] }
  0xac   :  { %1952 = vmatmul.mubr.bf16.vlgmr.msra.gmra.mrb[16].mxu0 %v11907_v12  ;;  %1993 = vmatmul.mubr.bf16.vlgmr.msra.gmra.mrb[16].mxu1 %v11907_v12 }
  0xad   :  { %2002 = vmatpush1.bf16.msra.mxu0 %v9341_v21  ;;  %2043 = vmatpush1.bf16.msra.mxu1 %v9343_v22  ;;  %v100_v21 = vld [vmem:[%s18032_s23 + $0x168] sm:$0xff] }
  0xae   :  { %2003 = vmatprep.subr.bf16.mxu0 %v9374_v23  ;;  %2044 = vmatprep.subr.bf16.mxu1 %v9376_v24  ;;  %v116_v22 = vld [vmem:[%s18032_s23 + $0x1e8] sm:$0xff]  ;;  %v9345_v23 = vcombine.low %v67_v10, %v83_v11  ;;  %v9347_v24 = vcombine.low %v68_v13, %v84_v14  ;;  %v9570_v10 = vcombine.high %v291_v4, %v307_v5  ;;  %v69_v13 = vld [vmem:[%s18032_s23 + $0x70] sm:$0xff] }
  0xaf   :  { %2033 = vmatprep.mubr.bf16.mxu0 %v17849_v3  ;;  %2074 = vmatprep.mubr.bf16.mxu1 %v17849_v3  ;;  %v9380_v26 = vcombine.high %v100_v21, %v116_v22  ;;  %v85_v14 = vld [vmem:[%s18032_s23 + $0xf0] sm:$0xff] }
  0xb1   :  { %2004 = vmatpush1.bf16.msra.mxu0 %v9373_v29  ;;  %2045 = vmatpush1.bf16.msra.mxu1 %v9375_v30  ;;  %v132_v29 = vld [vmem:[%s18032_s23 + $0x268] sm:$0xff] }
  0xb2   :  { %2005 = vmatprep.subr.bf16.mxu0 %v9406_v31  ;;  %2046 = vmatprep.subr.bf16.mxu1 %v9408_v32  ;;  %v148_v30 = vld [vmem:[%s18032_s23 + $0x2e8] sm:$0xff]  ;;  %v12425_v31 = vld [vmem:[%s17816_s0] sm:$0xf]  ;;  %v9377_v32 = vcombine.low %v99_v19, %v115_v20  ;;  %v9350_v19 = vcombine.high %v69_v13, %v85_v14 }
  0xb3   :  { %v9412_v34 = vcombine.high %v132_v29, %v148_v30 }
  0xb5   :  { %2006 = vmatpush1.bf16.msra.mxu0 %v9405_v37  ;;  %2047 = vmatpush1.bf16.msra.mxu1 %v9407_v38  ;;  %v164_v37 = vld [vmem:[%s18032_s23 + $0x368] sm:$0xff] }
  0xb6   :  { %2007 = vmatprep.subr.bf16.mxu0 %v9438_v39  ;;  %2048 = vmatprep.subr.bf16.mxu1 %v9440_v40  ;;  %v180_v38 = vld [vmem:[%s18032_s23 + $0x3e8] sm:$0xff]  ;;  %v9409_v39 = vcombine.low %v131_v27, %v147_v28  ;;  %v9411_v40 = vcombine.low %v132_v29, %v148_v30  ;;  %v133_v29 = vld [vmem:[%s18032_s23 + $0x270] sm:$0xff] }
  0xb7   :  { %v9444_v42 = vcombine.high %v164_v37, %v180_v38  ;;  %v149_v30 = vld [vmem:[%s18032_s23 + $0x2f0] sm:$0xff] }
  0xb9   :  { %2008 = vmatpush1.bf16.msra.mxu0 %v9437_v45  ;;  %2049 = vmatpush1.bf16.msra.mxu1 %v9439_v46  ;;  %v196_v45 = vld [vmem:[%s18032_s23 + $0x468] sm:$0xff] }
  0xba   :  { %2009 = vmatprep.subr.bf16.mxu0 %v9470_v47  ;;  %2050 = vmatprep.subr.bf16.mxu1 %v9472_v48  ;;  %v212_v46 = vld [vmem:[%s18032_s23 + $0x4e8] sm:$0xff]  ;;  %v9441_v47 = vcombine.low %v163_v35, %v179_v36  ;;  %v9443_v48 = vcombine.low %v164_v37, %v180_v38  ;;  %v9414_v35 = vcombine.high %v133_v29, %v149_v30  ;;  %v165_v37 = vld [vmem:[%s18032_s23 + $0x370] sm:$0xff] }
  0xbb   :  { %v9476_v50 = vcombine.high %v196_v45, %v212_v46  ;;  %v181_v38 = vld [vmem:[%s18032_s23 + $0x3f0] sm:$0xff] }
  0xbd   :  { %2010 = vmatpush1.bf16.msra.mxu0 %v9469_v53  ;;  %2051 = vmatpush1.bf16.msra.mxu1 %v9471_v54  ;;  %v228_v53 = vld [vmem:[%s18032_s23 + $0x568] sm:$0xff] }
  0xbe   :  { %2011 = vmatprep.subr.bf16.mxu0 %v9502_v55  ;;  %2052 = vmatprep.subr.bf16.mxu1 %v9504_v56  ;;  %v244_v54 = vld [vmem:[%s18032_s23 + $0x5e8] sm:$0xff]  ;;  %v9473_v55 = vcombine.low %v195_v43, %v211_v44  ;;  %v9475_v56 = vcombine.low %v196_v45, %v212_v46  ;;  %v9446_v43 = vcombine.high %v165_v37, %v181_v38  ;;  %v197_v45 = vld [vmem:[%s18032_s23 + $0x470] sm:$0xff] }
  0xbf   :  { %v9508_v58 = vcombine.high %v228_v53, %v244_v54  ;;  %v213_v46 = vld [vmem:[%s18032_s23 + $0x4f0] sm:$0xff] }
  0xc1   :  { %2012 = vmatpush1.bf16.msra.mxu0 %v9501_v61  ;;  %2053 = vmatpush1.bf16.msra.mxu1 %v9503_v62  ;;  %v260_v61 = vld [vmem:[%s18032_s23 + $0x668] sm:$0xff] }
  0xc2   :  { %2013 = vmatprep.subr.bf16.mxu0 %v9534_v63  ;;  %2054 = vmatprep.subr.bf16.mxu1 %v9536_v0  ;;  %v276_v62 = vld [vmem:[%s18032_s23 + $0x6e8] sm:$0xff]  ;;  %v9505_v63 = vcombine.low %v227_v51, %v243_v52  ;;  %v9507_v0 = vcombine.low %v228_v53, %v244_v54  ;;  %v9478_v51 = vcombine.high %v197_v45, %v213_v46  ;;  %v229_v53 = vld [vmem:[%s18032_s23 + $0x570] sm:$0xff] }
  0xc3   :  { %v9540_v2 = vcombine.high %v260_v61, %v276_v62  ;;  %v245_v54 = vld [vmem:[%s18032_s23 + $0x5f0] sm:$0xff] }
  0xc5   :  { %2014 = vmatpush1.bf16.msra.mxu0 %v9533_v6  ;;  %2055 = vmatpush1.bf16.msra.mxu1 %v9535_v7  ;;  %v292_v6 = vld [vmem:[%s18032_s23 + $0x768] sm:$0xff] }
  0xc6   :  { %2015 = vmatprep.subr.bf16.mxu0 %v9566_v8  ;;  %2056 = vmatprep.subr.bf16.mxu1 %v9568_v9  ;;  %v308_v7 = vld [vmem:[%s18032_s23 + $0x7e8] sm:$0xff]  ;;  %v9537_v8 = vcombine.low %v259_v59, %v275_v60  ;;  %v9539_v9 = vcombine.low %v260_v61, %v276_v62  ;;  %v9510_v59 = vcombine.high %v229_v53, %v245_v54  ;;  %v261_v61 = vld [vmem:[%s18032_s23 + $0x670] sm:$0xff] }
  0xc7   :  { %v9572_v11 = vcombine.high %v292_v6, %v308_v7  ;;  %v277_v62 = vld [vmem:[%s18032_s23 + $0x6f0] sm:$0xff] }
  0xc9   :  { %2016 = vmatpush1.bf16.msra.mxu0 %v9565_v15  ;;  %2057 = vmatpush1.bf16.msra.mxu1 %v9567_v16  ;;  %v70_v15 = vld [vmem:[%s18032_s23 + $0x78] sm:$0xff] }
  0xca   :  { %2083 = vmatprep.subr.bf16.mxu0 %v9346_v17  ;;  %2124 = vmatprep.subr.bf16.mxu1 %v9348_v18  ;;  %v86_v16 = vld [vmem:[%s18032_s23 + $0xf8] sm:$0xff]  ;;  %v9569_v17 = vcombine.low %v291_v4, %v307_v5  ;;  %v9571_v18 = vcombine.low %v292_v6, %v308_v7  ;;  %v9542_v4 = vcombine.high %v261_v61, %v277_v62  ;;  %v293_v7 = vld [vmem:[%s18032_s23 + $0x770] sm:$0xff] }
  0xcb   :  { %v9352_v20 = vcombine.high %v70_v15, %v86_v16 }
  0xcc   :  { %2034 = vmatmul.mubr.bf16.vlgmr.msra.gmra.mrb[20].mxu0 %v11907_v12  ;;  %2075 = vmatmul.mubr.bf16.vlgmr.msra.gmra.mrb[20].mxu1 %v12425_v31  ;;  %v9379_v12 = vcombine.low %v100_v21, %v116_v22  ;;  %v101_v21 = vld [vmem:[%s18032_s23 + $0x170] sm:$0xff] }
  0xcd   :  { %2084 = vmatpush1.bf16.msra.mxu0 %v9345_v23  ;;  %2125 = vmatpush1.bf16.msra.mxu1 %v9347_v24  ;;  %v117_v22 = vld [vmem:[%s18032_s23 + $0x1f0] sm:$0xff]  ;;  %v102_v23 = vld [vmem:[%s18032_s23 + $0x178] sm:$0xff] }
  0xce   :  { %2085 = vmatprep.subr.bf16.mxu0 %v9378_v25  ;;  %2126 = vmatprep.subr.bf16.mxu1 %v9380_v26  ;;  %v118_v24 = vld [vmem:[%s18032_s23 + $0x1f8] sm:$0xff]  ;;  %v9349_v25 = vcombine.low %v69_v13, %v85_v14  ;;  %v9351_v26 = vcombine.low %v70_v15, %v86_v16  ;;  %v9382_v27 = vcombine.high %v101_v21, %v117_v22 }
  0xcf   :  { %2115 = vmatprep.mubr.bf16.mxu0 %v17849_v3  ;;  %2156 = vmatprep.mubr.bf16.mxu1 %v17849_v3  ;;  %v9384_v28 = vcombine.high %v102_v23, %v118_v24  ;;  %v310_v13 = vld [vmem:[%s18032_s23 + $0x7f8] sm:$0xff] }
  0xd1   :  { %2086 = vmatpush1.bf16.msra.mxu0 %v9377_v32  ;;  %2127 = vmatpush1.bf16.msra.mxu1 %v9379_v12  ;;  %v134_v32 = vld [vmem:[%s18032_s23 + $0x278] sm:$0xff] }
  0xd2   :  { %2087 = vmatprep.subr.bf16.mxu0 %v9410_v33  ;;  %2128 = vmatprep.subr.bf16.mxu1 %v9412_v34  ;;  %v150_v12 = vld [vmem:[%s18032_s23 + $0x2f8] sm:$0xff]  ;;  %v9381_v33 = vcombine.low %v101_v21, %v117_v22  ;;  %v9383_v34 = vcombine.low %v102_v23, %v118_v24 }
  0xd3   :  { %v9416_v36 = vcombine.high %v134_v32, %v150_v12 }
  0xd5   :  { %2088 = vmatpush1.bf16.msra.mxu0 %v9409_v39  ;;  %2129 = vmatpush1.bf16.msra.mxu1 %v9411_v40  ;;  %v166_v39 = vld [vmem:[%s18032_s23 + $0x378] sm:$0xff] }
  0xd6   :  { %2089 = vmatprep.subr.bf16.mxu0 %v9442_v41  ;;  %2130 = vmatprep.subr.bf16.mxu1 %v9444_v42  ;;  %v182_v40 = vld [vmem:[%s18032_s23 + $0x3f8] sm:$0xff]  ;;  %v9413_v41 = vcombine.low %v133_v29, %v149_v30  ;;  %v9415_v42 = vcombine.low %v134_v32, %v150_v12 }
  0xd7   :  { %v9448_v44 = vcombine.high %v166_v39, %v182_v40 }
  0xd9   :  { %2090 = vmatpush1.bf16.msra.mxu0 %v9441_v47  ;;  %2131 = vmatpush1.bf16.msra.mxu1 %v9443_v48  ;;  %v198_v47 = vld [vmem:[%s18032_s23 + $0x478] sm:$0xff] }
  0xda   :  { %2091 = vmatprep.subr.bf16.mxu0 %v9474_v49  ;;  %2132 = vmatprep.subr.bf16.mxu1 %v9476_v50  ;;  %v214_v48 = vld [vmem:[%s18032_s23 + $0x4f8] sm:$0xff]  ;;  %v9445_v49 = vcombine.low %v165_v37, %v181_v38  ;;  %v9447_v50 = vcombine.low %v166_v39, %v182_v40 }
  0xdb   :  { %v9480_v52 = vcombine.high %v198_v47, %v214_v48 }
  0xdd   :  { %2092 = vmatpush1.bf16.msra.mxu0 %v9473_v55  ;;  %2133 = vmatpush1.bf16.msra.mxu1 %v9475_v56  ;;  %v230_v55 = vld [vmem:[%s18032_s23 + $0x578] sm:$0xff] }
  0xde   :  { %2093 = vmatprep.subr.bf16.mxu0 %v9506_v57  ;;  %2134 = vmatprep.subr.bf16.mxu1 %v9508_v58  ;;  %v246_v56 = vld [vmem:[%s18032_s23 + $0x5f8] sm:$0xff]  ;;  %v9477_v57 = vcombine.low %v197_v45, %v213_v46  ;;  %v9479_v58 = vcombine.low %v198_v47, %v214_v48 }
  0xdf   :  { %v9512_v60 = vcombine.high %v230_v55, %v246_v56 }
  0xe1   :  { %2094 = vmatpush1.bf16.msra.mxu0 %v9505_v63  ;;  %2135 = vmatpush1.bf16.msra.mxu1 %v9507_v0  ;;  %v262_v63 = vld [vmem:[%s18032_s23 + $0x678] sm:$0xff] }
  0xe2   :  { %2095 = vmatprep.subr.bf16.mxu0 %v9538_v1  ;;  %2136 = vmatprep.subr.bf16.mxu1 %v9540_v2  ;;  %v278_v0 = vld [vmem:[%s18032_s23 + $0x6f8] sm:$0xff]  ;;  %v9509_v1 = vcombine.low %v229_v53, %v245_v54  ;;  %v9511_v2 = vcombine.low %v230_v55, %v246_v56  ;;  %v11072_v56 = vld [vmem:[%s17818_s3] ss:$16 sps:$4 sm:$0xff]  }
  0xe3   :  { %v9544_v6 = vcombine.high %v262_v63, %v278_v0  ;;  %v9543_v21 = vcombine.low %v262_v63, %v278_v0 }
  0xe5   :  { %2096 = vmatpush1.bf16.msra.mxu0 %v9537_v8  ;;  %2137 = vmatpush1.bf16.msra.mxu1 %v9539_v9  ;;  %v309_v8 = vld [vmem:[%s18032_s23 + $0x7f0] sm:$0xff] }
  0xe6   :  { %2097 = vmatprep.subr.bf16.mxu0 %v9570_v10  ;;  %2138 = vmatprep.subr.bf16.mxu1 %v9572_v11  ;;  %v294_v11 = vld [vmem:[%s18032_s23 + $0x778] sm:$0xff]  ;;  %v9574_v22 = vcombine.high %v293_v7, %v309_v8 }
  0xe7   :  { %v9576_v24 = vcombine.high %v294_v11, %v310_v13 }
  0xe9   :  { %2098 = vmatpush1.bf16.msra.mxu0 %v9569_v17  ;;  %2139 = vmatpush1.bf16.msra.mxu1 %v9571_v18  ;;  %v9541_v17 = vcombine.low %v261_v61, %v277_v62 }
  0xea   :  { %2165 = vmatprep.subr.bf16.mxu0 %v9350_v19  ;;  %2206 = vmatprep.subr.bf16.mxu1 %v9352_v20 }
  0xec   :  { %2116 = vmatmul.mubr.bf16.vlgmr.msra.gmra.mrb[24].mxu0 %v12425_v31  ;;  %2157 = vmatmul.mubr.bf16.vlgmr.msra.gmra.mrb[24].mxu1 %v12425_v31 }
  0xed   :  { %2166 = vmatpush1.bf16.msra.mxu0 %v9349_v25  ;;  %2207 = vmatpush1.bf16.msra.mxu1 %v9351_v26  ;;  %v9573_v25 = vcombine.low %v293_v7, %v309_v8  ;;  %v9575_v26 = vcombine.low %v294_v11, %v310_v13 }
  0xee   :  { %2167 = vmatprep.subr.bf16.mxu0 %v9382_v27  ;;  %2208 = vmatprep.subr.bf16.mxu1 %v9384_v28 }
  0xef   :  { %2197 = vmatprep.mubr.bf16.mxu0 %v17849_v3  ;;  %2238 = vmatprep.mubr.bf16.mxu1 %v17849_v3 }
  0xf1   :  { %2168 = vmatpush1.bf16.msra.mxu0 %v9381_v33  ;;  %2209 = vmatpush1.bf16.msra.mxu1 %v9383_v34 }
  0xf2   :  { %2169 = vmatprep.subr.bf16.mxu0 %v9414_v35  ;;  %2210 = vmatprep.subr.bf16.mxu1 %v9416_v36 }
  0xf5   :  { %2170 = vmatpush1.bf16.msra.mxu0 %v9413_v41  ;;  %2211 = vmatpush1.bf16.msra.mxu1 %v9415_v42 }
  0xf6   :  { %2171 = vmatprep.subr.bf16.mxu0 %v9446_v43  ;;  %2212 = vmatprep.subr.bf16.mxu1 %v9448_v44 }
  0xf9   :  { %2172 = vmatpush1.bf16.msra.mxu0 %v9445_v49  ;;  %2213 = vmatpush1.bf16.msra.mxu1 %v9447_v50 }
  0xfa   :  { %2173 = vmatprep.subr.bf16.mxu0 %v9478_v51  ;;  %2214 = vmatprep.subr.bf16.mxu1 %v9480_v52 }
  0xfd   :  { %2174 = vmatpush1.bf16.msra.mxu0 %v9477_v57  ;;  %2215 = vmatpush1.bf16.msra.mxu1 %v9479_v58  ;;  %v11074_v57 = vld [vmem:[%s17818_s3 + $0x4] ss:$16 sps:$4 sm:$0xff]  }
  0xfe   :  { %2175 = vmatprep.subr.bf16.mxu0 %v9510_v59  ;;  %2216 = vmatprep.subr.bf16.mxu1 %v9512_v60  ;;  %v11080_v58 = vld [vmem:[%s17818_s3 + $0x24] ss:$16 sps:$4 sm:$0xff]   ;;  %v11078_v59 = vld [vmem:[%s17818_s3 + $0x20] ss:$16 sps:$4 sm:$0xff]  }
  0xff   :  { %v1625_v5 = vpop.f32.mrb[0].mxu0  ;;  %v1666_v9 = vpop.f32.mrb[0].mxu1 }
 0x100   :  { %v1627_v10 = vpop.f32.mrb[1].mxu0  ;;  %v2315_v14 = vpack.c.bf16 %v1666_v9, %v1625_v5  ;;  %v1668_v15 = vpop.f32.mrb[1].mxu1 }
 0x101   :  { %v1629_v16 = vpop.f32.mrb[2].mxu0  ;;  %2176 = vmatpush1.bf16.msra.mxu0 %v9509_v1  ;;  %v2316_v18 = vpack.c.bf16 %v1668_v15, %v1627_v10  ;;  %v1670_v19 = vpop.f32.mrb[2].mxu1  ;;  %2217 = vmatpush1.bf16.msra.mxu1 %v9511_v2 }
 0x102   :  { %v1630_v20 = vpop.f32.mrb[3].mxu0  ;;  %2177 = vmatprep.subr.bf16.mxu0 %v9542_v4  ;;  %v1671_v23 = vpop.f32.mrb[3].mxu1  ;;  %2218 = vmatprep.subr.bf16.mxu1 %v9544_v6 }
 0x105   :  { %2178 = vmatpush1.bf16.msra.mxu0 %v9541_v17  ;;  %2219 = vmatpush1.bf16.msra.mxu1 %v9543_v21 }
 0x106   :  { %2179 = vmatprep.subr.bf16.mxu0 %v9574_v22  ;;  %2220 = vmatprep.subr.bf16.mxu1 %v9576_v24 }
 0x109   :  { %2180 = vmatpush1.bf16.msra.mxu0 %v9573_v25  ;;  %2221 = vmatpush1.bf16.msra.mxu1 %v9575_v26 }
 0x10a   :  { %2343 = vmatprep.subr.bf16.mxu0 %v2316_v18  ;;  %2904 = vmatprep.subr.bf16.mxu1 %v11074_v57  ;;  %v11102_v57 = vld [vmem:[%s17818_s3 + $0xa0] ss:$16 sps:$4 sm:$0xff]  }
 0x10c   :  { %2198 = vmatmul.mubr.bf16.vlgmr.msra.gmra.mrb[28].mxu0 %v12425_v31  ;;  %2239 = vmatmul.mubr.bf16.vlgmr.msra.gmra.mrb[28].mxu1 %v12425_v31 }
 0x10d   :  { %2344 = vmatpush1.bf16.msra.mxu0 %v2315_v14  ;;  %2375 = vmatprep.mubr.bf16.mxu0 %v17849_v3 }
 0x10e   :  { %2905 = vmatpush1.bf16.msra.mxu1 %v11072_v56  ;;  %v11107_v56 = vld [vmem:[%s17818_s3 + $0xac] ss:$16 sps:$4 sm:$0xff]  }
 0x10f   :  { %2906 = vmatprep.subr.bf16.mxu1 %v11080_v58  ;;  %v11105_v58 = vld [vmem:[%s17818_s3 + $0xa8] ss:$16 sps:$4 sm:$0xff]  }
 0x112   :  { %2907 = vmatpush1.bf16.msra.mxu1 %v11078_v59  ;;  %v11110_v59 = vld [vmem:[%s17818_s3 + $0xc4] ss:$16 sps:$4 sm:$0xff]  }
 0x11f   :  { %v1707_v27 = vpop.f32.mrb[4].mxu0  ;;  %v1748_v28 = vpop.f32.mrb[4].mxu1 }
 0x120   :  { %v1709_v29 = vpop.f32.mrb[5].mxu0  ;;  %v2317_v30 = vpack.c.bf16 %v1748_v28, %v1707_v27  ;;  %v1750_v32 = vpop.f32.mrb[5].mxu1 }
 0x121   :  { %v1711_v12 = vpop.f32.mrb[6].mxu0  ;;  %v2318_v33 = vpack.c.bf16 %v1750_v32, %v1709_v29  ;;  %v1752_v34 = vpop.f32.mrb[6].mxu1 }
 0x122   :  { %v1712_v35 = vpop.f32.mrb[7].mxu0  ;;  %v1753_v36 = vpop.f32.mrb[7].mxu1 }
 0x123   :  { %2345 = vmatprep.subr.bf16.mxu0 %v2318_v33 }
 0x124   :  { %2346 = vmatpush1.bf16.msra.mxu0 %v2317_v30 }
 0x13f   :  { %v1789_v37 = vpop.f32.mrb[8].mxu0  ;;  %v1830_v38 = vpop.f32.mrb[8].mxu1 }
 0x140   :  { %v1791_v39 = vpop.f32.mrb[9].mxu0  ;;  %v2319_v40 = vpack.c.bf16 %v1830_v38, %v1789_v37  ;;  %v1832_v31 = vpop.f32.mrb[9].mxu1  ;;  %v11077_v37 = vld [vmem:[%s17818_s3 + $0xc] ss:$16 sps:$4 sm:$0xff]  }
 0x141   :  { %v1793_v41 = vpop.f32.mrb[10].mxu0  ;;  %v2320_v42 = vpack.c.bf16 %v1832_v31, %v1791_v39  ;;  %v1834_v43 = vpop.f32.mrb[10].mxu1  ;;  %v11070_v39 = vld [vmem:[%s17817_s2] sm:$0xff]   ;;  %v11083_v31 = vld [vmem:[%s17818_s3 + $0x2c] ss:$16 sps:$4 sm:$0xff]  }
 0x142   :  { %v1794_v44 = vpop.f32.mrb[11].mxu0  ;;  %v1835_v45 = vpop.f32.mrb[11].mxu1  ;;  %v11081_v41 = vld [vmem:[%s17818_s3 + $0x28] ss:$16 sps:$4 sm:$0xff]   ;;  %v11086_v43 = vld [vmem:[%s17818_s3 + $0x44] ss:$16 sps:$4 sm:$0xff]  }
 0x143   :  { %2347 = vmatprep.subr.bf16.mxu0 %v2320_v42  ;;  %v11071_v42 = vld [vmem:[%s17817_s2 + $0x8] sm:$0xff]   ;;  %v11084_v45 = vld [vmem:[%s17818_s3 + $0x40] ss:$16 sps:$4 sm:$0xff]   ;;  %2908 = vmatprep.subr.bf16.mxu1 %v11086_v43 }
 0x144   :  { %2348 = vmatpush1.bf16.msra.mxu0 %v2319_v40  ;;  %v11075_v40 = vld [vmem:[%s17818_s3 + $0x8] ss:$16 sps:$4 sm:$0xff]   ;;  %v11089_v44 = vld [vmem:[%s17818_s3 + $0x4c] ss:$16 sps:$4 sm:$0xff]   ;;  %2909 = vmatpush1.bf16.msra.mxu1 %v11084_v45 }
 0x15f   :  { %v1871_v46 = vpop.f32.mrb[12].mxu0  ;;  %v1912_v47 = vpop.f32.mrb[12].mxu1 }
 0x160   :  { %v1873_v48 = vpop.f32.mrb[13].mxu0  ;;  %v2321_v49 = vpack.c.bf16 %v1912_v47, %v1871_v46  ;;  %v1914_v50 = vpop.f32.mrb[13].mxu1  ;;  %v11087_v46 = vld [vmem:[%s17818_s3 + $0x48] ss:$16 sps:$4 sm:$0xff]   ;;  %v11092_v47 = vld [vmem:[%s17818_s3 + $0x64] ss:$16 sps:$4 sm:$0xff]  }
 0x161   :  { %v1875_v51 = vpop.f32.mrb[14].mxu0  ;;  %v2322_v52 = vpack.c.bf16 %v1914_v50, %v1873_v48  ;;  %v1916_v53 = vpop.f32.mrb[14].mxu1  ;;  %v11095_v48 = vld [vmem:[%s17818_s3 + $0x6c] ss:$16 sps:$4 sm:$0xff]   ;;  %v11093_v50 = vld [vmem:[%s17818_s3 + $0x68] ss:$16 sps:$4 sm:$0xff]   ;;  %2910 = vmatprep.subr.bf16.mxu1 %v11092_v47 }
 0x162   :  { %v1876_v54 = vpop.f32.mrb[15].mxu0  ;;  %v1917_v55 = vpop.f32.mrb[15].mxu1  ;;  %v11098_v51 = vld [vmem:[%s17818_s3 + $0x84] ss:$16 sps:$4 sm:$0xff]   ;;  %v11096_v53 = vld [vmem:[%s17818_s3 + $0x80] ss:$16 sps:$4 sm:$0xff]  }
 0x163   :  { %2349 = vmatprep.subr.bf16.mxu0 %v2322_v52  ;;  %v11101_v52 = vld [vmem:[%s17818_s3 + $0x8c] ss:$16 sps:$4 sm:$0xff]   ;;  %v11099_v54 = vld [vmem:[%s17818_s3 + $0x88] ss:$16 sps:$4 sm:$0xff]   ;;  %v11104_v55 = vld [vmem:[%s17818_s3 + $0xa4] ss:$16 sps:$4 sm:$0xff]  }
 0x164   :  { %2350 = vmatpush1.bf16.msra.mxu0 %v2321_v49  ;;  %v11090_v49 = vld [vmem:[%s17818_s3 + $0x60] ss:$16 sps:$4 sm:$0xff]  }
 0x165   :  { %2911 = vmatpush1.bf16.msra.mxu1 %v11090_v49 }
 0x166   :  { %2912 = vmatprep.subr.bf16.mxu1 %v11098_v51 }
 0x169   :  { %2913 = vmatpush1.bf16.msra.mxu1 %v11096_v53 }
 0x16a   :  { %2914 = vmatprep.subr.bf16.mxu1 %v11104_v55 }
 0x16d   :  { %2915 = vmatpush1.bf16.msra.mxu1 %v11102_v57 }
 0x16e   :  { %2916 = vmatprep.subr.bf16.mxu1 %v11110_v59 }
 0x17f   :  { %v1953_v60 = vpop.f32.mrb[16].mxu0  ;;  %v1994_v61 = vpop.f32.mrb[16].mxu1 }
 0x180   :  { %v1955_v62 = vpop.f32.mrb[17].mxu0  ;;  %v2323_v63 = vpack.c.bf16 %v1994_v61, %v1953_v60  ;;  %v1996_v0 = vpop.f32.mrb[17].mxu1  ;;  %v11113_v60 = vld [vmem:[%s17818_s3 + $0xcc] ss:$16 sps:$4 sm:$0xff]   ;;  %v11108_v61 = vld [vmem:[%s17818_s3 + $0xc0] ss:$16 sps:$4 sm:$0xff]  }
 0x181   :  { %v1957_v1 = vpop.f32.mrb[18].mxu0  ;;  %v2324_v2 = vpack.c.bf16 %v1996_v0, %v1955_v62  ;;  %v1998_v4 = vpop.f32.mrb[18].mxu1  ;;  %v11111_v62 = vld [vmem:[%s17818_s3 + $0xc8] ss:$16 sps:$4 sm:$0xff]   ;;  %2917 = vmatpush1.bf16.msra.mxu1 %v11108_v61  ;;  %v11119_v0 = vld [vmem:[%s17818_s3 + $0xec] ss:$16 sps:$4 sm:$0xff]  }
 0x182   :  { %v1958_v5 = vpop.f32.mrb[19].mxu0  ;;  %v1999_v6 = vpop.f32.mrb[19].mxu1  ;;  %v11114_v1 = vld [vmem:[%s17818_s3 + $0xe0] ss:$16 sps:$4 sm:$0xff]   ;;  %v11122_v4 = vld [vmem:[%s17818_s3 + $0x104] ss:$16 sps:$4 sm:$0xff]  }
 0x183   :  { %2351 = vmatprep.subr.bf16.mxu0 %v2324_v2  ;;  %v11117_v2 = vld [vmem:[%s17818_s3 + $0xe8] ss:$16 sps:$4 sm:$0xff]   ;;  %v11125_v5 = vld [vmem:[%s17818_s3 + $0x10c] ss:$16 sps:$4 sm:$0xff]   ;;  %v11120_v6 = vld [vmem:[%s17818_s3 + $0x100] ss:$16 sps:$4 sm:$0xff]  }
 0x184   :  { %2352 = vmatpush1.bf16.msra.mxu0 %v2323_v63  ;;  %v11116_v63 = vld [vmem:[%s17818_s3 + $0xe4] ss:$16 sps:$4 sm:$0xff]  }
 0x185   :  { %2918 = vmatprep.subr.bf16.mxu1 %v11116_v63 }
 0x186   :  { %2919 = vmatpush1.bf16.msra.mxu1 %v11114_v1 }
 0x187   :  { %2920 = vmatprep.subr.bf16.mxu1 %v11122_v4 }
 0x18a   :  { %2921 = vmatpush1.bf16.msra.mxu1 %v11120_v6 }
 0x19f   :  { %v2035_v7 = vpop.f32.mrb[20].mxu0  ;;  %v2076_v8 = vpop.f32.mrb[20].mxu1 }
 0x1a0   :  { %v2037_v9 = vpop.f32.mrb[21].mxu0  ;;  %v2325_v10 = vpack.c.bf16 %v2076_v8, %v2035_v7  ;;  %v2078_v11 = vpop.f32.mrb[21].mxu1  ;;  %v11123_v7 = vld [vmem:[%s17818_s3 + $0x108] ss:$16 sps:$4 sm:$0xff]   ;;  %v11128_v8 = vld [vmem:[%s17818_s3 + $0x124] ss:$16 sps:$4 sm:$0xff]  }
 0x1a1   :  { %v2039_v13 = vpop.f32.mrb[22].mxu0  ;;  %v2326_v14 = vpack.c.bf16 %v2078_v11, %v2037_v9  ;;  %v2080_v15 = vpop.f32.mrb[22].mxu1  ;;  %v11131_v9 = vld [vmem:[%s17818_s3 + $0x12c] ss:$16 sps:$4 sm:$0xff]   ;;  %v11129_v11 = vld [vmem:[%s17818_s3 + $0x128] ss:$16 sps:$4 sm:$0xff]   ;;  %2922 = vmatprep.subr.bf16.mxu1 %v11128_v8 }
 0x1a2   :  { %v2040_v16 = vpop.f32.mrb[23].mxu0  ;;  %v2081_v17 = vpop.f32.mrb[23].mxu1  ;;  %v11134_v13 = vld [vmem:[%s17818_s3 + $0x144] ss:$16 sps:$4 sm:$0xff]   ;;  %v11132_v15 = vld [vmem:[%s17818_s3 + $0x140] ss:$16 sps:$4 sm:$0xff]  }
 0x1a3   :  { %2353 = vmatprep.subr.bf16.mxu0 %v2326_v14  ;;  %v11137_v14 = vld [vmem:[%s17818_s3 + $0x14c] ss:$16 sps:$4 sm:$0xff]   ;;  %v11135_v16 = vld [vmem:[%s17818_s3 + $0x148] ss:$16 sps:$4 sm:$0xff]   ;;  %v11140_v17 = vld [vmem:[%s17818_s3 + $0x164] ss:$16 sps:$4 sm:$0xff]  }
 0x1a4   :  { %2354 = vmatpush1.bf16.msra.mxu0 %v2325_v10  ;;  %v11126_v10 = vld [vmem:[%s17818_s3 + $0x120] ss:$16 sps:$4 sm:$0xff]  }
 0x1a5   :  { %2923 = vmatpush1.bf16.msra.mxu1 %v11126_v10 }
 0x1a6   :  { %2924 = vmatprep.subr.bf16.mxu1 %v11134_v13 }
 0x1a9   :  { %2925 = vmatpush1.bf16.msra.mxu1 %v11132_v15 }
 0x1aa   :  { %2926 = vmatprep.subr.bf16.mxu1 %v11140_v17 }
 0x1bf   :  { %v2117_v18 = vpop.f32.mrb[24].mxu0  ;;  %v2158_v19 = vpop.f32.mrb[24].mxu1 }
 0x1c0   :  { %v2119_v20 = vpop.f32.mrb[25].mxu0  ;;  %v2327_v21 = vpack.c.bf16 %v2158_v19, %v2117_v18  ;;  %v2160_v22 = vpop.f32.mrb[25].mxu1  ;;  %v11143_v18 = vld [vmem:[%s17818_s3 + $0x16c] ss:$16 sps:$4 sm:$0xff]   ;;  %v11138_v19 = vld [vmem:[%s17818_s3 + $0x160] ss:$16 sps:$4 sm:$0xff]  }
 0x1c1   :  { %v2121_v23 = vpop.f32.mrb[26].mxu0  ;;  %v2328_v24 = vpack.c.bf16 %v2160_v22, %v2119_v20  ;;  %v2162_v25 = vpop.f32.mrb[26].mxu1  ;;  %v11141_v20 = vld [vmem:[%s17818_s3 + $0x168] ss:$16 sps:$4 sm:$0xff]   ;;  %2927 = vmatpush1.bf16.msra.mxu1 %v11138_v19  ;;  %v11149_v22 = vld [vmem:[%s17818_s3 + $0x18c] ss:$16 sps:$4 sm:$0xff]  }
 0x1c2   :  { %v2122_v26 = vpop.f32.mrb[27].mxu0  ;;  %v2163_v27 = vpop.f32.mrb[27].mxu1  ;;  %v11144_v23 = vld [vmem:[%s17818_s3 + $0x180] ss:$16 sps:$4 sm:$0xff]   ;;  %v11152_v25 = vld [vmem:[%s17818_s3 + $0x1a4] ss:$16 sps:$4 sm:$0xff]  }
 0x1c3   :  { %2355 = vmatprep.subr.bf16.mxu0 %v2328_v24  ;;  %v11147_v24 = vld [vmem:[%s17818_s3 + $0x188] ss:$16 sps:$4 sm:$0xff]   ;;  %v11155_v26 = vld [vmem:[%s17818_s3 + $0x1ac] ss:$16 sps:$4 sm:$0xff]   ;;  %v11150_v27 = vld [vmem:[%s17818_s3 + $0x1a0] ss:$16 sps:$4 sm:$0xff]  }
 0x1c4   :  { %2356 = vmatpush1.bf16.msra.mxu0 %v2327_v21  ;;  %v11146_v21 = vld [vmem:[%s17818_s3 + $0x184] ss:$16 sps:$4 sm:$0xff]  }
 0x1c5   :  { %2928 = vmatprep.subr.bf16.mxu1 %v11146_v21 }
 0x1c6   :  { %2929 = vmatpush1.bf16.msra.mxu1 %v11144_v23 }
 0x1c7   :  { %2930 = vmatprep.subr.bf16.mxu1 %v11152_v25 }
 0x1ca   :  { %2931 = vmatpush1.bf16.msra.mxu1 %v11150_v27 }
 0x1df   :  { %v2199_v28 = vpop.f32.mrb[28].mxu0  ;;  %v2240_v29 = vpop.f32.mrb[28].mxu1 }
 0x1e0   :  { %v2201_v30 = vpop.f32.mrb[29].mxu0  ;;  %v2329_v32 = vpack.c.bf16 %v2240_v29, %v2199_v28  ;;  %v2242_v12 = vpop.f32.mrb[29].mxu1  ;;  %v11153_v28 = vld [vmem:[%s17818_s3 + $0x1a8] ss:$16 sps:$4 sm:$0xff]   ;;  %v11158_v29 = vld [vmem:[%s17818_s3 + $0x1c4] ss:$16 sps:$4 sm:$0xff]  }
 0x1e1   :  { %v2203_v33 = vpop.f32.mrb[30].mxu0  ;;  %v2330_v34 = vpack.c.bf16 %v2242_v12, %v2201_v30  ;;  %v2244_v35 = vpop.f32.mrb[30].mxu1  ;;  %v11161_v30 = vld [vmem:[%s17818_s3 + $0x1cc] ss:$16 sps:$4 sm:$0xff]   ;;  %v11159_v12 = vld [vmem:[%s17818_s3 + $0x1c8] ss:$16 sps:$4 sm:$0xff]   ;;  %2932 = vmatprep.subr.bf16.mxu1 %v11158_v29 }
 0x1e2   :  { %v2204_v36 = vpop.f32.mrb[31].mxu0  ;;  %v2245_v38 = vpop.f32.mrb[31].mxu1  ;;  %v11164_v33 = vld [vmem:[%s17818_s3 + $0x1e4] ss:$16 sps:$4 sm:$0xff]   ;;  %v11162_v35 = vld [vmem:[%s17818_s3 + $0x1e0] ss:$16 sps:$4 sm:$0xff]  }
 0x1e3   :  { %2357 = vmatprep.subr.bf16.mxu0 %v2330_v34  ;;  %v11167_v34 = vld [vmem:[%s17818_s3 + $0x1ec] ss:$16 sps:$4 sm:$0xff]   ;;  %v11165_v36 = vld [vmem:[%s17818_s3 + $0x1e8] ss:$16 sps:$4 sm:$0xff]  }
 0x1e4   :  { %2358 = vmatpush1.bf16.msra.mxu0 %v2329_v32  ;;  %v11156_v32 = vld [vmem:[%s17818_s3 + $0x1c0] ss:$16 sps:$4 sm:$0xff]  }
 0x1e5   :  { %2957 = vmatprep.subr.bf16.mxu0 %v11077_v37  ;;  %2933 = vmatpush1.bf16.msra.mxu1 %v11156_v32 }
 0x1e6   :  { %2934 = vmatprep.subr.bf16.mxu1 %v11164_v33 }
 0x1e7   :  { %2376 = vmatmul.mubr.bf16.vlgmr.msra.gmra.mrb[32].mxu0 %v11070_v39 }
 0x1e8   :  { %2385 = vmatprep.mubr.bf16.mxu0 %v17849_v3  ;;  %2958 = vmatpush1.bf16.msra.mxu0 %v11075_v40 }
 0x1e9   :  { %2959 = vmatprep.subr.bf16.mxu0 %v11083_v31  ;;  %2935 = vmatpush1.bf16.msra.mxu1 %v11162_v35 }
 0x1ec   :  { %2960 = vmatpush1.bf16.msra.mxu0 %v11081_v41 }
 0x1ed   :  { %2961 = vmatprep.subr.bf16.mxu0 %v11089_v44 }
 0x1ef   :  { %2386 = vmatmul.mubr.bf16.gmra.mrb[36].mxu0 %v11071_v42 }
 0x1f0   :  { %2962 = vmatpush1.bf16.msra.mxu0 %v11087_v46 }
 0x1f1   :  { %2963 = vmatprep.subr.bf16.mxu0 %v11095_v48 }
 0x1f4   :  { %2964 = vmatpush1.bf16.msra.mxu0 %v11093_v50 }
 0x1f5   :  { %2965 = vmatprep.subr.bf16.mxu0 %v11101_v52 }
 0x1f8   :  { %2966 = vmatpush1.bf16.msra.mxu0 %v11099_v54 }
 0x1f9   :  { %2967 = vmatprep.subr.bf16.mxu0 %v11107_v56 }
 0x1fc   :  { %2968 = vmatpush1.bf16.msra.mxu0 %v11105_v58 }
 0x1fd   :  { %2969 = vmatprep.subr.bf16.mxu0 %v11113_v60 }
 0x200   :  { %2970 = vmatpush1.bf16.msra.mxu0 %v11111_v62 }
 0x201   :  { %2971 = vmatprep.subr.bf16.mxu0 %v11119_v0 }
 0x204   :  { %2972 = vmatpush1.bf16.msra.mxu0 %v11117_v2 }
 0x205   :  { %2973 = vmatprep.subr.bf16.mxu0 %v11125_v5 }
 0x208   :  { %2974 = vmatpush1.bf16.msra.mxu0 %v11123_v7 }
 0x209   :  { %2975 = vmatprep.subr.bf16.mxu0 %v11131_v9 }
 0x20c   :  { %2976 = vmatpush1.bf16.msra.mxu0 %v11129_v11 }
 0x20d   :  { %2977 = vmatprep.subr.bf16.mxu0 %v11137_v14 }
 0x210   :  { %2978 = vmatpush1.bf16.msra.mxu0 %v11135_v16 }
 0x211   :  { %2979 = vmatprep.subr.bf16.mxu0 %v11143_v18 }
 0x214   :  { %2980 = vmatpush1.bf16.msra.mxu0 %v11141_v20 }
 0x215   :  { %2981 = vmatprep.subr.bf16.mxu0 %v11149_v22 }
 0x218   :  { %2982 = vmatpush1.bf16.msra.mxu0 %v11147_v24 }
 0x219   :  { %2983 = vmatprep.subr.bf16.mxu0 %v11155_v26 }
 0x21c   :  { %2984 = vmatpush1.bf16.msra.mxu0 %v11153_v28 }
 0x21d   :  { %2985 = vmatprep.subr.bf16.mxu0 %v11161_v30 }
 0x220   :  { %2986 = vmatpush1.bf16.msra.mxu0 %v11159_v12 }
 0x221   :  { %2987 = vmatprep.subr.bf16.mxu0 %v11167_v34 }
 0x224   :  { %2988 = vmatpush1.bf16.msra.mxu0 %v11165_v36 }
 0x2ba   :  { %v12792_v37 = vpop.f32.mrb[32].mxu0 }
 0x2bb   :  { %v12794_v38 = vpop.f32.mrb[33].mxu0  ;;  %v2418_v40 = vmul.f32 %v12792_v37, %v12792_v37 }
 0x2bc   :  { %v12796_v39 = vpop.f32.mrb[34].mxu0  ;;  %v2419_v43 = vmul.f32 %v12794_v38, %v12794_v38 }
 0x2bd   :  { %v2398_v31 = vadd.f32 %v12796_v39, %v12792_v37  ;;  %v2420_v41 = vmul.f32 %v12796_v39, %v12796_v39  ;;  %v12804_v42 = vpop.f32.mrb[35].mxu0 }
 0x2be   :  { %v2407_v44 = vadd.f32 %v12804_v42, %v12794_v38  ;;  %v2421_v45 = vmul.f32 %v12804_v42, %v12804_v42 }
 0x2bf   :  { %v2426_v46 = vadd.f32 %v2420_v41, %v2418_v40 }
 0x2c0   :  { %v2435_v47 = vadd.f32 %v2421_v45, %v2419_v43  ;;  %v2471_v43 = vlaneseq }
 0x2c2   :  { %v12812_v48 = vpop.f32.mrb[36].mxu0 }
 0x2c3   :  { %v2399_v49 = vadd.f32 %v2398_v31, %v12812_v48  ;;  %v2422_v50 = vmul.f32 %v12812_v48, %v12812_v48  ;;  %v12817_v51 = vpop.f32.mrb[37].mxu0 }
 0x2c4   :  { %v2408_v52 = vadd.f32 %v2407_v44, %v12817_v51  ;;  %v2423_v53 = vmul.f32 %v12817_v51, %v12817_v51  ;;  %v12822_v54 = vpop.f32.mrb[38].mxu0 }
 0x2c5   :  { %v2427_v55 = vadd.f32 %v2426_v46, %v2422_v50  ;;  %v2400_v56 = vadd.f32 %v2399_v49, %v12822_v54  ;;  %v2424_v57 = vmul.f32 %v12822_v54, %v12822_v54  ;;  %v12827_v58 = vpop.f32.mrb[39].mxu0 }
 0x2c6   :  { %v2436_v59 = vadd.f32 %v2435_v47, %v2423_v53  ;;  %v2409_v60 = vadd.f32 %v2408_v52, %v12827_v58  ;;  %v2425_v61 = vmul.f32 %v12827_v58, %v12827_v58 }
 0x2c7   :  { %v2401_v62 = vrot.slane %v2400_v56, 4  ;;  %v2428_v63 = vadd.f32 %v2427_v55, %v2424_v57 }
 0x2c8   :  { %v2410_v0 = vrot.slane %v2409_v60, 4  ;;  %v2437_v1 = vadd.f32 %v2436_v59, %v2425_v61 }
 0x2c9   :  { %v2402_v2 = vadd.f32 %v2401_v62, %v2400_v56  ;;  %v2429_v4 = vrot.slane %v2428_v63, 4 }
 0x2ca   :  { %v2411_v5 = vadd.f32 %v2410_v0, %v2409_v60  ;;  %v2438_v6 = vrot.slane %v2437_v1, 4 }
 0x2cb   :  { %v2403_v7 = vrot.slane %v2402_v2, 2  ;;  %v2430_v8 = vadd.f32 %v2429_v4, %v2428_v63 }
 0x2cc   :  { %v2412_v9 = vrot.slane %v2411_v5, 2  ;;  %v2439_v10 = vadd.f32 %v2438_v6, %v2437_v1 }
 0x2cd   :  { %v2404_v11 = vadd.f32 %v2403_v7, %v2402_v2  ;;  %v2431_v13 = vrot.slane %v2430_v8, 2 }
 0x2ce   :  { %v2413_v14 = vadd.f32 %v2412_v9, %v2411_v5  ;;  %v2440_v15 = vrot.slane %v2439_v10, 2 }
 0x2cf   :  { %v2405_v16 = vrot.slane %v2404_v11, 1  ;;  %v2432_v17 = vadd.f32 %v2431_v13, %v2430_v8 }
 0x2d0   :  { %v2414_v18 = vrot.slane %v2413_v14, 1  ;;  %v2441_v19 = vadd.f32 %v2440_v15, %v2439_v10 }
 0x2d1   :  { %v2406_v20 = vadd.f32 %v2405_v16, %v2404_v11  ;;  %v2433_v21 = vrot.slane %v2432_v17, 1 }
 0x2d2   :  { %v2415_v22 = vadd.f32 %v2414_v18, %v2413_v14  ;;  %v2442_v23 = vrot.slane %v2441_v19, 1 }
 0x2d3   :  { %v2416_v24 = vmul.f32 0.03125, %v2406_v20  ;;  %v2434_v25 = vadd.f32 %v2433_v21, %v2432_v17 }
 0x2d4   :  { %v2417_v26 = vmul.f32 0.03125, %v2415_v22  ;;  %v2443_v27 = vadd.f32 %v2442_v23, %v2441_v19 }
 0x2d5   :  { %v2444_v28 = vmul.f32 0.03125, %v2434_v25  ;;  %v2446_v29 = vmul.f32 %v2416_v24, %v2416_v24  ;;  %v2456_v30 = vsub.f32 %v12822_v54, %v2416_v24  ;;  %v2450_v32 = vsub.f32 %v12792_v37, %v2416_v24 }
 0x2d6   :  { %v2445_v12 = vmul.f32 0.03125, %v2443_v27  ;;  %v2447_v33 = vmul.f32 %v2417_v26, %v2417_v26  ;;  %v2457_v34 = vsub.f32 %v12827_v58, %v2417_v26  ;;  %v2451_v35 = vsub.f32 %v12794_v38, %v2417_v26  ;;  %v2396_v38 = vld [vmem:[%s17819_s9] sm:$0x3] }
 0x2d7   :  { %v2448_v36 = vsub.f32 %v2444_v28, %v2446_v29  ;;  %v2453_v40 = vsub.f32 %v12804_v42, %v2417_v26  ;;  %v2452_v31 = vsub.f32 %v12796_v39, %v2416_v24  ;;  %v2455_v41 = vsub.f32 %v12817_v51, %v2417_v26  ;;  %v2397_v39 = vld [vmem:[%s17820_s10] sm:$0x3] }
 0x2d8   :  { %v2449_v44 = vsub.f32 %v2445_v12, %v2447_v33  ;;  %v2454_v45 = vsub.f32 %v12812_v48, %v2416_v24  ;;  %v2472_v37 = vshrl.u32 %v2471_v43, 7  ;;  %v11168_v29 = vld [vmem:[%s17821_s4] sm:$0xff]  }
 0x2d9   :  { %v2458_v46 = vadd.f32 1e-05, %v2448_v36 }
 0x2da   :  { %v2459_v47 = vadd.f32 1e-05, %v2449_v44  ;;  %v2473_v49 = vsub.s32 0, %v2472_v37  ;;  %v2477_v50 = vsub.s32 1, %v2472_v37 }
 0x2db   :  { %11639 = vrsqrt.f32 %v2458_v46 }
 0x2dc   :  { %11641 = vrsqrt.f32 %v2459_v47  ;;  %v2474_v42 = vrot.slane %v2396_v38, %v2473_v49  ;;  %v2478_v52 = vrot.slane %v2396_v38, %v2477_v50  ;;  %v2493_v53 = vrot.slane %v2397_v39, %v2473_v49 }
 0x2dd   :  { %v2497_v48 = vrot.slane %v2397_v39, %v2477_v50 }
 0x2e5   :  { %v11640_v51 = vpop.eup %11639 }
 0x2e6   :  { %v11642_v54 = vpop.eup %11641  ;;  %v2468_v55 = vmul.f32 %v11640_v51, %v2456_v30  ;;  %v2462_v56 = vmul.f32 %v11640_v51, %v2450_v32  ;;  %v2464_v57 = vmul.f32 %v11640_v51, %v2452_v31  ;;  %v2466_v58 = vmul.f32 %v11640_v51, %v2454_v45 }
 0x2e7   :  { %v2469_v59 = vmul.f32 %v11642_v54, %v2457_v34  ;;  %v2463_v60 = vmul.f32 %v11642_v54, %v2451_v35  ;;  %v2465_v61 = vmul.f32 %v11642_v54, %v2453_v40  ;;  %v2467_v62 = vmul.f32 %v11642_v54, %v2455_v41  ;;  %v11170_v54 = vld [vmem:[%s17821_s4 + $0x10] sm:$0xff]  }
 0x2e8   :  { %v2487_v63 = vmul.f32 %v2474_v42, %v2468_v55  ;;  %v2481_v0 = vmul.f32 %v2474_v42, %v2462_v56  ;;  %v2483_v1 = vmul.f32 %v2474_v42, %v2464_v57  ;;  %v2485_v2 = vmul.f32 %v2474_v42, %v2466_v58  ;;  %v11171_v55 = vld [vmem:[%s17821_s4 + $0x18] sm:$0xff]   ;;  %v11172_v56 = vld [vmem:[%s17821_s4 + $0x20] sm:$0xff]   ;;  %v11173_v57 = vld [vmem:[%s17821_s4 + $0x28] sm:$0xff]  }
 0x2e9   :  { %v2488_v4 = vmul.f32 %v2478_v52, %v2469_v59  ;;  %v2482_v5 = vmul.f32 %v2478_v52, %v2463_v60  ;;  %v2484_v6 = vmul.f32 %v2478_v52, %v2465_v61  ;;  %v2486_v7 = vmul.f32 %v2478_v52, %v2467_v62  ;;  %v11174_v58 = vld [vmem:[%s17821_s4 + $0x30] sm:$0xff]   ;;  %v11175_v59 = vld [vmem:[%s17821_s4 + $0x38] sm:$0xff]   ;;  %v11178_v60 = vld [vmem:[%s17822_s5 + $0x4] ss:$36 sps:$4 sm:$0xff]  }
 0x2ea   :  { %v2500_v8 = vadd.f32 %v2493_v53, %v2481_v0  ;;  %v2502_v9 = vadd.f32 %v2493_v53, %v2483_v1  ;;  %v2504_v10 = vadd.f32 %v2493_v53, %v2485_v2  ;;  %v2506_v11 = vadd.f32 %v2493_v53, %v2487_v63  ;;  %v11176_v61 = vld [vmem:[%s17822_s5] ss:$36 sps:$4 sm:$0xff]   ;;  %3793 = vmatprep.subr.bf16.mxu0 %v11178_v60  ;;  %v11179_v62 = vld [vmem:[%s17822_s5 + $0x8] ss:$36 sps:$4 sm:$0xff]   ;;  %v11187_v1 = vld [vmem:[%s17822_s5 + $0x54] ss:$36 sps:$4 sm:$0xff]  }
 0x2eb   :  { %v2501_v13 = vadd.f32 %v2497_v48, %v2482_v5  ;;  %v2503_v14 = vadd.f32 %v2497_v48, %v2484_v6  ;;  %v2505_v15 = vadd.f32 %v2497_v48, %v2486_v7  ;;  %v2507_v16 = vadd.f32 %v2497_v48, %v2488_v4  ;;  %v11169_v48 = vld [vmem:[%s17821_s4 + $0x8] sm:$0xff]   ;;  %v11185_v4 = vld [vmem:[%s17822_s5 + $0x50] ss:$36 sps:$4 sm:$0xff]   ;;  %v11193_v6 = vld [vmem:[%s17822_s5 + $0x9c] ss:$36 sps:$4 sm:$0xff]  }
 0x2ec   :  { %v2508_v17 = vmax.f32 %v2500_v8, 0.0  ;;  %v2510_v18 = vmax.f32 %v2502_v9, 0.0  ;;  %v2512_v19 = vmax.f32 %v2504_v10, 0.0  ;;  %v2514_v20 = vmax.f32 %v2506_v11, 0.0  ;;  %v11181_v63 = vld [vmem:[%s17822_s5 + $0xc] ss:$36 sps:$4 sm:$0xff]  }
 0x2ed   :  { %v2509_v21 = vmax.f32 %v2501_v13, 0.0  ;;  %v2511_v22 = vmax.f32 %v2503_v14, 0.0  ;;  %v2513_v23 = vmax.f32 %v2505_v15, 0.0  ;;  %v2515_v24 = vmax.f32 %v2507_v16, 0.0  ;;  %v11184_v0 = vld [vmem:[%s17822_s5 + $0x4c] ss:$36 sps:$4 sm:$0xff]  }
 0x2ee   :  { %v2516_v25 = vpack.c.bf16 %v2510_v18, %v2508_v17  ;;  %v2518_v26 = vpack.c.bf16 %v2514_v20, %v2512_v19  ;;  %v11182_v2 = vld [vmem:[%s17822_s5 + $0x48] ss:$36 sps:$4 sm:$0xff]   ;;  %v11190_v5 = vld [vmem:[%s17822_s5 + $0x94] ss:$36 sps:$4 sm:$0xff]   ;;  %v11196_v9 = vld [vmem:[%s17822_s5 + $0xdc] ss:$36 sps:$4 sm:$0xff]  }
 0x2ef   :  { %v2517_v27 = vpack.c.bf16 %v2511_v22, %v2509_v21  ;;  %v2519_v28 = vpack.c.bf16 %v2515_v24, %v2513_v23  ;;  %v11188_v7 = vld [vmem:[%s17822_s5 + $0x90] ss:$36 sps:$4 sm:$0xff]   ;;  %v11191_v8 = vld [vmem:[%s17822_s5 + $0x98] ss:$36 sps:$4 sm:$0xff]   ;;  %v11199_v10 = vld [vmem:[%s17822_s5 + $0xe4] ss:$36 sps:$4 sm:$0xff]  }
 0x2f0   :  { %v11194_v11 = vld [vmem:[%s17822_s5 + $0xd8] ss:$36 sps:$4 sm:$0xff]   ;;  %v11197_v13 = vld [vmem:[%s17822_s5 + $0xe0] ss:$36 sps:$4 sm:$0xff]   ;;  %v11205_v15 = vld [vmem:[%s17822_s5 + $0x12c] ss:$36 sps:$4 sm:$0xff]  }
 0x2f1   :  { %2936 = vmatprep.mubr.bf16.mxu1 %v2517_v27  ;;  %2989 = vmatprep.mubr.bf16.mxu0 %v2517_v27  ;;  %v11202_v14 = vld [vmem:[%s17822_s5 + $0x124] ss:$36 sps:$4 sm:$0xff]   ;;  %v11208_v18 = vld [vmem:[%s17822_s5 + $0x16c] ss:$36 sps:$4 sm:$0xff]   ;;  %v11211_v19 = vld [vmem:[%s17822_s5 + $0x174] ss:$36 sps:$4 sm:$0xff]  }
 0x2f2   :  { %2937 = vmatmul.mubr.bf16.vlgmr.msra.gmra.mrb[32].mxu1 %v2516_v25  ;;  %2990 = vmatmul.mubr.bf16.vlgmr.msra.gmra.mrb[40].mxu0 %v2516_v25  ;;  %v11200_v16 = vld [vmem:[%s17822_s5 + $0x120] ss:$36 sps:$4 sm:$0xff]   ;;  %v11203_v17 = vld [vmem:[%s17822_s5 + $0x128] ss:$36 sps:$4 sm:$0xff]   ;;  %v11209_v21 = vld [vmem:[%s17822_s5 + $0x170] ss:$36 sps:$4 sm:$0xff]  }
 0x2f3   :  { %2946 = vmatprep.mubr.bf16.mxu1 %v2519_v28  ;;  %2999 = vmatprep.mubr.bf16.mxu0 %v2519_v28  ;;  %v11206_v20 = vld [vmem:[%s17822_s5 + $0x168] ss:$36 sps:$4 sm:$0xff]   ;;  %v11214_v22 = vld [vmem:[%s17822_s5 + $0x1b4] ss:$36 sps:$4 sm:$0xff]   ;;  %v11217_v23 = vld [vmem:[%s17822_s5 + $0x1bc] ss:$36 sps:$4 sm:$0xff]  }
 0x2f4   :  { %3794 = vmatpush1.bf16.msra.mxu0 %v11176_v61  ;;  %v11212_v24 = vld [vmem:[%s17822_s5 + $0x1b0] ss:$36 sps:$4 sm:$0xff]   ;;  %v11215_v25 = vld [vmem:[%s17822_s5 + $0x1b8] ss:$36 sps:$4 sm:$0xff]   ;;  %v11221_v28 = vld [vmem:[%s17822_s5 + $0x200] ss:$36 sps:$4 sm:$0xff]  }
 0x2f5   :  { %3795 = vmatprep.subr.bf16.mxu0 %v11184_v0  ;;  %v11220_v27 = vld [vmem:[%s17822_s5 + $0x1fc] ss:$36 sps:$4 sm:$0xff]  }
 0x2f8   :  { %3796 = vmatpush1.bf16.msra.mxu0 %v11182_v2 }
 0x2f9   :  { %3797 = vmatprep.subr.bf16.mxu0 %v11190_v5 }
 0x2fa   :  { %2947 = vmatmul.mubr.bf16.gmra.mrb[36].mxu1 %v2518_v26  ;;  %3000 = vmatmul.mubr.bf16.gmra.mrb[44].mxu0 %v2518_v26  ;;  %v11218_v26 = vld [vmem:[%s17822_s5 + $0x1f8] ss:$36 sps:$4 sm:$0xff]  }
 0x2fb   :  { %3825 = vmatprep.mubr.bf16.mxu0 %v17849_v3  ;;  %10419 = vmatprep.mubr.bf16.mxu1 %v11168_v29  ;;  %v11223_v29 = vld [vmem:[%s17822_s5 + $0x204] ss:$36 sps:$4 sm:$0xff]  }
 0x2fc   :  { %3798 = vmatpush1.bf16.msra.mxu0 %v11188_v7 }
 0x2fd   :  { %3799 = vmatprep.subr.bf16.mxu0 %v11196_v9 }
 0x300   :  { %3800 = vmatpush1.bf16.msra.mxu0 %v11194_v11 }
 0x301   :  { %3801 = vmatprep.subr.bf16.mxu0 %v11202_v14 }
 0x304   :  { %3802 = vmatpush1.bf16.msra.mxu0 %v11200_v16 }
 0x305   :  { %3803 = vmatprep.subr.bf16.mxu0 %v11208_v18 }
 0x308   :  { %3804 = vmatpush1.bf16.msra.mxu0 %v11206_v20 }
 0x309   :  { %3805 = vmatprep.subr.bf16.mxu0 %v11214_v22 }
 0x30c   :  { %3806 = vmatpush1.bf16.msra.mxu0 %v11212_v24 }
 0x30d   :  { %3807 = vmatprep.subr.bf16.mxu0 %v11220_v27 }
 0x310   :  { %3808 = vmatpush1.bf16.msra.mxu0 %v11218_v26 }
 0x3c5   :  { %v2938_v30 = vpop.f32.mrb[32].mxu1  ;;  %v2991_v32 = vpop.f32.mrb[40].mxu0 }
 0x3c6   :  { %v2940_v12 = vpop.f32.mrb[33].mxu1  ;;  %v2993_v33 = vpop.f32.mrb[41].mxu0 }
 0x3c7   :  { %v2942_v34 = vpop.f32.mrb[34].mxu1  ;;  %v2995_v35 = vpop.f32.mrb[42].mxu0 }
 0x3c8   :  { %v3010_v36 = vpack.c.bf16 %v2942_v34, %v2938_v30  ;;  %v3014_v40 = vpack.c.bf16 %v2995_v35, %v2991_v32  ;;  %v2944_v31 = vpop.f32.mrb[35].mxu1  ;;  %v2997_v41 = vpop.f32.mrb[43].mxu0  ;;  %v11226_v30 = vld [vmem:[%s17822_s5 + $0x14] ss:$36 sps:$4 sm:$0xff]   ;;  %v11229_v32 = vld [vmem:[%s17822_s5 + $0x1c] ss:$36 sps:$4 sm:$0xff]  }
 0x3c9   :  { %v3012_v43 = vpack.c.bf16 %v2944_v31, %v2940_v12  ;;  %v3016_v44 = vpack.c.bf16 %v2997_v41, %v2993_v33  ;;  %4019 = vmatprep.subr.bf16.mxu0 %v11226_v30 }
 0x3ca   :  { %10403 = vmatprep.subr.bf16.mxu1 %v3010_v36 }
 0x3cb   :  { %10404 = vmatpush3.bf16.msra.mxu1 %v3010_v36 }
 0x3cd   :  { %v2948_v45 = vpop.f32.mrb[36].mxu1  ;;  %v3001_v46 = vpop.f32.mrb[44].mxu0 }
 0x3ce   :  { %v2950_v47 = vpop.f32.mrb[37].mxu1  ;;  %v3003_v37 = vpop.f32.mrb[45].mxu0 }
 0x3cf   :  { %v2952_v49 = vpop.f32.mrb[38].mxu1  ;;  %v3005_v38 = vpop.f32.mrb[46].mxu0 }
 0x3d0   :  { %v3011_v50 = vpack.c.bf16 %v2952_v49, %v2948_v45  ;;  %v3015_v39 = vpack.c.bf16 %v3005_v38, %v3001_v46  ;;  %v2954_v42 = vpop.f32.mrb[39].mxu1  ;;  %v3007_v51 = vpop.f32.mrb[47].mxu0 }
 0x3d1   :  { %v3013_v52 = vpack.c.bf16 %v2954_v42, %v2950_v47  ;;  %v3017_v53 = vpack.c.bf16 %v3007_v51, %v3003_v37 }
 0x3d2   :  { %10405 = vmatprep.subr.bf16.mxu1 %v3011_v50 }
 0x3d3   :  { %10406 = vmatpush3.bf16.msra.mxu1 %v3011_v50 }
 0x3d4   :  { %10407 = vmatprep.subr.bf16.mxu1 %v3012_v43 }
 0x3d7   :  { %10408 = vmatpush3.bf16.msra.mxu1 %v3012_v43 }
 0x3d8   :  { %10409 = vmatprep.subr.bf16.mxu1 %v3013_v52 }
 0x3db   :  { %10410 = vmatpush3.bf16.msra.mxu1 %v3013_v52 }
 0x3dc   :  { %10411 = vmatprep.subr.bf16.mxu1 %v3014_v40 }
 0x3df   :  { %10412 = vmatpush3.bf16.msra.mxu1 %v3014_v40 }
 0x3e0   :  { %10413 = vmatprep.subr.bf16.mxu1 %v3015_v39 }
 0x3e3   :  { %10414 = vmatpush3.bf16.msra.mxu1 %v3015_v39 }
 0x3e4   :  { %10415 = vmatprep.subr.bf16.mxu1 %v3016_v44 }
 0x3e7   :  { %10416 = vmatpush3.bf16.msra.mxu1 %v3016_v44 }
 0x3e8   :  { %10417 = vmatprep.subr.bf16.mxu1 %v3017_v53 }
 0x3eb   :  { %10418 = vmatpush3.bf16.msra.mxu1 %v3017_v53 }
 0x3ec   :  { %3906 = vmatprep.subr.bf16.mxu1 %v11181_v63 }
 0x3ee   :  { %10420 = vmatmul.mubr.bf16.vlgmr.msra.gmra.mrb[40].mxu1 %v11169_v48 }
 0x3ef   :  { %10423 = vmatprep.mubr.bf16.mxu1 %v11170_v54  ;;  %3907 = vmatpush1.bf16.msra.mxu1 %v11179_v62 }
 0x3f0   :  { %3908 = vmatprep.subr.bf16.mxu1 %v11187_v1 }
 0x3f3   :  { %3909 = vmatpush1.bf16.msra.mxu1 %v11185_v4 }
 0x3f4   :  { %3910 = vmatprep.subr.bf16.mxu1 %v11193_v6 }
 0x3f6   :  { %10424 = vmatmul.mubr.bf16.gmra.mrb[44].mxu1 %v11171_v55 }
 0x3f7   :  { %10427 = vmatprep.mubr.bf16.mxu1 %v11172_v56  ;;  %3911 = vmatpush1.bf16.msra.mxu1 %v11191_v8 }
 0x3f8   :  { %3912 = vmatprep.subr.bf16.mxu1 %v11199_v10 }
 0x3fb   :  { %3913 = vmatpush1.bf16.msra.mxu1 %v11197_v13 }
 0x3fc   :  { %3914 = vmatprep.subr.bf16.mxu1 %v11205_v15 }
 0x3fe   :  { %10428 = vmatmul.mubr.bf16.gmra.mrb[48].mxu1 %v11173_v57 }
 0x3ff   :  { %10431 = vmatprep.mubr.bf16.mxu1 %v11174_v58  ;;  %3915 = vmatpush1.bf16.msra.mxu1 %v11203_v17 }
 0x400   :  { %3916 = vmatprep.subr.bf16.mxu1 %v11211_v19 }
 0x403   :  { %3917 = vmatpush1.bf16.msra.mxu1 %v11209_v21 }
 0x404   :  { %3918 = vmatprep.subr.bf16.mxu1 %v11217_v23 }
 0x406   :  { %10432 = vmatmul.mubr.bf16.gmra.mrb[52].mxu1 %v11175_v59 }
 0x407   :  { %3938 = vmatprep.mubr.bf16.mxu1 %v17849_v3  ;;  %3919 = vmatpush1.bf16.msra.mxu1 %v11215_v25 }
 0x408   :  { %3920 = vmatprep.subr.bf16.mxu1 %v11223_v29 }
 0x40b   :  { %3921 = vmatpush1.bf16.msra.mxu1 %v11221_v28 }
 0x40c   :  { %4132 = vmatprep.subr.bf16.mxu1 %v11229_v32 }
 0x4c1   :  { %v12974_v12 = vpop.f32.mrb[40].mxu1 }
 0x4c2   :  { %v12976_v33 = vpop.f32.mrb[41].mxu1  ;;  %v3205_v41 = vmul.f32 %v12974_v12, %v12974_v12 }
 0x4c3   :  { %v12978_v34 = vpop.f32.mrb[42].mxu1  ;;  %v3203_v36 = vmul.f32 %v12976_v33, %v12976_v33 }
 0x4c4   :  { %v12980_v35 = vpop.f32.mrb[43].mxu1  ;;  %v3206_v45 = vmul.f32 %v12978_v34, %v12978_v34 }
 0x4c5   :  { %v3181_v40 = vadd.f32 %v12980_v35, %v12976_v33  ;;  %v3204_v31 = vmul.f32 %v12980_v35, %v12980_v35 }
 0x4c7   :  { %v3182_v43 = vadd.f32 %v12974_v12, %v3181_v40  ;;  %v3219_v44 = vadd.f32 %v3204_v31, %v3203_v36 }
 0x4c9   :  { %v3220_v46 = vadd.f32 %v3219_v44, %v3205_v41  ;;  %v12993_v47 = vpop.f32.mrb[44].mxu1  ;;  %v3183_v37 = vadd.f32 %v12978_v34, %v3182_v43 }
 0x4ca   :  { %v12996_v49 = vpop.f32.mrb[45].mxu1  ;;  %v3209_v54 = vmul.f32 %v12993_v47, %v12993_v47 }
 0x4cb   :  { %v3184_v38 = vadd.f32 %v3183_v37, %v12996_v49  ;;  %v3207_v50 = vmul.f32 %v12996_v49, %v12996_v49  ;;  %v3221_v39 = vadd.f32 %v3220_v46, %v3206_v45  ;;  %v13001_v42 = vpop.f32.mrb[46].mxu1 }
 0x4cc   :  { %v13003_v51 = vpop.f32.mrb[47].mxu1  ;;  %v3210_v57 = vmul.f32 %v13001_v42, %v13001_v42 }
 0x4cd   :  { %v3222_v52 = vadd.f32 %v3221_v39, %v3207_v50  ;;  %v3185_v53 = vadd.f32 %v3184_v38, %v13003_v51  ;;  %v3208_v48 = vmul.f32 %v13003_v51, %v13003_v51 }
 0x4cf   :  { %v3186_v55 = vadd.f32 %v12993_v47, %v3185_v53  ;;  %v3223_v56 = vadd.f32 %v3222_v52, %v3208_v48 }
 0x4d1   :  { %v3224_v58 = vadd.f32 %v3223_v56, %v3209_v54  ;;  %v13013_v59 = vpop.f32.mrb[48].mxu1  ;;  %v3187_v60 = vadd.f32 %v13001_v42, %v3186_v55 }
 0x4d2   :  { %v13016_v61 = vpop.f32.mrb[49].mxu1  ;;  %v3213_v7 = vmul.f32 %v13013_v59, %v13013_v59 }
 0x4d3   :  { %v3188_v62 = vadd.f32 %v3187_v60, %v13016_v61  ;;  %v3211_v63 = vmul.f32 %v13016_v61, %v13016_v61  ;;  %v3225_v0 = vadd.f32 %v3224_v58, %v3210_v57  ;;  %v13021_v1 = vpop.f32.mrb[50].mxu1 }
 0x4d4   :  { %v13023_v2 = vpop.f32.mrb[51].mxu1  ;;  %v3214_v10 = vmul.f32 %v13021_v1, %v13021_v1 }
 0x4d5   :  { %v3226_v4 = vadd.f32 %v3225_v0, %v3211_v63  ;;  %v3189_v5 = vadd.f32 %v3188_v62, %v13023_v2  ;;  %v3212_v6 = vmul.f32 %v13023_v2, %v13023_v2 }
 0x4d7   :  { %v3190_v8 = vadd.f32 %v13013_v59, %v3189_v5  ;;  %v3227_v9 = vadd.f32 %v3226_v4, %v3212_v6  ;;  %v13098_v6 = vld [vmem:[%s17824_s12] ss:$0 sm:$0xff] }
 0x4d9   :  { %v3228_v11 = vadd.f32 %v3227_v9, %v3213_v7  ;;  %v13033_v13 = vpop.f32.mrb[52].mxu1  ;;  %v3191_v14 = vadd.f32 %v13021_v1, %v3190_v8 }
 0x4da   :  { %v13036_v15 = vpop.f32.mrb[53].mxu1  ;;  %v3217_v24 = vmul.f32 %v13033_v13, %v13033_v13 }
 0x4db   :  { %v3192_v16 = vadd.f32 %v3191_v14, %v13036_v15  ;;  %v3215_v17 = vmul.f32 %v13036_v15, %v13036_v15  ;;  %v3229_v18 = vadd.f32 %v3228_v11, %v3214_v10  ;;  %v13041_v19 = vpop.f32.mrb[54].mxu1 }
 0x4dc   :  { %v3167_v20 = vpop.f32.mrb[55].mxu1  ;;  %v3218_v27 = vmul.f32 %v13041_v19, %v13041_v19 }
 0x4dd   :  { %v3230_v21 = vadd.f32 %v3229_v18, %v3215_v17  ;;  %v3193_v22 = vadd.f32 %v3192_v16, %v3167_v20  ;;  %v3216_v23 = vmul.f32 %v3167_v20, %v3167_v20 }
 0x4df   :  { %v3194_v25 = vadd.f32 %v13033_v13, %v3193_v22  ;;  %v3231_v26 = vadd.f32 %v3230_v21, %v3216_v23 }
 0x4e1   :  { %v3195_v28 = vadd.f32 %v13041_v19, %v3194_v25  ;;  %v3232_v29 = vadd.f32 %v3231_v26, %v3217_v24 }
 0x4e3   :  { %v3196_v30 = vrot.slane %v3195_v28, 4  ;;  %v3233_v32 = vadd.f32 %v3232_v29, %v3218_v27 }
 0x4e5   :  { %v3197_v36 = vadd.f32 %v3196_v30, %v3195_v28  ;;  %v3234_v40 = vrot.slane %v3233_v32, 4 }
 0x4e7   :  { %v3198_v31 = vrot.slane %v3197_v36, 2  ;;  %v3235_v41 = vadd.f32 %v3234_v40, %v3233_v32 }
 0x4e9   :  { %v3199_v43 = vadd.f32 %v3198_v31, %v3197_v36  ;;  %v3236_v44 = vrot.slane %v3235_v41, 2 }
 0x4eb   :  { %v3200_v45 = vrot.slane %v3199_v43, 1  ;;  %v3237_v46 = vadd.f32 %v3236_v44, %v3235_v41 }
 0x4ed   :  { %v3201_v37 = vadd.f32 %v3200_v45, %v3199_v43  ;;  %v3238_v38 = vrot.slane %v3237_v46, 1 }
 0x4ef   :  { %v13049_v50 = vmul.f32 0.0078125, %v3201_v37  ;;  %v3239_v39 = vadd.f32 %v3238_v38, %v3237_v46  ;;  %v11224_v37 = vld [vmem:[%s17822_s5 + $0x10] ss:$36 sps:$4 sm:$0xff]   ;;  %v11227_v38 = vld [vmem:[%s17822_s5 + $0x18] ss:$36 sps:$4 sm:$0xff]  }
 0x4f1   :  { %v3240_v52 = vmul.f32 0.0078125, %v3239_v39  ;;  %v3241_v53 = vmul.f32 %v13049_v50, %v13049_v50  ;;  %v3256_v48 = vsub.f32 %v3167_v20, %v13049_v50  ;;  %v3243_v54 = vsub.f32 %v12976_v33, %v13049_v50 }
 0x4f2   :  { %v3244_v55 = vsub.f32 %v12980_v35, %v13049_v50  ;;  %v3245_v56 = vsub.f32 %v12974_v12, %v13049_v50  ;;  %v3246_v57 = vsub.f32 %v12978_v34, %v13049_v50  ;;  %v3247_v58 = vsub.f32 %v12996_v49, %v13049_v50 }
 0x4f3   :  { %v3242_v60 = vsub.f32 %v3240_v52, %v3241_v53  ;;  %v3248_v62 = vsub.f32 %v13003_v51, %v13049_v50  ;;  %v3249_v63 = vsub.f32 %v12993_v47, %v13049_v50  ;;  %v3250_v33 = vsub.f32 %v13001_v42, %v13049_v50 }
 0x4f4   :  { %v3251_v35 = vsub.f32 %v13016_v61, %v13049_v50  ;;  %v3252_v12 = vsub.f32 %v13023_v2, %v13049_v50  ;;  %v3253_v34 = vsub.f32 %v13013_v59, %v13049_v50  ;;  %v3254_v49 = vsub.f32 %v13021_v1, %v13049_v50  ;;  %v13089_v59 = vld [vmem:[%s17823_s11] ss:$0 sm:$0xff] }
 0x4f5   :  { %v3259_v0 = vadd.f32 1e-05, %v3242_v60  ;;  %v3255_v51 = vsub.f32 %v13036_v15, %v13049_v50  ;;  %v3257_v47 = vsub.f32 %v13033_v13, %v13049_v50  ;;  %v3258_v42 = vsub.f32 %v13041_v19, %v13049_v50  ;;  %v11239_v19 = vld [vmem:[%s17822_s5 + $0xa8] ss:$36 sps:$4 sm:$0xff]  }
 0x4f7   :  { %11643 = vrsqrt.f32 %v3259_v0  ;;  %v11233_v0 = vld [vmem:[%s17822_s5 + $0x60] ss:$36 sps:$4 sm:$0xff]  }
 0x501   :  { %v13084_v61 = vpop.eup %11643 }
 0x502   :  { %v3274_v1 = vmul.f32 %v13084_v61, %v3256_v48  ;;  %v3261_v2 = vmul.f32 %v13084_v61, %v3243_v54  ;;  %v3262_v4 = vmul.f32 %v13084_v61, %v3244_v55  ;;  %v3263_v5 = vmul.f32 %v13084_v61, %v3245_v56  ;;  %v11232_v48 = vld [vmem:[%s17822_s5 + $0x5c] ss:$36 sps:$4 sm:$0xff]   ;;  %v11235_v54 = vld [vmem:[%s17822_s5 + $0x64] ss:$36 sps:$4 sm:$0xff]  }
 0x503   :  { %v3264_v7 = vmul.f32 %v13084_v61, %v3246_v57  ;;  %v3265_v8 = vmul.f32 %v13084_v61, %v3247_v58  ;;  %v3266_v9 = vmul.f32 %v13084_v61, %v3248_v62  ;;  %v3267_v10 = vmul.f32 %v13084_v61, %v3249_v63 }
 0x504   :  { %v3296_v11 = vmul.f32 %v13089_v59, %v3274_v1  ;;  %v3283_v13 = vmul.f32 %v13089_v59, %v3261_v2  ;;  %v3284_v14 = vmul.f32 %v13089_v59, %v3262_v4  ;;  %v3285_v15 = vmul.f32 %v13089_v59, %v3263_v5  ;;  %v11241_v4 = vld [vmem:[%s17822_s5 + $0xac] ss:$36 sps:$4 sm:$0xff]  }
 0x505   :  { %v3286_v16 = vmul.f32 %v13089_v59, %v3264_v7  ;;  %v3287_v17 = vmul.f32 %v13089_v59, %v3265_v8  ;;  %v3288_v18 = vmul.f32 %v13089_v59, %v3266_v9  ;;  %v3268_v20 = vmul.f32 %v13084_v61, %v3250_v33 }
 0x506   :  { %v3305_v21 = vadd.f32 %v13098_v6, %v3283_v13  ;;  %v3306_v22 = vadd.f32 %v13098_v6, %v3284_v14  ;;  %v3307_v23 = vadd.f32 %v13098_v6, %v3285_v15  ;;  %v3289_v27 = vmul.f32 %v13089_v59, %v3267_v10 }
 0x507   :  { %v3308_v24 = vadd.f32 %v13098_v6, %v3286_v16  ;;  %v3309_v25 = vadd.f32 %v13098_v6, %v3287_v17  ;;  %v3310_v26 = vadd.f32 %v13098_v6, %v3288_v18  ;;  %v13120_v28 = vadd.f32 %v13098_v6, %v3296_v11  ;;  %v11236_v18 = vld [vmem:[%s17822_s5 + $0xa0] ss:$36 sps:$4 sm:$0xff]  }
 0x508   :  { %v3321_v29 = vmax.f32 %v3305_v21, 0.0  ;;  %v3322_v30 = vmax.f32 %v3306_v22, 0.0  ;;  %v3323_v32 = vmax.f32 %v3307_v23, 0.0  ;;  %v3290_v41 = vmul.f32 %v13089_v59, %v3268_v20 }
 0x509   :  { %v3324_v36 = vmax.f32 %v3308_v24, 0.0  ;;  %v3325_v40 = vmax.f32 %v3309_v25, 0.0  ;;  %v3326_v31 = vmax.f32 %v3310_v26, 0.0  ;;  %v3311_v44 = vadd.f32 %v13098_v6, %v3289_v27  ;;  %v11242_v25 = vld [vmem:[%s17822_s5 + $0xe8] ss:$36 sps:$4 sm:$0xff]  }
 0x50a   :  { %v13123_v43 = vpack.c.bf16 %v3322_v30, %v3321_v29  ;;  %v3269_v45 = vmul.f32 %v13084_v61, %v3251_v35  ;;  %v3270_v46 = vmul.f32 %v13084_v61, %v3252_v12  ;;  %v3312_v53 = vadd.f32 %v13098_v6, %v3290_v41  ;;  %v11245_v26 = vld [vmem:[%s17822_s5 + $0xf0] ss:$36 sps:$4 sm:$0xff]   ;;  %v11257_v41 = vld [vmem:[%s17822_s5 + $0x180] ss:$36 sps:$4 sm:$0xff]  }
 0x50b   :  { %v13134_v39 = vpack.c.bf16 %v3324_v36, %v3323_v32  ;;  %v13136_v52 = vpack.c.bf16 %v3326_v31, %v3325_v40  ;;  %v3271_v55 = vmul.f32 %v13084_v61, %v3253_v34  ;;  %v3327_v56 = vmax.f32 %v3311_v44, 0.0  ;;  %v11248_v30 = vld [vmem:[%s17822_s5 + $0x130] ss:$36 sps:$4 sm:$0xff]   ;;  %v11251_v32 = vld [vmem:[%s17822_s5 + $0x138] ss:$36 sps:$4 sm:$0xff]  }
 0x50c   :  { %3826 = vmatmul.mubr.bf16.vlgmr.msra.gmra.mrb[48].mxu0 %v13123_v43  ;;  %3939 = vmatmul.mubr.bf16.vlgmr.msra.gmra.mrb[56].mxu1 %v13123_v43  ;;  %v3291_v57 = vmul.f32 %v13089_v59, %v3269_v45  ;;  %v3292_v58 = vmul.f32 %v13089_v59, %v3270_v46  ;;  %v3272_v60 = vmul.f32 %v13084_v61, %v3254_v49  ;;  %v3328_v62 = vmax.f32 %v3312_v53, 0.0  ;;  %v11230_v49 = vld [vmem:[%s17822_s5 + $0x58] ss:$36 sps:$4 sm:$0xff]   ;;  %v11259_v40 = vld [vmem:[%s17822_s5 + $0x184] ss:$36 sps:$4 sm:$0xff]  }
 0x50d   :  { %3835 = vmatprep.mubr.bf16.mxu0 %v17849_v3  ;;  %3948 = vmatprep.mubr.bf16.mxu1 %v17849_v3  ;;  %v3293_v63 = vmul.f32 %v13089_v59, %v3271_v55  ;;  %v3273_v33 = vmul.f32 %v13084_v61, %v3255_v51  ;;  %v3275_v35 = vmul.f32 %v13084_v61, %v3257_v47  ;;  %v11238_v47 = vld [vmem:[%s17822_s5 + $0xa4] ss:$36 sps:$4 sm:$0xff]   ;;  %v3334_v11 = vmax.f32 %v13120_v28, 0.0  ;;  %v11253_v28 = vld [vmem:[%s17822_s5 + $0x13c] ss:$36 sps:$4 sm:$0xff]  }
 0x50e   :  { %v3313_v12 = vadd.f32 %v13098_v6, %v3291_v57  ;;  %v3314_v34 = vadd.f32 %v13098_v6, %v3292_v58  ;;  %4020 = vmatpush1.bf16.msra.mxu0 %v11224_v37  ;;  %4133 = vmatpush1.bf16.msra.mxu1 %v11227_v38  ;;  %v3294_v1 = vmul.f32 %v13089_v59, %v3272_v60  ;;  %v11256_v36 = vld [vmem:[%s17822_s5 + $0x17c] ss:$36 sps:$4 sm:$0xff]   ;;  %v11262_v44 = vld [vmem:[%s17822_s5 + $0x1c4] ss:$36 sps:$4 sm:$0xff]   ;;  %v11265_v45 = vld [vmem:[%s17822_s5 + $0x1cc] ss:$36 sps:$4 sm:$0xff]  }
 0x50f   :  { %v13165_v2 = vpack.c.bf16 %v3328_v62, %v3327_v56  ;;  %4021 = vmatprep.subr.bf16.mxu0 %v11232_v48  ;;  %4134 = vmatprep.subr.bf16.mxu1 %v11235_v54  ;;  %v3315_v51 = vadd.f32 %v13098_v6, %v3293_v63  ;;  %v3295_v5 = vmul.f32 %v13089_v59, %v3273_v33  ;;  %v11254_v31 = vld [vmem:[%s17822_s5 + $0x178] ss:$36 sps:$4 sm:$0xff]   ;;  %v11260_v46 = vld [vmem:[%s17822_s5 + $0x1c0] ss:$36 sps:$4 sm:$0xff]   ;;  %v11263_v37 = vld [vmem:[%s17822_s5 + $0x1c8] ss:$36 sps:$4 sm:$0xff]  }
 0x510   :  { %v3329_v7 = vmax.f32 %v3313_v12, 0.0  ;;  %v3330_v8 = vmax.f32 %v3314_v34, 0.0  ;;  %v3316_v9 = vadd.f32 %v13098_v6, %v3294_v1  ;;  %v3276_v10 = vmul.f32 %v13084_v61, %v3258_v42  ;;  %v11244_v42 = vld [vmem:[%s17822_s5 + $0xec] ss:$36 sps:$4 sm:$0xff]   ;;  %v11247_v61 = vld [vmem:[%s17822_s5 + $0xf4] ss:$36 sps:$4 sm:$0xff]  }
 0x511   :  { %v3331_v13 = vmax.f32 %v3315_v51, 0.0  ;;  %v3317_v14 = vadd.f32 %v13098_v6, %v3295_v5  ;;  %v3297_v15 = vmul.f32 %v13089_v59, %v3275_v35  ;;  %v11268_v38 = vld [vmem:[%s17822_s5 + $0x20c] ss:$36 sps:$4 sm:$0xff]   ;;  %v11271_v53 = vld [vmem:[%s17822_s5 + $0x214] ss:$36 sps:$4 sm:$0xff]   ;;  %v17833_v5 = vmov 0.0  }
 0x512   :  { %v13183_v16 = vpack.c.bf16 %v3330_v8, %v3329_v7  ;;  %4022 = vmatpush1.bf16.msra.mxu0 %v11230_v49  ;;  %4135 = vmatpush1.bf16.msra.mxu1 %v11233_v0  ;;  %v3332_v17 = vmax.f32 %v3316_v9, 0.0  ;;  %v3298_v50 = vmul.f32 %v13089_v59, %v3276_v10  ;;  %v11266_v48 = vld [vmem:[%s17822_s5 + $0x208] ss:$36 sps:$4 sm:$0xff]   ;;  %v11269_v54 = vld [vmem:[%s17822_s5 + $0x210] ss:$36 sps:$4 sm:$0xff]  }
 0x513   :  { %4023 = vmatprep.subr.bf16.mxu0 %v11238_v47  ;;  %4136 = vmatprep.subr.bf16.mxu1 %v11241_v4  ;;  %v3333_v20 = vmax.f32 %v3317_v14, 0.0  ;;  %v3319_v21 = vadd.f32 %v13098_v6, %v3297_v15  ;;  %v11272_v55 = vld [vmem:[%s17822_s5 + $0x20] ss:$36 sps:$4 sm:$0xff]   ;;  %v11273_v56 = vld [vmem:[%s17822_s5 + $0x68] ss:$36 sps:$4 sm:$0xff]  }
 0x514   :  { %3836 = vmatmul.mubr.bf16.gmra.mrb[52].mxu0 %v13134_v39  ;;  %3949 = vmatmul.mubr.bf16.gmra.mrb[60].mxu1 %v13134_v39  ;;  %v13201_v22 = vpack.c.bf16 %v3332_v17, %v3331_v13  ;;  %v3320_v59 = vadd.f32 %v13098_v6, %v3298_v50  ;;  %v11250_v6 = vld [vmem:[%s17822_s5 + $0x134] ss:$36 sps:$4 sm:$0xff]   ;;  %v11276_v60 = vld [vmem:[%s17822_s5 + $0x140] ss:$36 sps:$4 sm:$0xff]   ;;  %v11277_v62 = vld [vmem:[%s17822_s5 + $0x188] ss:$36 sps:$4 sm:$0xff]  }
 0x515   :  { %3845 = vmatprep.mubr.bf16.mxu0 %v17849_v3  ;;  %3958 = vmatprep.mubr.bf16.mxu1 %v17849_v3  ;;  %v13206_v23 = vpack.c.bf16 %v3334_v11, %v3333_v20  ;;  %v3335_v24 = vmax.f32 %v3319_v21, 0.0  ;;  %v11274_v57 = vld [vmem:[%s17822_s5 + $0xb0] ss:$36 sps:$4 sm:$0xff]   ;;  %v11275_v58 = vld [vmem:[%s17822_s5 + $0xf8] ss:$36 sps:$4 sm:$0xff]  }
 0x516   :  { %4024 = vmatpush1.bf16.msra.mxu0 %v11236_v18  ;;  %4137 = vmatpush1.bf16.msra.mxu1 %v11239_v19  ;;  %v3336_v27 = vmax.f32 %v3320_v59, 0.0  ;;  %v11278_v63 = vld [vmem:[%s17822_s5 + $0x1d0] ss:$36 sps:$4 sm:$0xff]   ;;  %v11279_v33 = vld [vmem:[%s17822_s5 + $0x218] ss:$36 sps:$4 sm:$0xff]  }
 0x517   :  { %4025 = vmatprep.subr.bf16.mxu0 %v11244_v42  ;;  %4138 = vmatprep.subr.bf16.mxu1 %v11247_v61  ;;  %v11282_v35 = vld [vmem:[%s17825_s6 + $0x4] ss:$20 sps:$4 sm:$0xff]  }
 0x518   :  { %v13220_v29 = vpack.c.bf16 %v3336_v27, %v3335_v24 }
 0x51a   :  { %4026 = vmatpush1.bf16.msra.mxu0 %v11242_v25  ;;  %4139 = vmatpush1.bf16.msra.mxu1 %v11245_v26 }
 0x51b   :  { %4027 = vmatprep.subr.bf16.mxu0 %v11250_v6  ;;  %4140 = vmatprep.subr.bf16.mxu1 %v11253_v28 }
 0x51c   :  { %3846 = vmatmul.mubr.bf16.gmra.mrb[56].mxu0 %v13136_v52  ;;  %3959 = vmatmul.mubr.bf16.gmra.mrb[64].mxu1 %v13136_v52 }
 0x51d   :  { %3855 = vmatprep.mubr.bf16.mxu0 %v17849_v3  ;;  %3968 = vmatprep.mubr.bf16.mxu1 %v17849_v3 }
 0x51e   :  { %4028 = vmatpush1.bf16.msra.mxu0 %v11248_v30  ;;  %4141 = vmatpush1.bf16.msra.mxu1 %v11251_v32 }
 0x51f   :  { %4029 = vmatprep.subr.bf16.mxu0 %v11256_v36  ;;  %4142 = vmatprep.subr.bf16.mxu1 %v11259_v40 }
 0x522   :  { %4030 = vmatpush1.bf16.msra.mxu0 %v11254_v31  ;;  %4143 = vmatpush1.bf16.msra.mxu1 %v11257_v41 }
 0x523   :  { %4031 = vmatprep.subr.bf16.mxu0 %v11262_v44  ;;  %4144 = vmatprep.subr.bf16.mxu1 %v11265_v45 }
 0x524   :  { %3856 = vmatmul.mubr.bf16.gmra.mrb[60].mxu0 %v13165_v2  ;;  %3969 = vmatmul.mubr.bf16.gmra.mrb[68].mxu1 %v13165_v2 }
 0x525   :  { %3865 = vmatprep.mubr.bf16.mxu0 %v17849_v3  ;;  %3978 = vmatprep.mubr.bf16.mxu1 %v17849_v3 }
 0x526   :  { %4032 = vmatpush1.bf16.msra.mxu0 %v11260_v46  ;;  %4145 = vmatpush1.bf16.msra.mxu1 %v11263_v37 }
 0x527   :  { %4033 = vmatprep.subr.bf16.mxu0 %v11268_v38  ;;  %4146 = vmatprep.subr.bf16.mxu1 %v11271_v53 }
 0x52a   :  { %4034 = vmatpush1.bf16.msra.mxu0 %v11266_v48  ;;  %4147 = vmatpush1.bf16.msra.mxu1 %v11269_v54 }
 0x52b   :  { %10435 = vmatprep.subr.bf16.mxu0 %v11272_v55  ;;  %5014 = vmatprep.subr.bf16.mxu1 %v17849_v3 }
 0x52c   :  { %3866 = vmatmul.mubr.bf16.gmra.mrb[64].mxu0 %v13183_v16  ;;  %3979 = vmatmul.mubr.bf16.gmra.mrb[72].mxu1 %v13183_v16 }
 0x52d   :  { %3875 = vmatprep.mubr.bf16.mxu0 %v17849_v3  ;;  %3988 = vmatprep.mubr.bf16.mxu1 %v17849_v3 }
 0x534   :  { %3876 = vmatmul.mubr.bf16.gmra.mrb[68].mxu0 %v13201_v22  ;;  %3989 = vmatmul.mubr.bf16.gmra.mrb[76].mxu1 %v13201_v22 }
 0x535   :  { %3885 = vmatprep.mubr.bf16.mxu0 %v17849_v3  ;;  %3998 = vmatprep.mubr.bf16.mxu1 %v17849_v3 }
 0x53c   :  { %3886 = vmatmul.mubr.bf16.gmra.mrb[72].mxu0 %v13206_v23  ;;  %3999 = vmatmul.mubr.bf16.gmra.mrb[80].mxu1 %v13206_v23 }
 0x53d   :  { %3895 = vmatprep.mubr.bf16.mxu0 %v17849_v3  ;;  %4008 = vmatprep.mubr.bf16.mxu1 %v17849_v3 }
 0x544   :  { %3896 = vmatmul.mubr.bf16.gmra.mrb[76].mxu0 %v13220_v29  ;;  %4009 = vmatmul.mubr.bf16.gmra.mrb[84].mxu1 %v13220_v29 }
 0x545   :  { %4051 = vmatprep.mubr.bf16.mxu0 %v17849_v3  ;;  %4164 = vmatprep.mubr.bf16.mxu1 %v17849_v3 }
 0x54c   :  { %4052 = vmatmul.mubr.bf16.vlgmr.msra.gmra.mrb[80].mxu0 %v13123_v43  ;;  %4165 = vmatmul.mubr.bf16.vlgmr.msra.gmra.mrb[88].mxu1 %v13123_v43 }
 0x54d   :  { %4061 = vmatprep.mubr.bf16.mxu0 %v17849_v3  ;;  %4174 = vmatprep.mubr.bf16.mxu1 %v17849_v3 }
 0x54e   :  { %10436 = vmatpush3.bf16.msra.mxu0 %v11272_v55 }
 0x54f   :  { %10437 = vmatprep.subr.bf16.mxu0 %v11273_v56 }
 0x552   :  { %10438 = vmatpush3.bf16.msra.mxu0 %v11273_v56 }
 0x553   :  { %10439 = vmatprep.subr.bf16.mxu0 %v11274_v57 }
 0x554   :  { %4062 = vmatmul.mubr.bf16.gmra.mrb[84].mxu0 %v13134_v39  ;;  %4175 = vmatmul.mubr.bf16.gmra.mrb[92].mxu1 %v13134_v39 }
 0x555   :  { %4071 = vmatprep.mubr.bf16.mxu0 %v17849_v3  ;;  %4184 = vmatprep.mubr.bf16.mxu1 %v17849_v3 }
 0x556   :  { %10440 = vmatpush3.bf16.msra.mxu0 %v11274_v57 }
 0x557   :  { %10441 = vmatprep.subr.bf16.mxu0 %v11275_v58 }
 0x55a   :  { %10442 = vmatpush3.bf16.msra.mxu0 %v11275_v58 }
 0x55b   :  { %10443 = vmatprep.subr.bf16.mxu0 %v11276_v60 }
 0x55c   :  { %4072 = vmatmul.mubr.bf16.gmra.mrb[88].mxu0 %v13136_v52  ;;  %4185 = vmatmul.mubr.bf16.gmra.mrb[96].mxu1 %v13136_v52 }
 0x55d   :  { %4081 = vmatprep.mubr.bf16.mxu0 %v17849_v3  ;;  %4194 = vmatprep.mubr.bf16.mxu1 %v17849_v3 }
 0x55e   :  { %10444 = vmatpush3.bf16.msra.mxu0 %v11276_v60 }
 0x55f   :  { %10445 = vmatprep.subr.bf16.mxu0 %v11277_v62 }
 0x562   :  { %10446 = vmatpush3.bf16.msra.mxu0 %v11277_v62 }
 0x563   :  { %10447 = vmatprep.subr.bf16.mxu0 %v11278_v63 }
 0x564   :  { %4082 = vmatmul.mubr.bf16.gmra.mrb[92].mxu0 %v13165_v2  ;;  %4195 = vmatmul.mubr.bf16.gmra.mrb[100].mxu1 %v13165_v2 }
 0x565   :  { %4091 = vmatprep.mubr.bf16.mxu0 %v17849_v3  ;;  %4204 = vmatprep.mubr.bf16.mxu1 %v17849_v3 }
 0x566   :  { %10448 = vmatpush3.bf16.msra.mxu0 %v11278_v63 }
 0x567   :  { %10449 = vmatprep.subr.bf16.mxu0 %v11279_v33 }
 0x56a   :  { %10450 = vmatpush3.bf16.msra.mxu0 %v11279_v33 }
 0x56b   :  { %10467 = vmatprep.subr.bf16.mxu0 %v17833_v5 }
 0x56c   :  { %4092 = vmatmul.mubr.bf16.gmra.mrb[96].mxu0 %v13183_v16  ;;  %4205 = vmatmul.mubr.bf16.gmra.mrb[104].mxu1 %v13183_v16 }
 0x56d   :  { %4101 = vmatprep.mubr.bf16.mxu0 %v17849_v3  ;;  %4214 = vmatprep.mubr.bf16.mxu1 %v17849_v3 }
 0x574   :  { %4102 = vmatmul.mubr.bf16.gmra.mrb[100].mxu0 %v13201_v22  ;;  %4215 = vmatmul.mubr.bf16.gmra.mrb[108].mxu1 %v13201_v22 }
 0x575   :  { %4111 = vmatprep.mubr.bf16.mxu0 %v17849_v3  ;;  %4224 = vmatprep.mubr.bf16.mxu1 %v17849_v3 }
 0x57c   :  { %4112 = vmatmul.mubr.bf16.gmra.mrb[104].mxu0 %v13206_v23  ;;  %4225 = vmatmul.mubr.bf16.gmra.mrb[112].mxu1 %v13206_v23 }
 0x57d   :  { %4121 = vmatprep.mubr.bf16.mxu0 %v17849_v3  ;;  %4234 = vmatprep.mubr.bf16.mxu1 %v17849_v3 }
 0x584   :  { %4122 = vmatmul.mubr.bf16.gmra.mrb[108].mxu0 %v13220_v29  ;;  %4235 = vmatmul.mubr.bf16.gmra.mrb[116].mxu1 %v13220_v29 }
 0x585   :  { %10451 = vmatprep.mubr.bf16.mxu0 %v13123_v43  ;;  %5046 = vmatprep.mubr.bf16.mxu1 %v11282_v35 }
 0x58c   :  { %10452 = vmatmul.mubr.bf16.vlgmr.msra.gmra.mrb[112].mxu0 %v13134_v39 }
 0x58d   :  { %10455 = vmatprep.mubr.bf16.mxu0 %v13136_v52 }
 0x594   :  { %10456 = vmatmul.mubr.bf16.gmra.mrb[116].mxu0 %v13165_v2 }
 0x595   :  { %10459 = vmatprep.mubr.bf16.mxu0 %v13183_v16 }
 0x59c   :  { %10460 = vmatmul.mubr.bf16.gmra.mrb[120].mxu0 %v13201_v22 }
 0x59d   :  { %10463 = vmatprep.mubr.bf16.mxu0 %v13206_v23 }
 0x5a4   :  { %10464 = vmatmul.mubr.bf16.gmra.mrb[124].mxu0 %v13220_v29 }
 0x5a5   :  { %10475 = vmatprep.mubr.msk.bf16.mxu0 %vm11694_vm0, %v17833_v5 }
 0x5df   :  { %v3827_v43 = vpop.f32.mrb[48].mxu0  ;;  %v13354_v12 = vpop.f32.mrb[56].mxu1 }
 0x5e0   :  { %v3829_v39 = vpop.f32.mrb[49].mxu0  ;;  %v13356_v52 = vpop.f32.mrb[57].mxu1 }
 0x5e1   :  { %v3831_v34 = vpop.f32.mrb[50].mxu0  ;;  %v13358_v49 = vpop.f32.mrb[58].mxu1 }
 0x5e2   :  { %v4342_v0 = vpack.c.bf16 %v3831_v34, %v3827_v43  ;;  %v4350_v1 = vpack.c.bf16 %v13358_v49, %v13354_v12  ;;  %v3833_v2 = vpop.f32.mrb[51].mxu0  ;;  %v13362_v51 = vpop.f32.mrb[59].mxu1 }
 0x5e3   :  { %v4346_v47 = vpack.c.bf16 %v3833_v2, %v3829_v39  ;;  %v4354_v4 = vpack.c.bf16 %v13362_v51, %v13356_v52 }
 0x5e4   :  { %5015 = vmatpush1.bf16.msra.mxu1 %v4342_v0 }
 0x5e5   :  { %5016 = vmatprep.subr.bf16.mxu1 %v17849_v3 }
 0x5e7   :  { %v3837_v7 = vpop.f32.mrb[52].mxu0  ;;  %v13368_v8 = vpop.f32.mrb[60].mxu1 }
 0x5e8   :  { %v3839_v9 = vpop.f32.mrb[53].mxu0  ;;  %v13370_v10 = vpop.f32.mrb[61].mxu1 }
 0x5e9   :  { %v3841_v11 = vpop.f32.mrb[54].mxu0  ;;  %v13372_v13 = vpop.f32.mrb[62].mxu1 }
 0x5ea   :  { %v4343_v14 = vpack.c.bf16 %v3841_v11, %v3837_v7  ;;  %v4351_v15 = vpack.c.bf16 %v13372_v13, %v13368_v8  ;;  %v3843_v16 = vpop.f32.mrb[55].mxu0  ;;  %v13376_v17 = vpop.f32.mrb[63].mxu1 }
 0x5eb   :  { %v4347_v18 = vpack.c.bf16 %v3843_v16, %v3839_v9  ;;  %v4355_v19 = vpack.c.bf16 %v13376_v17, %v13370_v10 }
 0x5ec   :  { %5017 = vmatpush1.bf16.msra.mxu1 %v4343_v14 }
 0x5ed   :  { %5018 = vmatprep.subr.bf16.mxu1 %v17849_v3 }
 0x5ef   :  { %v3847_v50 = vpop.f32.mrb[56].mxu0  ;;  %v13381_v42 = vpop.f32.mrb[64].mxu1 }
 0x5f0   :  { %v3849_v61 = vpop.f32.mrb[57].mxu0  ;;  %v13383_v20 = vpop.f32.mrb[65].mxu1 }
 0x5f1   :  { %v3851_v21 = vpop.f32.mrb[58].mxu0  ;;  %v13385_v22 = vpop.f32.mrb[66].mxu1 }
 0x5f2   :  { %v4344_v59 = vpack.c.bf16 %v3851_v21, %v3847_v50  ;;  %v4352_v23 = vpack.c.bf16 %v13385_v22, %v13381_v42  ;;  %v3853_v24 = vpop.f32.mrb[59].mxu0  ;;  %v13389_v25 = vpop.f32.mrb[67].mxu1 }
 0x5f3   :  { %v4348_v26 = vpack.c.bf16 %v3853_v24, %v3849_v61  ;;  %v4356_v27 = vpack.c.bf16 %v13389_v25, %v13383_v20  ;;  %v13576_v25 = vld [vmem:[%s17825_s6] ss:$20 sps:$4 sm:$0xff]  }
 0x5f4   :  { %5019 = vmatpush1.bf16.msra.mxu1 %v4344_v59  ;;  %18035 = vst [vmem:[#allocation5_spill] sm:$0xff] %v13576_v25 }
 0x5f5   :  { %5020 = vmatprep.subr.bf16.mxu1 %v17849_v3 }
 0x5f7   :  { %v3857_v6 = vpop.f32.mrb[60].mxu0  ;;  %v13396_v28 = vpop.f32.mrb[68].mxu1 }
 0x5f8   :  { %v3859_v29 = vpop.f32.mrb[61].mxu0  ;;  %v13398_v30 = vpop.f32.mrb[69].mxu1 }
 0x5f9   :  { %v3861_v32 = vpop.f32.mrb[62].mxu0  ;;  %v13400_v36 = vpop.f32.mrb[70].mxu1 }
 0x5fa   :  { %v4345_v40 = vpack.c.bf16 %v3861_v32, %v3857_v6  ;;  %v4353_v31 = vpack.c.bf16 %v13400_v36, %v13396_v28  ;;  %v3863_v41 = vpop.f32.mrb[63].mxu0  ;;  %v13404_v44 = vpop.f32.mrb[71].mxu1 }
 0x5fb   :  { %v4349_v45 = vpack.c.bf16 %v3863_v41, %v3859_v29  ;;  %v4357_v46 = vpack.c.bf16 %v13404_v44, %v13398_v30 }
 0x5fc   :  { %5021 = vmatpush1.bf16.msra.mxu1 %v4345_v40 }
 0x5fd   :  { %5022 = vmatprep.subr.bf16.mxu1 %v17849_v3 }
 0x5ff   :  { %v13409_v37 = vpop.f32.mrb[64].mxu0  ;;  %v13411_v38 = vpop.f32.mrb[72].mxu1 }
 0x600   :  { %v13413_v53 = vpop.f32.mrb[65].mxu0  ;;  %v13415_v48 = vpop.f32.mrb[73].mxu1  ;;  %5023 = vmatpush1.bf16.msra.mxu1 %v4346_v47 }
 0x601   :  { %v13417_v54 = vpop.f32.mrb[66].mxu0  ;;  %v13419_v55 = vpop.f32.mrb[74].mxu1  ;;  %5024 = vmatprep.subr.bf16.mxu1 %v17849_v3 }
 0x602   :  { %v13426_v58 = vpop.f32.mrb[67].mxu0  ;;  %v13428_v60 = vpop.f32.mrb[75].mxu1 }
 0x604   :  { %5025 = vmatpush1.bf16.msra.mxu1 %v4347_v18 }
 0x605   :  { %5026 = vmatprep.subr.bf16.mxu1 %v17849_v3 }
 0x607   :  { %v13435_v33 = vpop.f32.mrb[68].mxu0  ;;  %v13437_v35 = vpop.f32.mrb[76].mxu1 }
 0x608   :  { %v13439_v43 = vpop.f32.mrb[69].mxu0  ;;  %v13441_v39 = vpop.f32.mrb[77].mxu1  ;;  %5027 = vmatpush1.bf16.msra.mxu1 %v4348_v26 }
 0x609   :  { %v13443_v34 = vpop.f32.mrb[70].mxu0  ;;  %v13445_v0 = vpop.f32.mrb[78].mxu1  ;;  %5028 = vmatprep.subr.bf16.mxu1 %v17849_v3 }
 0x60a   :  { %v13452_v7 = vpop.f32.mrb[71].mxu0  ;;  %v13454_v9 = vpop.f32.mrb[79].mxu1 }
 0x60c   :  { %5029 = vmatpush1.bf16.msra.mxu1 %v4349_v45 }
 0x60d   :  { %5030 = vmatprep.subr.bf16.mxu1 %v17849_v3 }
 0x60f   :  { %v13461_v16 = vpop.f32.mrb[72].mxu0  ;;  %v13463_v18 = vpop.f32.mrb[80].mxu1 }
 0x610   :  { %v13465_v50 = vpop.f32.mrb[73].mxu0  ;;  %v13467_v61 = vpop.f32.mrb[81].mxu1  ;;  %5031 = vmatpush1.bf16.msra.mxu1 %v4350_v1 }
 0x611   :  { %v13472_v21 = vpop.f32.mrb[74].mxu0  ;;  %v13474_v59 = vpop.f32.mrb[82].mxu1  ;;  %5032 = vmatprep.subr.bf16.mxu1 %v17849_v3 }
 0x612   :  { %v13481_v6 = vpop.f32.mrb[75].mxu0  ;;  %v13483_v29 = vpop.f32.mrb[83].mxu1 }
 0x614   :  { %5033 = vmatpush1.bf16.msra.mxu1 %v4351_v15 }
 0x615   :  { %5034 = vmatprep.subr.bf16.mxu1 %v17849_v3 }
 0x617   :  { %v13493_v1 = vpop.f32.mrb[76].mxu0  ;;  %v13495_v32 = vpop.f32.mrb[84].mxu1 }
 0x618   :  { %v13497_v40 = vpop.f32.mrb[77].mxu0  ;;  %v13499_v41 = vpop.f32.mrb[85].mxu1  ;;  %5035 = vmatpush1.bf16.msra.mxu1 %v4352_v23 }
 0x619   :  { %18033 = vst [vmem:[#allocation3_spill] sm:$0xff] %v13499_v41  ;;  %v13504_v45 = vpop.f32.mrb[78].mxu0  ;;  %v13506_v49 = vpop.f32.mrb[86].mxu1  ;;  %5036 = vmatprep.subr.bf16.mxu1 %v17849_v3 }
 0x61a   :  { %v13513_v15 = vpop.f32.mrb[79].mxu0  ;;  %v13515_v14 = vpop.f32.mrb[87].mxu1 }
 0x61b   :  { %18034 = vst [vmem:[#allocation4_spill] sm:$0xff] %v13515_v14 }
 0x61c   :  { %5037 = vmatpush1.bf16.msra.mxu1 %v4353_v31 }
 0x61d   :  { %5038 = vmatprep.subr.bf16.mxu1 %v17849_v3 }
 0x61f   :  { %v4053_v23 = vpop.f32.mrb[80].mxu0  ;;  %v13525_v63 = vpop.f32.mrb[88].mxu1 }
 0x620   :  { %v13527_v13 = vpop.f32.mrb[81].mxu0  ;;  %v13529_v26 = vpop.f32.mrb[89].mxu1  ;;  %5039 = vmatpush1.bf16.msra.mxu1 %v4354_v4 }
 0x621   :  { %v4057_v47 = vpop.f32.mrb[82].mxu0  ;;  %v13534_v57 = vpop.f32.mrb[90].mxu1  ;;  %5040 = vmatprep.subr.bf16.mxu1 %v17849_v3 }
 0x622   :  { %v4358_v28 = vpack.c.bf16 %v4057_v47, %v4053_v23  ;;  %v13539_v31 = vpop.f32.mrb[83].mxu0  ;;  %v13541_v22 = vpop.f32.mrb[91].mxu1 }
 0x624   :  { %5041 = vmatpush1.bf16.msra.mxu1 %v4355_v19 }
 0x625   :  { %5042 = vmatprep.subr.bf16.mxu1 %v17849_v3 }
 0x627   :  { %v4063_v51 = vpop.f32.mrb[84].mxu0  ;;  %v13551_v4 = vpop.f32.mrb[92].mxu1 }
 0x628   :  { %v13553_v47 = vpop.f32.mrb[85].mxu0  ;;  %v13555_v23 = vpop.f32.mrb[93].mxu1  ;;  %5043 = vmatpush1.bf16.msra.mxu1 %v4356_v27  ;;  %v13584_v27 = vld [vmem:[%s17825_s6 + $0x2c] ss:$20 sps:$4 sm:$0xff]  }
 0x629   :  { %v4067_v12 = vpop.f32.mrb[86].mxu0  ;;  %v13560_v11 = vpop.f32.mrb[94].mxu1  ;;  %5044 = vmatprep.subr.bf16.mxu1 %v17849_v3  ;;  %18036 = vst [vmem:[#allocation6_spill] sm:$0xff] %v13584_v27 }
 0x62a   :  { %v4359_v10 = vpack.c.bf16 %v4067_v12, %v4063_v51  ;;  %v13565_v19 = vpop.f32.mrb[87].mxu0  ;;  %v13567_v62 = vpop.f32.mrb[95].mxu1 }
 0x62b   :  { %v4363_v8 = vpack.c.bf16 %v13565_v19, %v13553_v47 }
 0x62c   :  { %5045 = vmatpush1.bf16.msra.mxu1 %v4357_v46 }
 0x62d   :  { %5198 = vmatprep.subr.bf16.mxu1 %v17849_v3 }
 0x62f   :  { %v4073_v12 = vpop.f32.mrb[88].mxu0  ;;  %v13587_v51 = vpop.f32.mrb[96].mxu1  ;;  %5047 = vmatmul.mubr.bf16.vlgmr.msra.gmra.mrb[120].mxu1 %v13576_v25 }
 0x630   :  { %v4075_v47 = vpop.f32.mrb[89].mxu0  ;;  %v13590_v19 = vpop.f32.mrb[97].mxu1  ;;  %5199 = vmatpush1.bf16.msra.mxu1 %v4358_v28  ;;  %5054 = vmatprep.mubr.bf16.mxu1 %v13584_v27  ;;  %v13605_v28 = vld [vmem:[%s17825_s6 + $0x28] ss:$20 sps:$4 sm:$0xff]  }
 0x631   :  { %v4077_v30 = vpop.f32.mrb[90].mxu0  ;;  %v13593_v44 = vpop.f32.mrb[98].mxu1  ;;  %5200 = vmatprep.subr.bf16.mxu1 %v17849_v3  ;;  %18037 = vst [vmem:[#allocation7_spill] sm:$0xff] %v13605_v28 }
 0x632   :  { %v4360_v46 = vpack.c.bf16 %v4077_v30, %v4073_v12  ;;  %v4079_v2 = vpop.f32.mrb[91].mxu0  ;;  %v13598_v56 = vpop.f32.mrb[99].mxu1  ;;  %v13610_v12 = vld [vmem:[%s17825_s6 + $0x54] ss:$20 sps:$4 sm:$0xff]  }
 0x633   :  { %v4364_v5 = vpack.c.bf16 %v4079_v2, %v4075_v47  ;;  %18038 = vst [vmem:[#allocation8_spill] sm:$0xff] %v13610_v12 }
 0x634   :  { %5201 = vmatpush1.bf16.msra.mxu1 %v4359_v10 }
 0x635   :  { %5202 = vmatprep.subr.bf16.mxu1 %v17849_v3 }
 0x637   :  { %v4083_v30 = vpop.f32.mrb[92].mxu0  ;;  %v13613_v52 = vpop.f32.mrb[100].mxu1  ;;  %5055 = vmatmul.mubr.bf16.gmra.mrb[124].mxu1 %v13605_v28 }
 0x638   :  { %v4085_v2 = vpop.f32.mrb[93].mxu0  ;;  %v13616_v47 = vpop.f32.mrb[101].mxu1  ;;  %5203 = vmatpush1.bf16.msra.mxu1 %v4360_v46  ;;  %5062 = vmatprep.mubr.bf16.mxu1 %v13610_v12  ;;  %v13631_v46 = vld [vmem:[%s17825_s6 + $0x50] ss:$20 sps:$4 sm:$0xff]  }
 0x639   :  { %v4087_v20 = vpop.f32.mrb[94].mxu0  ;;  %v13619_v10 = vpop.f32.mrb[102].mxu1  ;;  %5204 = vmatprep.subr.bf16.mxu1 %v17849_v3  ;;  %18039 = vst [vmem:[#allocation9_spill] sm:$0xff] %v13631_v46 }
 0x63a   :  { %v4361_v24 = vpack.c.bf16 %v4087_v20, %v4083_v30  ;;  %v4089_v36 = vpop.f32.mrb[95].mxu0  ;;  %v13624_v42 = vpop.f32.mrb[103].mxu1  ;;  %v13636_v20 = vld [vmem:[%s17825_s6 + $0x7c] ss:$20 sps:$4 sm:$0xff]  }
 0x63b   :  { %v4365_v27 = vpack.c.bf16 %v4089_v36, %v4085_v2  ;;  %18040 = vst [vmem:[#allocation10_spill] sm:$0xff] %v13636_v20 }
 0x63c   :  { %5205 = vmatpush1.bf16.msra.mxu1 %v4361_v24  ;;  %v18044_v24 = vpack.c.bf16 %v13539_v31, %v13527_v13 }
 0x63d   :  { %5206 = vmatprep.subr.bf16.mxu1 %v17849_v3 }
 0x63f   :  { %v13639_v30 = vpop.f32.mrb[96].mxu0  ;;  %v13641_v17 = vpop.f32.mrb[104].mxu1  ;;  %5063 = vmatmul.mubr.bf16.gmra.mrb[128].mxu1 %v13631_v46  ;;  %v13677_v46 = vld [vmem:[%s17825_s6 + $0xa4] ss:$20 sps:$4 sm:$0xff]  }
 0x640   :  { %18041 = vst [vmem:[#allocation11_spill] sm:$0xff] %v13641_v17  ;;  %v13644_v36 = vpop.f32.mrb[97].mxu0  ;;  %v13646_v2 = vpop.f32.mrb[105].mxu1  ;;  %5207 = vmatpush1.bf16.msra.mxu1 %v18044_v24  ;;  %5070 = vmatprep.mubr.bf16.mxu1 %v13636_v20  ;;  %v13672_v24 = vld [vmem:[%s17825_s6 + $0x78] ss:$20 sps:$4 sm:$0xff]   ;;  %18048 = vst [vmem:[#allocation17_spill] sm:$0xff] %v13677_v46 }
 0x641   :  { %18042 = vst [vmem:[#allocation12_spill] sm:$0xff] %v13644_v36  ;;  %18043 = vst [vmem:[#allocation13_spill] sm:$0xff] %v13646_v2  ;;  %v13652_v28 = vpop.f32.mrb[98].mxu0  ;;  %v13654_v12 = vpop.f32.mrb[106].mxu1  ;;  %5208 = vmatprep.subr.bf16.mxu1 %v17849_v3 }
 0x642   :  { %18045 = vst [vmem:[#allocation14_spill] sm:$0xff] %v13654_v12  ;;  %v13661_v41 = vpop.f32.mrb[99].mxu0  ;;  %v13663_v14 = vpop.f32.mrb[107].mxu1  ;;  %18047 = vst [vmem:[#allocation16_spill] sm:$0xff] %v13672_v24  ;;  %v13715_v12 = vld [vmem:[%s17825_s6 + $0xcc] ss:$20 sps:$4 sm:$0xff]  }
 0x643   :  { %18046 = vst [vmem:[#allocation15_spill] sm:$0xff] %v13663_v14  ;;  %18056 = vst [vmem:[#allocation25_spill] sm:$0xff] %v13715_v12  ;;  %v18057_v14 = vmov 0  }
 0x644   :  { %5209 = vmatpush1.bf16.msra.mxu1 %v4363_v8 }
 0x645   :  { %5210 = vmatprep.subr.bf16.mxu1 %v17849_v3 }
 0x647   :  { %v13680_v25 = vpop.f32.mrb[100].mxu0  ;;  %v13682_v17 = vpop.f32.mrb[108].mxu1  ;;  %5071 = vmatmul.mubr.bf16.gmra.mrb[132].mxu1 %v13672_v24 }
 0x648   :  { %18049 = vst [vmem:[#allocation18_spill] sm:$0xff] %v13682_v17  ;;  %v13685_v31 = vpop.f32.mrb[101].mxu0  ;;  %v13687_v13 = vpop.f32.mrb[109].mxu1  ;;  %5211 = vmatpush1.bf16.msra.mxu1 %v4364_v5  ;;  %5078 = vmatprep.mubr.bf16.mxu1 %v13677_v46 }
 0x649   :  { %18050 = vst [vmem:[#allocation19_spill] sm:$0xff] %v13685_v31  ;;  %18051 = vst [vmem:[#allocation20_spill] sm:$0xff] %v13687_v13  ;;  %v13690_v8 = vpop.f32.mrb[102].mxu0  ;;  %v13692_v2 = vpop.f32.mrb[110].mxu1  ;;  %5212 = vmatprep.subr.bf16.mxu1 %v17849_v3  ;;  %v13710_v3 = vld [vmem:[%s17825_s6 + $0xa0] ss:$20 sps:$4 sm:$0xff]   ;;  %v18064_v31 = vpack.c.bf16 %v13560_v11, %v13551_v4  ;;  %v18067_v11 = vpack.c.bf16 %v13593_v44, %v13587_v51 }
 0x64a   :  { %18052 = vst [vmem:[#allocation21_spill] sm:$0xff] %v13692_v2  ;;  %v13699_v24 = vpop.f32.mrb[103].mxu0  ;;  %v13701_v20 = vpop.f32.mrb[111].mxu1  ;;  %18055 = vst [vmem:[#allocation24_spill] sm:$0xff] %v13710_v3 }
 0x64b   :  { %18053 = vst [vmem:[#allocation22_spill] sm:$0xff] %v13699_v24  ;;  %18054 = vst [vmem:[#allocation23_spill] sm:$0xff] %v13701_v20 }
 0x64c   :  { %5213 = vmatpush1.bf16.msra.mxu1 %v4365_v27  ;;  %v18060_v27 = vpack.c.bf16 %v13534_v57, %v13525_v63 }
 0x64d   :  { %5214 = vmatprep.subr.bf16.mxu1 %v18057_v14 }
 0x64f   :  { %v13718_v17 = vpop.f32.mrb[104].mxu0  ;;  %v13720_v2 = vpop.f32.mrb[112].mxu1  ;;  %5079 = vmatmul.mubr.bf16.gmra.mrb[136].mxu1 %v13710_v3  ;;  %v13759_v3 = vld [vmem:[%s17825_s6 + $0xf4] ss:$20 sps:$4 sm:$0xff]  }
 0x650   :  { %18058 = vst [vmem:[#allocation26_spill] sm:$0xff] %v13720_v2  ;;  %v13723_v46 = vpop.f32.mrb[105].mxu0  ;;  %v13725_v5 = vpop.f32.mrb[113].mxu1  ;;  %5215 = vmatpush1.bf16.msra.mxu1 %v18060_v27  ;;  %5086 = vmatprep.mubr.bf16.mxu1 %v13715_v12  ;;  %v13751_v27 = vld [vmem:[%s17825_s6 + $0xc8] ss:$20 sps:$4 sm:$0xff]  }
 0x651   :  { %18059 = vst [vmem:[#allocation27_spill] sm:$0xff] %v13725_v5  ;;  %v13731_v13 = vpop.f32.mrb[106].mxu0  ;;  %v13733_v20 = vpop.f32.mrb[114].mxu1  ;;  %5216 = vmatprep.subr.bf16.mxu1 %v18057_v14  ;;  %18063 = vst [vmem:[#allocation30_spill] sm:$0xff] %v13751_v27 }
 0x652   :  { %18061 = vst [vmem:[#allocation28_spill] sm:$0xff] %v13733_v20  ;;  %v13740_v24 = vpop.f32.mrb[107].mxu0  ;;  %v13742_v36 = vpop.f32.mrb[115].mxu1  ;;  %v13803_v20 = vld [vmem:[%s17825_s6 + $0x11c] ss:$20 sps:$4 sm:$0xff]  }
 0x653   :  { %18062 = vst [vmem:[#allocation29_spill] sm:$0xff] %v13742_v36  ;;  %v18070_v36 = vpack.c.bf16 %v13619_v10, %v13613_v52 }
 0x654   :  { %5217 = vmatpush1.bf16.msra.mxu1 %v18064_v31 }
 0x655   :  { %5218 = vmatprep.subr.bf16.mxu1 %v18057_v14 }
 0x657   :  { %v13762_v57 = vpop.f32.mrb[108].mxu0  ;;  %v13764_v2 = vpop.f32.mrb[116].mxu1  ;;  %5087 = vmatmul.mubr.bf16.gmra.mrb[140].mxu1 %v13751_v27 }
 0x658   :  { %18065 = vst [vmem:[#allocation31_spill] sm:$0xff] %v13764_v2  ;;  %v13767_v63 = vpop.f32.mrb[109].mxu0  ;;  %v13769_v5 = vpop.f32.mrb[117].mxu1  ;;  %5219 = vmatpush1.bf16.msra.mxu1 %v18067_v11  ;;  %5094 = vmatprep.mubr.bf16.mxu1 %v13759_v3  ;;  %v13795_v11 = vld [vmem:[%s17825_s6 + $0xf0] ss:$20 sps:$4 sm:$0xff]  }
 0x659   :  { %18066 = vst [vmem:[#allocation32_spill] sm:$0xff] %v13769_v5  ;;  %v13775_v4 = vpop.f32.mrb[110].mxu0  ;;  %v13777_v31 = vpop.f32.mrb[118].mxu1  ;;  %5220 = vmatprep.subr.bf16.mxu1 %v18057_v14  ;;  %18069 = vst [vmem:[#allocation34_spill] sm:$0xff] %v13795_v11  ;;  %v18071_v5 = vpack.c.bf16 %v13541_v22, %v13529_v26  ;;  %v13819_v2 = vld [vmem:[%s17825_s6 + $0x118] ss:$20 sps:$4 sm:$0xff]  }
 0x65a   :  { %v13784_v27 = vpop.f32.mrb[111].mxu0  ;;  %v13786_v12 = vpop.f32.mrb[119].mxu1  ;;  %v13827_v26 = vld [vmem:[%s17825_s6 + $0x144] ss:$20 sps:$4 sm:$0xff]   ;;  %v18073_v22 = vmov 0.0  }
 0x65b   :  { %18068 = vst [vmem:[#allocation33_spill] sm:$0xff] %v13786_v12 }
 0x65c   :  { %5221 = vmatpush1.bf16.msra.mxu1 %v18070_v36 }
 0x65d   :  { %5222 = vmatprep.subr.bf16.mxu1 %v18057_v14 }
 0x65f   :  { %v10453_v51 = vpop.f32.mrb[112].mxu0  ;;  %5095 = vmatmul.mubr.bf16.gmra.mrb[144].mxu1 %v13795_v11  ;;  %v18072_v11 = vpack.c.bf16 %v13567_v62, %v13555_v23 }
 0x660   :  { %v4279_v44 = vpop.f32.mrb[113].mxu0  ;;  %5223 = vmatpush1.bf16.msra.mxu1 %v18071_v5  ;;  %5102 = vmatprep.mubr.bf16.mxu1 %v13803_v20 }
 0x661   :  { %v10454_v12 = vpop.f32.mrb[114].mxu0  ;;  %5224 = vmatprep.subr.bf16.mxu1 %v18057_v14 }
 0x662   :  { %v13812_v52 = vpack.c.bf16 %v10454_v12, %v10453_v51  ;;  %v4282_v10 = vpop.f32.mrb[115].mxu0  ;;  %v18074_v51 = vpack.c.bf16 %v13598_v56, %v13590_v19  ;;  %v18075_v56 = vpack.c.bf16 %v13624_v42, %v13616_v47  ;;  %v13855_v19 = vld [vmem:[%s17825_s6 + $0x16c] ss:$20 sps:$4 sm:$0xff]   ;;  %v13868_v42 = vld [vmem:[%s17825_s6 + $0x10] ss:$20 sps:$4 sm:$0xff]  }
 0x663   :  { %v13814_v36 = vpack.c.bf16 %v4282_v10, %v4279_v44  ;;  %v13847_v10 = vld [vmem:[%s17825_s6 + $0x140] ss:$20 sps:$4 sm:$0xff]   ;;  %18076 = vst [vmem:[#allocation35_spill] sm:$0xff] %v13855_v19  ;;  %18079 = vst [vmem:[#allocation38_spill] sm:$0xff] %v13868_v42 }
 0x664   :  { %5225 = vmatpush1.bf16.msra.mxu1 %v18072_v11 }
 0x665   :  { %10468 = vmatpush3.bf16.msra.mxu0 %v13814_v36  ;;  %5226 = vmatprep.subr.bf16.mxu1 %v18057_v14 }
 0x666   :  { %10469 = vmatprep.subr.bf16.mxu0 %v18073_v22 }
 0x667   :  { %v10457_v12 = vpop.f32.mrb[116].mxu0  ;;  %5103 = vmatmul.mubr.bf16.gmra.mrb[148].mxu1 %v13819_v2 }
 0x668   :  { %v4295_v5 = vpop.f32.mrb[117].mxu0  ;;  %5227 = vmatpush1.bf16.msra.mxu1 %v18074_v51  ;;  %5110 = vmatprep.mubr.bf16.mxu1 %v13827_v26  ;;  %v18082_v51 = vpack.c.bf16 %v13417_v54, %v13409_v37  ;;  %v18083_v54 = vpack.c.bf16 %v13443_v34, %v13435_v33  ;;  %v13932_v33 = vld [vmem:[%s17825_s6 + $0x1bc] ss:$20 sps:$4 sm:$0xff]   ;;  %v18084_v34 = vpack.c.bf16 %v13472_v21, %v13461_v16  ;;  %v13954_v16 = vld [vmem:[%s17825_s6 + $0x1b8] ss:$20 sps:$4 sm:$0xff]  }
 0x669   :  { %v10458_v62 = vpop.f32.mrb[118].mxu0  ;;  %10470 = vmatpush3.bf16.msra.mxu0 %v13812_v52  ;;  %5228 = vmatprep.subr.bf16.mxu1 %v18057_v14  ;;  %v13961_v21 = vld [vmem:[%s17825_s6 + $0x1e4] ss:$20 sps:$4 sm:$0xff]  }
 0x66a   :  { %v13839_v23 = vpack.c.bf16 %v10458_v62, %v10457_v12  ;;  %v4298_v44 = vpop.f32.mrb[119].mxu0  ;;  %10471 = vmatprep.subr.bf16.mxu0 %v18073_v22 }
 0x66b   :  { %v13842_v11 = vpack.c.bf16 %v4298_v44, %v4295_v5 }
 0x66c   :  { %5229 = vmatpush1.bf16.msra.mxu1 %v18075_v56  ;;  %v13884_v56 = vld [vmem:[%s17825_s6 + $0x168] ss:$20 sps:$4 sm:$0xff]  }
 0x66d   :  { %10472 = vmatpush3.bf16.msra.mxu0 %v13842_v11  ;;  %10715 = vmatprep.subr.bf16.mxu1 %v18073_v22 }
 0x66e   :  { %10473 = vmatprep.subr.bf16.mxu0 %v18073_v22 }
 0x66f   :  { %v13860_v12 = vpop.f32.mrb[120].mxu0  ;;  %5111 = vmatmul.mubr.bf16.gmra.mrb[152].mxu1 %v13847_v10 }
 0x670   :  { %18077 = vst [vmem:[#allocation36_spill] sm:$0xff] %v13860_v12  ;;  %v13863_v5 = vpop.f32.mrb[121].mxu0  ;;  %5118 = vmatprep.mubr.bf16.mxu1 %v13855_v19  ;;  %v13891_v19 = vld [vmem:[%s17825_s6 + $0x194] ss:$20 sps:$4 sm:$0xff]  }
 0x671   :  { %18078 = vst [vmem:[#allocation37_spill] sm:$0xff] %v13863_v5  ;;  %v13871_v47 = vpop.f32.mrb[122].mxu0  ;;  %10474 = vmatpush3.bf16.msra.mxu0 %v13839_v23 }
 0x672   :  { %18080 = vst [vmem:[#allocation39_spill] sm:$0xff] %v13871_v47  ;;  %v13876_v62 = vpop.f32.mrb[123].mxu0  ;;  %5602 = vmatprep.subr.bf16.mxu0 %v18057_v14 }
 0x673   :  { %18081 = vst [vmem:[#allocation40_spill] sm:$0xff] %v13876_v62  ;;  %v13925_v62 = vld [vmem:[%s17825_s6 + $0x190] ss:$20 sps:$4 sm:$0xff]  }
 0x674   :  { %10476 = vmatmul.mubr.msk.bf16.vlgmr.msra.gmra.mrb[128].mxu0 %vm4956_vm1, %v13868_v42  ;;  %v13907_v42 = vld [vmem:[%s17825_s6 + $0x38] ss:$20 sps:$4 sm:$0xff]  }
 0x675   :  { %5603 = vmatpush1.bf16.msra.mxu0 %v18082_v51  ;;  %10479 = vmatprep.mubr.msk.bf16.mxu0 %vm11694_vm0, %v18073_v22  ;;  %v18085_v51 = vpack.c.bf16 %v13504_v45, %v13493_v1  ;;  %v13973_v1 = vld [vmem:[%s17825_s6 + $0x88] ss:$20 sps:$4 sm:$0xff]   ;;  %v18087_v45 = vpack.c.bf16 %v13452_v7, %v13439_v43  ;;  %v14002_v43 = vld [vmem:[%s17825_s6 + $0xb0] ss:$20 sps:$4 sm:$0xff]   ;;  %v18089_v7 = vpack.c.bf16 %v13513_v15, %v13497_v40  ;;  %v14031_v40 = vld [vmem:[%s17825_s6 + $0xd8] ss:$20 sps:$4 sm:$0xff]  }
 0x676   :  { %5604 = vmatprep.subr.bf16.mxu0 %v18057_v14  ;;  %v18091_v15 = vpack.c.bf16 %v13445_v0, %v13437_v35  ;;  %v14060_v35 = vld [vmem:[%s17825_s6 + $0x100] ss:$20 sps:$4 sm:$0xff]   ;;  %v18093_v0 = vpack.c.bf16 %v13506_v49, %v13495_v32  ;;  %v14089_v49 = vld [vmem:[%s17825_s6 + $0x128] ss:$20 sps:$4 sm:$0xff]   ;;  %v18095_v32 = vpack.c.bf16 %v13454_v9, %v13441_v39  ;;  %v14118_v39 = vld [vmem:[%s17825_s6 + $0x150] ss:$20 sps:$4 sm:$0xff]  }
 0x677   :  { %v13899_v44 = vpop.f32.mrb[124].mxu0  ;;  %5119 = vmatmul.mubr.bf16.gmra.mrb[156].mxu1 %v13884_v56  ;;  %v18097_v9 = vld [vmem:[#allocation4_spill] sm:$0xff] }
 0x678   :  { %v13902_v12 = vpop.f32.mrb[125].mxu0  ;;  %5126 = vmatprep.mubr.bf16.mxu1 %v13891_v19 }
 0x679   :  { %v13910_v37 = vpop.f32.mrb[126].mxu0  ;;  %5605 = vmatpush1.bf16.msra.mxu0 %v18083_v54  ;;  %v13944_v54 = vld [vmem:[%s17825_s6 + $0x60] ss:$20 sps:$4 sm:$0xff]  }
 0x67a   :  { %v13917_v47 = vpop.f32.mrb[127].mxu0  ;;  %5606 = vmatprep.subr.bf16.mxu0 %v18057_v14 }
 0x67b   :  { %v5600_v5 = vpack.c.bf16 %v13917_v47, %v13902_v12 }
 0x67c   :  { %10480 = vmatmul.mubr.msk.bf16.gmra.mrb[132].mxu0 %vm4956_vm1, %v13907_v42 }
 0x67d   :  { %5607 = vmatpush1.bf16.msra.mxu0 %v18084_v34  ;;  %10483 = vmatprep.mubr.msk.bf16.mxu0 %vm11694_vm0, %v18073_v22  ;;  %v18086_v34 = vpack.c.bf16 %v13426_v58, %v13413_v53  ;;  %v13983_v53 = vld [vmem:[%s17825_s6 + $0x1e0] ss:$20 sps:$4 sm:$0xff]  }
 0x67e   :  { %5608 = vmatprep.subr.bf16.mxu0 %v18057_v14  ;;  %v13990_v58 = vld [vmem:[%s17825_s6 + $0x20c] ss:$20 sps:$4 sm:$0xff]  }
 0x67f   :  { %5127 = vmatmul.mubr.bf16.gmra.mrb[160].mxu1 %v13925_v62 }
 0x680   :  { %5134 = vmatprep.mubr.bf16.mxu1 %v13932_v33 }
 0x681   :  { %5609 = vmatpush1.bf16.msra.mxu0 %v18085_v51  ;;  %v18088_v51 = vpack.c.bf16 %v13481_v6, %v13465_v50  ;;  %v14012_v50 = vld [vmem:[%s17825_s6 + $0x208] ss:$20 sps:$4 sm:$0xff]  }
 0x682   :  { %5610 = vmatprep.subr.bf16.mxu0 %v18057_v14  ;;  %v14019_v6 = vld [vmem:[%s17825_s6 + $0x234] ss:$20 sps:$4 sm:$0xff]  }
 0x684   :  { %10484 = vmatmul.mubr.msk.bf16.gmra.mrb[136].mxu0 %vm4956_vm1, %v13944_v54 }
 0x685   :  { %5611 = vmatpush1.bf16.msra.mxu0 %v18086_v34  ;;  %10487 = vmatprep.mubr.msk.bf16.mxu0 %vm11694_vm0, %v18073_v22  ;;  %v18090_v34 = vpack.c.bf16 %v13419_v55, %v13411_v38  ;;  %v14041_v38 = vld [vmem:[%s17825_s6 + $0x230] ss:$20 sps:$4 sm:$0xff]  }
 0x686   :  { %5612 = vmatprep.subr.bf16.mxu0 %v18057_v14  ;;  %v14048_v55 = vld [vmem:[%s17825_s6 + $0x25c] ss:$20 sps:$4 sm:$0xff]  }
 0x687   :  { %5135 = vmatmul.mubr.bf16.gmra.mrb[164].mxu1 %v13954_v16 }
 0x688   :  { %5142 = vmatprep.mubr.bf16.mxu1 %v13961_v21 }
 0x689   :  { %5613 = vmatpush1.bf16.msra.mxu0 %v18087_v45  ;;  %v18092_v45 = vpack.c.bf16 %v13474_v59, %v13463_v18  ;;  %v14070_v18 = vld [vmem:[%s17825_s6 + $0x258] ss:$20 sps:$4 sm:$0xff]  }
 0x68a   :  { %5614 = vmatprep.subr.bf16.mxu0 %v18057_v14  ;;  %v14077_v59 = vld [vmem:[%s17825_s6 + $0x284] ss:$20 sps:$4 sm:$0xff]  }
 0x68c   :  { %10488 = vmatmul.mubr.msk.bf16.gmra.mrb[140].mxu0 %vm4956_vm1, %v13973_v1 }
 0x68d   :  { %5615 = vmatpush1.bf16.msra.mxu0 %v18088_v51  ;;  %10491 = vmatprep.mubr.msk.bf16.mxu0 %vm11694_vm0, %v18073_v22  ;;  %v18094_v51 = vpack.c.bf16 %v13428_v60, %v13415_v48  ;;  %v14099_v48 = vld [vmem:[%s17825_s6 + $0x280] ss:$20 sps:$4 sm:$0xff]  }
 0x68e   :  { %5616 = vmatprep.subr.bf16.mxu0 %v18057_v14  ;;  %v14106_v60 = vld [vmem:[%s17825_s6 + $0x2ac] ss:$20 sps:$4 sm:$0xff]  }
 0x68f   :  { %5143 = vmatmul.mubr.bf16.gmra.mrb[168].mxu1 %v13983_v53 }
 0x690   :  { %5150 = vmatprep.mubr.bf16.mxu1 %v13990_v58 }
 0x691   :  { %5617 = vmatpush1.bf16.msra.mxu0 %v18089_v7  ;;  %v18096_v7 = vpack.c.bf16 %v13483_v29, %v13467_v61  ;;  %v4486_v61 = vld [vmem:[%s17825_s6 + $0x2d0] sm:$0xff]  ;;  %v14131_v29 = vld [vmem:[%s17825_s6 + $0x2a8] ss:$20 sps:$4 sm:$0xff]  }
 0x692   :  { %5618 = vmatprep.subr.bf16.mxu0 %v18057_v14 }
 0x694   :  { %10492 = vmatmul.mubr.msk.bf16.gmra.mrb[144].mxu0 %vm4956_vm1, %v14002_v43 }
 0x695   :  { %5619 = vmatpush1.bf16.msra.mxu0 %v18090_v34  ;;  %10495 = vmatprep.mubr.msk.bf16.mxu0 %vm11694_vm0, %v18073_v22  ;;  %v18098_v34 = vld [vmem:[#allocation3_spill] sm:$0xff] }
 0x696   :  { %5620 = vmatprep.subr.bf16.mxu0 %v18057_v14 }
 0x697   :  { %5151 = vmatmul.mubr.bf16.gmra.mrb[172].mxu1 %v14012_v50 }
 0x698   :  { %5158 = vmatprep.mubr.bf16.mxu1 %v14019_v6 }
 0x699   :  { %5621 = vmatpush1.bf16.msra.mxu0 %v18091_v15  ;;  %v18099_v15 = vpack.c.bf16 %v18097_v9, %v18098_v34  ;;  %v18101_v9 = vpack.c.bf16 %v13652_v28, %v13639_v30  ;;  %v18102_v34 = vld [vmem:[#allocation6_spill] sm:$0xff]  ;;  %v18104_v28 = vld [vmem:[#allocation7_spill] sm:$0xff]  ;;  %v14170_v30 = vld [vmem:[%s17825_s6 + $0x34] ss:$20 sps:$4 sm:$0xff]  }
 0x69a   :  { %5622 = vmatprep.subr.bf16.mxu0 %v18057_v14 }
 0x69c   :  { %10496 = vmatmul.mubr.msk.bf16.gmra.mrb[148].mxu0 %vm4956_vm1, %v14031_v40 }
 0x69d   :  { %5623 = vmatpush1.bf16.msra.mxu0 %v18092_v45  ;;  %10499 = vmatprep.mubr.msk.bf16.mxu0 %vm11694_vm0, %v18073_v22  ;;  %v14135_v45 = vcombine.high %v4486_v61, %v4486_v61 }
 0x69e   :  { %5624 = vmatprep.subr.bf16.mxu0 %v18057_v14 }
 0x69f   :  { %5159 = vmatmul.mubr.bf16.gmra.mrb[176].mxu1 %v14041_v38 }
 0x6a0   :  { %5166 = vmatprep.mubr.bf16.mxu1 %v14048_v55 }
 0x6a1   :  { %5625 = vmatpush1.bf16.msra.mxu0 %v18093_v0  ;;  %v11660_v0 = vld [vmem:[%s17825_s6 + $0x4] ss:$20 sps:$4 sm:$0xff]  }
 0x6a2   :  { %5626 = vmatprep.subr.bf16.mxu0 %v18057_v14 }
 0x6a4   :  { %10500 = vmatmul.mubr.msk.bf16.gmra.mrb[152].mxu0 %vm4956_vm1, %v14060_v35 }
 0x6a5   :  { %5627 = vmatpush1.bf16.msra.mxu0 %v18094_v51  ;;  %10503 = vmatprep.mubr.msk.bf16.mxu0 %vm11694_vm0, %v18073_v22  ;;  %v14142_v51 = vcombine.low %v4486_v61, %v4486_v61  ;;  %v14164_v61 = vld [vmem:[%s17825_s6 + $0x8] ss:$20 sps:$4 sm:$0xff]  }
 0x6a6   :  { %5628 = vmatprep.subr.bf16.mxu0 %v18057_v14 }
 0x6a7   :  { %5167 = vmatmul.mubr.bf16.gmra.mrb[180].mxu1 %v14070_v18 }
 0x6a8   :  { %5174 = vmatprep.mubr.bf16.mxu1 %v14077_v59 }
 0x6a9   :  { %5629 = vmatpush1.bf16.msra.mxu0 %v18095_v32  ;;  %v18100_v32 = vld [vmem:[#allocation5_spill] sm:$0xff] }
 0x6aa   :  { %5630 = vmatprep.subr.bf16.mxu0 %v18057_v14 }
 0x6ac   :  { %10504 = vmatmul.mubr.msk.bf16.gmra.mrb[156].mxu0 %vm4956_vm1, %v14089_v49 }
 0x6ad   :  { %5631 = vmatpush1.bf16.msra.mxu0 %v18096_v7  ;;  %10507 = vmatprep.mubr.msk.bf16.mxu0 %vm11694_vm0, %v18073_v22  ;;  %v14148_v7 = vld [vmem:[%s17825_s6 + $0xc] ss:$20 sps:$4 sm:$0xff]  }
 0x6ae   :  { %5632 = vmatprep.subr.bf16.mxu0 %v18057_v14 }
 0x6af   :  { %5175 = vmatmul.mubr.bf16.gmra.mrb[184].mxu1 %v14099_v48 }
 0x6b0   :  { %5182 = vmatprep.mubr.bf16.mxu1 %v14106_v60 }
 0x6b1   :  { %5633 = vmatpush1.bf16.msra.mxu0 %v18099_v15  ;;  %v18103_v15 = vpack.c.bf16 %v13690_v8, %v13680_v25  ;;  %v18106_v25 = vld [vmem:[#allocation8_spill] sm:$0xff]  ;;  %v18107_v8 = vpack.c.bf16 %v13775_v4, %v13762_v57 }
 0x6b2   :  { %5786 = vmatprep.subr.bf16.mxu0 %v18057_v14  ;;  %v18109_v57 = vld [vmem:[#allocation12_spill] sm:$0xff] }
 0x6b3   :  { %v18110_v4 = vpack.c.bf16 %v13661_v41, %v18109_v57  ;;  %v14214_v41 = vld [vmem:[%s17825_s6 + $0x58] ss:$20 sps:$4 sm:$0xff]  }
 0x6b4   :  { %10508 = vmatmul.mubr.msk.bf16.gmra.mrb[160].mxu0 %vm4956_vm1, %v14118_v39 }
 0x6b5   :  { %5634 = vmatprep.mubr.bf16.mxu0 %v11660_v0  ;;  %v18105_v0 = vpack.c.bf16 %v13731_v13, %v13718_v17  ;;  %v14188_v17 = vld [vmem:[%s17825_s6 + $0x30] ss:$20 sps:$4 sm:$0xff]  }
 0x6b6   :  { %v18108_v13 = vld [vmem:[#allocation9_spill] sm:$0xff] }
 0x6b7   :  { %5183 = vmatmul.mubr.bf16.gmra.mrb[188].mxu1 %v14131_v29 }
 0x6b8   :  { %5190 = vmatprep.mubr.bf16.mxu1 %v14135_v45 }
 0x6bc   :  { %5635 = vmatmul.mubr.bf16.vlgmr.msra.gmra.mrb[164].mxu0 %v18100_v32  ;;  %v18111_v32 = vld [vmem:[#allocation10_spill] sm:$0xff] }
 0x6bd   :  { %5787 = vmatpush1.bf16.msra.mxu0 %v18101_v9  ;;  %5642 = vmatprep.mubr.bf16.mxu0 %v18102_v34  ;;  %v18113_v9 = vld [vmem:[#allocation19_spill] sm:$0xff] }
 0x6be   :  { %5788 = vmatprep.subr.bf16.mxu0 %v18057_v14 }
 0x6bf   :  { %5191 = vmatmul.mubr.bf16.gmra.mrb[192].mxu1 %v14142_v51 }
 0x6c0   :  { %5230 = vmatprep.mubr.bf16.mxu1 %v14148_v7 }
 0x6c1   :  { %5789 = vmatpush1.bf16.msra.mxu0 %v18103_v15  ;;  %v18115_v15 = vld [vmem:[#allocation16_spill] sm:$0xff] }
 0x6c2   :  { %5790 = vmatprep.subr.bf16.mxu0 %v18057_v14 }
 0x6c4   :  { %5643 = vmatmul.mubr.bf16.gmra.mrb[168].mxu0 %v18104_v28  ;;  %v18116_v28 = vpack.c.bf16 %v13740_v24, %v13723_v46  ;;  %v18119_v46 = vld [vmem:[#allocation24_spill] sm:$0xff] }
 0x6c5   :  { %5791 = vmatpush1.bf16.msra.mxu0 %v18105_v0  ;;  %5650 = vmatprep.mubr.bf16.mxu0 %v18106_v25  ;;  %v18117_v0 = vld [vmem:[#allocation17_spill] sm:$0xff]  ;;  %v14243_v24 = vld [vmem:[%s17825_s6 + $0xac] ss:$20 sps:$4 sm:$0xff]  }
 0x6c6   :  { %5792 = vmatprep.subr.bf16.mxu0 %v18057_v14  ;;  %v14237_v25 = vld [vmem:[%s17825_s6 + $0x80] ss:$20 sps:$4 sm:$0xff]  }
 0x6c7   :  { %5231 = vmatmul.mubr.bf16.vlgmr.msra.gmra.mrb[120].mxu1 %v14164_v61 }
 0x6c8   :  { %10719 = vmatpush3.bf16.msra.mxu1 %v13814_v36  ;;  %5238 = vmatprep.mubr.bf16.mxu1 %v14170_v30  ;;  %v14195_v36 = vld [vmem:[%s17825_s6 + $0x5c] ss:$20 sps:$4 sm:$0xff]  }
 0x6c9   :  { %5793 = vmatpush1.bf16.msra.mxu0 %v18107_v8  ;;  %10716 = vmatprep.subr.bf16.mxu1 %v18073_v22  ;;  %v18120_v8 = vld [vmem:[#allocation14_spill] sm:$0xff] }
 0x6ca   :  { %5794 = vmatprep.subr.bf16.mxu0 %v18057_v14 }
 0x6cc   :  { %10720 = vmatpush3.bf16.msra.mxu1 %v13812_v52  ;;  %5651 = vmatmul.mubr.bf16.gmra.mrb[172].mxu0 %v18108_v13  ;;  %v18112_v52 = vld [vmem:[#allocation22_spill] sm:$0xff]  ;;  %v18121_v13 = vld [vmem:[#allocation11_spill] sm:$0xff] }
 0x6cd   :  { %5795 = vmatpush1.bf16.msra.mxu0 %v18110_v4  ;;  %10717 = vmatprep.subr.bf16.mxu1 %v18073_v22  ;;  %v18114_v34 = vpack.c.bf16 %v18112_v52, %v18113_v9  ;;  %v18122_v57 = vpack.c.bf16 %v18120_v8, %v18121_v13  ;;  %v18125_v4 = vld [vmem:[#allocation18_spill] sm:$0xff]  ;;  %v14281_v8 = vld [vmem:[%s17825_s6 + $0xd0] ss:$20 sps:$4 sm:$0xff]  }
 0x6ce   :  { %5796 = vmatprep.subr.bf16.mxu0 %v18057_v14  ;;  %5658 = vmatprep.mubr.bf16.mxu0 %v18111_v32  ;;  %v14259_v52 = vld [vmem:[%s17825_s6 + $0xa8] ss:$20 sps:$4 sm:$0xff]  }
 0x6cf   :  { %5239 = vmatmul.mubr.bf16.gmra.mrb[124].mxu1 %v14188_v17  ;;  %v18127_v9 = vld [vmem:[#allocation30_spill] sm:$0xff] }
 0x6d0   :  { %10721 = vmatpush3.bf16.msra.mxu1 %v13842_v11  ;;  %5246 = vmatprep.mubr.bf16.mxu1 %v14195_v36  ;;  %v14221_v11 = vld [vmem:[%s17825_s6 + $0x84] ss:$20 sps:$4 sm:$0xff]  }
 0x6d1   :  { %5797 = vmatpush1.bf16.msra.mxu0 %v18114_v34  ;;  %10718 = vmatprep.subr.bf16.mxu1 %v18073_v22  ;;  %v14265_v34 = vld [vmem:[%s17825_s6 + $0xd4] ss:$20 sps:$4 sm:$0xff]   ;;  %v18133_v13 = vld [vmem:[#allocation34_spill] sm:$0xff] }
 0x6d2   :  { %5798 = vmatprep.subr.bf16.mxu0 %v18057_v14 }
 0x6d4   :  { %10722 = vmatpush3.bf16.msra.mxu1 %v13839_v23  ;;  %5659 = vmatmul.mubr.bf16.gmra.mrb[176].mxu0 %v18115_v15  ;;  %v18118_v23 = vpack.c.bf16 %v13784_v27, %v13767_v63  ;;  %v18123_v63 = vld [vmem:[#allocation25_spill] sm:$0xff]  ;;  %v18128_v15 = vld [vmem:[#allocation28_spill] sm:$0xff] }
 0x6d5   :  { %5799 = vmatpush1.bf16.msra.mxu0 %v18116_v28  ;;  %5666 = vmatprep.mubr.bf16.mxu0 %v18117_v0  ;;  %v18124_v27 = vld [vmem:[#allocation21_spill] sm:$0xff]  ;;  %v18129_v28 = vld [vmem:[#allocation26_spill] sm:$0xff] }
 0x6d6   :  { %5800 = vmatprep.subr.bf16.mxu0 %v18057_v14  ;;  %v18126_v32 = vpack.c.bf16 %v18124_v27, %v18125_v4  ;;  %v18130_v0 = vpack.c.bf16 %v18128_v15, %v18129_v28  ;;  %v18138_v4 = vld [vmem:[#allocation20_spill] sm:$0xff]  ;;  %v18140_v15 = vld [vmem:[#allocation29_spill] sm:$0xff]  ;;  %v18141_v28 = vld [vmem:[#allocation27_spill] sm:$0xff] }
 0x6d7   :  { %5247 = vmatmul.mubr.bf16.gmra.mrb[128].mxu1 %v14214_v41 }
 0x6d8   :  { %5254 = vmatprep.mubr.bf16.mxu1 %v14221_v11 }
 0x6d9   :  { %5801 = vmatpush1.bf16.msra.mxu0 %v18118_v23  ;;  %v18131_v23 = vld [vmem:[#allocation31_spill] sm:$0xff] }
 0x6da   :  { %5802 = vmatprep.subr.bf16.mxu0 %v18057_v14 }
 0x6dc   :  { %5667 = vmatmul.mubr.bf16.gmra.mrb[180].mxu0 %v18119_v46  ;;  %v18132_v46 = vpack.c.bf16 %v13777_v31, %v18131_v23  ;;  %v18137_v31 = vld [vmem:[#allocation23_spill] sm:$0xff]  ;;  %v18143_v23 = vld [vmem:[#allocation33_spill] sm:$0xff] }
 0x6dd   :  { %5803 = vmatpush1.bf16.msra.mxu0 %v18122_v57  ;;  %5674 = vmatprep.mubr.bf16.mxu0 %v18123_v63  ;;  %v18134_v57 = vld [vmem:[#allocation15_spill] sm:$0xff]  ;;  %v18135_v63 = vld [vmem:[#allocation13_spill] sm:$0xff] }
 0x6de   :  { %5804 = vmatprep.subr.bf16.mxu0 %v18057_v14  ;;  %v18136_v27 = vpack.c.bf16 %v18134_v57, %v18135_v63  ;;  %v18146_v57 = vld [vmem:[#allocation35_spill] sm:$0xff]  ;;  %v14339_v63 = vld [vmem:[%s17825_s6 + $0x148] ss:$20 sps:$4 sm:$0xff]  }
 0x6df   :  { %5255 = vmatmul.mubr.bf16.gmra.mrb[132].mxu1 %v14237_v25 }
 0x6e0   :  { %5262 = vmatprep.mubr.bf16.mxu1 %v14243_v24 }
 0x6e1   :  { %5805 = vmatpush1.bf16.msra.mxu0 %v18126_v32  ;;  %v18139_v32 = vpack.c.bf16 %v18137_v31, %v18138_v4 }
 0x6e2   :  { %5806 = vmatprep.subr.bf16.mxu0 %v18057_v14 }
 0x6e4   :  { %5675 = vmatmul.mubr.bf16.gmra.mrb[184].mxu0 %v18127_v9  ;;  %v14303_v9 = vld [vmem:[%s17825_s6 + $0xf8] ss:$20 sps:$4 sm:$0xff]  }
 0x6e5   :  { %5807 = vmatpush1.bf16.msra.mxu0 %v18130_v0  ;;  %5682 = vmatprep.mubr.bf16.mxu0 %v13759_v3  ;;  %v14287_v3 = vld [vmem:[%s17825_s6 + $0xfc] ss:$20 sps:$4 sm:$0xff]   ;;  %v18142_v0 = vpack.c.bf16 %v18140_v15, %v18141_v28 }
 0x6e6   :  { %5808 = vmatprep.subr.bf16.mxu0 %v18057_v14  ;;  %v14472_v15 = vld [vmem:[%s17825_s6 + $0x2b0] ss:$20 sps:$4 sm:$0xff]  }
 0x6e7   :  { %5263 = vmatmul.mubr.bf16.gmra.mrb[136].mxu1 %v14259_v52 }
 0x6e8   :  { %5270 = vmatprep.mubr.bf16.mxu1 %v14265_v34 }
 0x6e9   :  { %5809 = vmatpush1.bf16.msra.mxu0 %v18132_v46  ;;  %v18144_v46 = vld [vmem:[#allocation32_spill] sm:$0xff] }
 0x6ea   :  { %5810 = vmatprep.subr.bf16.mxu0 %v18057_v14 }
 0x6ec   :  { %5683 = vmatmul.mubr.bf16.gmra.mrb[188].mxu0 %v18133_v13  ;;  %v14325_v13 = vld [vmem:[%s17825_s6 + $0x120] ss:$20 sps:$4 sm:$0xff]  }
 0x6ed   :  { %5811 = vmatpush1.bf16.msra.mxu0 %v18136_v27  ;;  %5690 = vmatprep.mubr.bf16.mxu0 %v13803_v20  ;;  %v14309_v20 = vld [vmem:[%s17825_s6 + $0x124] ss:$20 sps:$4 sm:$0xff]  }
 0x6ee   :  { %5812 = vmatprep.subr.bf16.mxu0 %v18057_v14  ;;  %v14353_v27 = vld [vmem:[%s17825_s6 + $0x170] ss:$20 sps:$4 sm:$0xff]  }
 0x6ef   :  { %5271 = vmatmul.mubr.bf16.gmra.mrb[140].mxu1 %v14281_v8 }
 0x6f0   :  { %5278 = vmatprep.mubr.bf16.mxu1 %v14287_v3 }
 0x6f1   :  { %5813 = vmatpush1.bf16.msra.mxu0 %v18139_v32 }
 0x6f2   :  { %5814 = vmatprep.subr.bf16.mxu0 %v18057_v14 }
 0x6f4   :  { %5691 = vmatmul.mubr.bf16.gmra.mrb[192].mxu0 %v13819_v2  ;;  %v18145_v2 = vpack.c.bf16 %v18143_v23, %v18144_v46 }
 0x6f5   :  { %5815 = vmatpush1.bf16.msra.mxu0 %v18142_v0  ;;  %5698 = vmatprep.mubr.bf16.mxu0 %v13827_v26  ;;  %v14331_v26 = vld [vmem:[%s17825_s6 + $0x14c] ss:$20 sps:$4 sm:$0xff]  }
 0x6f6   :  { %5816 = vmatprep.subr.bf16.mxu0 %v18057_v14 }
 0x6f7   :  { %5279 = vmatmul.mubr.bf16.gmra.mrb[144].mxu1 %v14303_v9 }
 0x6f8   :  { %5286 = vmatprep.mubr.bf16.mxu1 %v14309_v20 }
 0x6f9   :  { %5817 = vmatpush1.bf16.msra.mxu0 %v18145_v2 }
 0x6fa   :  { %10551 = vmatprep.subr.bf16.mxu0 %v18073_v22 }
 0x6fc   :  { %5699 = vmatmul.mubr.bf16.gmra.mrb[196].mxu0 %v13847_v10  ;;  %v14345_v10 = vld [vmem:[%s17825_s6 + $0x174] ss:$20 sps:$4 sm:$0xff]  }
 0x6fd   :  { %5706 = vmatprep.mubr.bf16.mxu0 %v18146_v57  ;;  %v18147_v57 = vld [vmem:[#allocation40_spill] sm:$0xff] }
 0x6ff   :  { %5287 = vmatmul.mubr.bf16.gmra.mrb[148].mxu1 %v14325_v13 }
 0x700   :  { %5294 = vmatprep.mubr.bf16.mxu1 %v14331_v26 }
 0x704   :  { %5707 = vmatmul.mubr.bf16.gmra.mrb[200].mxu0 %v13884_v56  ;;  %v14359_v56 = vld [vmem:[%s17825_s6 + $0x19c] ss:$20 sps:$4 sm:$0xff]  }
 0x705   :  { %5714 = vmatprep.mubr.bf16.mxu0 %v13891_v19  ;;  %v14367_v19 = vld [vmem:[%s17825_s6 + $0x198] ss:$20 sps:$4 sm:$0xff]  }
 0x707   :  { %5295 = vmatmul.mubr.bf16.gmra.mrb[152].mxu1 %v14339_v63 }
 0x708   :  { %5302 = vmatprep.mubr.bf16.mxu1 %v14345_v10 }
 0x70c   :  { %5715 = vmatmul.mubr.bf16.gmra.mrb[204].mxu0 %v13925_v62  ;;  %v14373_v62 = vld [vmem:[%s17825_s6 + $0x1c4] ss:$20 sps:$4 sm:$0xff]  }
 0x70d   :  { %5722 = vmatprep.mubr.bf16.mxu0 %v13932_v33  ;;  %v14381_v33 = vld [vmem:[%s17825_s6 + $0x1c0] ss:$20 sps:$4 sm:$0xff]  }
 0x70f   :  { %5303 = vmatmul.mubr.bf16.gmra.mrb[156].mxu1 %v14353_v27 }
 0x710   :  { %5310 = vmatprep.mubr.bf16.mxu1 %v14359_v56 }
 0x714   :  { %5723 = vmatmul.mubr.bf16.gmra.mrb[208].mxu0 %v13954_v16  ;;  %v14387_v16 = vld [vmem:[%s17825_s6 + $0x1ec] ss:$20 sps:$4 sm:$0xff]  }
 0x715   :  { %5730 = vmatprep.mubr.bf16.mxu0 %v13961_v21  ;;  %v14395_v21 = vld [vmem:[%s17825_s6 + $0x1e8] ss:$20 sps:$4 sm:$0xff]  }
 0x717   :  { %5311 = vmatmul.mubr.bf16.gmra.mrb[160].mxu1 %v14367_v19 }
 0x718   :  { %5318 = vmatprep.mubr.bf16.mxu1 %v14373_v62 }
 0x71c   :  { %5731 = vmatmul.mubr.bf16.gmra.mrb[212].mxu0 %v13983_v53  ;;  %v14401_v53 = vld [vmem:[%s17825_s6 + $0x214] ss:$20 sps:$4 sm:$0xff]  }
 0x71d   :  { %5738 = vmatprep.mubr.bf16.mxu0 %v13990_v58  ;;  %v14409_v58 = vld [vmem:[%s17825_s6 + $0x210] ss:$20 sps:$4 sm:$0xff]  }
 0x71f   :  { %5319 = vmatmul.mubr.bf16.gmra.mrb[164].mxu1 %v14381_v33 }
 0x720   :  { %5326 = vmatprep.mubr.bf16.mxu1 %v14387_v16 }
 0x724   :  { %5739 = vmatmul.mubr.bf16.gmra.mrb[216].mxu0 %v14012_v50  ;;  %v14415_v50 = vld [vmem:[%s17825_s6 + $0x23c] ss:$20 sps:$4 sm:$0xff]  }
 0x725   :  { %5746 = vmatprep.mubr.bf16.mxu0 %v14019_v6  ;;  %v14423_v6 = vld [vmem:[%s17825_s6 + $0x238] ss:$20 sps:$4 sm:$0xff]  }
 0x727   :  { %5327 = vmatmul.mubr.bf16.gmra.mrb[168].mxu1 %v14395_v21 }
 0x728   :  { %5334 = vmatprep.mubr.bf16.mxu1 %v14401_v53 }
 0x72c   :  { %5747 = vmatmul.mubr.bf16.gmra.mrb[220].mxu0 %v14041_v38  ;;  %v14429_v38 = vld [vmem:[%s17825_s6 + $0x264] ss:$20 sps:$4 sm:$0xff]  }
 0x72d   :  { %5754 = vmatprep.mubr.bf16.mxu0 %v14048_v55  ;;  %v14437_v55 = vld [vmem:[%s17825_s6 + $0x260] ss:$20 sps:$4 sm:$0xff]  }
 0x72f   :  { %5335 = vmatmul.mubr.bf16.gmra.mrb[172].mxu1 %v14409_v58 }
 0x730   :  { %5342 = vmatprep.mubr.bf16.mxu1 %v14415_v50 }
 0x734   :  { %5755 = vmatmul.mubr.bf16.gmra.mrb[224].mxu0 %v14070_v18  ;;  %v14443_v18 = vld [vmem:[%s17825_s6 + $0x28c] ss:$20 sps:$4 sm:$0xff]  }
 0x735   :  { %5762 = vmatprep.mubr.bf16.mxu0 %v14077_v59  ;;  %v14451_v59 = vld [vmem:[%s17825_s6 + $0x288] ss:$20 sps:$4 sm:$0xff]  }
 0x737   :  { %5343 = vmatmul.mubr.bf16.gmra.mrb[176].mxu1 %v14423_v6 }
 0x738   :  { %5350 = vmatprep.mubr.bf16.mxu1 %v14429_v38 }
 0x73c   :  { %5763 = vmatmul.mubr.bf16.gmra.mrb[228].mxu0 %v14099_v48  ;;  %v14457_v48 = vld [vmem:[%s17825_s6 + $0x2b4] ss:$20 sps:$4 sm:$0xff]  }
 0x73d   :  { %5770 = vmatprep.mubr.bf16.mxu0 %v14106_v60 }
 0x73f   :  { %5351 = vmatmul.mubr.bf16.gmra.mrb[180].mxu1 %v14437_v55 }
 0x740   :  { %5358 = vmatprep.mubr.bf16.mxu1 %v14443_v18 }
 0x744   :  { %5771 = vmatmul.mubr.bf16.gmra.mrb[232].mxu0 %v14131_v29  ;;  %v4487_v29 = vld [vmem:[%s17825_s6 + $0x2d8] sm:$0xff] }
 0x745   :  { %5778 = vmatprep.mubr.bf16.mxu0 %v14135_v45  ;;  %v14475_v45 = vcombine.high %v4487_v29, %v4487_v29  ;;  %v14484_v2 = vcombine.low %v4487_v29, %v4487_v29  ;;  %v18150_v29 = vld [vmem:[#allocation39_spill] sm:$0xff] }
 0x747   :  { %5359 = vmatmul.mubr.bf16.gmra.mrb[184].mxu1 %v14451_v59  ;;  %v14461_v60 = vpop.f32.mrb[128].mxu0 }
 0x748   :  { %v10477_v31 = vpop.f32.mrb[129].mxu0  ;;  %5366 = vmatprep.mubr.bf16.mxu1 %v14457_v48 }
 0x749   :  { %v14464_v4 = vpop.f32.mrb[130].mxu0 }
 0x74a   :  { %v10478_v32 = vpop.f32.mrb[131].mxu0 }
 0x74c   :  { %5779 = vmatmul.mubr.bf16.gmra.mrb[236].mxu0 %v14142_v51  ;;  %v18148_v51 = vld [vmem:[#allocation37_spill] sm:$0xff] }
 0x74d   :  { %5818 = vmatprep.mubr.bf16.mxu0 %v14148_v7  ;;  %v18149_v31 = vpack.c.bf16 %v18147_v57, %v18148_v51 }
 0x74f   :  { %5367 = vmatmul.mubr.bf16.gmra.mrb[188].mxu1 %v14472_v15  ;;  %v14479_v28 = vpop.f32.mrb[132].mxu0 }
 0x750   :  { %v10481_v0 = vpop.f32.mrb[133].mxu0  ;;  %5374 = vmatprep.mubr.bf16.mxu1 %v14475_v45 }
 0x751   :  { %v14482_v23 = vpop.f32.mrb[134].mxu0  ;;  %v18151_v0 = vld [vmem:[#allocation36_spill] sm:$0xff] }
 0x752   :  { %v10482_v46 = vpop.f32.mrb[135].mxu0 }
 0x753   :  { %v18152_v46 = vpack.c.bf16 %v18150_v29, %v18151_v0  ;;  %v14543_v29 = vld [vmem:[%s17825_s6 + $0x1c8] ss:$20 sps:$4 sm:$0xff]  }
 0x754   :  { %5819 = vmatmul.mubr.bf16.vlgmr.msra.gmra.mrb[164].mxu0 %v14164_v61 }
 0x755   :  { %10552 = vmatpush3.bf16.msra.mxu0 %v18149_v31  ;;  %5826 = vmatprep.mubr.bf16.mxu0 %v14170_v30  ;;  %v14506_v30 = vld [vmem:[%s17825_s6 + $0x178] ss:$20 sps:$4 sm:$0xff]  }
 0x756   :  { %10553 = vmatprep.subr.bf16.mxu0 %v18073_v22 }
 0x757   :  { %5375 = vmatmul.mubr.bf16.gmra.mrb[192].mxu1 %v14484_v2  ;;  %v14493_v7 = vpop.f32.mrb[136].mxu0 }
 0x758   :  { %v10485_v32 = vpop.f32.mrb[137].mxu0  ;;  %10511 = vmatprep.mubr.msk.bf16.mxu1 %vm11694_vm0, %v18073_v22 }
 0x759   :  { %10554 = vmatpush3.bf16.msra.mxu0 %v18152_v46  ;;  %v14500_v61 = vpop.f32.mrb[138].mxu0 }
 0x75a   :  { %v10486_v57 = vpop.f32.mrb[139].mxu0  ;;  %10555 = vmatprep.subr.bf16.mxu0 %v18073_v22 }
 0x75b   :  { %v14558_v57 = vld [vmem:[%s17825_s6 + $0x1f0] ss:$20 sps:$4 sm:$0xff]  }
 0x75c   :  { %5827 = vmatmul.mubr.bf16.gmra.mrb[168].mxu0 %v14188_v17  ;;  %v18153_v17 = vpack.c.bf16 %v13910_v37, %v13899_v44 }
 0x75d   :  { %10556 = vmatpush3.bf16.msra.mxu0 %v5600_v5  ;;  %5834 = vmatprep.mubr.bf16.mxu0 %v14195_v36  ;;  %v14528_v5 = vld [vmem:[%s17825_s6 + $0x1a0] ss:$20 sps:$4 sm:$0xff]  }
 0x75e   :  { %10557 = vmatprep.subr.bf16.mxu0 %v18073_v22 }
 0x75f   :  { %v14514_v51 = vpop.f32.mrb[140].mxu0  ;;  %10512 = vmatmul.mubr.msk.bf16.vlgmr.msra.gmra.mrb[156].mxu1 %vm4956_vm1, %v14506_v30 }
 0x760   :  { %v10489_v31 = vpop.f32.mrb[141].mxu0  ;;  %10515 = vmatprep.mubr.msk.bf16.mxu1 %vm11694_vm0, %v18073_v22 }
 0x761   :  { %10558 = vmatpush3.bf16.msra.mxu0 %v18153_v17  ;;  %v14523_v32 = vpop.f32.mrb[142].mxu0 }
 0x762   :  { %v10490_v12 = vpop.f32.mrb[143].mxu0 }
 0x763   :  { %v14573_v12 = vld [vmem:[%s17825_s6 + $0x218] ss:$20 sps:$4 sm:$0xff]  }
 0x764   :  { %5835 = vmatmul.mubr.bf16.gmra.mrb[172].mxu0 %v14214_v41 }
 0x765   :  { %5842 = vmatprep.mubr.bf16.mxu0 %v14221_v11 }
 0x767   :  { %v14532_v47 = vpop.f32.mrb[144].mxu0  ;;  %10516 = vmatmul.mubr.msk.bf16.gmra.mrb[160].mxu1 %vm4956_vm1, %v14528_v5 }
 0x768   :  { %v10493_v36 = vpop.f32.mrb[145].mxu0  ;;  %10519 = vmatprep.mubr.msk.bf16.mxu1 %vm11694_vm0, %v18073_v22 }
 0x769   :  { %v14538_v44 = vpop.f32.mrb[146].mxu0 }
 0x76a   :  { %v10494_v37 = vpop.f32.mrb[147].mxu0 }
 0x76c   :  { %5843 = vmatmul.mubr.bf16.gmra.mrb[176].mxu0 %v14237_v25 }
 0x76d   :  { %5850 = vmatprep.mubr.bf16.mxu0 %v14243_v24 }
 0x76f   :  { %v14547_v41 = vpop.f32.mrb[148].mxu0  ;;  %10520 = vmatmul.mubr.msk.bf16.gmra.mrb[164].mxu1 %vm4956_vm1, %v14543_v29 }
 0x770   :  { %v10497_v11 = vpop.f32.mrb[149].mxu0  ;;  %10523 = vmatprep.mubr.msk.bf16.mxu1 %vm11694_vm0, %v18073_v22 }
 0x771   :  { %v14553_v0 = vpop.f32.mrb[150].mxu0  ;;  %v14588_v11 = vld [vmem:[%s17825_s6 + $0x240] ss:$20 sps:$4 sm:$0xff]  }
 0x772   :  { %v10498_v46 = vpop.f32.mrb[151].mxu0 }
 0x774   :  { %5851 = vmatmul.mubr.bf16.gmra.mrb[180].mxu0 %v14259_v52 }
 0x775   :  { %5858 = vmatprep.mubr.bf16.mxu0 %v14265_v34 }
 0x777   :  { %v14562_v25 = vpop.f32.mrb[152].mxu0  ;;  %10524 = vmatmul.mubr.msk.bf16.gmra.mrb[168].mxu1 %vm4956_vm1, %v14558_v57 }
 0x778   :  { %v10501_v24 = vpop.f32.mrb[153].mxu0  ;;  %10527 = vmatprep.mubr.msk.bf16.mxu1 %vm11694_vm0, %v18073_v22 }
 0x779   :  { %v14568_v31 = vpop.f32.mrb[154].mxu0 }
 0x77a   :  { %v10502_v17 = vpop.f32.mrb[155].mxu0 }
 0x77b   :  { %v14603_v17 = vld [vmem:[%s17825_s6 + $0x268] ss:$20 sps:$4 sm:$0xff]  }
 0x77c   :  { %5859 = vmatmul.mubr.bf16.gmra.mrb[184].mxu0 %v14281_v8 }
 0x77d   :  { %5866 = vmatprep.mubr.bf16.mxu0 %v14287_v3 }
 0x77f   :  { %v14577_v52 = vpop.f32.mrb[156].mxu0  ;;  %10528 = vmatmul.mubr.msk.bf16.gmra.mrb[172].mxu1 %vm4956_vm1, %v14573_v12 }
 0x780   :  { %v10505_v34 = vpop.f32.mrb[157].mxu0  ;;  %10531 = vmatprep.mubr.msk.bf16.mxu1 %vm11694_vm0, %v18073_v22 }
 0x781   :  { %v14583_v36 = vpop.f32.mrb[158].mxu0  ;;  %v14628_v34 = vld [vmem:[%s17825_s6 + $0x2b8] ss:$20 sps:$4 sm:$0xff]  }
 0x782   :  { %v10506_v37 = vpop.f32.mrb[159].mxu0 }
 0x784   :  { %5867 = vmatmul.mubr.bf16.gmra.mrb[188].mxu0 %v14303_v9  ;;  %v14614_v9 = vld [vmem:[%s17825_s6 + $0x290] ss:$20 sps:$4 sm:$0xff]  }
 0x785   :  { %5874 = vmatprep.mubr.bf16.mxu0 %v14309_v20 }
 0x787   :  { %v14592_v8 = vpop.f32.mrb[160].mxu0  ;;  %10532 = vmatmul.mubr.msk.bf16.gmra.mrb[176].mxu1 %vm4956_vm1, %v14588_v11 }
 0x788   :  { %v10509_v3 = vpop.f32.mrb[161].mxu0  ;;  %10535 = vmatprep.mubr.msk.bf16.mxu1 %vm11694_vm0, %v18073_v22 }
 0x789   :  { %v14598_v46 = vpop.f32.mrb[162].mxu0 }
 0x78a   :  { %v10510_v24 = vpop.f32.mrb[163].mxu0 }
 0x78c   :  { %5875 = vmatmul.mubr.bf16.gmra.mrb[192].mxu0 %v14325_v13 }
 0x78d   :  { %5882 = vmatprep.mubr.bf16.mxu0 %v14331_v26 }
 0x78f   :  { %10536 = vmatmul.mubr.msk.bf16.gmra.mrb[180].mxu1 %vm4956_vm1, %v14603_v17 }
 0x790   :  { %10539 = vmatprep.mubr.msk.bf16.mxu1 %vm11694_vm0, %v18073_v22 }
 0x794   :  { %5883 = vmatmul.mubr.bf16.gmra.mrb[196].mxu0 %v14339_v63 }
 0x795   :  { %5890 = vmatprep.mubr.bf16.mxu0 %v14345_v10 }
 0x797   :  { %10540 = vmatmul.mubr.msk.bf16.gmra.mrb[184].mxu1 %vm4956_vm1, %v14614_v9 }
 0x798   :  { %10543 = vmatprep.mubr.msk.bf16.mxu1 %vm11694_vm0, %v18073_v22 }
 0x79a   :  { %v5232_v20 = vpop.f32.mrb[120].mxu1 }
 0x79b   :  { %v14623_v13 = vadd.f32 %v14461_v60, %v5232_v20  ;;  %v5234_v26 = vpop.f32.mrb[121].mxu1 }
 0x79c   :  { %v5235_v37 = vpop.f32.mrb[122].mxu1  ;;  %5891 = vmatmul.mubr.bf16.gmra.mrb[200].mxu0 %v14353_v27  ;;  %v14645_v27 = vld [vmem:[%s17825_s6 + $0x2e0] ss:$0 sps:$4 sm:$0xff]  }
 0x79d   :  { %v14632_v63 = vadd.f32 %v14464_v4, %v5235_v37  ;;  %v5237_v10 = vpop.f32.mrb[123].mxu1  ;;  %5898 = vmatprep.mubr.bf16.mxu0 %v14359_v56 }
 0x79f   :  { %10544 = vmatmul.mubr.msk.bf16.gmra.mrb[188].mxu1 %vm4956_vm1, %v14628_v34 }
 0x7a0   :  { %10547 = vmatprep.mubr.msk.bf16.mxu1 %vm11694_vm0, %v18073_v22 }
 0x7a2   :  { %v5240_v60 = vpop.f32.mrb[124].mxu1 }
 0x7a3   :  { %v14640_v3 = vadd.f32 %v14479_v28, %v5240_v60  ;;  %v5242_v24 = vpop.f32.mrb[125].mxu1 }
 0x7a4   :  { %v5243_v4 = vpop.f32.mrb[126].mxu1  ;;  %5899 = vmatmul.mubr.bf16.gmra.mrb[204].mxu0 %v14367_v19 }
 0x7a5   :  { %v14649_v56 = vadd.f32 %v14482_v23, %v5243_v4  ;;  %v5245_v20 = vpop.f32.mrb[127].mxu1  ;;  %5906 = vmatprep.mubr.bf16.mxu0 %v14373_v62 }
 0x7a7   :  { %10548 = vmatmul.mubr.msk.bf16.gmra.mrb[192].mxu1 %vm4956_vm1, %v14645_v27 }
 0x7aa   :  { %v5248_v28 = vpop.f32.mrb[128].mxu1 }
 0x7ab   :  { %v14655_v26 = vadd.f32 %v14493_v7, %v5248_v28  ;;  %v5250_v37 = vpop.f32.mrb[129].mxu1 }
 0x7ac   :  { %v5251_v10 = vpop.f32.mrb[130].mxu1  ;;  %5907 = vmatmul.mubr.bf16.gmra.mrb[208].mxu0 %v14381_v33 }
 0x7ad   :  { %v14659_v60 = vadd.f32 %v14500_v61, %v5251_v10  ;;  %v5253_v19 = vpop.f32.mrb[131].mxu1  ;;  %5914 = vmatprep.mubr.bf16.mxu0 %v14387_v16 }
 0x7b2   :  { %v5256_v23 = vpop.f32.mrb[132].mxu1 }
 0x7b3   :  { %v14663_v62 = vadd.f32 %v14514_v51, %v5256_v23  ;;  %v5258_v24 = vpop.f32.mrb[133].mxu1 }
 0x7b4   :  { %v5259_v4 = vpop.f32.mrb[134].mxu1  ;;  %5915 = vmatmul.mubr.bf16.gmra.mrb[212].mxu0 %v14395_v21 }
 0x7b5   :  { %v14667_v7 = vadd.f32 %v14523_v32, %v5259_v4  ;;  %v5261_v20 = vpop.f32.mrb[135].mxu1  ;;  %5922 = vmatprep.mubr.bf16.mxu0 %v14401_v53 }
 0x7ba   :  { %v5264_v33 = vpop.f32.mrb[136].mxu1 }
 0x7bb   :  { %v14671_v61 = vadd.f32 %v14532_v47, %v5264_v33  ;;  %v5266_v28 = vpop.f32.mrb[137].mxu1 }
 0x7bc   :  { %v5267_v16 = vpop.f32.mrb[138].mxu1  ;;  %5923 = vmatmul.mubr.bf16.gmra.mrb[216].mxu0 %v14409_v58 }
 0x7bd   :  { %v14675_v51 = vadd.f32 %v14538_v44, %v5267_v16  ;;  %v5269_v37 = vpop.f32.mrb[139].mxu1  ;;  %5930 = vmatprep.mubr.bf16.mxu0 %v14415_v50  ;;  %v6240_v16 = vmul.f32 %v14655_v26, %v14655_v26 }
 0x7c2   :  { %v5272_v21 = vpop.f32.mrb[140].mxu1 }
 0x7c3   :  { %v14679_v32 = vadd.f32 %v14547_v41, %v5272_v21  ;;  %v5274_v10 = vpop.f32.mrb[141].mxu1 }
 0x7c4   :  { %v5275_v53 = vpop.f32.mrb[142].mxu1  ;;  %5931 = vmatmul.mubr.bf16.gmra.mrb[220].mxu0 %v14423_v6 }
 0x7c5   :  { %v14683_v47 = vadd.f32 %v14553_v0, %v5275_v53  ;;  %v5277_v19 = vpop.f32.mrb[143].mxu1  ;;  %5938 = vmatprep.mubr.bf16.mxu0 %v14429_v38  ;;  %v6241_v53 = vmul.f32 %v14659_v60, %v14659_v60 }
 0x7c6   :  { %v6242_v19 = vmul.f32 %v14663_v62, %v14663_v62 }
 0x7ca   :  { %v5280_v58 = vpop.f32.mrb[144].mxu1 }
 0x7cb   :  { %v14687_v44 = vadd.f32 %v14562_v25, %v5280_v58  ;;  %v5282_v23 = vpop.f32.mrb[145].mxu1 }
 0x7cc   :  { %v5283_v50 = vpop.f32.mrb[146].mxu1  ;;  %5939 = vmatmul.mubr.bf16.gmra.mrb[224].mxu0 %v14437_v55 }
 0x7cd   :  { %v14691_v41 = vadd.f32 %v14568_v31, %v5283_v50  ;;  %v5285_v24 = vpop.f32.mrb[147].mxu1  ;;  %5946 = vmatprep.mubr.bf16.mxu0 %v14443_v18 }
 0x7ce   :  { %v6243_v24 = vmul.f32 %v14667_v7, %v14667_v7 }
 0x7d2   :  { %v5288_v6 = vpop.f32.mrb[148].mxu1 }
 0x7d3   :  { %v14695_v0 = vadd.f32 %v14577_v52, %v5288_v6  ;;  %v5290_v4 = vpop.f32.mrb[149].mxu1 }
 0x7d4   :  { %v5291_v38 = vpop.f32.mrb[150].mxu1  ;;  %5947 = vmatmul.mubr.bf16.gmra.mrb[228].mxu0 %v14451_v59  ;;  %v18154_v59 = vld [vmem:[#allocation38_spill] sm:$0xff] }
 0x7d5   :  { %v14699_v25 = vadd.f32 %v14583_v36, %v5291_v38  ;;  %v5293_v20 = vpop.f32.mrb[151].mxu1  ;;  %5954 = vmatprep.mubr.bf16.mxu0 %v14457_v48  ;;  %v6237_v48 = vmul.f32 %v14632_v63, %v14632_v63 }
 0x7da   :  { %v5296_v55 = vpop.f32.mrb[152].mxu1 }
 0x7db   :  { %v14703_v31 = vadd.f32 %v14592_v8, %v5296_v55  ;;  %v5298_v33 = vpop.f32.mrb[153].mxu1  ;;  %v6239_v8 = vmul.f32 %v14649_v56, %v14649_v56  ;;  %v6245_v55 = vmul.f32 %v14675_v51, %v14675_v51 }
 0x7dc   :  { %v5299_v18 = vpop.f32.mrb[154].mxu1  ;;  %5955 = vmatmul.mubr.bf16.gmra.mrb[232].mxu0 %v14472_v15  ;;  %v6236_v15 = vmul.f32 %v14623_v13, %v14623_v13 }
 0x7dd   :  { %v14707_v52 = vadd.f32 %v14598_v46, %v5299_v18  ;;  %v5301_v28 = vpop.f32.mrb[155].mxu1  ;;  %5962 = vmatprep.mubr.bf16.mxu0 %v14475_v45  ;;  %v6156_v45 = vadd.f32 %v14632_v63, %v14623_v13  ;;  %v6246_v18 = vmul.f32 %v14679_v32, %v14679_v32 }
 0x7df   :  { %v6157_v36 = vadd.f32 %v14640_v3, %v6156_v45  ;;  %v6248_v45 = vmul.f32 %v14687_v44, %v14687_v44 }
 0x7e1   :  { %v6158_v46 = vadd.f32 %v14649_v56, %v6157_v36 }
 0x7e3   :  { %v6159_v21 = vadd.f32 %v14655_v26, %v6158_v46 }
 0x7e4   :  { %5963 = vmatmul.mubr.bf16.gmra.mrb[236].mxu0 %v14484_v2  ;;  %v6310_v2 = vadd.f32 %v6237_v48, %v6236_v15  ;;  %v6247_v48 = vmul.f32 %v14683_v47, %v14683_v47 }
 0x7e5   :  { %10559 = vmatprep.mubr.msk.bf16.mxu0 %vm11694_vm0, %v18073_v22 }
 0x7ec   :  { %10560 = vmatmul.mubr.msk.bf16.vlgmr.msra.gmra.mrb[164].mxu0 %vm4956_vm1, %v18154_v59 }
 0x7ed   :  { %10563 = vmatprep.mubr.msk.bf16.mxu0 %vm11694_vm0, %v18073_v22 }
 0x7f4   :  { %10564 = vmatmul.mubr.msk.bf16.gmra.mrb[168].mxu0 %vm4956_vm1, %v13907_v42  ;;  %v6238_v42 = vmul.f32 %v14640_v3, %v14640_v3 }
 0x7f5   :  { %10567 = vmatprep.mubr.msk.bf16.mxu0 %vm11694_vm0, %v18073_v22 }
 0x7fc   :  { %10568 = vmatmul.mubr.msk.bf16.gmra.mrb[172].mxu0 %vm4956_vm1, %v13944_v54  ;;  %v6311_v54 = vadd.f32 %v6310_v2, %v6238_v42 }
 0x7fd   :  { %10571 = vmatprep.mubr.msk.bf16.mxu0 %vm11694_vm0, %v18073_v22 }
 0x7fe   :  { %v6312_v37 = vadd.f32 %v6311_v54, %v6239_v8  ;;  %v6249_v54 = vmul.f32 %v14691_v41, %v14691_v41  ;;  %v6250_v8 = vmul.f32 %v14695_v0, %v14695_v0 }
 0x800   :  { %v6313_v10 = vadd.f32 %v6312_v37, %v6240_v16 }
 0x802   :  { %v6314_v58 = vadd.f32 %v6313_v10, %v6241_v53 }
 0x804   :  { %10572 = vmatmul.mubr.msk.bf16.gmra.mrb[176].mxu0 %vm4956_vm1, %v13973_v1  ;;  %v6160_v1 = vadd.f32 %v14659_v60, %v6159_v21  ;;  %v6315_v50 = vadd.f32 %v6314_v58, %v6242_v19  ;;  %v6251_v21 = vmul.f32 %v14699_v25, %v14699_v25  ;;  %v6253_v58 = vmul.f32 %v14707_v52, %v14707_v52 }
 0x805   :  { %10575 = vmatprep.mubr.msk.bf16.mxu0 %vm11694_vm0, %v18073_v22 }
 0x806   :  { %v6161_v23 = vadd.f32 %v14663_v62, %v6160_v1  ;;  %v6316_v4 = vadd.f32 %v6315_v50, %v6243_v24 }
 0x808   :  { %v6162_v6 = vadd.f32 %v14667_v7, %v6161_v23 }
 0x80a   :  { %v6163_v38 = vadd.f32 %v14671_v61, %v6162_v6 }
 0x80c   :  { %10576 = vmatmul.mubr.msk.bf16.gmra.mrb[180].mxu0 %vm4956_vm1, %v14002_v43  ;;  %v6244_v43 = vmul.f32 %v14671_v61, %v14671_v61  ;;  %v6164_v33 = vadd.f32 %v14675_v51, %v6163_v38 }
 0x80d   :  { %10579 = vmatprep.mubr.msk.bf16.mxu0 %vm11694_vm0, %v18073_v22 }
 0x80e   :  { %v6317_v20 = vadd.f32 %v6316_v4, %v6244_v43  ;;  %v6165_v59 = vadd.f32 %v14679_v32, %v6164_v33 }
 0x810   :  { %v6318_v28 = vadd.f32 %v6317_v20, %v6245_v55  ;;  %v6166_v15 = vadd.f32 %v14683_v47, %v6165_v59 }
 0x812   :  { %v6167_v2 = vadd.f32 %v14687_v44, %v6166_v15 }
 0x814   :  { %10580 = vmatmul.mubr.msk.bf16.gmra.mrb[184].mxu0 %vm4956_vm1, %v14031_v40  ;;  %v6319_v40 = vadd.f32 %v6318_v28, %v6246_v18 }
 0x815   :  { %10583 = vmatprep.mubr.msk.bf16.mxu0 %vm11694_vm0, %v18073_v22 }
 0x816   :  { %v6320_v42 = vadd.f32 %v6319_v40, %v6247_v48 }
 0x818   :  { %v6321_v36 = vadd.f32 %v6320_v42, %v6248_v45 }
 0x81a   :  { %v6322_v46 = vadd.f32 %v6321_v36, %v6249_v54 }
 0x81c   :  { %10584 = vmatmul.mubr.msk.bf16.gmra.mrb[188].mxu0 %vm4956_vm1, %v14060_v35  ;;  %v6168_v35 = vadd.f32 %v14691_v41, %v6167_v2  ;;  %v6323_v37 = vadd.f32 %v6322_v46, %v6250_v8 }
 0x81d   :  { %10587 = vmatprep.mubr.msk.bf16.mxu0 %vm11694_vm0, %v18073_v22 }
 0x81e   :  { %v6169_v16 = vadd.f32 %v14695_v0, %v6168_v35  ;;  %v6324_v53 = vadd.f32 %v6323_v37, %v6251_v21 }
 0x820   :  { %v6170_v10 = vadd.f32 %v14699_v25, %v6169_v16 }
 0x822   :  { %v6171_v1 = vadd.f32 %v14703_v31, %v6170_v10 }
 0x824   :  { %10588 = vmatmul.mubr.msk.bf16.gmra.mrb[192].mxu0 %vm4956_vm1, %v14089_v49  ;;  %v6252_v49 = vmul.f32 %v14703_v31, %v14703_v31  ;;  %v6172_v23 = vadd.f32 %v14707_v52, %v6171_v1 }
 0x825   :  { %10591 = vmatprep.mubr.msk.bf16.mxu0 %vm11694_vm0, %v18073_v22 }
 0x826   :  { %v6325_v19 = vadd.f32 %v6324_v53, %v6252_v49 }
 0x828   :  { %v6326_v24 = vadd.f32 %v6325_v19, %v6253_v58 }
 0x82c   :  { %10592 = vmatmul.mubr.msk.bf16.gmra.mrb[196].mxu0 %vm4956_vm1, %v14118_v39 }
 0x82d   :  { %10595 = vmatprep.mubr.msk.bf16.mxu0 %vm11694_vm0, %v18073_v22 }
 0x832   :  { %v14803_v50 = vpop.f32.mrb[156].mxu1 }
 0x833   :  { %v6173_v6 = vadd.f32 %v6172_v23, %v14803_v50  ;;  %v6254_v39 = vmul.f32 %v14803_v50, %v14803_v50  ;;  %v10513_v43 = vpop.f32.mrb[157].mxu1 }
 0x834   :  { %v14808_v4 = vpop.f32.mrb[158].mxu1  ;;  %10596 = vmatmul.mubr.msk.bf16.gmra.mrb[200].mxu0 %vm4956_vm1, %v14506_v30 }
 0x835   :  { %v6327_v38 = vadd.f32 %v6326_v24, %v6254_v39  ;;  %v6174_v20 = vadd.f32 %v6173_v6, %v14808_v4  ;;  %v6255_v55 = vmul.f32 %v14808_v4, %v14808_v4  ;;  %v10514_v33 = vpop.f32.mrb[159].mxu1  ;;  %10599 = vmatprep.mubr.msk.bf16.mxu0 %vm11694_vm0, %v18073_v22 }
 0x837   :  { %v6328_v18 = vadd.f32 %v6327_v38, %v6255_v55 }
 0x83a   :  { %v14817_v28 = vpop.f32.mrb[160].mxu1 }
 0x83b   :  { %v6175_v59 = vadd.f32 %v6174_v20, %v14817_v28  ;;  %v6256_v40 = vmul.f32 %v14817_v28, %v14817_v28  ;;  %v10517_v48 = vpop.f32.mrb[161].mxu1 }
 0x83c   :  { %v14822_v30 = vpop.f32.mrb[162].mxu1  ;;  %10600 = vmatmul.mubr.msk.bf16.gmra.mrb[204].mxu0 %vm4956_vm1, %v14528_v5 }
 0x83d   :  { %v6329_v15 = vadd.f32 %v6328_v18, %v6256_v40  ;;  %v6176_v45 = vadd.f32 %v6175_v59, %v14822_v30  ;;  %v6257_v42 = vmul.f32 %v14822_v30, %v14822_v30  ;;  %v10518_v2 = vpop.f32.mrb[163].mxu1  ;;  %10603 = vmatprep.mubr.msk.bf16.mxu0 %vm11694_vm0, %v18073_v22 }
 0x83f   :  { %v6330_v36 = vadd.f32 %v6329_v15, %v6257_v42 }
 0x842   :  { %v14831_v54 = vpop.f32.mrb[164].mxu1 }
 0x843   :  { %v6177_v35 = vadd.f32 %v6176_v45, %v14831_v54  ;;  %v6258_v8 = vmul.f32 %v14831_v54, %v14831_v54  ;;  %v10521_v46 = vpop.f32.mrb[165].mxu1 }
 0x844   :  { %v14836_v5 = vpop.f32.mrb[166].mxu1  ;;  %10604 = vmatmul.mubr.msk.bf16.gmra.mrb[208].mxu0 %vm4956_vm1, %v14543_v29 }
 0x845   :  { %v6331_v16 = vadd.f32 %v6330_v36, %v6258_v8  ;;  %v6178_v37 = vadd.f32 %v6177_v35, %v14836_v5  ;;  %v6259_v21 = vmul.f32 %v14836_v5, %v14836_v5  ;;  %v10522_v10 = vpop.f32.mrb[167].mxu1  ;;  %10607 = vmatprep.mubr.msk.bf16.mxu0 %vm11694_vm0, %v18073_v22 }
 0x847   :  { %v6332_v49 = vadd.f32 %v6331_v16, %v6259_v21 }
 0x84a   :  { %v14845_v53 = vpop.f32.mrb[168].mxu1 }
 0x84b   :  { %v6179_v1 = vadd.f32 %v6178_v37, %v14845_v53  ;;  %v6260_v19 = vmul.f32 %v14845_v53, %v14845_v53  ;;  %v10525_v58 = vpop.f32.mrb[169].mxu1 }
 0x84c   :  { %v14850_v29 = vpop.f32.mrb[170].mxu1  ;;  %10608 = vmatmul.mubr.msk.bf16.gmra.mrb[212].mxu0 %vm4956_vm1, %v14558_v57 }
 0x84d   :  { %v6333_v23 = vadd.f32 %v6332_v49, %v6260_v19  ;;  %v6180_v24 = vadd.f32 %v6179_v1, %v14850_v29  ;;  %v6261_v6 = vmul.f32 %v14850_v29, %v14850_v29  ;;  %v10526_v39 = vpop.f32.mrb[171].mxu1  ;;  %10611 = vmatprep.mubr.msk.bf16.mxu0 %vm11694_vm0, %v18073_v22 }
 0x84f   :  { %v6334_v43 = vadd.f32 %v6333_v23, %v6261_v6 }
 0x852   :  { %v14859_v38 = vpop.f32.mrb[172].mxu1 }
 0x853   :  { %v6181_v20 = vadd.f32 %v6180_v24, %v14859_v38  ;;  %v6262_v55 = vmul.f32 %v14859_v38, %v14859_v38  ;;  %v10529_v33 = vpop.f32.mrb[173].mxu1 }
 0x854   :  { %v14864_v57 = vpop.f32.mrb[174].mxu1  ;;  %10612 = vmatmul.mubr.msk.bf16.gmra.mrb[216].mxu0 %vm4956_vm1, %v14573_v12 }
 0x855   :  { %v6335_v18 = vadd.f32 %v6334_v43, %v6262_v55  ;;  %v6182_v59 = vadd.f32 %v6181_v20, %v14864_v57  ;;  %v6263_v40 = vmul.f32 %v14864_v57, %v14864_v57  ;;  %v10530_v48 = vpop.f32.mrb[175].mxu1  ;;  %10615 = vmatprep.mubr.msk.bf16.mxu0 %vm11694_vm0, %v18073_v22 }
 0x857   :  { %v6336_v15 = vadd.f32 %v6335_v18, %v6263_v40 }
 0x85a   :  { %v14873_v45 = vpop.f32.mrb[176].mxu1 }
 0x85b   :  { %v6183_v42 = vadd.f32 %v6182_v59, %v14873_v45  ;;  %v6264_v2 = vmul.f32 %v14873_v45, %v14873_v45  ;;  %v10533_v36 = vpop.f32.mrb[177].mxu1 }
 0x85c   :  { %v14878_v12 = vpop.f32.mrb[178].mxu1  ;;  %10616 = vmatmul.mubr.msk.bf16.gmra.mrb[220].mxu0 %vm4956_vm1, %v14588_v11 }
 0x85d   :  { %v6337_v35 = vadd.f32 %v6336_v15, %v6264_v2  ;;  %v6184_v8 = vadd.f32 %v6183_v42, %v14878_v12  ;;  %v6265_v46 = vmul.f32 %v14878_v12, %v14878_v12  ;;  %v10534_v16 = vpop.f32.mrb[179].mxu1  ;;  %10619 = vmatprep.mubr.msk.bf16.mxu0 %vm11694_vm0, %v18073_v22 }
 0x85f   :  { %v6338_v37 = vadd.f32 %v6337_v35, %v6265_v46 }
 0x862   :  { %v14887_v21 = vpop.f32.mrb[180].mxu1 }
 0x863   :  { %v6185_v10 = vadd.f32 %v6184_v8, %v14887_v21  ;;  %v6266_v49 = vmul.f32 %v14887_v21, %v14887_v21  ;;  %v10537_v1 = vpop.f32.mrb[181].mxu1 }
 0x864   :  { %v14892_v11 = vpop.f32.mrb[182].mxu1  ;;  %10620 = vmatmul.mubr.msk.bf16.gmra.mrb[224].mxu0 %vm4956_vm1, %v14603_v17 }
 0x865   :  { %v6339_v19 = vadd.f32 %v6338_v37, %v6266_v49  ;;  %v6186_v58 = vadd.f32 %v6185_v10, %v14892_v11  ;;  %v6267_v23 = vmul.f32 %v14892_v11, %v14892_v11  ;;  %v10538_v24 = vpop.f32.mrb[183].mxu1  ;;  %10623 = vmatprep.mubr.msk.bf16.mxu0 %vm11694_vm0, %v18073_v22 }
 0x867   :  { %v6340_v6 = vadd.f32 %v6339_v19, %v6267_v23 }
 0x86a   :  { %v14901_v39 = vpop.f32.mrb[184].mxu1 }
 0x86b   :  { %v6187_v43 = vadd.f32 %v6186_v58, %v14901_v39  ;;  %v6268_v20 = vmul.f32 %v14901_v39, %v14901_v39  ;;  %v10541_v55 = vpop.f32.mrb[185].mxu1 }
 0x86c   :  { %v14906_v17 = vpop.f32.mrb[186].mxu1  ;;  %10624 = vmatmul.mubr.msk.bf16.gmra.mrb[228].mxu0 %vm4956_vm1, %v14614_v9 }
 0x86d   :  { %v6341_v33 = vadd.f32 %v6340_v6, %v6268_v20  ;;  %v6188_v18 = vadd.f32 %v6187_v43, %v14906_v17  ;;  %v6269_v59 = vmul.f32 %v14906_v17, %v14906_v17  ;;  %v10542_v40 = vpop.f32.mrb[187].mxu1  ;;  %10627 = vmatprep.mubr.msk.bf16.mxu0 %vm11694_vm0, %v18073_v22 }
 0x86f   :  { %v6342_v48 = vadd.f32 %v6341_v33, %v6269_v59 }
 0x872   :  { %v14915_v15 = vpop.f32.mrb[188].mxu1 }
 0x873   :  { %v6189_v42 = vadd.f32 %v6188_v18, %v14915_v15  ;;  %v6270_v2 = vmul.f32 %v14915_v15, %v14915_v15  ;;  %v10545_v36 = vpop.f32.mrb[189].mxu1 }
 0x874   :  { %v14920_v9 = vpop.f32.mrb[190].mxu1  ;;  %10628 = vmatmul.mubr.msk.bf16.gmra.mrb[232].mxu0 %vm4956_vm1, %v14628_v34 }
 0x875   :  { %v6343_v35 = vadd.f32 %v6342_v48, %v6270_v2  ;;  %v6190_v8 = vadd.f32 %v6189_v42, %v14920_v9  ;;  %v6271_v46 = vmul.f32 %v14920_v9, %v14920_v9  ;;  %v10546_v16 = vpop.f32.mrb[191].mxu1  ;;  %10631 = vmatprep.mubr.msk.bf16.mxu0 %vm11694_vm0, %v18073_v22 }
 0x877   :  { %v6344_v37 = vadd.f32 %v6343_v35, %v6271_v46 }
 0x87a   :  { %v14929_v10 = vpop.f32.mrb[192].mxu1 }
 0x87b   :  { %v6191_v49 = vadd.f32 %v6190_v8, %v14929_v10  ;;  %v6272_v1 = vmul.f32 %v14929_v10, %v14929_v10  ;;  %v10549_v19 = vpop.f32.mrb[193].mxu1 }
 0x87c   :  { %v5563_v34 = vpop.f32.mrb[194].mxu1  ;;  %10632 = vmatmul.mubr.msk.bf16.gmra.mrb[236].mxu0 %vm4956_vm1, %v14645_v27 }
 0x87d   :  { %v6345_v58 = vadd.f32 %v6344_v37, %v6272_v1  ;;  %v10550_v23 = vpop.f32.mrb[195].mxu1 }
 0x8bf   :  { %v14936_v24 = vpop.f32.mrb[164].mxu0 }
 0x8c0   :  { %v6192_v6 = vadd.f32 %v6191_v49, %v14936_v24  ;;  %v6273_v43 = vmul.f32 %v14936_v24, %v14936_v24  ;;  %v10561_v20 = vpop.f32.mrb[165].mxu0 }
 0x8c1   :  { %v14941_v55 = vpop.f32.mrb[166].mxu0 }
 0x8c2   :  { %v6346_v33 = vadd.f32 %v6345_v58, %v6273_v43  ;;  %v6193_v18 = vadd.f32 %v6192_v6, %v14941_v55  ;;  %v6274_v59 = vmul.f32 %v14941_v55, %v14941_v55  ;;  %v10562_v40 = vpop.f32.mrb[167].mxu0 }
 0x8c4   :  { %v6347_v27 = vadd.f32 %v6346_v33, %v6274_v59 }
 0x8c7   :  { %v14946_v48 = vpop.f32.mrb[168].mxu0 }
 0x8c8   :  { %v6194_v42 = vadd.f32 %v6193_v18, %v14946_v48  ;;  %v6275_v2 = vmul.f32 %v14946_v48, %v14946_v48  ;;  %v10565_v36 = vpop.f32.mrb[169].mxu0 }
 0x8c9   :  { %v14951_v35 = vpop.f32.mrb[170].mxu0 }
 0x8ca   :  { %v6348_v8 = vadd.f32 %v6347_v27, %v6275_v2  ;;  %v6195_v46 = vadd.f32 %v6194_v42, %v14951_v35  ;;  %v6276_v16 = vmul.f32 %v14951_v35, %v14951_v35  ;;  %v10566_v37 = vpop.f32.mrb[171].mxu0 }
 0x8cc   :  { %v6349_v49 = vadd.f32 %v6348_v8, %v6276_v16 }
 0x8cf   :  { %v14956_v1 = vpop.f32.mrb[172].mxu0 }
 0x8d0   :  { %18155 = vst [vmem:[#allocation4_spill] sm:$0xff] %v14956_v1  ;;  %v6196_v19 = vadd.f32 %v6195_v46, %v14956_v1  ;;  %v6277_v34 = vmul.f32 %v14956_v1, %v14956_v1  ;;  %v10569_v58 = vpop.f32.mrb[173].mxu0 }
 0x8d1   :  { %v14961_v23 = vpop.f32.mrb[174].mxu0 }
 0x8d2   :  { %18156 = vst [vmem:[#allocation3_spill] sm:$0xff] %v14961_v23  ;;  %v6350_v6 = vadd.f32 %v6349_v49, %v6277_v34  ;;  %v6197_v43 = vadd.f32 %v6196_v19, %v14961_v23  ;;  %v6278_v20 = vmul.f32 %v14961_v23, %v14961_v23  ;;  %v10570_v33 = vpop.f32.mrb[175].mxu0 }
 0x8d4   :  { %v6351_v18 = vadd.f32 %v6350_v6, %v6278_v20 }
 0x8d7   :  { %v14966_v59 = vpop.f32.mrb[176].mxu0 }
 0x8d8   :  { %18157 = vst [vmem:[#allocation5_spill] sm:$0xff] %v14966_v59  ;;  %v6198_v40 = vadd.f32 %v6197_v43, %v14966_v59  ;;  %v6279_v27 = vmul.f32 %v14966_v59, %v14966_v59  ;;  %v10573_v42 = vpop.f32.mrb[177].mxu0 }
 0x8d9   :  { %v14971_v2 = vpop.f32.mrb[178].mxu0 }
 0x8da   :  { %18158 = vst [vmem:[#allocation6_spill] sm:$0xff] %v14971_v2  ;;  %v6352_v36 = vadd.f32 %v6351_v18, %v6279_v27  ;;  %v6199_v8 = vadd.f32 %v6198_v40, %v14971_v2  ;;  %v6280_v46 = vmul.f32 %v14971_v2, %v14971_v2  ;;  %v10574_v16 = vpop.f32.mrb[179].mxu0 }
 0x8dc   :  { %v6353_v37 = vadd.f32 %v6352_v36, %v6280_v46 }
 0x8df   :  { %v14976_v49 = vpop.f32.mrb[180].mxu0 }
 0x8e0   :  { %18159 = vst [vmem:[#allocation7_spill] sm:$0xff] %v14976_v49  ;;  %v6200_v19 = vadd.f32 %v6199_v8, %v14976_v49  ;;  %v6281_v34 = vmul.f32 %v14976_v49, %v14976_v49  ;;  %v10577_v58 = vpop.f32.mrb[181].mxu0 }
 0x8e1   :  { %v14981_v6 = vpop.f32.mrb[182].mxu0 }
 0x8e2   :  { %18160 = vst [vmem:[#allocation8_spill] sm:$0xff] %v14981_v6  ;;  %v6354_v43 = vadd.f32 %v6353_v37, %v6281_v34  ;;  %v6201_v20 = vadd.f32 %v6200_v19, %v14981_v6  ;;  %v6282_v33 = vmul.f32 %v14981_v6, %v14981_v6  ;;  %v10578_v18 = vpop.f32.mrb[183].mxu0 }
 0x8e4   :  { %v6355_v40 = vadd.f32 %v6354_v43, %v6282_v33 }
 0x8e7   :  { %v14986_v27 = vpop.f32.mrb[184].mxu0 }
 0x8e8   :  { %18161 = vst [vmem:[#allocation9_spill] sm:$0xff] %v14986_v27  ;;  %v6202_v42 = vadd.f32 %v6201_v20, %v14986_v27  ;;  %v6283_v36 = vmul.f32 %v14986_v27, %v14986_v27  ;;  %v10581_v8 = vpop.f32.mrb[185].mxu0 }
 0x8e9   :  { %v14991_v46 = vpop.f32.mrb[186].mxu0 }
 0x8ea   :  { %18162 = vst [vmem:[#allocation12_spill] sm:$0xff] %v14991_v46  ;;  %v6356_v16 = vadd.f32 %v6355_v40, %v6283_v36  ;;  %v6203_v37 = vadd.f32 %v6202_v42, %v14991_v46  ;;  %v6284_v19 = vmul.f32 %v14991_v46, %v14991_v46  ;;  %v10582_v34 = vpop.f32.mrb[187].mxu0 }
 0x8ec   :  { %v6357_v58 = vadd.f32 %v6356_v16, %v6284_v19 }
 0x8ef   :  { %v14996_v18 = vpop.f32.mrb[188].mxu0 }
 0x8f0   :  { %18163 = vst [vmem:[#allocation10_spill] sm:$0xff] %v14996_v18  ;;  %v6204_v43 = vadd.f32 %v6203_v37, %v14996_v18  ;;  %v6285_v20 = vmul.f32 %v14996_v18, %v14996_v18  ;;  %v10585_v33 = vpop.f32.mrb[189].mxu0 }
 0x8f1   :  { %v15001_v14 = vpop.f32.mrb[190].mxu0 }
 0x8f2   :  { %18164 = vst [vmem:[#allocation22_spill] sm:$0xff] %v15001_v14  ;;  %v6358_v8 = vadd.f32 %v6357_v58, %v6285_v20  ;;  %v6205_v40 = vadd.f32 %v6204_v43, %v15001_v14  ;;  %v6286_v42 = vmul.f32 %v15001_v14, %v15001_v14  ;;  %v10586_v36 = vpop.f32.mrb[191].mxu0 }
 0x8f4   :  { %v6359_v22 = vadd.f32 %v6358_v8, %v6286_v42 }
 0x8f7   :  { %v15006_v34 = vpop.f32.mrb[192].mxu0 }
 0x8f8   :  { %18165 = vst [vmem:[#allocation19_spill] sm:$0xff] %v15006_v34  ;;  %v6206_v16 = vadd.f32 %v6205_v40, %v15006_v34  ;;  %v6287_v37 = vmul.f32 %v15006_v34, %v15006_v34  ;;  %v10589_v19 = vpop.f32.mrb[193].mxu0 }
 0x8f9   :  { %v15011_v18 = vpop.f32.mrb[194].mxu0 }
 0x8fa   :  { %18166 = vst [vmem:[#allocation16_spill] sm:$0xff] %v15011_v18  ;;  %v6360_v33 = vadd.f32 %v6359_v22, %v6287_v37  ;;  %v6207_v58 = vadd.f32 %v6206_v16, %v15011_v18  ;;  %v6288_v43 = vmul.f32 %v15011_v18, %v15011_v18  ;;  %v10590_v20 = vpop.f32.mrb[195].mxu0 }
 0x8fc   :  { %v6361_v14 = vadd.f32 %v6360_v33, %v6288_v43 }
 0x8ff   :  { %v15016_v36 = vpop.f32.mrb[196].mxu0 }
 0x900   :  { %18167 = vst [vmem:[#allocation17_spill] sm:$0xff] %v15016_v36  ;;  %v6208_v8 = vadd.f32 %v6207_v58, %v15016_v36  ;;  %v6289_v40 = vmul.f32 %v15016_v36, %v15016_v36  ;;  %v10593_v42 = vpop.f32.mrb[197].mxu0 }
 0x901   :  { %v15021_v34 = vpop.f32.mrb[198].mxu0 }
 0x902   :  { %18168 = vst [vmem:[#allocation24_spill] sm:$0xff] %v15021_v34  ;;  %v6362_v19 = vadd.f32 %v6361_v14, %v6289_v40  ;;  %v6209_v22 = vadd.f32 %v6208_v8, %v15021_v34  ;;  %v6290_v16 = vmul.f32 %v15021_v34, %v15021_v34  ;;  %v10594_v37 = vpop.f32.mrb[199].mxu0 }
 0x904   :  { %v6363_v18 = vadd.f32 %v6362_v19, %v6290_v16 }
 0x907   :  { %v15026_v20 = vpop.f32.mrb[200].mxu0 }
 0x908   :  { %18169 = vst [vmem:[#allocation14_spill] sm:$0xff] %v15026_v20  ;;  %v6210_v33 = vadd.f32 %v6209_v22, %v15026_v20  ;;  %v6291_v58 = vmul.f32 %v15026_v20, %v15026_v20  ;;  %v10597_v43 = vpop.f32.mrb[201].mxu0 }
 0x909   :  { %v15031_v36 = vpop.f32.mrb[202].mxu0 }
 0x90a   :  { %18170 = vst [vmem:[#allocation11_spill] sm:$0xff] %v15031_v36  ;;  %v6364_v42 = vadd.f32 %v6363_v18, %v6291_v58  ;;  %v6211_v14 = vadd.f32 %v6210_v33, %v15031_v36  ;;  %v6292_v8 = vmul.f32 %v15031_v36, %v15031_v36  ;;  %v10598_v40 = vpop.f32.mrb[203].mxu0 }
 0x90c   :  { %v6365_v34 = vadd.f32 %v6364_v42, %v6292_v8 }
 0x90f   :  { %v15036_v37 = vpop.f32.mrb[204].mxu0 }
 0x910   :  { %18171 = vst [vmem:[#allocation25_spill] sm:$0xff] %v15036_v37  ;;  %v6212_v19 = vadd.f32 %v6211_v14, %v15036_v37  ;;  %v6293_v22 = vmul.f32 %v15036_v37, %v15036_v37  ;;  %v10601_v16 = vpop.f32.mrb[205].mxu0 }
 0x911   :  { %v15041_v20 = vpop.f32.mrb[206].mxu0 }
 0x912   :  { %18172 = vst [vmem:[#allocation21_spill] sm:$0xff] %v15041_v20  ;;  %v6366_v43 = vadd.f32 %v6365_v34, %v6293_v22  ;;  %v6213_v18 = vadd.f32 %v6212_v19, %v15041_v20  ;;  %v6294_v33 = vmul.f32 %v15041_v20, %v15041_v20  ;;  %v10602_v58 = vpop.f32.mrb[207].mxu0 }
 0x914   :  { %v6367_v36 = vadd.f32 %v6366_v43, %v6294_v33 }
 0x917   :  { %v15046_v40 = vpop.f32.mrb[208].mxu0 }
 0x918   :  { %18173 = vst [vmem:[#allocation18_spill] sm:$0xff] %v15046_v40  ;;  %v6214_v42 = vadd.f32 %v6213_v18, %v15046_v40  ;;  %v6295_v14 = vmul.f32 %v15046_v40, %v15046_v40  ;;  %v10605_v8 = vpop.f32.mrb[209].mxu0 }
 0x919   :  { %v15051_v37 = vpop.f32.mrb[210].mxu0 }
 0x91a   :  { %18174 = vst [vmem:[#allocation30_spill] sm:$0xff] %v15051_v37  ;;  %v6368_v16 = vadd.f32 %v6367_v36, %v6295_v14  ;;  %v6215_v34 = vadd.f32 %v6214_v42, %v15051_v37  ;;  %v6296_v19 = vmul.f32 %v15051_v37, %v15051_v37  ;;  %v10606_v22 = vpop.f32.mrb[211].mxu0 }
 0x91c   :  { %v6369_v20 = vadd.f32 %v6368_v16, %v6296_v19 }
 0x91f   :  { %v15056_v58 = vpop.f32.mrb[212].mxu0 }
 0x920   :  { %18175 = vst [vmem:[#allocation28_spill] sm:$0xff] %v15056_v58  ;;  %v6216_v43 = vadd.f32 %v6215_v34, %v15056_v58  ;;  %v6297_v18 = vmul.f32 %v15056_v58, %v15056_v58  ;;  %v10609_v33 = vpop.f32.mrb[213].mxu0 }
 0x921   :  { %v15061_v40 = vpop.f32.mrb[214].mxu0 }
 0x922   :  { %18176 = vst [vmem:[#allocation26_spill] sm:$0xff] %v15061_v40  ;;  %v6370_v8 = vadd.f32 %v6369_v20, %v6297_v18  ;;  %v6217_v36 = vadd.f32 %v6216_v43, %v15061_v40  ;;  %v6298_v42 = vmul.f32 %v15061_v40, %v15061_v40  ;;  %v10610_v14 = vpop.f32.mrb[215].mxu0 }
 0x924   :  { %v6371_v37 = vadd.f32 %v6370_v8, %v6298_v42 }
 0x927   :  { %v15066_v22 = vpop.f32.mrb[216].mxu0 }
 0x928   :  { %18177 = vst [vmem:[#allocation31_spill] sm:$0xff] %v15066_v22  ;;  %v6218_v16 = vadd.f32 %v6217_v36, %v15066_v22  ;;  %v6299_v34 = vmul.f32 %v15066_v22, %v15066_v22  ;;  %v10613_v19 = vpop.f32.mrb[217].mxu0 }
 0x929   :  { %v15071_v58 = vpop.f32.mrb[218].mxu0 }
 0x92a   :  { %18178 = vst [vmem:[#allocation34_spill] sm:$0xff] %v15071_v58  ;;  %v6372_v33 = vadd.f32 %v6371_v37, %v6299_v34  ;;  %v6219_v20 = vadd.f32 %v6218_v16, %v15071_v58  ;;  %v6300_v43 = vmul.f32 %v15071_v58, %v15071_v58  ;;  %v10614_v18 = vpop.f32.mrb[219].mxu0 }
 0x92c   :  { %v6373_v40 = vadd.f32 %v6372_v33, %v6300_v43 }
 0x92f   :  { %v15076_v14 = vpop.f32.mrb[220].mxu0 }
 0x930   :  { %18179 = vst [vmem:[#allocation15_spill] sm:$0xff] %v15076_v14  ;;  %v6220_v8 = vadd.f32 %v6219_v20, %v15076_v14  ;;  %v6301_v36 = vmul.f32 %v15076_v14, %v15076_v14  ;;  %v10617_v42 = vpop.f32.mrb[221].mxu0 }
 0x931   :  { %v15081_v22 = vpop.f32.mrb[222].mxu0 }
 0x932   :  { %18180 = vst [vmem:[#allocation13_spill] sm:$0xff] %v15081_v22  ;;  %v6374_v19 = vadd.f32 %v6373_v40, %v6301_v36  ;;  %v6221_v37 = vadd.f32 %v6220_v8, %v15081_v22  ;;  %v6302_v16 = vmul.f32 %v15081_v22, %v15081_v22  ;;  %v10618_v34 = vpop.f32.mrb[223].mxu0 }
 0x934   :  { %v6375_v58 = vadd.f32 %v6374_v19, %v6302_v16 }
 0x937   :  { %v15086_v18 = vpop.f32.mrb[224].mxu0 }
 0x938   :  { %18181 = vst [vmem:[#allocation23_spill] sm:$0xff] %v15086_v18  ;;  %v6222_v33 = vadd.f32 %v6221_v37, %v15086_v18  ;;  %v6303_v20 = vmul.f32 %v15086_v18, %v15086_v18  ;;  %v10621_v43 = vpop.f32.mrb[225].mxu0 }
 0x939   :  { %v15091_v14 = vpop.f32.mrb[226].mxu0 }
 0x93a   :  { %18182 = vst [vmem:[#allocation20_spill] sm:$0xff] %v15091_v14  ;;  %v6376_v42 = vadd.f32 %v6375_v58, %v6303_v20  ;;  %v6223_v40 = vadd.f32 %v6222_v33, %v15091_v14  ;;  %v6304_v8 = vmul.f32 %v15091_v14, %v15091_v14  ;;  %v10622_v36 = vpop.f32.mrb[227].mxu0 }
 0x93c   :  { %v6377_v22 = vadd.f32 %v6376_v42, %v6304_v8 }
 0x93f   :  { %v15096_v34 = vpop.f32.mrb[228].mxu0 }
 0x940   :  { %18183 = vst [vmem:[#allocation29_spill] sm:$0xff] %v15096_v34  ;;  %v6224_v19 = vadd.f32 %v6223_v40, %v15096_v34  ;;  %v6305_v37 = vmul.f32 %v15096_v34, %v15096_v34  ;;  %v10625_v16 = vpop.f32.mrb[229].mxu0 }
 0x941   :  { %v15101_v18 = vpop.f32.mrb[230].mxu0 }
 0x942   :  { %18184 = vst [vmem:[#allocation27_spill] sm:$0xff] %v15101_v18  ;;  %v6378_v43 = vadd.f32 %v6377_v22, %v6305_v37  ;;  %v6225_v58 = vadd.f32 %v6224_v19, %v15101_v18  ;;  %v6306_v33 = vmul.f32 %v15101_v18, %v15101_v18  ;;  %v10626_v20 = vpop.f32.mrb[231].mxu0 }
 0x944   :  { %v6379_v14 = vadd.f32 %v6378_v43, %v6306_v33 }
 0x947   :  { %v15106_v36 = vpop.f32.mrb[232].mxu0 }
 0x948   :  { %18185 = vst [vmem:[#allocation33_spill] sm:$0xff] %v15106_v36  ;;  %v6226_v42 = vadd.f32 %v6225_v58, %v15106_v36  ;;  %v6307_v40 = vmul.f32 %v15106_v36, %v15106_v36  ;;  %v10629_v8 = vpop.f32.mrb[233].mxu0 }
 0x949   :  { %v15111_v34 = vpop.f32.mrb[234].mxu0 }
 0x94a   :  { %v6380_v16 = vadd.f32 %v6379_v14, %v6307_v40  ;;  %v6227_v22 = vadd.f32 %v6226_v42, %v15111_v34  ;;  %v6308_v19 = vmul.f32 %v15111_v34, %v15111_v34  ;;  %v10630_v37 = vpop.f32.mrb[235].mxu0 }
 0x94c   :  { %v6381_v18 = vadd.f32 %v6380_v16, %v6308_v19 }
 0x94f   :  { %v15116_v20 = vpop.f32.mrb[236].mxu0 }
 0x950   :  { %v6228_v43 = vadd.f32 %v6227_v22, %v15116_v20  ;;  %v6309_v58 = vmul.f32 %v15116_v20, %v15116_v20  ;;  %v10633_v33 = vpop.f32.mrb[237].mxu0 }
 0x951   :  { %v6151_v36 = vpop.f32.mrb[238].mxu0 }
 0x952   :  { %v6229_v8 = vrot.slane %v6228_v43, 4  ;;  %v6382_v46 = vadd.f32 %v6381_v18, %v6309_v58  ;;  %v10634_v27 = vpop.f32.mrb[239].mxu0  ;;  %v18217_v18 = vld [vmem:[#allocation23_spill] sm:$0xff] }
 0x954   :  { %v6230_v14 = vadd.f32 %v6229_v8, %v6228_v43  ;;  %v6383_v40 = vrot.slane %v6382_v46, 4  ;;  %v18210_v43 = vld [vmem:[#allocation28_spill] sm:$0xff] }
 0x956   :  { %v6231_v42 = vrot.slane %v6230_v14, 2  ;;  %v6384_v6 = vadd.f32 %v6383_v40, %v6382_v46  ;;  %v18189_v40 = vld [vmem:[#allocation6_spill] sm:$0xff]  ;;  %v15248_v46 = vld [vmem:[%s17826_s13] ss:$0 sm:$0xff] }
 0x957   :  { %18202 = vst [vmem:[#allocation32_spill] sm:$0xff] %v15248_v46 }
 0x958   :  { %v6232_v49 = vadd.f32 %v6231_v42, %v6230_v14  ;;  %v6385_v2 = vrot.slane %v6384_v6, 2 }
 0x95a   :  { %v6233_v37 = vrot.slane %v6232_v49, 1  ;;  %v6386_v16 = vadd.f32 %v6385_v2, %v6384_v6 }
 0x95c   :  { %v6234_v19 = vadd.f32 %v6233_v37, %v6232_v49  ;;  %v6387_v59 = vrot.slane %v6386_v16, 1 }
 0x95e   :  { %v15121_v23 = vmul.f32 0.0017301039, %v6234_v19  ;;  %v6388_v22 = vadd.f32 %v6387_v59, %v6386_v16  ;;  %v18186_v19 = vld [vmem:[#allocation4_spill] sm:$0xff] }
 0x960   :  { %v6389_v1 = vmul.f32 0.0017301039, %v6388_v22  ;;  %v6390_v36 = vmul.f32 %v15121_v23, %v15121_v23  ;;  %v18187_v22 = vld [vmem:[#allocation3_spill] sm:$0xff]  ;;  %v18208_v49 = vsub.f32 %v15111_v34, %v15121_v23  ;;  %v18209_v2 = vsub.f32 %v15116_v20, %v15121_v23  ;;  %v18220_v20 = vld [vmem:[#allocation29_spill] sm:$0xff] }
 0x961   :  { %v18221_v34 = vld [vmem:[#allocation27_spill] sm:$0xff]  ;;  %v18223_v27 = vsub.f32 %v14623_v13, %v15121_v23 }
 0x962   :  { %v6391_v6 = vsub.f32 %v6389_v1, %v6390_v36  ;;  %v18188_v36 = vld [vmem:[#allocation5_spill] sm:$0xff]  ;;  %v15261_v1 = vld [vmem:[%s17827_s14] ss:$0 sm:$0xff] }
 0x963   :  { %18207 = vst [vmem:[#allocation35_spill] sm:$0xff] %v15261_v1 }
 0x964   :  { %v6466_v42 = vadd.f32 1e-05, %v6391_v6 }
 0x966   :  { %11645 = vrsqrt.f32 %v6466_v42  ;;  %v18224_v42 = vsub.f32 %v14632_v63, %v15121_v23  ;;  %v18227_v63 = vsub.f32 %v14655_v26, %v15121_v23  ;;  %v18230_v26 = vsub.f32 %v14667_v7, %v15121_v23 }
 0x970   :  { %v15243_v37 = vpop.eup %11645 }
 0x971   :  { %v6540_v33 = vmul.f32 %v15243_v37, %v18208_v49  ;;  %v6541_v58 = vmul.f32 %v15243_v37, %v18209_v2  ;;  %v15286_v2 = vld [vmem:[%s17828_s7] sm:$0x3f]   ;;  %v15297_v49 = vld [vmem:[%s17828_s7 + $0x8] sm:$0x3f]   ;;  %v15318_v59 = vmul.f32 %v15243_v37, %v18224_v42 }
 0x972   :  { %18216 = vst [vmem:[#allocation40_spill] sm:$0xff] %v15286_v2  ;;  %18219 = vst [vmem:[#allocation37_spill] sm:$0xff] %v15297_v49  ;;  %10243 = vmatprep.mubr.bf16.mxu1 %v15286_v2  ;;  %10265 = vmatprep.mubr.bf16.mxu0 %v15297_v49 }
 0x973   :  { %v6620_v16 = vmul.f32 %v15248_v46, %v6540_v33  ;;  %v6621_v6 = vmul.f32 %v15248_v46, %v6541_v58  ;;  %v18222_v33 = vld [vmem:[#allocation33_spill] sm:$0xff]  ;;  %v15309_v46 = vmul.f32 %v15243_v37, %v18223_v27  ;;  %v18225_v58 = vsub.f32 %v14640_v3, %v15121_v23 }
 0x974   :  { %v18226_v27 = vsub.f32 %v14649_v56, %v15121_v23  ;;  %v18228_v3 = vsub.f32 %v14659_v60, %v15121_v23  ;;  %v18231_v60 = vsub.f32 %v14671_v61, %v15121_v23 }
 0x975   :  { %v6700_v8 = vadd.f32 %v15261_v1, %v6620_v16  ;;  %v6701_v14 = vadd.f32 %v15261_v1, %v6621_v6  ;;  %v15324_v13 = vmul.f32 %v15243_v37, %v18225_v58  ;;  %v15337_v6 = vmul.f32 %v15243_v37, %v18227_v63 }
 0x976   :  { %v15331_v16 = vmul.f32 %v15243_v37, %v18226_v27  ;;  %v15343_v42 = vmul.f32 %v15243_v37, %v18228_v3  ;;  %v18229_v58 = vsub.f32 %v14663_v62, %v15121_v23  ;;  %v15355_v63 = vmul.f32 %v15243_v37, %v18230_v26 }
 0x977   :  { %v6774_v27 = vmax.f32 %v6700_v8, 0.0  ;;  %v6775_v49 = vmax.f32 %v6701_v14, 0.0  ;;  %v15361_v3 = vmul.f32 %v15243_v37, %v18231_v60  ;;  %v18232_v62 = vsub.f32 %v14675_v51, %v15121_v23 }
 0x978   :  { %v15349_v56 = vmul.f32 %v15243_v37, %v18229_v58  ;;  %v18233_v8 = vsub.f32 %v14679_v32, %v15121_v23  ;;  %v18234_v14 = vsub.f32 %v14683_v47, %v15121_v23  ;;  %v18235_v26 = vsub.f32 %v14687_v44, %v15121_v23 }
 0x979   :  { %v15367_v58 = vmul.f32 %v15243_v37, %v18232_v62  ;;  %v15387_v60 = vpack.c.bf16 %v6775_v49, %v6774_v27  ;;  %v18237_v32 = vsub.f32 %v14691_v41, %v15121_v23  ;;  %v18238_v47 = vsub.f32 %v14695_v0, %v15121_v23 }
 0x97a   :  { %v15373_v7 = vmul.f32 %v15243_v37, %v18233_v8  ;;  %v15379_v61 = vmul.f32 %v15243_v37, %v18234_v14  ;;  %v15385_v51 = vmul.f32 %v15243_v37, %v18235_v26  ;;  %v18239_v44 = vsub.f32 %v14699_v25, %v15121_v23 }
 0x97b   :  { %18236 = vst [vmem:[#allocation39_spill] sm:$0xff] %v15387_v60  ;;  %v15393_v62 = vmul.f32 %v15243_v37, %v18237_v32  ;;  %v15399_v8 = vmul.f32 %v15243_v37, %v18238_v47  ;;  %v18240_v49 = vsub.f32 %v14703_v31, %v15121_v23  ;;  %v18241_v27 = vsub.f32 %v14707_v52, %v15121_v23 }
 0x97c   :  { %v15405_v14 = vmul.f32 %v15243_v37, %v18239_v44  ;;  %v18243_v26 = vsub.f32 %v14803_v50, %v15121_v23  ;;  %v18244_v32 = vsub.f32 %v14808_v4, %v15121_v23  ;;  %v18245_v47 = vsub.f32 %v14817_v28, %v15121_v23 }
 0x97d   :  { %v15411_v41 = vmul.f32 %v15243_v37, %v18240_v49  ;;  %v15417_v0 = vmul.f32 %v15243_v37, %v18241_v27  ;;  %v18246_v44 = vsub.f32 %v14822_v30, %v15121_v23  ;;  %v18247_v49 = vsub.f32 %v14831_v54, %v15121_v23 }
 0x97e   :  { %v15423_v25 = vmul.f32 %v15243_v37, %v18243_v26  ;;  %v15429_v31 = vmul.f32 %v15243_v37, %v18244_v32  ;;  %v15435_v52 = vmul.f32 %v15243_v37, %v18245_v47  ;;  %v18248_v27 = vsub.f32 %v14836_v5, %v15121_v23 }
 0x97f   :  { %18242 = vst [vmem:[#allocation36_spill] sm:$0xff] %v15417_v0  ;;  %v15441_v50 = vmul.f32 %v15243_v37, %v18246_v44  ;;  %v15447_v4 = vmul.f32 %v15243_v37, %v18247_v49  ;;  %v18249_v26 = vsub.f32 %v14845_v53, %v15121_v23  ;;  %v18250_v32 = vsub.f32 %v14850_v29, %v15121_v23 }
 0x980   :  { %v15453_v28 = vmul.f32 %v15243_v37, %v18248_v27  ;;  %v18251_v47 = vsub.f32 %v14859_v38, %v15121_v23  ;;  %v18252_v44 = vsub.f32 %v14864_v57, %v15121_v23  ;;  %v18253_v49 = vsub.f32 %v14873_v45, %v15121_v23 }
 0x981   :  { %v15459_v30 = vmul.f32 %v15243_v37, %v18249_v26  ;;  %v15465_v54 = vmul.f32 %v15243_v37, %v18250_v32  ;;  %v18254_v27 = vsub.f32 %v14878_v12, %v15121_v23  ;;  %v18255_v26 = vsub.f32 %v14887_v21, %v15121_v23 }
 0x982   :  { %v15471_v5 = vmul.f32 %v15243_v37, %v18251_v47  ;;  %v15477_v53 = vmul.f32 %v15243_v37, %v18252_v44  ;;  %v15483_v29 = vmul.f32 %v15243_v37, %v18253_v49  ;;  %v18256_v32 = vsub.f32 %v14892_v11, %v15121_v23 }
 0x983   :  { %v15489_v38 = vmul.f32 %v15243_v37, %v18254_v27  ;;  %v15495_v57 = vmul.f32 %v15243_v37, %v18255_v26  ;;  %v18258_v47 = vsub.f32 %v14901_v39, %v15121_v23  ;;  %v18259_v44 = vsub.f32 %v14906_v17, %v15121_v23 }
 0x984   :  { %v15501_v45 = vmul.f32 %v15243_v37, %v18256_v32  ;;  %v18260_v49 = vsub.f32 %v14915_v15, %v15121_v23  ;;  %v18261_v27 = vsub.f32 %v14920_v9, %v15121_v23  ;;  %v18262_v26 = vsub.f32 %v14929_v10, %v15121_v23 }
 0x985   :  { %v15507_v12 = vmul.f32 %v15243_v37, %v18258_v47  ;;  %v15513_v21 = vmul.f32 %v15243_v37, %v18259_v44  ;;  %v18263_v32 = vsub.f32 %v14936_v24, %v15121_v23  ;;  %v18264_v47 = vsub.f32 %v14941_v55, %v15121_v23 }
 0x986   :  { %18257 = vst [vmem:[#allocation38_spill] sm:$0xff] %v15501_v45  ;;  %v15519_v11 = vmul.f32 %v15243_v37, %v18260_v49  ;;  %v15525_v39 = vmul.f32 %v15243_v37, %v18261_v27  ;;  %v15531_v17 = vmul.f32 %v15243_v37, %v18262_v26  ;;  %v18265_v44 = vsub.f32 %v14946_v48, %v15121_v23 }
 0x987   :  { %v15537_v15 = vmul.f32 %v15243_v37, %v18263_v32  ;;  %v15543_v9 = vmul.f32 %v15243_v37, %v18264_v47  ;;  %v18266_v49 = vsub.f32 %v14951_v35, %v15121_v23  ;;  %v18267_v27 = vsub.f32 %v18186_v19, %v15121_v23 }
 0x988   :  { %v15549_v10 = vmul.f32 %v15243_v37, %v18265_v44  ;;  %v18268_v26 = vsub.f32 %v18187_v22, %v15121_v23  ;;  %v18269_v32 = vsub.f32 %v18188_v36, %v15121_v23  ;;  %v18270_v47 = vsub.f32 %v18189_v40, %v15121_v23  ;;  %v18271_v44 = vld [vmem:[#allocation7_spill] sm:$0xff] }
 0x989   :  { %v15555_v24 = vmul.f32 %v15243_v37, %v18266_v49  ;;  %v15561_v55 = vmul.f32 %v15243_v37, %v18267_v27  ;;  %v18272_v49 = vsub.f32 %v18271_v44, %v15121_v23  ;;  %v18273_v27 = vld [vmem:[#allocation8_spill] sm:$0xff] }
 0x98a   :  { %v15567_v48 = vmul.f32 %v15243_v37, %v18268_v26  ;;  %v15573_v35 = vmul.f32 %v15243_v37, %v18269_v32  ;;  %v15579_v19 = vmul.f32 %v15243_v37, %v18270_v47  ;;  %v18274_v26 = vsub.f32 %v18273_v27, %v15121_v23  ;;  %v18275_v32 = vld [vmem:[#allocation9_spill] sm:$0xff]  ;;  %v18277_v47 = vld [vmem:[#allocation12_spill] sm:$0xff] }
 0x98b   :  { %v15585_v22 = vmul.f32 %v15243_v37, %v18272_v49  ;;  %v18276_v60 = vsub.f32 %v18275_v32, %v15121_v23  ;;  %v18278_v2 = vsub.f32 %v18277_v47, %v15121_v23  ;;  %v18280_v49 = vld [vmem:[#allocation10_spill] sm:$0xff] }
 0x98c   :  { %v15591_v36 = vmul.f32 %v15243_v37, %v18274_v26  ;;  %v18281_v1 = vsub.f32 %v18280_v49, %v15121_v23  ;;  %v18283_v26 = vld [vmem:[#allocation22_spill] sm:$0xff] }
 0x98d   :  { %v15597_v40 = vmul.f32 %v15243_v37, %v18276_v60  ;;  %v15603_v44 = vmul.f32 %v15243_v37, %v18278_v2  ;;  %v18284_v45 = vsub.f32 %v18283_v26, %v15121_v23  ;;  %v18286_v60 = vld [vmem:[#allocation19_spill] sm:$0xff]  ;;  %v18289_v2 = vld [vmem:[#allocation16_spill] sm:$0xff] }
 0x98e   :  { %v15609_v27 = vmul.f32 %v15243_v37, %v18281_v1  ;;  %v18287_v0 = vsub.f32 %v18286_v60, %v15121_v23  ;;  %v18292_v1 = vld [vmem:[#allocation17_spill] sm:$0xff] }
 0x98f   :  { %18279 = vst [vmem:[#allocation4_spill] sm:$0xff] %v15603_v44  ;;  %v15615_v32 = vmul.f32 %v15243_v37, %v18284_v45  ;;  %v18290_v44 = vsub.f32 %v18289_v2, %v15121_v23  ;;  %v18295_v45 = vld [vmem:[#allocation24_spill] sm:$0xff] }
 0x990   :  { %18282 = vst [vmem:[#allocation3_spill] sm:$0xff] %v15609_v27  ;;  %v15621_v47 = vmul.f32 %v15243_v37, %v18287_v0  ;;  %v18293_v27 = vsub.f32 %v18292_v1, %v15121_v23  ;;  %v18298_v0 = vld [vmem:[#allocation14_spill] sm:$0xff] }
 0x991   :  { %18285 = vst [vmem:[#allocation5_spill] sm:$0xff] %v15615_v32  ;;  %v15627_v49 = vmul.f32 %v15243_v37, %v18290_v44  ;;  %v18296_v32 = vsub.f32 %v18295_v45, %v15121_v23  ;;  %v18301_v44 = vld [vmem:[#allocation11_spill] sm:$0xff] }
 0x992   :  { %18288 = vst [vmem:[#allocation6_spill] sm:$0xff] %v15621_v47  ;;  %v15633_v26 = vmul.f32 %v15243_v37, %v18293_v27  ;;  %v18299_v47 = vsub.f32 %v18298_v0, %v15121_v23  ;;  %v18304_v27 = vld [vmem:[#allocation25_spill] sm:$0xff] }
 0x993   :  { %18291 = vst [vmem:[#allocation28_spill] sm:$0xff] %v15627_v49  ;;  %v15639_v60 = vmul.f32 %v15243_v37, %v18296_v32  ;;  %v18302_v49 = vsub.f32 %v18301_v44, %v15121_v23  ;;  %v18306_v32 = vld [vmem:[#allocation21_spill] sm:$0xff] }
 0x994   :  { %18294 = vst [vmem:[#allocation23_spill] sm:$0xff] %v15633_v26  ;;  %v15645_v2 = vmul.f32 %v15243_v37, %v18299_v47  ;;  %v18305_v26 = vsub.f32 %v18304_v27, %v15121_v23  ;;  %v18309_v47 = vld [vmem:[#allocation18_spill] sm:$0xff] }
 0x995   :  { %18297 = vst [vmem:[#allocation29_spill] sm:$0xff] %v15639_v60  ;;  %v15651_v1 = vmul.f32 %v15243_v37, %v18302_v49  ;;  %v18307_v60 = vsub.f32 %v18306_v32, %v15121_v23  ;;  %v18312_v49 = vld [vmem:[#allocation30_spill] sm:$0xff] }
 0x996   :  { %18300 = vst [vmem:[#allocation27_spill] sm:$0xff] %v15645_v2  ;;  %v15657_v45 = vmul.f32 %v15243_v37, %v18305_v26  ;;  %v18310_v2 = vsub.f32 %v18309_v47, %v15121_v23  ;;  %v18315_v26 = vsub.f32 %v18210_v43, %v15121_v23 }
 0x997   :  { %18303 = vst [vmem:[#allocation33_spill] sm:$0xff] %v15651_v1  ;;  %v15663_v0 = vmul.f32 %v15243_v37, %v18307_v60  ;;  %v18313_v1 = vsub.f32 %v18312_v49, %v15121_v23  ;;  %v18317_v60 = vld [vmem:[#allocation26_spill] sm:$0xff] }
 0x998   :  { %v15669_v44 = vmul.f32 %v15243_v37, %v18310_v2  ;;  %v15681_v32 = vmul.f32 %v15243_v37, %v18315_v26  ;;  %v18320_v2 = vld [vmem:[#allocation31_spill] sm:$0xff] }
 0x999   :  { %18308 = vst [vmem:[#allocation7_spill] sm:$0xff] %v15663_v0  ;;  %v15675_v27 = vmul.f32 %v15243_v37, %v18313_v1  ;;  %v18318_v0 = vsub.f32 %v18317_v60, %v15121_v23  ;;  %v18322_v1 = vld [vmem:[#allocation34_spill] sm:$0xff]  ;;  %v18325_v26 = vld [vmem:[#allocation15_spill] sm:$0xff] }
 0x99a   :  { %18311 = vst [vmem:[#allocation8_spill] sm:$0xff] %v15669_v44  ;;  %18316 = vst [vmem:[#allocation12_spill] sm:$0xff] %v15681_v32  ;;  %v18321_v44 = vsub.f32 %v18320_v2, %v15121_v23  ;;  %v18326_v32 = vsub.f32 %v18325_v26, %v15121_v23 }
 0x99b   :  { %18314 = vst [vmem:[#allocation9_spill] sm:$0xff] %v15675_v27  ;;  %v15687_v47 = vmul.f32 %v15243_v37, %v18318_v0  ;;  %v18323_v27 = vsub.f32 %v18322_v1, %v15121_v23  ;;  %v18327_v0 = vld [vmem:[#allocation13_spill] sm:$0xff] }
 0x99c   :  { %v15693_v49 = vmul.f32 %v15243_v37, %v18321_v44  ;;  %v15705_v60 = vmul.f32 %v15243_v37, %v18326_v32  ;;  %v18329_v44 = vsub.f32 %v18217_v18, %v15121_v23  ;;  %v18333_v32 = vsub.f32 %v18220_v20, %v15121_v23 }
 0x99d   :  { %18319 = vst [vmem:[#allocation10_spill] sm:$0xff] %v15687_v47  ;;  %v15699_v43 = vmul.f32 %v15243_v37, %v18323_v27  ;;  %v18328_v47 = vsub.f32 %v18327_v0, %v15121_v23  ;;  %v18330_v27 = vld [vmem:[#allocation20_spill] sm:$0xff] }
 0x99e   :  { %v15717_v1 = vmul.f32 %v15243_v37, %v18329_v44  ;;  %v15729_v0 = vmul.f32 %v15243_v37, %v18333_v32  ;;  %v18335_v44 = vsub.f32 %v18222_v33, %v15121_v23 }
 0x99f   :  { %18324 = vst [vmem:[#allocation22_spill] sm:$0xff] %v15699_v43  ;;  %v15711_v2 = vmul.f32 %v15243_v37, %v18328_v47  ;;  %v18331_v43 = vsub.f32 %v18330_v27, %v15121_v23  ;;  %v18334_v47 = vsub.f32 %v18221_v34, %v15121_v23 }
 0x9a0   :  { %v15741_v27 = vmul.f32 %v15243_v37, %v18335_v44  ;;  %v18355_v44 = vld [vmem:[#allocation3_spill] sm:$0xff] }
 0x9a1   :  { %v15723_v26 = vmul.f32 %v15243_v37, %v18331_v43  ;;  %v15735_v18 = vmul.f32 %v15243_v37, %v18334_v47  ;;  %v18336_v43 = vld [vmem:[#allocation32_spill] sm:$0xff] }
 0x9a2   :  { %v15749_v20 = vmul.f32 %v18336_v43, %v15318_v59  ;;  %v15753_v34 = vmul.f32 %v18336_v43, %v15324_v13  ;;  %v15757_v32 = vmul.f32 %v18336_v43, %v15331_v16  ;;  %v15761_v23 = vmul.f32 %v18336_v43, %v15337_v6  ;;  %v18354_v47 = vld [vmem:[#allocation4_spill] sm:$0xff] }
 0x9a3   :  { %18332 = vst [vmem:[#allocation19_spill] sm:$0xff] %v15723_v26  ;;  %v15745_v26 = vmul.f32 %v18336_v43, %v15309_v46  ;;  %v15765_v46 = vmul.f32 %v18336_v43, %v15343_v42  ;;  %v15769_v59 = vmul.f32 %v18336_v43, %v15349_v56  ;;  %v15773_v37 = vmul.f32 %v18336_v43, %v15355_v63 }
 0x9a4   :  { %18338 = vst [vmem:[#allocation17_spill] sm:$0xff] %v15749_v20  ;;  %18339 = vst [vmem:[#allocation24_spill] sm:$0xff] %v15753_v34  ;;  %v15777_v33 = vmul.f32 %v18336_v43, %v15361_v3  ;;  %v15781_v13 = vmul.f32 %v18336_v43, %v15367_v58  ;;  %v15785_v16 = vmul.f32 %v18336_v43, %v15373_v7  ;;  %v18370_v20 = vld [vmem:[#allocation36_spill] sm:$0xff] }
 0x9a5   :  { %18337 = vst [vmem:[#allocation16_spill] sm:$0xff] %v15745_v26  ;;  %18340 = vst [vmem:[#allocation14_spill] sm:$0xff] %v15757_v32  ;;  %v15789_v6 = vmul.f32 %v18336_v43, %v15379_v61  ;;  %v15793_v42 = vmul.f32 %v18336_v43, %v15385_v51  ;;  %v15797_v56 = vmul.f32 %v18336_v43, %v15393_v62  ;;  %v18371_v26 = vld [vmem:[#allocation38_spill] sm:$0xff] }
 0x9a6   :  { %18341 = vst [vmem:[#allocation11_spill] sm:$0xff] %v15761_v23  ;;  %18342 = vst [vmem:[#allocation25_spill] sm:$0xff] %v15765_v46  ;;  %v15801_v63 = vmul.f32 %v18336_v43, %v15399_v8  ;;  %v15805_v3 = vmul.f32 %v18336_v43, %v15405_v14  ;;  %v15809_v58 = vmul.f32 %v18336_v43, %v15411_v41  ;;  %v18366_v46 = vld [vmem:[#allocation12_spill] sm:$0xff]  ;;  %v18367_v23 = vld [vmem:[#allocation10_spill] sm:$0xff] }
 0x9a7   :  { %18343 = vst [vmem:[#allocation21_spill] sm:$0xff] %v15769_v59  ;;  %18344 = vst [vmem:[#allocation18_spill] sm:$0xff] %v15773_v37  ;;  %v6566_v7 = vmul.f32 %v18336_v43, %v15423_v25  ;;  %v6567_v61 = vmul.f32 %v18336_v43, %v15429_v31  ;;  %v6568_v51 = vmul.f32 %v18336_v43, %v15435_v52  ;;  %v18364_v37 = vld [vmem:[#allocation8_spill] sm:$0xff]  ;;  %v18365_v59 = vld [vmem:[#allocation9_spill] sm:$0xff] }
 0x9a8   :  { %18345 = vst [vmem:[#allocation30_spill] sm:$0xff] %v15777_v33  ;;  %18346 = vst [vmem:[#allocation26_spill] sm:$0xff] %v15781_v13  ;;  %v6569_v62 = vmul.f32 %v18336_v43, %v15441_v50  ;;  %v6570_v8 = vmul.f32 %v18336_v43, %v15447_v4  ;;  %v6571_v14 = vmul.f32 %v18336_v43, %v15453_v28  ;;  %v18362_v13 = vld [vmem:[#allocation33_spill] sm:$0xff]  ;;  %v18363_v33 = vld [vmem:[#allocation7_spill] sm:$0xff] }
 0x9a9   :  { %18347 = vst [vmem:[#allocation31_spill] sm:$0xff] %v15785_v16  ;;  %18348 = vst [vmem:[#allocation34_spill] sm:$0xff] %v15789_v6  ;;  %v6572_v41 = vmul.f32 %v18336_v43, %v15459_v30  ;;  %v6573_v25 = vmul.f32 %v18336_v43, %v15465_v54  ;;  %v6574_v31 = vmul.f32 %v18336_v43, %v15471_v5  ;;  %v18360_v6 = vld [vmem:[#allocation29_spill] sm:$0xff]  ;;  %v18361_v16 = vld [vmem:[#allocation27_spill] sm:$0xff] }
 0x9aa   :  { %18349 = vst [vmem:[#allocation15_spill] sm:$0xff] %v15793_v42  ;;  %18350 = vst [vmem:[#allocation13_spill] sm:$0xff] %v15797_v56  ;;  %v6575_v52 = vmul.f32 %v18336_v43, %v15477_v53  ;;  %v6576_v50 = vmul.f32 %v18336_v43, %v15483_v29  ;;  %v6577_v4 = vmul.f32 %v18336_v43, %v15489_v38  ;;  %v18358_v56 = vld [vmem:[#allocation28_spill] sm:$0xff]  ;;  %v18359_v42 = vld [vmem:[#allocation23_spill] sm:$0xff] }
 0x9ab   :  { %18351 = vst [vmem:[#allocation20_spill] sm:$0xff] %v15801_v63  ;;  %18352 = vst [vmem:[#allocation32_spill] sm:$0xff] %v15805_v3  ;;  %v6578_v28 = vmul.f32 %v18336_v43, %v15495_v57  ;;  %v6580_v30 = vmul.f32 %v18336_v43, %v15507_v12  ;;  %v6581_v54 = vmul.f32 %v18336_v43, %v15513_v21  ;;  %v18356_v3 = vld [vmem:[#allocation5_spill] sm:$0xff]  ;;  %v18357_v63 = vld [vmem:[#allocation6_spill] sm:$0xff] }
 0x9ac   :  { %18353 = vst [vmem:[#allocation41_spill] sm:$0xff] %v15809_v58  ;;  %v6582_v5 = vmul.f32 %v18336_v43, %v15519_v11  ;;  %v6583_v53 = vmul.f32 %v18336_v43, %v15525_v39  ;;  %v6584_v29 = vmul.f32 %v18336_v43, %v15531_v17  ;;  %v6585_v38 = vmul.f32 %v18336_v43, %v15537_v15  ;;  %v18368_v32 = vld [vmem:[#allocation22_spill] sm:$0xff]  ;;  %v18369_v34 = vld [vmem:[#allocation19_spill] sm:$0xff] }
 0x9ad   :  { %v6586_v57 = vmul.f32 %v18336_v43, %v15543_v9  ;;  %v6587_v12 = vmul.f32 %v18336_v43, %v15549_v10  ;;  %v6588_v21 = vmul.f32 %v18336_v43, %v15555_v24  ;;  %v6589_v11 = vmul.f32 %v18336_v43, %v15561_v55  ;;  %v18372_v58 = vld [vmem:[#allocation35_spill] sm:$0xff] }
 0x9ae   :  { %v6590_v39 = vmul.f32 %v18336_v43, %v15567_v48  ;;  %v6591_v17 = vmul.f32 %v18336_v43, %v15573_v35  ;;  %v6592_v15 = vmul.f32 %v18336_v43, %v15579_v19  ;;  %v6593_v9 = vmul.f32 %v18336_v43, %v15585_v22 }
 0x9af   :  { %v6594_v10 = vmul.f32 %v18336_v43, %v15591_v36  ;;  %v6595_v24 = vmul.f32 %v18336_v43, %v15597_v40  ;;  %v6596_v55 = vmul.f32 %v18336_v43, %v18354_v47  ;;  %v6597_v48 = vmul.f32 %v18336_v43, %v18355_v44 }
 0x9b0   :  { %v6598_v35 = vmul.f32 %v18336_v43, %v18356_v3  ;;  %v6599_v19 = vmul.f32 %v18336_v43, %v18357_v63  ;;  %v6600_v22 = vmul.f32 %v18336_v43, %v18358_v56  ;;  %v6601_v36 = vmul.f32 %v18336_v43, %v18359_v42 }
 0x9b1   :  { %v6602_v40 = vmul.f32 %v18336_v43, %v18360_v6  ;;  %v6603_v47 = vmul.f32 %v18336_v43, %v18361_v16  ;;  %v6604_v44 = vmul.f32 %v18336_v43, %v18362_v13  ;;  %v6605_v3 = vmul.f32 %v18336_v43, %v15657_v45 }
 0x9b2   :  { %v6606_v63 = vmul.f32 %v18336_v43, %v18363_v33  ;;  %v6607_v56 = vmul.f32 %v18336_v43, %v18364_v37  ;;  %v6608_v42 = vmul.f32 %v18336_v43, %v18365_v59  ;;  %v6609_v6 = vmul.f32 %v18336_v43, %v18366_v46 }
 0x9b3   :  { %v6610_v16 = vmul.f32 %v18336_v43, %v18367_v23  ;;  %v6611_v13 = vmul.f32 %v18336_v43, %v15693_v49  ;;  %v6612_v45 = vmul.f32 %v18336_v43, %v18368_v32  ;;  %v6613_v33 = vmul.f32 %v18336_v43, %v15705_v60 }
 0x9b4   :  { %v6614_v37 = vmul.f32 %v18336_v43, %v15711_v2  ;;  %v6615_v59 = vmul.f32 %v18336_v43, %v15717_v1  ;;  %v6616_v46 = vmul.f32 %v18336_v43, %v18369_v34  ;;  %v6617_v23 = vmul.f32 %v18336_v43, %v15729_v0 }
 0x9b5   :  { %v6618_v49 = vmul.f32 %v18336_v43, %v15735_v18  ;;  %v6565_v32 = vmul.f32 %v18336_v43, %v18370_v20  ;;  %v6579_v60 = vmul.f32 %v18336_v43, %v18371_v26  ;;  %v6619_v2 = vmul.f32 %v18336_v43, %v15741_v27 }
 0x9b6   :  { %v15922_v1 = vadd.f32 %v18372_v58, %v6566_v7  ;;  %v15925_v34 = vadd.f32 %v18372_v58, %v6567_v61  ;;  %v15928_v0 = vadd.f32 %v18372_v58, %v6568_v51  ;;  %v15931_v18 = vadd.f32 %v18372_v58, %v6569_v62 }
 0x9b7   :  { %v15934_v20 = vadd.f32 %v18372_v58, %v6570_v8  ;;  %v15937_v26 = vadd.f32 %v18372_v58, %v6571_v14  ;;  %v15940_v27 = vadd.f32 %v18372_v58, %v6572_v41  ;;  %v15943_v43 = vadd.f32 %v18372_v58, %v6573_v25 }
 0x9b8   :  { %v15946_v7 = vadd.f32 %v18372_v58, %v6574_v31  ;;  %v15949_v61 = vadd.f32 %v18372_v58, %v6575_v52  ;;  %v15952_v51 = vadd.f32 %v18372_v58, %v6576_v50  ;;  %v15955_v62 = vadd.f32 %v18372_v58, %v6577_v4 }
 0x9b9   :  { %v15958_v8 = vadd.f32 %v18372_v58, %v6578_v28  ;;  %v15961_v14 = vadd.f32 %v18372_v58, %v6579_v60  ;;  %v15964_v41 = vadd.f32 %v18372_v58, %v6580_v30  ;;  %v15967_v25 = vadd.f32 %v18372_v58, %v6581_v54 }
 0x9ba   :  { %v15970_v31 = vadd.f32 %v18372_v58, %v6582_v5  ;;  %v15973_v52 = vadd.f32 %v18372_v58, %v6583_v53  ;;  %v15976_v50 = vadd.f32 %v18372_v58, %v6584_v29  ;;  %v15979_v4 = vadd.f32 %v18372_v58, %v6585_v38 }
 0x9bb   :  { %18373 = vst [vmem:[#allocation4_spill] sm:$0xff] %v15967_v25  ;;  %v15982_v28 = vadd.f32 %v18372_v58, %v6586_v57  ;;  %v15985_v30 = vadd.f32 %v18372_v58, %v6587_v12  ;;  %v15988_v54 = vadd.f32 %v18372_v58, %v6588_v21  ;;  %v15991_v5 = vadd.f32 %v18372_v58, %v6589_v11 }
 0x9bc   :  { %18374 = vst [vmem:[#allocation3_spill] sm:$0xff] %v15970_v31  ;;  %18375 = vst [vmem:[#allocation5_spill] sm:$0xff] %v15973_v52  ;;  %v15994_v53 = vadd.f32 %v18372_v58, %v6590_v39  ;;  %v15997_v29 = vadd.f32 %v18372_v58, %v6591_v17  ;;  %v16000_v38 = vadd.f32 %v18372_v58, %v6592_v15 }
 0x9bd   :  { %v16003_v57 = vadd.f32 %v18372_v58, %v6593_v9  ;;  %v16006_v12 = vadd.f32 %v18372_v58, %v6594_v10  ;;  %v16009_v21 = vadd.f32 %v18372_v58, %v6595_v24  ;;  %v16012_v11 = vadd.f32 %v18372_v58, %v6596_v55 }
 0x9be   :  { %v16015_v39 = vadd.f32 %v18372_v58, %v6597_v48  ;;  %v16018_v17 = vadd.f32 %v18372_v58, %v6598_v35  ;;  %v16021_v15 = vadd.f32 %v18372_v58, %v6599_v19  ;;  %v16024_v9 = vadd.f32 %v18372_v58, %v6600_v22 }
 0x9bf   :  { %v16027_v10 = vadd.f32 %v18372_v58, %v6601_v36  ;;  %v16030_v24 = vadd.f32 %v18372_v58, %v6602_v40  ;;  %v16033_v55 = vadd.f32 %v18372_v58, %v6603_v47  ;;  %v16036_v48 = vadd.f32 %v18372_v58, %v6604_v44 }
 0x9c0   :  { %18376 = vst [vmem:[#allocation6_spill] sm:$0xff] %v16018_v17  ;;  %18377 = vst [vmem:[#allocation28_spill] sm:$0xff] %v16021_v15  ;;  %v16039_v35 = vadd.f32 %v18372_v58, %v6605_v3  ;;  %v16042_v19 = vadd.f32 %v18372_v58, %v6606_v63  ;;  %v16045_v22 = vadd.f32 %v18372_v58, %v6607_v56  ;;  %v18389_v17 = vld [vmem:[#allocation25_spill] sm:$0xff] }
 0x9c1   :  { %v16048_v36 = vadd.f32 %v18372_v58, %v6608_v42  ;;  %v16051_v40 = vadd.f32 %v18372_v58, %v6609_v6  ;;  %v16054_v47 = vadd.f32 %v18372_v58, %v6610_v16  ;;  %v16057_v44 = vadd.f32 %v18372_v58, %v6611_v13  ;;  %v18381_v13 = vld [vmem:[#allocation41_spill] sm:$0xff] }
 0x9c2   :  { %v16060_v3 = vadd.f32 %v18372_v58, %v6612_v45  ;;  %v16063_v63 = vadd.f32 %v18372_v58, %v6613_v33  ;;  %v16066_v56 = vadd.f32 %v18372_v58, %v6614_v37  ;;  %v16069_v42 = vadd.f32 %v18372_v58, %v6615_v59 }
 0x9c3   :  { %v16072_v6 = vadd.f32 %v18372_v58, %v6616_v46  ;;  %v16075_v16 = vadd.f32 %v18372_v58, %v6617_v23  ;;  %v6644_v60 = vadd.f32 %v18372_v58, %v18381_v13  ;;  %v16080_v45 = vadd.f32 %v18372_v58, %v6618_v49  ;;  %v18384_v13 = vld [vmem:[#allocation16_spill] sm:$0xff]  ;;  %v18385_v23 = vld [vmem:[#allocation17_spill] sm:$0xff] }
 0x9c4   :  { %18378 = vst [vmem:[#allocation23_spill] sm:$0xff] %v16069_v42  ;;  %v16083_v33 = vadd.f32 %v18372_v58, %v6619_v2  ;;  %v6645_v37 = vadd.f32 %v18372_v58, %v6565_v32  ;;  %v6628_v49 = vadd.f32 %v18372_v58, %v18384_v13  ;;  %v6629_v2 = vadd.f32 %v18372_v58, %v18385_v23  ;;  %v18386_v46 = vld [vmem:[#allocation24_spill] sm:$0xff] }
 0x9c5   :  { %18379 = vst [vmem:[#allocation29_spill] sm:$0xff] %v16072_v6  ;;  %18380 = vst [vmem:[#allocation27_spill] sm:$0xff] %v16075_v16  ;;  %v6718_v52 = vmax.f32 %v6644_v60, 0.0  ;;  %v6720_v32 = vmax.f32 %v15922_v1, 0.0  ;;  %v6721_v59 = vmax.f32 %v15925_v34, 0.0  ;;  %v6630_v31 = vadd.f32 %v18372_v58, %v18386_v46  ;;  %v18388_v1 = vld [vmem:[#allocation11_spill] sm:$0xff] }
 0x9c6   :  { %18382 = vst [vmem:[#allocation33_spill] sm:$0xff] %v16080_v45  ;;  %v6719_v25 = vmax.f32 %v6645_v37, 0.0  ;;  %v18387_v37 = vld [vmem:[#allocation14_spill] sm:$0xff]  ;;  %v6723_v13 = vmax.f32 %v15931_v18, 0.0  ;;  %v6702_v60 = vmax.f32 %v6628_v49, 0.0  ;;  %v6703_v23 = vmax.f32 %v6629_v2, 0.0 }
 0x9c7   :  { %v16136_v16 = vpack.c.bf16 %v6721_v59, %v6720_v32  ;;  %v6632_v34 = vadd.f32 %v18372_v58, %v18388_v1  ;;  %v6704_v6 = vmax.f32 %v6630_v31, 0.0  ;;  %v6633_v46 = vadd.f32 %v18372_v58, %v18389_v17  ;;  %v18390_v2 = vld [vmem:[#allocation21_spill] sm:$0xff]  ;;  %v18391_v31 = vld [vmem:[#allocation18_spill] sm:$0xff] }
 0x9c8   :  { %v16120_v45 = vpack.c.bf16 %v6719_v25, %v6718_v52  ;;  %v6631_v25 = vadd.f32 %v18372_v58, %v18387_v37  ;;  %v6722_v52 = vmax.f32 %v15928_v0, 0.0  ;;  %v16144_v42 = vpack.c.bf16 %v6703_v23, %v6702_v60  ;;  %v18393_v23 = vld [vmem:[#allocation26_spill] sm:$0xff] }
 0x9c9   :  { %v6706_v37 = vmax.f32 %v6632_v34, 0.0  ;;  %v6724_v0 = vmax.f32 %v15934_v20, 0.0  ;;  %v6725_v18 = vmax.f32 %v15937_v26, 0.0  ;;  %v6707_v59 = vmax.f32 %v6633_v46, 0.0  ;;  %v18392_v26 = vld [vmem:[#allocation30_spill] sm:$0xff] }
 0x9ca   :  { %18383 = vst [vmem:[#allocation7_spill] sm:$0xff] %v16120_v45  ;;  %10227 = vmatprep.subr.bf16.mxu1 %v16120_v45  ;;  %10249 = vmatprep.subr.bf16.mxu0 %v16120_v45  ;;  %v6705_v15 = vmax.f32 %v6631_v25, 0.0  ;;  %v16140_v45 = vpack.c.bf16 %v6723_v13, %v6722_v52  ;;  %v6634_v32 = vadd.f32 %v18372_v58, %v18390_v2  ;;  %v6726_v60 = vmax.f32 %v15940_v27, 0.0  ;;  %v18394_v2 = vld [vmem:[#allocation31_spill] sm:$0xff] }
 0x9cb   :  { %v6635_v25 = vadd.f32 %v18372_v58, %v18391_v31  ;;  %10228 = vmatpush3.bf16.xpose.msra.mxu1 %v16144_v42  ;;  %10250 = vmatpush3.bf16.xpose.msra.mxu0 %v16144_v42  ;;  %v16156_v17 = vpack.c.bf16 %v6725_v18, %v6724_v0  ;;  %v6727_v20 = vmax.f32 %v15943_v43, 0.0  ;;  %v6637_v1 = vadd.f32 %v18372_v58, %v18393_v23 }
 0x9cc   :  { %v16148_v49 = vpack.c.bf16 %v6705_v15, %v6704_v6  ;;  %v6636_v15 = vadd.f32 %v18372_v58, %v18392_v26  ;;  %10229 = vmatprep.subr.bf16.mxu1 %v16136_v16  ;;  %10251 = vmatprep.subr.bf16.mxu0 %v16136_v16  ;;  %v16164_v6 = vpack.c.bf16 %v6707_v59, %v6706_v37  ;;  %v6708_v52 = vmax.f32 %v6634_v32, 0.0  ;;  %v18395_v37 = vld [vmem:[#allocation34_spill] sm:$0xff] }
 0x9cd   :  { %v6709_v13 = vmax.f32 %v6635_v25, 0.0  ;;  %v16168_v34 = vpack.c.bf16 %v6727_v20, %v6726_v60  ;;  %v6728_v27 = vmax.f32 %v15946_v7, 0.0  ;;  %v6729_v43 = vmax.f32 %v15949_v61, 0.0  ;;  %v18396_v20 = vld [vmem:[#allocation15_spill] sm:$0xff] }
 0x9ce   :  { %v6710_v46 = vmax.f32 %v6636_v15, 0.0  ;;  %v6711_v18 = vmax.f32 %v6637_v1, 0.0  ;;  %v6638_v31 = vadd.f32 %v18372_v58, %v18394_v2  ;;  %v6639_v59 = vadd.f32 %v18372_v58, %v18395_v37  ;;  %v18398_v2 = vld [vmem:[#allocation20_spill] sm:$0xff] }
 0x9cf   :  { %v16172_v0 = vpack.c.bf16 %v6709_v13, %v6708_v52  ;;  %v16178_v32 = vpack.c.bf16 %v6729_v43, %v6728_v27  ;;  %v6730_v25 = vmax.f32 %v15952_v51, 0.0  ;;  %v6731_v60 = vmax.f32 %v15955_v62, 0.0  ;;  %v18397_v52 = vld [vmem:[#allocation13_spill] sm:$0xff] }
 0x9d0   :  { %v6640_v7 = vadd.f32 %v18372_v58, %v18396_v20  ;;  %v16184_v61 = vpack.c.bf16 %v6711_v18, %v6710_v46  ;;  %v6712_v26 = vmax.f32 %v6638_v31, 0.0  ;;  %v6713_v15 = vmax.f32 %v6639_v59, 0.0  ;;  %v18399_v46 = vld [vmem:[#allocation32_spill] sm:$0xff] }
 0x9d1   :  { %v6641_v13 = vadd.f32 %v18372_v58, %v18397_v52  ;;  %v16188_v23 = vpack.c.bf16 %v6731_v60, %v6730_v25  ;;  %v6732_v27 = vmax.f32 %v15958_v8, 0.0  ;;  %v6733_v43 = vmax.f32 %v15961_v14, 0.0  ;;  %v18400_v8 = vld [vmem:[#allocation4_spill] sm:$0xff]  ;;  %v18401_v14 = vld [vmem:[#allocation3_spill] sm:$0xff] }
 0x9d2   :  { %v6714_v1 = vmax.f32 %v6640_v7, 0.0  ;;  %v16192_v51 = vpack.c.bf16 %v6713_v15, %v6712_v26  ;;  %v6642_v37 = vadd.f32 %v18372_v58, %v18398_v2  ;;  %v6643_v18 = vadd.f32 %v18372_v58, %v18399_v46  ;;  %v18402_v26 = vld [vmem:[#allocation5_spill] sm:$0xff] }
 0x9d3   :  { %v6715_v62 = vmax.f32 %v6641_v13, 0.0  ;;  %10230 = vmatpush3.bf16.xpose.msra.mxu1 %v16148_v49  ;;  %10252 = vmatpush3.bf16.xpose.msra.mxu0 %v16148_v49  ;;  %v16200_v31 = vpack.c.bf16 %v6733_v43, %v6732_v27  ;;  %v6734_v59 = vmax.f32 %v15964_v41, 0.0  ;;  %v6735_v25 = vmax.f32 %v18400_v8, 0.0 }
 0x9d4   :  { %v6736_v60 = vmax.f32 %v18401_v14, 0.0  ;;  %10231 = vmatprep.subr.bf16.mxu1 %v16140_v45  ;;  %10253 = vmatprep.subr.bf16.mxu0 %v16140_v45  ;;  %v6716_v7 = vmax.f32 %v6642_v37, 0.0  ;;  %v6717_v58 = vmax.f32 %v6643_v18, 0.0  ;;  %v6737_v15 = vmax.f32 %v18402_v26, 0.0  ;;  %v18413_v14 = vld [vmem:[#allocation33_spill] sm:$0xff] }
 0x9d5   :  { %v16207_v20 = vpack.c.bf16 %v6715_v62, %v6714_v1  ;;  %v16210_v52 = vpack.c.bf16 %v6735_v25, %v6734_v59  ;;  %v18403_v13 = vmax.f32 %v15976_v50, 0.0  ;;  %v18404_v41 = vmax.f32 %v15979_v4, 0.0 }
 0x9d6   :  { %v18405_v43 = vmax.f32 %v16024_v9, 0.0  ;;  %v18406_v2 = vmax.f32 %v16027_v10, 0.0  ;;  %v18407_v1 = vmax.f32 %v16030_v24, 0.0  ;;  %v18408_v62 = vmax.f32 %v16033_v55, 0.0 }
 0x9d7   :  { %v16216_v27 = vpack.c.bf16 %v18404_v41, %v18403_v13  ;;  %v16226_v18 = vpack.c.bf16 %v6717_v58, %v6716_v7  ;;  %v16228_v59 = vpack.c.bf16 %v6737_v15, %v6736_v60  ;;  %v18409_v50 = vmax.f32 %v15982_v28, 0.0 }
 0x9d8   :  { %v6802_v46 = vpack.c.bf16 %v18406_v2, %v18405_v43  ;;  %v6803_v37 = vpack.c.bf16 %v18408_v62, %v18407_v1  ;;  %v18410_v4 = vmax.f32 %v15985_v30, 0.0  ;;  %v18411_v9 = vmax.f32 %v16036_v48, 0.0 }
 0x9d9   :  { %v18412_v10 = vmax.f32 %v16039_v35, 0.0  ;;  %v6772_v24 = vmax.f32 %v18413_v14, 0.0  ;;  %v18414_v7 = vmax.f32 %v15988_v54, 0.0  ;;  %v18415_v60 = vmax.f32 %v15991_v5, 0.0 }
 0x9da   :  { %v16234_v8 = vpack.c.bf16 %v18410_v4, %v18409_v50  ;;  %v8512_v26 = vrot.slane %v6802_v46, 4  ;;  %v8514_v55 = vrot.slane %v6803_v37, 4  ;;  %v18416_v30 = vmax.f32 %v16042_v19, 0.0 }
 0x9db   :  { %v6804_v25 = vpack.c.bf16 %v18412_v10, %v18411_v9  ;;  %v6796_v58 = vpack.c.bf16 %v18415_v60, %v18414_v7  ;;  %v18417_v13 = vmax.f32 %v16045_v22, 0.0  ;;  %v18418_v35 = vmax.f32 %v15994_v53, 0.0  ;;  %10232 = vmatpush3.bf16.xpose.msra.mxu1 %v16164_v6  ;;  %10254 = vmatpush3.bf16.xpose.msra.mxu0 %v16164_v6 }
 0x9dc   :  { %v8498_v28 = vrot.slane %v16234_v8, 4  ;;  %v18419_v41 = vmax.f32 %v15997_v29, 0.0  ;;  %v16255_v2 = vsel %vm7268_vm2, %v8512_v26, %v8514_v55  ;;  %v18420_v5 = vmax.f32 %v16048_v36, 0.0  ;;  %10233 = vmatprep.subr.bf16.mxu1 %v16156_v17  ;;  %10255 = vmatprep.subr.bf16.mxu0 %v16156_v17 }
 0x9dd   :  { %v8516_v15 = vrot.slane %v6804_v25, 4  ;;  %v6805_v48 = vpack.c.bf16 %v18417_v13, %v18416_v30  ;;  %v8500_v54 = vrot.slane %v6796_v58, 4  ;;  %v18421_v46 = vmax.f32 %v16051_v40, 0.0 }
 0x9de   :  { %v6797_v43 = vpack.c.bf16 %v18419_v41, %v18418_v35  ;;  %v18422_v62 = vmax.f32 %v16000_v38, 0.0  ;;  %v18423_v19 = vmax.f32 %v16003_v57, 0.0  ;;  %v6773_v37 = vmax.f32 %v16083_v33, 0.0  ;;  %v18433_v35 = vld [vmem:[#allocation23_spill] sm:$0xff] }
 0x9df   :  { %v6806_v1 = vpack.c.bf16 %v18421_v46, %v18420_v5  ;;  %v16267_v53 = vsel %vm7268_vm2, %v8514_v55, %v8516_v15  ;;  %v8518_v29 = vrot.slane %v6805_v48, 4  ;;  %v16274_v36 = vsel %vm7268_vm2, %v8498_v28, %v8500_v54  ;;  %v18437_v46 = vld [vmem:[#allocation28_spill] sm:$0xff] }
 0x9e0   :  { %v6798_v22 = vpack.c.bf16 %v18423_v19, %v18422_v62  ;;  %v8502_v50 = vrot.slane %v6797_v43, 4  ;;  %v18424_v57 = vmax.f32 %v16054_v47, 0.0  ;;  %v18425_v33 = vmax.f32 %v16057_v44, 0.0  ;;  %v18439_v19 = vld [vmem:[#allocation29_spill] sm:$0xff] }
 0x9e1   :  { %v8520_v38 = vrot.slane %v6806_v1, 4  ;;  %v16283_v9 = vsel %vm7268_vm2, %v8516_v15, %v8518_v29  ;;  %v18426_v25 = vmax.f32 %v16006_v12, 0.0  ;;  %v18427_v14 = vmax.f32 %v16009_v21, 0.0 }
 0x9e2   :  { %v8504_v40 = vrot.slane %v6798_v22, 4  ;;  %v6807_v4 = vpack.c.bf16 %v18425_v33, %v18424_v57  ;;  %v16286_v10 = vsel %vm7268_vm2, %v8500_v54, %v8502_v50  ;;  %v18428_v60 = vmax.f32 %v16060_v3, 0.0  ;;  %v18435_v54 = vld [vmem:[#allocation6_spill] sm:$0xff] }
 0x9e3   :  { %v6799_v55 = vpack.c.bf16 %v18427_v14, %v18426_v25  ;;  %v16293_v47 = vsel %vm7268_vm2, %v8518_v29, %v8520_v38  ;;  %v18429_v58 = vmax.f32 %v16063_v63, 0.0  ;;  %v18430_v13 = vmax.f32 %v16012_v11, 0.0  ;;  %v18441_v11 = vld [vmem:[#allocation27_spill] sm:$0xff]  ;;  %10234 = vmatpush3.bf16.xpose.msra.mxu1 %v16172_v0  ;;  %10256 = vmatpush3.bf16.xpose.msra.mxu0 %v16172_v0 }
 0x9e4   :  { %v16296_v44 = vsel %vm7268_vm2, %v8502_v50, %v8504_v40  ;;  %v8522_v7 = vrot.slane %v6807_v4, 4  ;;  %v18431_v12 = vmax.f32 %v16015_v39, 0.0  ;;  %v18432_v21 = vmax.f32 %v16066_v56, 0.0  ;;  %10235 = vmatprep.subr.bf16.mxu1 %v16168_v34  ;;  %10257 = vmatprep.subr.bf16.mxu0 %v16168_v34 }
 0x9e5   :  { %v6808_v15 = vpack.c.bf16 %v18429_v58, %v18428_v60  ;;  %v8506_v30 = vrot.slane %v6799_v55, 4  ;;  %v18434_v41 = vmax.f32 %v18433_v35, 0.0  ;;  %v18436_v5 = vmax.f32 %v18435_v54, 0.0  ;;  %v11420_v35 = vld [vmem:[%s17829_s8 + $0x13c] ss:$8 sps:$4 sm:$0xff]  }
 0x9e6   :  { %v6800_v48 = vpack.c.bf16 %v18431_v12, %v18430_v13  ;;  %v18438_v1 = vmax.f32 %v18437_v46, 0.0  ;;  %v16315_v3 = vsel %vm7268_vm2, %v8520_v38, %v8522_v7  ;;  %v18440_v22 = vmax.f32 %v18439_v19, 0.0  ;;  %v18446_v13 = vld [vmem:[#allocation37_spill] sm:$0xff]  ;;  %v11426_v54 = vld [vmem:[%s17829_s8 + $0x15c] ss:$8 sps:$4 sm:$0xff]  }
 0x9e7   :  { %v6809_v43 = vpack.c.bf16 %v18434_v41, %v18432_v21  ;;  %v8524_v63 = vrot.slane %v6808_v15, 4  ;;  %v18442_v29 = vmax.f32 %v18441_v11, 0.0  ;;  %v16321_v50 = vpack.c.bf16 %v6773_v37, %v6772_v24  ;;  %v16373_v15 = vld [vmem:[%s17828_s7 + $0x10] sm:$0x3f]   ;;  %v11418_v21 = vld [vmem:[%s17829_s8 + $0x138] ss:$8 sps:$4 sm:$0xff]  }
 0x9e8   :  { %v6801_v62 = vpack.c.bf16 %v18438_v1, %v18436_v5  ;;  %v16324_v56 = vsel %vm7268_vm2, %v8504_v40, %v8506_v30  ;;  %v8508_v57 = vrot.slane %v6800_v48, 4  ;;  %v18444_v58 = vmov 0.0   ;;  %v11415_v12 = vld [vmem:[%s17829_s8 + $0x128] ss:$8 sps:$4 sm:$0xff]   ;;  %v11417_v48 = vld [vmem:[%s17829_s8 + $0x12c] ss:$8 sps:$4 sm:$0xff]  }
 0x9e9   :  { %v6810_v39 = vpack.c.bf16 %v18442_v29, %v18440_v22  ;;  %v8526_v33 = vrot.slane %v6809_v43, 4  ;;  %v16327_v25 = vsel %vm7268_vm2, %v8522_v7, %v8524_v63  ;;  %v8530_v38 = vrot.slane %v16321_v50, 4  ;;  %v11421_v41 = vld [vmem:[%s17829_s8 + $0x148] ss:$8 sps:$4 sm:$0xff]   ;;  %v11423_v43 = vld [vmem:[%s17829_s8 + $0x14c] ss:$8 sps:$4 sm:$0xff]  }
 0x9ea   :  { %v8510_v4 = vrot.slane %v6801_v62, 4  ;;  %v16331_v55 = vsel %vm7268_vm2, %v8506_v30, %v8508_v57  ;;  %v18445_v30 = vld [vmem:[#allocation40_spill] sm:$0xff]  ;;  %v11424_v5 = vld [vmem:[%s17829_s8 + $0x158] ss:$8 sps:$4 sm:$0xff]   ;;  %v11432_v62 = vld [vmem:[%s17829_s8 + $0x17c] ss:$8 sps:$4 sm:$0xff]  }
 0x9eb   :  { %v8528_v14 = vrot.slane %v6810_v39, 4  ;;  %v16334_v60 = vsel %vm7268_vm2, %v8524_v63, %v8526_v33  ;;  %10236 = vmatpush3.bf16.xpose.msra.mxu1 %v16184_v61  ;;  %10258 = vmatpush3.bf16.xpose.msra.mxu0 %v16184_v61  ;;  %v11427_v46 = vld [vmem:[%s17829_s8 + $0x168] ss:$8 sps:$4 sm:$0xff]   ;;  %v11429_v1 = vld [vmem:[%s17829_s8 + $0x16c] ss:$8 sps:$4 sm:$0xff]  }
 0x9ec   :  { %v16337_v24 = vsel %vm7268_vm2, %v8508_v57, %v8510_v4  ;;  %v16340_v37 = vsel %vm7268_vm2, %v8510_v4, %v8512_v26  ;;  %10237 = vmatprep.subr.bf16.mxu1 %v16178_v32  ;;  %10259 = vmatprep.subr.bf16.mxu0 %v16178_v32  ;;  %v18443_v26 = vld [vmem:[#allocation7_spill] sm:$0xff]  ;;  %v11433_v19 = vld [vmem:[%s17829_s8 + $0x188] ss:$8 sps:$4 sm:$0xff]   ;;  %v11435_v22 = vld [vmem:[%s17829_s8 + $0x18c] ss:$8 sps:$4 sm:$0xff]  }
 0x9ed   :  { %v16345_v40 = vsel %vm7268_vm2, %v8526_v33, %v8528_v14  ;;  %v16350_v7 = vsel %vm7268_vm2, %v8528_v14, %v8530_v38  ;;  %v11430_v63 = vld [vmem:[%s17829_s8 + $0x178] ss:$8 sps:$4 sm:$0xff]   ;;  %v11438_v29 = vld [vmem:[%s17829_s8 + $0x19c] ss:$8 sps:$4 sm:$0xff]   ;;  %v11439_v57 = vld [vmem:[%s17829_s8 + $0x1a8] ss:$8 sps:$4 sm:$0xff]  }
 0x9ee   :  { %v16465_v11 = vld [vmem:[%s17828_s7 + $0x18] sm:$0x3f]   ;;  %v11441_v33 = vld [vmem:[%s17829_s8 + $0x1ac] ss:$8 sps:$4 sm:$0xff]  }
 0x9ef   :  { %v11436_v39 = vld [vmem:[%s17829_s8 + $0x198] ss:$8 sps:$4 sm:$0xff]   ;;  %v11444_v4 = vld [vmem:[%s17829_s8 + $0x1bc] ss:$8 sps:$4 sm:$0xff]   ;;  %v11447_v14 = vld [vmem:[%s17829_s8 + $0x1cc] ss:$8 sps:$4 sm:$0xff]  }
 0x9f3   :  { %10238 = vmatpush3.bf16.xpose.msra.mxu1 %v16192_v51  ;;  %10260 = vmatpush3.bf16.xpose.msra.mxu0 %v16192_v51 }
 0x9f4   :  { %10239 = vmatprep.subr.bf16.mxu1 %v16188_v23  ;;  %10261 = vmatprep.subr.bf16.mxu0 %v16188_v23 }
 0x9fb   :  { %10240 = vmatpush3.bf16.xpose.msra.mxu1 %v16207_v20  ;;  %10262 = vmatpush3.bf16.xpose.msra.mxu0 %v16207_v20 }
 0x9fc   :  { %10241 = vmatprep.subr.bf16.mxu1 %v16200_v31  ;;  %10263 = vmatprep.subr.bf16.mxu0 %v16200_v31 }
 0xa03   :  { %10242 = vmatpush3.bf16.xpose.msra.mxu1 %v16226_v18  ;;  %10264 = vmatpush3.bf16.xpose.msra.mxu0 %v16226_v18 }
 0xa04   :  { %10271 = vmatprep.subr.bf16.mxu0 %v18443_v26  ;;  %10635 = vmatprep.subr.bf16.mxu1 %v18444_v58 }
 0xa0a   :  { %10244 = vmatmul.mubr.bf16.vlgmr.msra.gmra.mrb[196].mxu1 %v18445_v30  ;;  %10266 = vmatmul.mubr.bf16.vlgmr.msra.gmra.mrb[240].mxu0 %v18446_v13 }
 0xa0b   :  { %10636 = vmatpush3.bf16.xpose.msra.mxu1 %v16210_v52  ;;  %10272 = vmatpush3.bf16.xpose.msra.mxu0 %v16144_v42 }
 0xa0c   :  { %10273 = vmatprep.subr.bf16.mxu0 %v16136_v16  ;;  %10637 = vmatprep.subr.bf16.mxu1 %v18444_v58 }
 0xa0d   :  { %10641 = vmatprep.mubr.msk.bf16.mxu1 %vm11694_vm0, %v18444_v58  ;;  %10287 = vmatprep.mubr.bf16.mxu0 %v16373_v15 }
 0xa13   :  { %10638 = vmatpush3.bf16.xpose.msra.mxu1 %v16228_v59  ;;  %10274 = vmatpush3.bf16.xpose.msra.mxu0 %v16148_v49 }
 0xa14   :  { %10275 = vmatprep.subr.bf16.mxu0 %v16140_v45  ;;  %10639 = vmatprep.subr.bf16.mxu1 %v18444_v58 }
 0xa1b   :  { %10640 = vmatpush3.bf16.xpose.msra.mxu1 %v16216_v27  ;;  %10276 = vmatpush3.bf16.xpose.msra.mxu0 %v16164_v6 }
 0xa1c   :  { %10277 = vmatprep.subr.bf16.mxu0 %v16156_v17  ;;  %10645 = vmatprep.subr.bf16.mxu1 %v18444_v58 }
 0xa22   :  { %10642 = vmatmul.mubr.bf16.vlgmr.msra.gmra.mrb[200].mxu1 %v18445_v30  ;;  %v11453_v30 = vld [vmem:[%s17829_s8 + $0x1ec] ss:$8 sps:$4 sm:$0xff]  }
 0xa23   :  { %10646 = vmatpush3.bf16.xpose.msra.mxu1 %v16210_v52  ;;  %10278 = vmatpush3.bf16.xpose.msra.mxu0 %v16172_v0 }
 0xa24   :  { %10279 = vmatprep.subr.bf16.mxu0 %v16168_v34  ;;  %10647 = vmatprep.subr.bf16.mxu1 %v18444_v58 }
 0xa25   :  { %10651 = vmatprep.mubr.msk.bf16.mxu1 %vm11694_vm0, %v18444_v58 }
 0xa2b   :  { %10648 = vmatpush3.bf16.xpose.msra.mxu1 %v16228_v59  ;;  %10280 = vmatpush3.bf16.xpose.msra.mxu0 %v16184_v61 }
 0xa2c   :  { %10281 = vmatprep.subr.bf16.mxu0 %v16178_v32  ;;  %10649 = vmatprep.subr.bf16.mxu1 %v18444_v58 }
 0xa33   :  { %10650 = vmatpush3.bf16.xpose.msra.mxu1 %v16216_v27  ;;  %10282 = vmatpush3.bf16.xpose.msra.mxu0 %v16192_v51 }
 0xa34   :  { %10283 = vmatprep.subr.bf16.mxu0 %v16188_v23  ;;  %7275 = vmatprep.subr.bf16.mxu1 %v11417_v48  ;;  %v16534_v48 = vld [vmem:[%s17829_s8 + $0x21c] ss:$8 sps:$4 sm:$0xff]  }
 0xa3a   :  { %10652 = vmatmul.mubr.bf16.vlgmr.msra.gmra.mrb[204].mxu1 %v18446_v13  ;;  %v11456_v13 = vld [vmem:[%s17829_s8 + $0x1fc] ss:$8 sps:$4 sm:$0xff]  }
 0xa3b   :  { %10284 = vmatpush3.bf16.xpose.msra.mxu0 %v16207_v20  ;;  %7276 = vmatpush1.bf16.msra.mxu1 %v11415_v12  ;;  %v16523_v12 = vld [vmem:[%s17829_s8 + $0x208] ss:$8 sps:$4 sm:$0xff]  }
 0xa3c   :  { %10285 = vmatprep.subr.bf16.mxu0 %v16200_v31  ;;  %7277 = vmatprep.subr.bf16.mxu1 %v11420_v35 }
 0xa3f   :  { %7278 = vmatpush1.bf16.msra.mxu1 %v11418_v21 }
 0xa40   :  { %7279 = vmatprep.subr.bf16.mxu1 %v11423_v43 }
 0xa43   :  { %10286 = vmatpush3.bf16.xpose.msra.mxu0 %v16226_v18  ;;  %7280 = vmatpush1.bf16.msra.mxu1 %v11421_v41  ;;  %v16603_v41 = vld [vmem:[%s17829_s8 + $0x228] ss:$8 sps:$4 sm:$0xff]  }
 0xa44   :  { %10655 = vmatprep.subr.bf16.mxu0 %v18444_v58  ;;  %7281 = vmatprep.subr.bf16.mxu1 %v11426_v54  ;;  %v16609_v54 = vld [vmem:[%s17829_s8 + $0x23c] ss:$8 sps:$4 sm:$0xff]  }
 0xa47   :  { %7282 = vmatpush1.bf16.msra.mxu1 %v11424_v5  ;;  %v9900_v5 = vld [vmem:[%s17829_s8 + $0x248] sm:$0xff] }
 0xa48   :  { %7283 = vmatprep.subr.bf16.mxu1 %v11429_v1  ;;  %v18447_v1 = vmov 0  }
 0xa4a   :  { %10288 = vmatmul.mubr.bf16.vlgmr.msra.gmra.mrb[244].mxu0 %v16373_v15 }
 0xa4b   :  { %10656 = vmatpush3.bf16.xpose.msra.mxu0 %v16210_v52  ;;  %10661 = vmatprep.mubr.msk.bf16.mxu0 %vm11694_vm0, %v18444_v58 }
 0xa4c   :  { %10657 = vmatprep.subr.bf16.mxu0 %v18444_v58  ;;  %7284 = vmatpush1.bf16.msra.mxu1 %v11427_v46  ;;  %v16620_v46 = vld [vmem:[%s17829_s8 + $0x238] ss:$8 sps:$4 sm:$0xff]  }
 0xa4d   :  { %7285 = vmatprep.subr.bf16.mxu1 %v11432_v62  ;;  %v16624_v62 = vcombine.high %v9900_v5, %v9900_v5 }
 0xa50   :  { %7286 = vmatpush1.bf16.msra.mxu1 %v11430_v63  ;;  %v9937_v63 = vcombine.low %v9900_v5, %v9900_v5  ;;  %v16741_v5 = vld [vmem:[%s17829_s8 + $0x54] ss:$8 sps:$4 sm:$0xff]  }
 0xa51   :  { %7287 = vmatprep.subr.bf16.mxu1 %v11435_v22  ;;  %v16635_v22 = vld [vmem:[%s17829_s8 + $0x4] ss:$8 sps:$4 sm:$0xff]  }
 0xa53   :  { %10658 = vmatpush3.bf16.xpose.msra.mxu0 %v16228_v59 }
 0xa54   :  { %10659 = vmatprep.subr.bf16.mxu0 %v18444_v58  ;;  %7288 = vmatpush1.bf16.msra.mxu1 %v11433_v19  ;;  %v16630_v19 = vsel %vm7268_vm2, %v9937_v63, 0  ;;  %v16793_v63 = vld [vmem:[%s17829_s8 + $0x80] ss:$8 sps:$4 sm:$0xff]  }
 0xa55   :  { %7289 = vmatprep.subr.bf16.mxu1 %v11438_v29  ;;  %18454 = vst [vmem:[#allocation19_spill] sm:$0xff] %v16793_v63 }
 0xa58   :  { %7290 = vmatpush1.bf16.msra.mxu1 %v11436_v39 }
 0xa59   :  { %7291 = vmatprep.subr.bf16.mxu1 %v11441_v33  ;;  %v16806_v33 = vld [vmem:[%s17829_s8 + $0x90] ss:$8 sps:$4 sm:$0xff]  }
 0xa5a   :  { %18456 = vst [vmem:[#allocation38_spill] sm:$0xff] %v16806_v33 }
 0xa5b   :  { %10660 = vmatpush3.bf16.xpose.msra.mxu0 %v16216_v27 }
 0xa5c   :  { %10293 = vmatprep.subr.bf16.mxu0 %v18443_v26  ;;  %7292 = vmatpush1.bf16.msra.mxu1 %v11439_v57  ;;  %v11450_v26 = vld [vmem:[%s17829_s8 + $0x1dc] ss:$8 sps:$4 sm:$0xff]  }
 0xa5d   :  { %7293 = vmatprep.subr.bf16.mxu1 %v11444_v4 }
 0xa62   :  { %10662 = vmatmul.mubr.bf16.vlgmr.msra.gmra.mrb[248].mxu0 %v16373_v15 }
 0xa63   :  { %10294 = vmatpush3.bf16.xpose.msra.mxu0 %v16144_v42  ;;  %10309 = vmatprep.mubr.bf16.mxu0 %v16465_v11  ;;  %v11442_v42 = vld [vmem:[%s17829_s8 + $0x1b8] ss:$8 sps:$4 sm:$0xff]  }
 0xa64   :  { %10295 = vmatprep.subr.bf16.mxu0 %v16136_v16  ;;  %v11445_v16 = vld [vmem:[%s17829_s8 + $0x1c8] ss:$8 sps:$4 sm:$0xff]   ;;  %7294 = vmatpush1.bf16.msra.mxu1 %v11442_v42  ;;  %v18448_v42 = vld [vmem:[#allocation39_spill] sm:$0xff] }
 0xa65   :  { %7295 = vmatprep.subr.bf16.mxu1 %v11447_v14 }
 0xa68   :  { %7296 = vmatpush1.bf16.msra.mxu1 %v11445_v16  ;;  %v16655_v16 = vrot.slane %v18448_v42, 4  ;;  %v16754_v42 = vld [vmem:[%s17829_s8 + $0x50] ss:$8 sps:$4 sm:$0xff]  }
 0xa69   :  { %7297 = vmatprep.subr.bf16.mxu1 %v11450_v26 }
 0xa6a   :  { %v16661_v14 = vsel %vm7268_vm2, %v8530_v38, %v16655_v16  ;;  %v16675_v38 = vld [vmem:[%s17829_s8 + $0x14] ss:$8 sps:$4 sm:$0xff]  }
 0xa6b   :  { %10296 = vmatpush3.bf16.xpose.msra.mxu0 %v16148_v49  ;;  %v11448_v49 = vld [vmem:[%s17829_s8 + $0x1d8] ss:$8 sps:$4 sm:$0xff]  }
 0xa6c   :  { %10297 = vmatprep.subr.bf16.mxu0 %v16140_v45  ;;  %v11451_v45 = vld [vmem:[%s17829_s8 + $0x1e8] ss:$8 sps:$4 sm:$0xff]   ;;  %7298 = vmatpush1.bf16.msra.mxu1 %v11448_v49 }
 0xa6d   :  { %7299 = vmatprep.subr.bf16.mxu1 %v11453_v30  ;;  %v16670_v30 = vld [vmem:[%s17829_s8] ss:$8 sps:$4 sm:$0xff]  }
 0xa70   :  { %7300 = vmatpush1.bf16.msra.mxu1 %v11451_v45 }
 0xa71   :  { %7301 = vmatprep.subr.bf16.mxu1 %v11456_v13 }
 0xa73   :  { %10298 = vmatpush3.bf16.xpose.msra.mxu0 %v16164_v6  ;;  %v16517_v6 = vld [vmem:[%s17829_s8 + $0x1f8] ss:$8 sps:$4 sm:$0xff]  }
 0xa74   :  { %10299 = vmatprep.subr.bf16.mxu0 %v16156_v17  ;;  %v16528_v17 = vld [vmem:[%s17829_s8 + $0x20c] ss:$8 sps:$4 sm:$0xff]   ;;  %7302 = vmatpush1.bf16.msra.mxu1 %v16517_v6 }
 0xa75   :  { %7303 = vmatprep.subr.bf16.mxu1 %v16528_v17 }
 0xa78   :  { %7304 = vmatpush1.bf16.msra.mxu1 %v16523_v12 }
 0xa79   :  { %7305 = vmatprep.subr.bf16.mxu1 %v16534_v48 }
 0xa7b   :  { %10300 = vmatpush3.bf16.xpose.msra.mxu0 %v16172_v0  ;;  %v16542_v0 = vld [vmem:[%s17829_s8 + $0x218] ss:$8 sps:$4 sm:$0xff]  }
 0xa7c   :  { %10301 = vmatprep.subr.bf16.mxu0 %v16168_v34  ;;  %v16549_v34 = vld [vmem:[%s17829_s8 + $0x22c] ss:$8 sps:$4 sm:$0xff]   ;;  %7306 = vmatpush1.bf16.msra.mxu1 %v16542_v0 }
 0xa7d   :  { %7318 = vmatprep.subr.bf16.mxu1 %v16549_v34 }
 0xa83   :  { %10302 = vmatpush3.bf16.xpose.msra.mxu0 %v16184_v61 }
 0xa84   :  { %10303 = vmatprep.subr.bf16.mxu0 %v16178_v32  ;;  %v8497_v32 = vrot.slane %v16216_v27, 4 }
 0xa86   :  { %v16574_v61 = vsel %vm7268_vm2, %v8497_v32, %v8498_v28  ;;  %v16684_v32 = vld [vmem:[%s17829_s8 + $0x10] ss:$8 sps:$4 sm:$0xff]   ;;  %v16813_v28 = vld [vmem:[%s17829_s8 + $0xa4] ss:$8 sps:$4 sm:$0xff]  }
 0xa87   :  { %18457 = vst [vmem:[#allocation35_spill] sm:$0xff] %v16813_v28 }
 0xa8b   :  { %10304 = vmatpush3.bf16.xpose.msra.mxu0 %v16192_v51 }
 0xa8c   :  { %10305 = vmatprep.subr.bf16.mxu0 %v16188_v23  ;;  %v16580_v23 = vld [vmem:[%s17828_s7] sm:$0x3f]  }
 0xa93   :  { %10306 = vmatpush3.bf16.xpose.msra.mxu0 %v16207_v20 }
 0xa94   :  { %10307 = vmatprep.subr.bf16.mxu0 %v16200_v31 }
 0xa9b   :  { %10308 = vmatpush3.bf16.xpose.msra.mxu0 %v16226_v18 }
 0xa9c   :  { %10665 = vmatprep.subr.bf16.mxu0 %v18444_v58 }
 0xaa2   :  { %10310 = vmatmul.mubr.bf16.vlgmr.msra.gmra.mrb[252].mxu0 %v16465_v11 }
 0xaa3   :  { %10666 = vmatpush3.bf16.xpose.msra.mxu0 %v16210_v52  ;;  %10671 = vmatprep.mubr.msk.bf16.mxu0 %vm11694_vm0, %v18444_v58 }
 0xaa4   :  { %10667 = vmatprep.subr.bf16.mxu0 %v18444_v58 }
 0xaab   :  { %10668 = vmatpush3.bf16.xpose.msra.mxu0 %v16228_v59 }
 0xaac   :  { %10669 = vmatprep.subr.bf16.mxu0 %v18444_v58 }
 0xab3   :  { %10670 = vmatpush3.bf16.xpose.msra.mxu0 %v16216_v27 }
 0xab4   :  { %10315 = vmatprep.subr.bf16.mxu0 %v16255_v2 }
 0xaba   :  { %10672 = vmatmul.mubr.bf16.vlgmr.msra.gmra.mrb[0].mxu0 %v16465_v11 }
 0xabb   :  { %10316 = vmatpush3.bf16.xpose.msra.mxu0 %v16574_v61  ;;  %10331 = vmatprep.mubr.bf16.mxu0 %v16580_v23 }
 0xabc   :  { %10317 = vmatprep.subr.bf16.mxu0 %v16267_v53 }
 0xac3   :  { %10318 = vmatpush3.bf16.xpose.msra.mxu0 %v16274_v36 }
 0xac4   :  { %10319 = vmatprep.subr.bf16.mxu0 %v16283_v9 }
 0xacb   :  { %10320 = vmatpush3.bf16.xpose.msra.mxu0 %v16286_v10 }
 0xacc   :  { %10321 = vmatprep.subr.bf16.mxu0 %v16293_v47 }
 0xad3   :  { %10322 = vmatpush3.bf16.xpose.msra.mxu0 %v16296_v44 }
 0xad4   :  { %10323 = vmatprep.subr.bf16.mxu0 %v16315_v3 }
 0xadb   :  { %10324 = vmatpush3.bf16.xpose.msra.mxu0 %v16324_v56 }
 0xadc   :  { %10325 = vmatprep.subr.bf16.mxu0 %v16327_v25 }
 0xadd   :  { %v6988_v51 = vpop.f32.mrb[240].mxu0  ;;  %v16592_v31 = vpop.f32.mrb[196].mxu1 }
 0xade   :  { %v6990_v20 = vpop.f32.mrb[241].mxu0  ;;  %v16594_v52 = vpop.f32.mrb[197].mxu1 }
 0xadf   :  { %v6992_v27 = vpop.f32.mrb[242].mxu0  ;;  %v16596_v18 = vpop.f32.mrb[198].mxu1 }
 0xae0   :  { %v7038_v59 = vpack.c.bf16 %v6992_v27, %v6988_v51  ;;  %v6994_v8 = vpop.f32.mrb[243].mxu0  ;;  %v6861_v21 = vpop.f32.mrb[199].mxu1  ;;  %v16691_v51 = vld [vmem:[%s17829_s8 + $0x24] ss:$8 sps:$4 sm:$0xff]   ;;  %v16716_v27 = vld [vmem:[%s17829_s8 + $0x30] ss:$8 sps:$4 sm:$0xff]  }
 0xae1   :  { %v7039_v35 = vpack.c.bf16 %v6994_v8, %v6990_v20  ;;  %v6906_v43 = vpack.c.bf16 %v6861_v21, %v16594_v52  ;;  %v16703_v20 = vld [vmem:[%s17829_s8 + $0x20] ss:$8 sps:$4 sm:$0xff]   ;;  %v16709_v52 = vld [vmem:[%s17829_s8 + $0x34] ss:$8 sps:$4 sm:$0xff]  }
 0xae3   :  { %10326 = vmatpush3.bf16.xpose.msra.mxu0 %v16331_v55  ;;  %7307 = vmatprep.mubr.bf16.mxu1 %v7039_v35  ;;  %v16733_v35 = vld [vmem:[%s17829_s8 + $0x40] ss:$8 sps:$4 sm:$0xff]  }
 0xae4   :  { %10327 = vmatprep.subr.bf16.mxu0 %v16334_v60  ;;  %7308 = vmatmul.mubr.bf16.vlgmr.msra.gmra.mrb[208].mxu1 %v7038_v59  ;;  %v16723_v59 = vld [vmem:[%s17829_s8 + $0x44] ss:$8 sps:$4 sm:$0xff]  }
 0xae5   :  { %7319 = vmatpush1.bf16.msra.mxu1 %v16603_v41  ;;  %7350 = vmatprep.mubr.bf16.mxu1 %v18447_v1 }
 0xae6   :  { %7320 = vmatprep.subr.bf16.mxu1 %v16609_v54 }
 0xae9   :  { %7321 = vmatpush1.bf16.msra.mxu1 %v16620_v46 }
 0xaea   :  { %9939 = vmatprep.subr.msk.bf16.mxu1 %vm7268_vm2, %v16624_v62 }
 0xaeb   :  { %10328 = vmatpush3.bf16.xpose.msra.mxu0 %v16337_v24 }
 0xaec   :  { %10329 = vmatprep.subr.bf16.mxu0 %v16345_v40 }
 0xaed   :  { %7323 = vmatpush1.bf16.msra.mxu1 %v16630_v19 }
 0xaee   :  { %7555 = vmatprep.subr.bf16.mxu1 %v16635_v22 }
 0xaf3   :  { %10330 = vmatpush3.bf16.xpose.msra.mxu0 %v16340_v37 }
 0xaf4   :  { %10675 = vmatprep.subr.bf16.mxu0 %v18444_v58 }
 0xaf5   :  { %v16643_v29 = vpop.f32.mrb[200].mxu1 }
 0xaf6   :  { %v10643_v39 = vpop.f32.mrb[201].mxu1 }
 0xaf7   :  { %v16645_v57 = vpop.f32.mrb[202].mxu1 }
 0xaf8   :  { %v10644_v4 = vpop.f32.mrb[203].mxu1 }
 0xaf9   :  { %v16799_v4 = vld [vmem:[%s17829_s8 + $0x94] ss:$8 sps:$4 sm:$0xff]  }
 0xafa   :  { %10332 = vmatmul.mubr.bf16.vlgmr.msra.gmra.mrb[4].mxu0 %v16580_v23  ;;  %18455 = vst [vmem:[#allocation36_spill] sm:$0xff] %v16799_v4 }
 0xafb   :  { %10676 = vmatpush3.bf16.xpose.msra.mxu0 %v16350_v7  ;;  %10681 = vmatprep.mubr.msk.bf16.mxu0 %vm11694_vm0, %v18444_v58 }
 0xafc   :  { %10677 = vmatprep.subr.bf16.mxu0 %v18444_v58 }
 0xb03   :  { %10678 = vmatpush3.bf16.xpose.msra.mxu0 %v16661_v14 }
 0xb04   :  { %10679 = vmatprep.subr.bf16.mxu0 %v18444_v58 }
 0xb0b   :  { %10680 = vmatpush3.bf16.xpose.msra.mxu0 %v16655_v16 }
 0xb0c   :  { %10337 = vmatprep.subr.bf16.mxu0 %v16255_v2 }
 0xb0d   :  { %v7031_v26 = vpop.f32.mrb[204].mxu1 }
 0xb0e   :  { %v10653_v49 = vpop.f32.mrb[205].mxu1 }
 0xb0f   :  { %v7034_v45 = vpop.f32.mrb[206].mxu1  ;;  %v16767_v49 = vld [vmem:[%s17829_s8 + $0x60] ss:$8 sps:$4 sm:$0xff]  }
 0xb10   :  { %v7040_v50 = vpack.c.bf16 %v7034_v45, %v7031_v26  ;;  %v10654_v13 = vpop.f32.mrb[207].mxu1  ;;  %v16761_v26 = vld [vmem:[%s17829_s8 + $0x64] ss:$8 sps:$4 sm:$0xff]   ;;  %18450 = vst [vmem:[#allocation9_spill] sm:$0xff] %v16767_v49  ;;  %v16773_v45 = vld [vmem:[%s17829_s8 + $0x74] ss:$8 sps:$4 sm:$0xff]  }
 0xb11   :  { %18449 = vst [vmem:[#allocation8_spill] sm:$0xff] %v16761_v26  ;;  %18451 = vst [vmem:[#allocation12_spill] sm:$0xff] %v16773_v45  ;;  %v16787_v13 = vld [vmem:[%s17829_s8 + $0x84] ss:$8 sps:$4 sm:$0xff]  }
 0xb12   :  { %9940 = vmatmul.mubr.msk.bf16.vlgmr.msra.gmra.mrb[208].mxu1 %vm7264_vm3, %v7040_v50  ;;  %10682 = vmatmul.mubr.bf16.vlgmr.msra.gmra.mrb[8].mxu0 %v16580_v23  ;;  %v16696_v23 = vld [vmem:[%s17828_s7 + $0x8] sm:$0x3f]   ;;  %v16780_v50 = vld [vmem:[%s17829_s8 + $0x70] ss:$8 sps:$4 sm:$0xff]   ;;  %18453 = vst [vmem:[#allocation22_spill] sm:$0xff] %v16787_v13 }
 0xb13   :  { %7556 = vmatpush1.bf16.msra.mxu1 %v16670_v30  ;;  %10338 = vmatpush3.bf16.xpose.msra.mxu0 %v16574_v61  ;;  %18452 = vst [vmem:[#allocation10_spill] sm:$0xff] %v16780_v50 }
 0xb14   :  { %10339 = vmatprep.subr.bf16.mxu0 %v16267_v53  ;;  %7557 = vmatprep.subr.bf16.mxu1 %v16675_v38 }
 0xb15   :  { %7587 = vmatprep.mubr.bf16.mxu1 %v6906_v43  ;;  %10353 = vmatprep.mubr.bf16.mxu0 %v16696_v23 }
 0xb17   :  { %7558 = vmatpush1.bf16.msra.mxu1 %v16684_v32 }
 0xb18   :  { %7559 = vmatprep.subr.bf16.mxu1 %v16691_v51 }
 0xb1b   :  { %7560 = vmatpush1.bf16.msra.mxu1 %v16703_v20  ;;  %10340 = vmatpush3.bf16.xpose.msra.mxu0 %v16274_v36 }
 0xb1c   :  { %10341 = vmatprep.subr.bf16.mxu0 %v16283_v9  ;;  %7561 = vmatprep.subr.bf16.mxu1 %v16709_v52 }
 0xb1d   :  { %v16725_v8 = vpop.f32.mrb[244].mxu0 }
 0xb1e   :  { %v16727_v21 = vpop.f32.mrb[245].mxu0 }
 0xb1f   :  { %7562 = vmatpush1.bf16.msra.mxu1 %v16716_v27  ;;  %v16735_v43 = vpop.f32.mrb[246].mxu0 }
 0xb20   :  { %7563 = vmatprep.subr.bf16.mxu1 %v16723_v59  ;;  %v16745_v39 = vpop.f32.mrb[247].mxu0 }
 0xb23   :  { %7564 = vmatpush1.bf16.msra.mxu1 %v16733_v35  ;;  %10342 = vmatpush3.bf16.xpose.msra.mxu0 %v16286_v10 }
 0xb24   :  { %10343 = vmatprep.subr.bf16.mxu0 %v16293_v47  ;;  %7565 = vmatprep.subr.bf16.mxu1 %v16741_v5 }
 0xb27   :  { %7566 = vmatpush1.bf16.msra.mxu1 %v16754_v42 }
 0xb28   :  { %7567 = vmatprep.subr.bf16.mxu1 %v16761_v26 }
 0xb2b   :  { %7568 = vmatpush1.bf16.msra.mxu1 %v16767_v49  ;;  %10344 = vmatpush3.bf16.xpose.msra.mxu0 %v16296_v44  ;;  %v16857_v49 = vld [vmem:[%s17829_s8 + $0xd4] ss:$8 sps:$4 sm:$0xff]  }
 0xb2c   :  { %10345 = vmatprep.subr.bf16.mxu0 %v16315_v3  ;;  %7569 = vmatprep.subr.bf16.mxu1 %v16773_v45  ;;  %18463 = vst [vmem:[#allocation11_spill] sm:$0xff] %v16857_v49 }
 0xb2f   :  { %7570 = vmatpush1.bf16.msra.mxu1 %v16780_v50 }
 0xb30   :  { %7571 = vmatprep.subr.bf16.mxu1 %v16787_v13 }
 0xb33   :  { %7572 = vmatpush1.bf16.msra.mxu1 %v16793_v63  ;;  %10346 = vmatpush3.bf16.xpose.msra.mxu0 %v16324_v56  ;;  %v16821_v63 = vld [vmem:[%s17829_s8 + $0xa0] ss:$8 sps:$4 sm:$0xff]  }
 0xb34   :  { %10347 = vmatprep.subr.bf16.mxu0 %v16327_v25  ;;  %7573 = vmatprep.subr.bf16.mxu1 %v16799_v4  ;;  %18458 = vst [vmem:[#allocation41_spill] sm:$0xff] %v16821_v63  ;;  %v16829_v4 = vld [vmem:[%s17829_s8 + $0xb4] ss:$8 sps:$4 sm:$0xff]  }
 0xb35   :  { %v16815_v13 = vpop.f32.mrb[248].mxu0  ;;  %18459 = vst [vmem:[#allocation16_spill] sm:$0xff] %v16829_v4 }
 0xb36   :  { %v10663_v50 = vpop.f32.mrb[249].mxu0 }
 0xb37   :  { %7574 = vmatpush1.bf16.msra.mxu1 %v16806_v33  ;;  %v16823_v45 = vpop.f32.mrb[250].mxu0  ;;  %v16838_v33 = vld [vmem:[%s17829_s8 + $0xb0] ss:$8 sps:$4 sm:$0xff]  }
 0xb38   :  { %7575 = vmatprep.subr.bf16.mxu1 %v16813_v28  ;;  %v10664_v50 = vpop.f32.mrb[251].mxu0  ;;  %18460 = vst [vmem:[#allocation17_spill] sm:$0xff] %v16838_v33  ;;  %v16845_v28 = vld [vmem:[%s17829_s8 + $0xc4] ss:$8 sps:$4 sm:$0xff]  }
 0xb39   :  { %18461 = vst [vmem:[#allocation24_spill] sm:$0xff] %v16845_v28  ;;  %v16851_v50 = vld [vmem:[%s17829_s8 + $0xc0] ss:$8 sps:$4 sm:$0xff]  }
 0xb3a   :  { %18462 = vst [vmem:[#allocation14_spill] sm:$0xff] %v16851_v50 }
 0xb3b   :  { %7576 = vmatpush1.bf16.msra.mxu1 %v16821_v63  ;;  %10348 = vmatpush3.bf16.xpose.msra.mxu0 %v16331_v55  ;;  %v18472_v63 = vpack.c.bf16 %v16596_v18, %v16592_v31  ;;  %v16940_v18 = vld [vmem:[%s17829_s8 + $0x254] ss:$8 sps:$4 sm:$0xff]  }
 0xb3c   :  { %10349 = vmatprep.subr.bf16.mxu0 %v16334_v60  ;;  %7577 = vmatprep.subr.bf16.mxu1 %v16829_v4  ;;  %v16883_v4 = vld [vmem:[%s17829_s8 + $0xf4] ss:$8 sps:$4 sm:$0xff]   ;;  %18476 = vst [vmem:[#allocation4_spill] sm:$0xff] %v16940_v18 }
 0xb3d   :  { %18467 = vst [vmem:[#allocation30_spill] sm:$0xff] %v16883_v4 }
 0xb3f   :  { %7578 = vmatpush1.bf16.msra.mxu1 %v16838_v33  ;;  %v16864_v33 = vld [vmem:[%s17829_s8 + $0xd0] ss:$8 sps:$4 sm:$0xff]  }
 0xb40   :  { %7579 = vmatprep.subr.bf16.mxu1 %v16845_v28  ;;  %18464 = vst [vmem:[#allocation25_spill] sm:$0xff] %v16864_v33  ;;  %v16871_v28 = vld [vmem:[%s17829_s8 + $0xe4] ss:$8 sps:$4 sm:$0xff]  }
 0xb41   :  { %18465 = vst [vmem:[#allocation21_spill] sm:$0xff] %v16871_v28 }
 0xb43   :  { %7580 = vmatpush1.bf16.msra.mxu1 %v16851_v50  ;;  %10350 = vmatpush3.bf16.xpose.msra.mxu0 %v16337_v24  ;;  %v16877_v50 = vld [vmem:[%s17829_s8 + $0xe0] ss:$8 sps:$4 sm:$0xff]  }
 0xb44   :  { %10351 = vmatprep.subr.bf16.mxu0 %v16345_v40  ;;  %7581 = vmatprep.subr.bf16.mxu1 %v16857_v49  ;;  %18466 = vst [vmem:[#allocation18_spill] sm:$0xff] %v16877_v50  ;;  %v16909_v49 = vld [vmem:[%s17829_s8 + $0x114] ss:$8 sps:$4 sm:$0xff]  }
 0xb45   :  { %18471 = vst [vmem:[#allocation15_spill] sm:$0xff] %v16909_v49 }
 0xb47   :  { %7582 = vmatpush1.bf16.msra.mxu1 %v16864_v33  ;;  %v16890_v33 = vld [vmem:[%s17829_s8 + $0xf0] ss:$8 sps:$4 sm:$0xff]  }
 0xb48   :  { %7583 = vmatprep.subr.bf16.mxu1 %v16871_v28  ;;  %18468 = vst [vmem:[#allocation26_spill] sm:$0xff] %v16890_v33  ;;  %v16897_v28 = vld [vmem:[%s17829_s8 + $0x104] ss:$8 sps:$4 sm:$0xff]  }
 0xb49   :  { %18469 = vst [vmem:[#allocation31_spill] sm:$0xff] %v16897_v28 }
 0xb4b   :  { %7584 = vmatpush1.bf16.msra.mxu1 %v16877_v50  ;;  %10352 = vmatpush3.bf16.xpose.msra.mxu0 %v16340_v37  ;;  %v16903_v50 = vld [vmem:[%s17829_s8 + $0x100] ss:$8 sps:$4 sm:$0xff]  }
 0xb4c   :  { %10359 = vmatprep.subr.bf16.mxu0 %v16255_v2  ;;  %7585 = vmatprep.subr.bf16.mxu1 %v16883_v4  ;;  %18470 = vst [vmem:[#allocation34_spill] sm:$0xff] %v16903_v50  ;;  %v6944_v4 = vld [vmem:[%s17829_s8 + $0x120] sm:$0xff] }
 0xb4d   :  { %v9977_v26 = vcombine.low %v6944_v4, %v6944_v4 }
 0xb4f   :  { %7586 = vmatpush1.bf16.msra.mxu1 %v16890_v33  ;;  %v16927_v33 = vcombine.high %v6944_v4, %v6944_v4  ;;  %v16935_v31 = vsel %vm7268_vm2, %v9977_v26, 0  ;;  %v18479_v4 = vpack.c.bf16 %v16645_v57, %v16643_v29  ;;  %v16964_v26 = vld [vmem:[%s17829_s8 + $0x260] ss:$8 sps:$4 sm:$0xff]   ;;  %v16980_v29 = vld [vmem:[%s17829_s8 + $0x270] ss:$8 sps:$4 sm:$0xff]  }
 0xb50   :  { %7598 = vmatprep.subr.bf16.mxu1 %v16897_v28  ;;  %v16923_v28 = vld [vmem:[%s17829_s8 + $0x110] ss:$8 sps:$4 sm:$0xff]   ;;  %18475 = vst [vmem:[#allocation32_spill] sm:$0xff] %v16935_v31  ;;  %18480 = vst [vmem:[#allocation33_spill] sm:$0xff] %v16964_v26  ;;  %v16987_v57 = vld [vmem:[%s17829_s8 + $0x284] ss:$8 sps:$4 sm:$0xff]  }
 0xb51   :  { %18473 = vst [vmem:[#allocation13_spill] sm:$0xff] %v16923_v28  ;;  %18474 = vst [vmem:[#allocation20_spill] sm:$0xff] %v16927_v33 }
 0xb52   :  { %7588 = vmatmul.mubr.bf16.vlgmr.msra.gmra.mrb[208].mxu1 %v18472_v63  ;;  %10354 = vmatmul.mubr.bf16.vlgmr.msra.gmra.mrb[12].mxu0 %v16696_v23  ;;  %v16954_v63 = vld [vmem:[%s17829_s8 + $0x264] ss:$8 sps:$4 sm:$0xff]   ;;  %18483 = vst [vmem:[#allocation6_spill] sm:$0xff] %v16980_v29  ;;  %18484 = vst [vmem:[#allocation28_spill] sm:$0xff] %v16987_v57 }
 0xb53   :  { %7599 = vmatpush1.bf16.msra.mxu1 %v16903_v50  ;;  %10360 = vmatpush3.bf16.xpose.msra.mxu0 %v16574_v61  ;;  %18478 = vst [vmem:[#allocation5_spill] sm:$0xff] %v16954_v63 }
 0xb54   :  { %10361 = vmatprep.subr.bf16.mxu0 %v16267_v53  ;;  %7600 = vmatprep.subr.bf16.mxu1 %v16909_v49 }
 0xb55   :  { %7630 = vmatprep.mubr.bf16.mxu1 %v18447_v1  ;;  %10375 = vmatprep.mubr.bf16.mxu0 %v16373_v15  ;;  %v16947_v15 = vld [vmem:[%s17829_s8 + $0x250] ss:$8 sps:$4 sm:$0xff]  }
 0xb56   :  { %18477 = vst [vmem:[#allocation3_spill] sm:$0xff] %v16947_v15 }
 0xb57   :  { %7601 = vmatpush1.bf16.msra.mxu1 %v16923_v28  ;;  %v9281_v28 = vld [vmem:[%s17830_s15] sm:$0xff] }
 0xb58   :  { %9979 = vmatprep.subr.msk.bf16.mxu1 %vm7268_vm2, %v16927_v33  ;;  %9286 = vperm.xlu0 %11068, %v9281_v28   ;;  %v17188_v28 = vld [vmem:[%s17829_s8 + $0x350] ss:$8 sps:$4 sm:$0xff]  }
 0xb5b   :  { %7603 = vmatpush1.bf16.msra.mxu1 %v16935_v31  ;;  %10362 = vmatpush3.bf16.xpose.msra.mxu0 %v16274_v36  ;;  %v16973_v31 = vld [vmem:[%s17829_s8 + $0x274] ss:$8 sps:$4 sm:$0xff]  }
 0xb5c   :  { %10363 = vmatprep.subr.bf16.mxu0 %v16283_v9  ;;  %7969 = vmatprep.subr.bf16.mxu1 %v16940_v18  ;;  %v18481_v18 = vpack.c.bf16 %v16745_v39, %v16727_v21  ;;  %18482 = vst [vmem:[#allocation23_spill] sm:$0xff] %v16973_v31  ;;  %v16993_v21 = vld [vmem:[%s17829_s8 + $0x280] ss:$8 sps:$4 sm:$0xff]   ;;  %v16999_v39 = vld [vmem:[%s17829_s8 + $0x294] ss:$8 sps:$4 sm:$0xff]  }
 0xb5d   :  { %18485 = vst [vmem:[#allocation29_spill] sm:$0xff] %v16993_v21  ;;  %18486 = vst [vmem:[#allocation27_spill] sm:$0xff] %v16999_v39 }
 0xb5e   :  { %9980 = vmatmul.mubr.msk.bf16.vlgmr.msra.gmra.mrb[208].mxu1 %vm7264_vm3, %v18479_v4  ;;  %v17013_v4 = vld [vmem:[%s17829_s8 + $0x2a4] ss:$8 sps:$4 sm:$0xff]  }
 0xb5f   :  { %7970 = vmatpush1.bf16.msra.mxu1 %v16947_v15  ;;  %8001 = vmatprep.mubr.bf16.mxu1 %v18481_v18  ;;  %v17006_v18 = vld [vmem:[%s17829_s8 + $0x290] ss:$8 sps:$4 sm:$0xff]   ;;  %18488 = vst [vmem:[#allocation40_spill] sm:$0xff] %v17013_v4 }
 0xb60   :  { %7971 = vmatprep.subr.bf16.mxu1 %v16954_v63  ;;  %18487 = vst [vmem:[#allocation7_spill] sm:$0xff] %v17006_v18 }
 0xb63   :  { %7972 = vmatpush1.bf16.msra.mxu1 %v16964_v26  ;;  %10364 = vmatpush3.bf16.xpose.msra.mxu0 %v16286_v10  ;;  %v17077_v26 = vld [vmem:[%s17829_s8 + $0x2e4] ss:$8 sps:$4 sm:$0xff]  }
 0xb64   :  { %10365 = vmatprep.subr.bf16.mxu0 %v16293_v47  ;;  %7973 = vmatprep.subr.bf16.mxu1 %v16973_v31  ;;  %18496 = vst [vmem:[#allocation47_spill] sm:$0xff] %v17077_v26 }
 0xb67   :  { %7974 = vmatpush1.bf16.msra.mxu1 %v16980_v29 }
 0xb68   :  { %7975 = vmatprep.subr.bf16.mxu1 %v16987_v57  ;;  %v17025_v57 = vld [vmem:[%s17829_s8 + $0x2b4] ss:$8 sps:$4 sm:$0xff]  }
 0xb69   :  { %18490 = vst [vmem:[#allocation39_spill] sm:$0xff] %v17025_v57 }
 0xb6b   :  { %7976 = vmatpush1.bf16.msra.mxu1 %v16993_v21  ;;  %10366 = vmatpush3.bf16.xpose.msra.mxu0 %v16296_v44  ;;  %v17019_v21 = vld [vmem:[%s17829_s8 + $0x2a0] ss:$8 sps:$4 sm:$0xff]  }
 0xb6c   :  { %10367 = vmatprep.subr.bf16.mxu0 %v16315_v3  ;;  %7977 = vmatprep.subr.bf16.mxu1 %v16999_v39  ;;  %18489 = vst [vmem:[#allocation37_spill] sm:$0xff] %v17019_v21 }
 0xb6f   :  { %7978 = vmatpush1.bf16.msra.mxu1 %v17006_v18  ;;  %v17032_v18 = vld [vmem:[%s17829_s8 + $0x2b0] ss:$8 sps:$4 sm:$0xff]  }
 0xb70   :  { %7979 = vmatprep.subr.bf16.mxu1 %v17013_v4  ;;  %18491 = vst [vmem:[#allocation42_spill] sm:$0xff] %v17032_v18  ;;  %v17039_v4 = vld [vmem:[%s17829_s8 + $0x2c4] ss:$8 sps:$4 sm:$0xff]  }
 0xb71   :  { %18492 = vst [vmem:[#allocation43_spill] sm:$0xff] %v17039_v4 }
 0xb73   :  { %7980 = vmatpush1.bf16.msra.mxu1 %v17019_v21  ;;  %10368 = vmatpush3.bf16.xpose.msra.mxu0 %v16324_v56  ;;  %v17049_v21 = vld [vmem:[%s17829_s8 + $0x2c0] ss:$8 sps:$4 sm:$0xff]  }
 0xb74   :  { %10369 = vmatprep.subr.bf16.mxu0 %v16327_v25  ;;  %7981 = vmatprep.subr.bf16.mxu1 %v17025_v57  ;;  %18493 = vst [vmem:[#allocation44_spill] sm:$0xff] %v17049_v21  ;;  %v17057_v57 = vld [vmem:[%s17829_s8 + $0x2d4] ss:$8 sps:$4 sm:$0xff]  }
 0xb75   :  { %v17041_v39 = vpop.f32.mrb[252].mxu0  ;;  %18494 = vst [vmem:[#allocation45_spill] sm:$0xff] %v17057_v57 }
 0xb76   :  { %v17043_v29 = vpop.f32.mrb[253].mxu0 }
 0xb77   :  { %7982 = vmatpush1.bf16.msra.mxu1 %v17032_v18  ;;  %v17051_v31 = vpop.f32.mrb[254].mxu0  ;;  %v17083_v18 = vld [vmem:[%s17829_s8 + $0x2e0] ss:$8 sps:$4 sm:$0xff]  }
 0xb78   :  { %7983 = vmatprep.subr.bf16.mxu1 %v17039_v4  ;;  %v17061_v63 = vpop.f32.mrb[255].mxu0  ;;  %v17070_v4 = vld [vmem:[%s17829_s8 + $0x2d0] ss:$8 sps:$4 sm:$0xff]   ;;  %18497 = vst [vmem:[#allocation48_spill] sm:$0xff] %v17083_v18 }
 0xb79   :  { %18495 = vst [vmem:[#allocation46_spill] sm:$0xff] %v17070_v4 }
 0xb7b   :  { %7984 = vmatpush1.bf16.msra.mxu1 %v17049_v21  ;;  %10370 = vmatpush3.bf16.xpose.msra.mxu0 %v16331_v55  ;;  %v17089_v21 = vld [vmem:[%s17829_s8 + $0x2f4] ss:$8 sps:$4 sm:$0xff]  }
 0xb7c   :  { %10371 = vmatprep.subr.bf16.mxu0 %v16334_v60  ;;  %7985 = vmatprep.subr.bf16.mxu1 %v17057_v57  ;;  %18498 = vst [vmem:[#allocation49_spill] sm:$0xff] %v17089_v21  ;;  %v17115_v57 = vld [vmem:[%s17829_s8 + $0x314] ss:$8 sps:$4 sm:$0xff]  }
 0xb7d   :  { %18502 = vst [vmem:[#allocation53_spill] sm:$0xff] %v17115_v57 }
 0xb7f   :  { %7986 = vmatpush1.bf16.msra.mxu1 %v17070_v4  ;;  %v17096_v4 = vld [vmem:[%s17829_s8 + $0x2f0] ss:$8 sps:$4 sm:$0xff]  }
 0xb80   :  { %7987 = vmatprep.subr.bf16.mxu1 %v17077_v26  ;;  %18499 = vst [vmem:[#allocation50_spill] sm:$0xff] %v17096_v4  ;;  %v17103_v26 = vld [vmem:[%s17829_s8 + $0x304] ss:$8 sps:$4 sm:$0xff]  }
 0xb81   :  { %18500 = vst [vmem:[#allocation51_spill] sm:$0xff] %v17103_v26 }
 0xb83   :  { %7988 = vmatpush1.bf16.msra.mxu1 %v17083_v18  ;;  %10372 = vmatpush3.bf16.xpose.msra.mxu0 %v16337_v24  ;;  %v17109_v18 = vld [vmem:[%s17829_s8 + $0x300] ss:$8 sps:$4 sm:$0xff]  }
 0xb84   :  { %10373 = vmatprep.subr.bf16.mxu0 %v16345_v40  ;;  %7989 = vmatprep.subr.bf16.mxu1 %v17089_v21  ;;  %18501 = vst [vmem:[#allocation52_spill] sm:$0xff] %v17109_v18 }
 0xb87   :  { %7990 = vmatpush1.bf16.msra.mxu1 %v17096_v4  ;;  %v17122_v4 = vld [vmem:[%s17829_s8 + $0x310] ss:$8 sps:$4 sm:$0xff]  }
 0xb88   :  { %7991 = vmatprep.subr.bf16.mxu1 %v17103_v26  ;;  %18503 = vst [vmem:[#allocation54_spill] sm:$0xff] %v17122_v4  ;;  %v17128_v26 = vld [vmem:[%s17829_s8 + $0x324] ss:$8 sps:$4 sm:$0xff]  }
 0xb89   :  { %18504 = vst [vmem:[#allocation55_spill] sm:$0xff] %v17128_v26 }
 0xb8b   :  { %7992 = vmatpush1.bf16.msra.mxu1 %v17109_v18  ;;  %10374 = vmatpush3.bf16.xpose.msra.mxu0 %v16340_v37  ;;  %v17137_v18 = vld [vmem:[%s17829_s8 + $0x320] ss:$8 sps:$4 sm:$0xff]  }
 0xb8c   :  { %7993 = vmatprep.subr.bf16.mxu1 %v17115_v57  ;;  %10695 = vmatprep.subr.bf16.mxu0 %v18444_v58  ;;  %18505 = vst [vmem:[#allocation56_spill] sm:$0xff] %v17137_v18  ;;  %v17145_v57 = vld [vmem:[%s17829_s8 + $0x334] ss:$8 sps:$4 sm:$0xff]  }
 0xb8d   :  { %v17131_v21 = vpop.f32.mrb[0].mxu0  ;;  %18506 = vst [vmem:[#allocation57_spill] sm:$0xff] %v17145_v57 }
 0xb8e   :  { %v10673_v15 = vpop.f32.mrb[1].mxu0 }
 0xb8f   :  { %7994 = vmatpush1.bf16.msra.mxu1 %v17122_v4  ;;  %v17139_v33 = vpop.f32.mrb[2].mxu0  ;;  %v11663_v4 = vld [vmem:[%s17828_s7 + $0x10] sm:$0x3f]  }
 0xb90   :  { %7995 = vmatprep.subr.bf16.mxu1 %v17128_v26  ;;  %v10674_v15 = vpop.f32.mrb[3].mxu0  ;;  %v17157_v26 = vld [vmem:[%s17829_s8 + $0x330] ss:$8 sps:$4 sm:$0xff]  }
 0xb91   :  { %18507 = vst [vmem:[#allocation58_spill] sm:$0xff] %v17157_v26  ;;  %v17163_v15 = vld [vmem:[%s17829_s8 + $0x344] ss:$8 sps:$4 sm:$0xff]  }
 0xb92   :  { %10376 = vmatmul.mubr.bf16.vlgmr.msra.gmra.mrb[16].mxu0 %v11663_v4  ;;  %18508 = vst [vmem:[#allocation59_spill] sm:$0xff] %v17163_v15 }
 0xb93   :  { %7996 = vmatpush1.bf16.msra.mxu1 %v17137_v18  ;;  %10696 = vmatpush3.bf16.xpose.msra.mxu0 %v16350_v7  ;;  %v17181_v18 = vld [vmem:[%s17829_s8 + $0x354] ss:$8 sps:$4 sm:$0xff]  }
 0xb94   :  { %7997 = vmatprep.subr.bf16.mxu1 %v17145_v57  ;;  %10697 = vmatprep.subr.bf16.mxu0 %v18444_v58  ;;  %v17175_v57 = vld [vmem:[%s17829_s8 + $0x340] ss:$8 sps:$4 sm:$0xff]   ;;  %18510 = vst [vmem:[#allocation61_spill] sm:$0xff] %v17181_v18 }
 0xb95   :  { %10701 = vmatprep.mubr.msk.bf16.mxu0 %vm11694_vm0, %v18444_v58  ;;  %18509 = vst [vmem:[#allocation60_spill] sm:$0xff] %v17175_v57 }
 0xb97   :  { %7998 = vmatpush1.bf16.msra.mxu1 %v17157_v26  ;;  %v18511_v26 = vpack.c.bf16 %v16735_v43, %v16725_v8  ;;  %v17224_v43 = vld [vmem:[%s17829_s8 + $0x37c] ss:$8 sps:$4 sm:$0xff]  }
 0xb98   :  { %7999 = vmatprep.subr.bf16.mxu1 %v17163_v15  ;;  %v17194_v15 = vld [vmem:[%s17829_s8 + $0x364] ss:$8 sps:$4 sm:$0xff]  }
 0xb9b   :  { %8000 = vmatpush1.bf16.msra.mxu1 %v17175_v57  ;;  %10698 = vmatpush3.bf16.xpose.msra.mxu0 %v16661_v14  ;;  %v10020_v57 = vld [vmem:[%s17829_s8 + $0x370] sm:$0xff] }
 0xb9c   :  { %8012 = vmatprep.subr.bf16.mxu1 %v17181_v18  ;;  %10699 = vmatprep.subr.bf16.mxu0 %v18444_v58  ;;  %v17207_v18 = vld [vmem:[%s17829_s8 + $0x360] ss:$8 sps:$4 sm:$0xff]   ;;  %v17211_v49 = vcombine.high %v10020_v57, %v10020_v57  ;;  %v10057_v50 = vcombine.low %v10020_v57, %v10020_v57 }
 0xb9d   :  { %v17247_v57 = vld [vmem:[%s17829_s8 + $0x388] ss:$8 sps:$4 sm:$0xff]  }
 0xb9e   :  { %8002 = vmatmul.mubr.bf16.vlgmr.msra.gmra.mrb[208].mxu1 %v18511_v26  ;;  %v17219_v8 = vsel %vm7268_vm2, %v10057_v50, 0  ;;  %v17230_v26 = vld [vmem:[%s17829_s8 + $0x378] ss:$8 sps:$4 sm:$0xff]   ;;  %v18512_v50 = vpack.c.bf16 %v16823_v45, %v16815_v13  ;;  %v17254_v45 = vld [vmem:[%s17829_s8 + $0x39c] ss:$8 sps:$4 sm:$0xff]   ;;  %v18513_v13 = vpack.c.bf16 %v17061_v63, %v17043_v29 }
 0xb9f   :  { %8013 = vmatpush1.bf16.msra.mxu1 %v17188_v28  ;;  %8044 = vmatprep.mubr.bf16.mxu1 %v18447_v1  ;;  %v17284_v63 = vld [vmem:[%s17829_s8 + $0x3bc] ss:$8 sps:$4 sm:$0xff]   ;;  %v17303_v29 = vld [vmem:[%s17829_s8 + $0x3c8] ss:$8 sps:$4 sm:$0xff]  }
 0xba0   :  { %8014 = vmatprep.subr.bf16.mxu1 %v17194_v15 }
 0xba3   :  { %8015 = vmatpush1.bf16.msra.mxu1 %v17207_v18  ;;  %10700 = vmatpush3.bf16.xpose.msra.mxu0 %v16655_v16 }
 0xba4   :  { %10381 = vmatprep.subr.bf16.mxu0 %v16255_v2  ;;  %10059 = vmatprep.subr.msk.bf16.mxu1 %vm7268_vm2, %v17211_v49  ;;  %v17236_v2 = vld [vmem:[%s17829_s8 + $0x38c] ss:$8 sps:$4 sm:$0xff]  }
 0xba7   :  { %8017 = vmatpush1.bf16.msra.mxu1 %v17219_v8 }
 0xba8   :  { %8387 = vmatprep.subr.bf16.mxu1 %v17224_v43 }
 0xbaa   :  { %10060 = vmatmul.mubr.msk.bf16.vlgmr.msra.gmra.mrb[208].mxu1 %vm7264_vm3, %v18512_v50  ;;  %10702 = vmatmul.mubr.bf16.vlgmr.msra.gmra.mrb[20].mxu0 %v11663_v4  ;;  %v17310_v4 = vld [vmem:[%s17829_s8 + $0x3dc] ss:$8 sps:$4 sm:$0xff]   ;;  %v17329_v50 = vld [vmem:[%s17829_s8 + $0x3e8] ss:$8 sps:$4 sm:$0xff]  }
 0xbab   :  { %8388 = vmatpush1.bf16.msra.mxu1 %v17230_v26  ;;  %10382 = vmatpush3.bf16.xpose.msra.mxu0 %v16574_v61  ;;  %v17264_v61 = vld [vmem:[%s17829_s8 + $0x398] ss:$8 sps:$4 sm:$0xff]   ;;  %18514 = vst [vmem:[#allocation62_spill] sm:$0xff] %v17310_v4  ;;  %18517 = vst [vmem:[#allocation65_spill] sm:$0xff] %v17329_v50 }
 0xbac   :  { %10383 = vmatprep.subr.bf16.mxu0 %v16267_v53  ;;  %8389 = vmatprep.subr.bf16.mxu1 %v17236_v2  ;;  %v17270_v53 = vld [vmem:[%s17829_s8 + $0x3ac] ss:$8 sps:$4 sm:$0xff]  }
 0xbad   :  { %8419 = vmatprep.mubr.bf16.mxu1 %v18513_v13  ;;  %10397 = vmatprep.mubr.bf16.mxu0 %v16465_v11  ;;  %v17277_v11 = vld [vmem:[%s17829_s8 + $0x3a8] ss:$8 sps:$4 sm:$0xff]   ;;  %v17336_v13 = vld [vmem:[%s17829_s8 + $0x3fc] ss:$8 sps:$4 sm:$0xff]  }
 0xbae   :  { %18518 = vst [vmem:[#allocation66_spill] sm:$0xff] %v17336_v13 }
 0xbaf   :  { %8390 = vmatpush1.bf16.msra.mxu1 %v17247_v57 }
 0xbb0   :  { %8391 = vmatprep.subr.bf16.mxu1 %v17254_v45 }
 0xbb3   :  { %8392 = vmatpush1.bf16.msra.mxu1 %v17264_v61  ;;  %10384 = vmatpush3.bf16.xpose.msra.mxu0 %v16274_v36  ;;  %v17290_v36 = vld [vmem:[%s17829_s8 + $0x3b8] ss:$8 sps:$4 sm:$0xff]  }
 0xbb4   :  { %10385 = vmatprep.subr.bf16.mxu0 %v16283_v9  ;;  %8393 = vmatprep.subr.bf16.mxu1 %v17270_v53  ;;  %v17296_v9 = vld [vmem:[%s17829_s8 + $0x3cc] ss:$8 sps:$4 sm:$0xff]  }
 0xbb7   :  { %8394 = vmatpush1.bf16.msra.mxu1 %v17277_v11 }
 0xbb8   :  { %8395 = vmatprep.subr.bf16.mxu1 %v17284_v63 }
 0xbbb   :  { %8396 = vmatpush1.bf16.msra.mxu1 %v17290_v36  ;;  %10386 = vmatpush3.bf16.xpose.msra.mxu0 %v16286_v10  ;;  %v17316_v10 = vld [vmem:[%s17829_s8 + $0x3d8] ss:$8 sps:$4 sm:$0xff]  }
 0xbbc   :  { %10387 = vmatprep.subr.bf16.mxu0 %v16293_v47  ;;  %8397 = vmatprep.subr.bf16.mxu1 %v17296_v9  ;;  %18515 = vst [vmem:[#allocation63_spill] sm:$0xff] %v17316_v10  ;;  %v17322_v47 = vld [vmem:[%s17829_s8 + $0x3ec] ss:$8 sps:$4 sm:$0xff]  }
 0xbbd   :  { %18516 = vst [vmem:[#allocation64_spill] sm:$0xff] %v17322_v47 }
 0xbbf   :  { %8398 = vmatpush1.bf16.msra.mxu1 %v17303_v29 }
 0xbc0   :  { %8399 = vmatprep.subr.bf16.mxu1 %v17310_v4 }
 0xbc3   :  { %8400 = vmatpush1.bf16.msra.mxu1 %v17316_v10  ;;  %10388 = vmatpush3.bf16.xpose.msra.mxu0 %v16296_v44  ;;  %v17342_v44 = vld [vmem:[%s17829_s8 + $0x3f8] ss:$8 sps:$4 sm:$0xff]  }
 0xbc4   :  { %10389 = vmatprep.subr.bf16.mxu0 %v16315_v3  ;;  %8401 = vmatprep.subr.bf16.mxu1 %v17322_v47  ;;  %18519 = vst [vmem:[#allocation67_spill] sm:$0xff] %v17342_v44  ;;  %v17348_v3 = vld [vmem:[%s17829_s8 + $0x40c] ss:$8 sps:$4 sm:$0xff]  }
 0xbc5   :  { %18520 = vst [vmem:[#allocation68_spill] sm:$0xff] %v17348_v3 }
 0xbc7   :  { %8402 = vmatpush1.bf16.msra.mxu1 %v17329_v50  ;;  %v17355_v50 = vld [vmem:[%s17829_s8 + $0x408] ss:$8 sps:$4 sm:$0xff]  }
 0xbc8   :  { %8403 = vmatprep.subr.bf16.mxu1 %v17336_v13  ;;  %18521 = vst [vmem:[#allocation69_spill] sm:$0xff] %v17355_v50  ;;  %v17362_v13 = vld [vmem:[%s17829_s8 + $0x41c] ss:$8 sps:$4 sm:$0xff]  }
 0xbc9   :  { %18522 = vst [vmem:[#allocation70_spill] sm:$0xff] %v17362_v13 }
 0xbcb   :  { %8404 = vmatpush1.bf16.msra.mxu1 %v17342_v44  ;;  %10390 = vmatpush3.bf16.xpose.msra.mxu0 %v16324_v56  ;;  %v17372_v56 = vld [vmem:[%s17829_s8 + $0x418] ss:$8 sps:$4 sm:$0xff]  }
 0xbcc   :  { %10391 = vmatprep.subr.bf16.mxu0 %v16327_v25  ;;  %8405 = vmatprep.subr.bf16.mxu1 %v17348_v3  ;;  %v17380_v25 = vld [vmem:[%s17829_s8 + $0x42c] ss:$8 sps:$4 sm:$0xff]   ;;  %v17400_v3 = vld [vmem:[%s17829_s8 + $0x43c] ss:$8 sps:$4 sm:$0xff]  }
 0xbcd   :  { %v17364_v47 = vpop.f32.mrb[4].mxu0  ;;  %18523 = vst [vmem:[#allocation71_spill] sm:$0xff] %v17400_v3 }
 0xbce   :  { %v17366_v10 = vpop.f32.mrb[5].mxu0 }
 0xbcf   :  { %8406 = vmatpush1.bf16.msra.mxu1 %v17355_v50  ;;  %v17374_v44 = vpop.f32.mrb[6].mxu0  ;;  %v17419_v50 = vld [vmem:[%s17829_s8 + $0x448] ss:$8 sps:$4 sm:$0xff]  }
 0xbd0   :  { %8407 = vmatprep.subr.bf16.mxu1 %v17362_v13  ;;  %v17384_v4 = vpop.f32.mrb[7].mxu0  ;;  %v17393_v13 = vld [vmem:[%s17829_s8 + $0x428] ss:$8 sps:$4 sm:$0xff]   ;;  %18526 = vst [vmem:[#allocation74_spill] sm:$0xff] %v17419_v50 }
 0xbd3   :  { %8408 = vmatpush1.bf16.msra.mxu1 %v17372_v56  ;;  %10392 = vmatpush3.bf16.xpose.msra.mxu0 %v16331_v55  ;;  %v17406_v55 = vld [vmem:[%s17829_s8 + $0x438] ss:$8 sps:$4 sm:$0xff]  }
 0xbd4   :  { %10393 = vmatprep.subr.bf16.mxu0 %v16334_v60  ;;  %8409 = vmatprep.subr.bf16.mxu1 %v17380_v25  ;;  %18524 = vst [vmem:[#allocation72_spill] sm:$0xff] %v17406_v55  ;;  %v17412_v60 = vld [vmem:[%s17829_s8 + $0x44c] ss:$8 sps:$4 sm:$0xff]  }
 0xbd5   :  { %18525 = vst [vmem:[#allocation73_spill] sm:$0xff] %v17412_v60 }
 0xbd7   :  { %8410 = vmatpush1.bf16.msra.mxu1 %v17393_v13 }
 0xbd8   :  { %8411 = vmatprep.subr.bf16.mxu1 %v17400_v3  ;;  %v17426_v3 = vld [vmem:[%s17829_s8 + $0x45c] ss:$8 sps:$4 sm:$0xff]  }
 0xbd9   :  { %18527 = vst [vmem:[#allocation75_spill] sm:$0xff] %v17426_v3 }
 0xbdb   :  { %8412 = vmatpush1.bf16.msra.mxu1 %v17406_v55  ;;  %10394 = vmatpush3.bf16.xpose.msra.mxu0 %v16337_v24  ;;  %v17432_v24 = vld [vmem:[%s17829_s8 + $0x458] ss:$8 sps:$4 sm:$0xff]  }
 0xbdc   :  { %10395 = vmatprep.subr.bf16.mxu0 %v16345_v40  ;;  %8413 = vmatprep.subr.bf16.mxu1 %v17412_v60  ;;  %18528 = vst [vmem:[#allocation76_spill] sm:$0xff] %v17432_v24  ;;  %v17438_v40 = vld [vmem:[%s17829_s8 + $0x46c] ss:$8 sps:$4 sm:$0xff]   ;;  %v18532_v60 = vpack.c.bf16 %v17051_v31, %v17041_v39 }
 0xbdd   :  { %18529 = vst [vmem:[#allocation77_spill] sm:$0xff] %v17438_v40 }
 0xbdf   :  { %8414 = vmatpush1.bf16.msra.mxu1 %v17419_v50  ;;  %v17445_v50 = vld [vmem:[%s17829_s8 + $0x468] ss:$8 sps:$4 sm:$0xff]  }
 0xbe0   :  { %8415 = vmatprep.subr.bf16.mxu1 %v17426_v3  ;;  %18530 = vst [vmem:[#allocation78_spill] sm:$0xff] %v17445_v50  ;;  %v17451_v3 = vld [vmem:[%s17829_s8 + $0x47c] ss:$8 sps:$4 sm:$0xff]  }
 0xbe1   :  { %18531 = vst [vmem:[#allocation79_spill] sm:$0xff] %v17451_v3 }
 0xbe3   :  { %8416 = vmatpush1.bf16.msra.mxu1 %v17432_v24  ;;  %10396 = vmatpush3.bf16.xpose.msra.mxu0 %v16340_v37  ;;  %v17458_v37 = vld [vmem:[%s17829_s8 + $0x478] ss:$8 sps:$4 sm:$0xff]  }
 0xbe4   :  { %8417 = vmatprep.subr.bf16.mxu1 %v17438_v40  ;;  %10705 = vmatprep.subr.bf16.mxu0 %v18444_v58  ;;  %v17464_v40 = vld [vmem:[%s17829_s8 + $0x48c] ss:$8 sps:$4 sm:$0xff]   ;;  %v10100_v24 = vld [vmem:[%s17829_s8 + $0x498] sm:$0xff] }
 0xbe5   :  { %v17483_v55 = vcombine.high %v10100_v24, %v10100_v24  ;;  %v10137_v31 = vcombine.low %v10100_v24, %v10100_v24  ;;  %v11673_v24 = vld [vmem:[%s17829_s8 + $0x16c] ss:$8 sps:$4 sm:$0xff]  }
 0xbe7   :  { %8418 = vmatpush1.bf16.msra.mxu1 %v17445_v50  ;;  %v11664_v50 = vld [vmem:[%s17828_s7 + $0x18] sm:$0x3f]   ;;  %v17493_v39 = vsel %vm7268_vm2, %v10137_v31, 0  ;;  %v11674_v31 = vld [vmem:[%s17829_s8 + $0x168] ss:$8 sps:$4 sm:$0xff]  }
 0xbe8   :  { %8430 = vmatprep.subr.bf16.mxu1 %v17451_v3  ;;  %v17480_v3 = vld [vmem:[%s17829_s8 + $0x488] ss:$8 sps:$4 sm:$0xff]  }
 0xbea   :  { %8420 = vmatmul.mubr.bf16.vlgmr.msra.gmra.mrb[208].mxu1 %v18532_v60  ;;  %10398 = vmatmul.mubr.bf16.vlgmr.msra.gmra.mrb[24].mxu0 %v11664_v50  ;;  %v18533_v60 = vpack.c.bf16 %v17139_v33, %v17131_v21  ;;  %v11665_v33 = vld [vmem:[%s17829_s8 + $0x12c] ss:$8 sps:$4 sm:$0xff]   ;;  %v11671_v21 = vld [vmem:[%s17829_s8 + $0x15c] ss:$8 sps:$4 sm:$0xff]  }
 0xbeb   :  { %8431 = vmatpush1.bf16.msra.mxu1 %v17458_v37  ;;  %10706 = vmatpush3.bf16.xpose.msra.mxu0 %v16350_v7 }
 0xbec   :  { %8432 = vmatprep.subr.bf16.mxu1 %v17464_v40  ;;  %10707 = vmatprep.subr.bf16.mxu0 %v18444_v58 }
 0xbed   :  { %8462 = vmatprep.mubr.bf16.mxu1 %v18447_v1  ;;  %10711 = vmatprep.mubr.msk.bf16.mxu0 %vm11694_vm0, %v18444_v58 }
 0xbef   :  { %8433 = vmatpush1.bf16.msra.mxu1 %v17480_v3 }
 0xbf0   :  { %10139 = vmatprep.subr.msk.bf16.mxu1 %vm7268_vm2, %v17483_v55 }
 0xbf3   :  { %8435 = vmatpush1.bf16.msra.mxu1 %v17493_v39  ;;  %10708 = vmatpush3.bf16.xpose.msra.mxu0 %v16661_v14 }
 0xbf4   :  { %10685 = vmatprep.subr.bf16.mxu1 %v18444_v58  ;;  %10709 = vmatprep.subr.bf16.mxu0 %v18444_v58 }
 0xbf6   :  { %10140 = vmatmul.mubr.msk.bf16.vlgmr.msra.gmra.mrb[208].mxu1 %vm7264_vm3, %v18533_v60  ;;  %v11675_v60 = vld [vmem:[%s17829_s8 + $0x17c] ss:$8 sps:$4 sm:$0xff]  }
 0xbf7   :  { %10691 = vmatprep.mubr.msk.bf16.mxu1 %vm11694_vm0, %v18444_v58 }
 0xbfb   :  { %10710 = vmatpush3.bf16.xpose.msra.mxu0 %v16655_v16 }
 0xbfc   :  { %10686 = vmatpush3.bf16.xpose.msra.mxu1 %v16350_v7  ;;  %v11666_v7 = vld [vmem:[%s17829_s8 + $0x128] ss:$8 sps:$4 sm:$0xff]  }
 0xbfd   :  { %10687 = vmatprep.subr.bf16.mxu1 %v18444_v58 }
 0xc02   :  { %10712 = vmatmul.mubr.bf16.vlgmr.msra.gmra.mrb[28].mxu0 %v11664_v50  ;;  %v11672_v50 = vld [vmem:[%s17829_s8 + $0x158] ss:$8 sps:$4 sm:$0xff]  }
 0xc04   :  { %10688 = vmatpush3.bf16.xpose.msra.mxu1 %v16661_v14  ;;  %v11667_v14 = vld [vmem:[%s17829_s8 + $0x13c] ss:$8 sps:$4 sm:$0xff]  }
 0xc05   :  { %10689 = vmatprep.subr.bf16.mxu1 %v18444_v58  ;;  %v11668_v58 = vld [vmem:[%s17829_s8 + $0x138] ss:$8 sps:$4 sm:$0xff]  }
 0xc0c   :  { %10690 = vmatpush3.bf16.xpose.msra.mxu1 %v16655_v16  ;;  %v11669_v16 = vld [vmem:[%s17829_s8 + $0x14c] ss:$8 sps:$4 sm:$0xff]  }
 0xc0d   :  { %8730 = vmatprep.subr.bf16.mxu1 %v11665_v33  ;;  %v11676_v33 = vld [vmem:[%s17829_s8 + $0x178] ss:$8 sps:$4 sm:$0xff]  }
 0xc13   :  { %10692 = vmatmul.mubr.bf16.vlgmr.msra.gmra.mrb[212].mxu1 %v16696_v23  ;;  %v11670_v23 = vld [vmem:[%s17829_s8 + $0x148] ss:$8 sps:$4 sm:$0xff]  }
 0xc14   :  { %8731 = vmatpush1.bf16.msra.mxu1 %v11666_v7  ;;  %v11677_v7 = vld [vmem:[%s17829_s8 + $0x18c] ss:$8 sps:$4 sm:$0xff]  }
 0xc15   :  { %8732 = vmatprep.subr.bf16.mxu1 %v11667_v14  ;;  %v11678_v14 = vld [vmem:[%s17829_s8 + $0x188] ss:$8 sps:$4 sm:$0xff]  }
 0xc18   :  { %8733 = vmatpush1.bf16.msra.mxu1 %v11668_v58  ;;  %v17554_v58 = vpop.f32.mrb[8].mxu0 }
 0xc19   :  { %8734 = vmatprep.subr.bf16.mxu1 %v11669_v16  ;;  %v11679_v16 = vld [vmem:[%s17829_s8 + $0x19c] ss:$8 sps:$4 sm:$0xff]  }
 0xc1c   :  { %8735 = vmatpush1.bf16.msra.mxu1 %v11670_v23  ;;  %v10683_v23 = vpop.f32.mrb[9].mxu0 }
 0xc1d   :  { %8736 = vmatprep.subr.bf16.mxu1 %v11671_v21  ;;  %v17559_v21 = vpop.f32.mrb[10].mxu0  ;;  %v11686_v23 = vld [vmem:[%s17829_s8 + $0x1c8] ss:$8 sps:$4 sm:$0xff]  }
 0xc20   :  { %8737 = vmatpush1.bf16.msra.mxu1 %v11672_v50  ;;  %v10684_v50 = vpop.f32.mrb[11].mxu0 }
 0xc21   :  { %8738 = vmatprep.subr.bf16.mxu1 %v11673_v24  ;;  %v11680_v24 = vld [vmem:[%s17829_s8 + $0x198] ss:$8 sps:$4 sm:$0xff]   ;;  %v11687_v50 = vld [vmem:[%s17829_s8 + $0x1dc] ss:$8 sps:$4 sm:$0xff]  }
 0xc24   :  { %8739 = vmatpush1.bf16.msra.mxu1 %v11674_v31  ;;  %v8639_v31 = vpack.c.bf16 %v17559_v21, %v17554_v58 }
 0xc25   :  { %8740 = vmatprep.subr.bf16.mxu1 %v11675_v60  ;;  %v11681_v60 = vld [vmem:[%s17829_s8 + $0x1ac] ss:$8 sps:$4 sm:$0xff]  }
 0xc28   :  { %8741 = vmatpush1.bf16.msra.mxu1 %v11676_v33  ;;  %v11682_v33 = vld [vmem:[%s17829_s8 + $0x1a8] ss:$8 sps:$4 sm:$0xff]  }
 0xc29   :  { %8742 = vmatprep.subr.bf16.mxu1 %v11677_v7  ;;  %v11683_v7 = vld [vmem:[%s17829_s8 + $0x1bc] ss:$8 sps:$4 sm:$0xff]  }
 0xc2c   :  { %8743 = vmatpush1.bf16.msra.mxu1 %v11678_v14  ;;  %v11684_v14 = vld [vmem:[%s17829_s8 + $0x1b8] ss:$8 sps:$4 sm:$0xff]  }
 0xc2d   :  { %8744 = vmatprep.subr.bf16.mxu1 %v11679_v16  ;;  %v11685_v16 = vld [vmem:[%s17829_s8 + $0x1cc] ss:$8 sps:$4 sm:$0xff]  }
 0xc30   :  { %8745 = vmatpush1.bf16.msra.mxu1 %v11680_v24  ;;  %v11688_v24 = vld [vmem:[%s17829_s8 + $0x1d8] ss:$8 sps:$4 sm:$0xff]  }
 0xc31   :  { %8746 = vmatprep.subr.bf16.mxu1 %v11681_v60  ;;  %v11689_v60 = vld [vmem:[%s17829_s8 + $0x1ec] ss:$8 sps:$4 sm:$0xff]  }
 0xc34   :  { %8747 = vmatpush1.bf16.msra.mxu1 %v11682_v33  ;;  %v11690_v33 = vld [vmem:[%s17829_s8 + $0x1e8] ss:$8 sps:$4 sm:$0xff]  }
 0xc35   :  { %8748 = vmatprep.subr.bf16.mxu1 %v11683_v7  ;;  %v11691_v7 = vld [vmem:[%s17829_s8 + $0x1fc] ss:$8 sps:$4 sm:$0xff]  }
 0xc38   :  { %8749 = vmatpush1.bf16.msra.mxu1 %v11684_v14  ;;  %v8674_v14 = vpop.f32.mrb[12].mxu0 }
 0xc39   :  { %8750 = vmatprep.subr.bf16.mxu1 %v11685_v16  ;;  %v8676_v16 = vpop.f32.mrb[13].mxu0 }
 0xc3c   :  { %8751 = vmatpush1.bf16.msra.mxu1 %v11686_v23  ;;  %v8678_v23 = vpop.f32.mrb[14].mxu0 }
 0xc3d   :  { %8752 = vmatprep.subr.bf16.mxu1 %v11687_v50  ;;  %v8724_v50 = vpack.c.bf16 %v8678_v23, %v8674_v14  ;;  %v18534_v14 = vpack.c.bf16 %v17384_v4, %v17366_v10  ;;  %v18539_v10 = vld [vmem:[#allocation22_spill] sm:$0xff] }
 0xc40   :  { %8753 = vmatpush1.bf16.msra.mxu1 %v11688_v24  ;;  %v8680_v24 = vpop.f32.mrb[15].mxu0 }
 0xc41   :  { %8754 = vmatprep.subr.bf16.mxu1 %v11689_v60  ;;  %v8725_v60 = vpack.c.bf16 %v8680_v24, %v8676_v16 }
 0xc43   :  { %8762 = vmatprep.mubr.bf16.mxu1 %v8725_v60 }
 0xc44   :  { %8755 = vmatpush1.bf16.msra.mxu1 %v11690_v33 }
 0xc45   :  { %8756 = vmatprep.subr.bf16.mxu1 %v11691_v7 }
 0xc48   :  { %8757 = vmatpush1.bf16.msra.mxu1 %v16517_v6  ;;  %v9287_v6 = vpop.permute.xlu0 %9286 }
 0xc49   :  { %8758 = vmatprep.subr.bf16.mxu1 %v16528_v17 }
 0xc4c   :  { %8759 = vmatpush1.bf16.msra.mxu1 %v16523_v12 }
 0xc4d   :  { %8760 = vmatprep.subr.bf16.mxu1 %v16534_v48 }
 0xc50   :  { %8761 = vmatpush1.bf16.msra.mxu1 %v16542_v0 }
 0xc51   :  { %8773 = vmatprep.subr.bf16.mxu1 %v16549_v34 }
 0xc53   :  { %8763 = vmatmul.mubr.bf16.vlgmr.msra.gmra.mrb[216].mxu1 %v8724_v50 }
 0xc54   :  { %8774 = vmatpush1.bf16.msra.mxu1 %v16603_v41  ;;  %8805 = vmatprep.mubr.bf16.mxu1 %v18447_v1 }
 0xc55   :  { %8775 = vmatprep.subr.bf16.mxu1 %v16609_v54 }
 0xc58   :  { %8776 = vmatpush1.bf16.msra.mxu1 %v16620_v46 }
 0xc59   :  { %10141 = vmatprep.subr.msk.bf16.mxu1 %vm7268_vm2, %v16624_v62 }
 0xc5c   :  { %8778 = vmatpush1.bf16.msra.mxu1 %v16630_v19 }
 0xc5d   :  { %8819 = vmatprep.subr.bf16.mxu1 %v16635_v22 }
 0xc65   :  { %v17629_v16 = vpop.f32.mrb[16].mxu0 }
 0xc66   :  { %v8941_v23 = vpop.f32.mrb[17].mxu0 }
 0xc67   :  { %v17631_v50 = vpop.f32.mrb[18].mxu0 }
 0xc68   :  { %v8989_v24 = vpack.c.bf16 %v17631_v50, %v17629_v16  ;;  %v8945_v60 = vpop.f32.mrb[19].mxu0 }
 0xcc9   :  { %v8464_v12 = vpop.f32.mrb[208].mxu1 }
 0xcca   :  { %v9299_v17 = vadd.f32 %v9287_v6, %v8464_v12  ;;  %v8466_v48 = vpop.f32.mrb[209].mxu1  ;;  %v18543_v12 = vld [vmem:[#allocation35_spill] sm:$0xff] }
 0xccb   :  { %v9300_v0 = vadd.f32 %v9287_v6, %v8466_v48  ;;  %v17613_v34 = vpop.f32.mrb[210].mxu1  ;;  %v18541_v6 = vld [vmem:[#allocation36_spill] sm:$0xff] }
 0xccc   :  { %11647 = vtanh.f32 %v9299_v17  ;;  %v17615_v41 = vpop.f32.mrb[211].mxu1  ;;  %v18544_v17 = vld [vmem:[#allocation41_spill] sm:$0xff]  ;;  %v18545_v48 = vld [vmem:[#allocation16_spill] sm:$0xff] }
 0xccd   :  { %11649 = vtanh.f32 %v9300_v0  ;;  %v18546_v0 = vld [vmem:[#allocation17_spill] sm:$0xff] }
 0xcd6   :  { %v11648_v54 = vpop.eup %11647 }
 0xcd7   :  { %v11650_v46 = vpop.eup %11649  ;;  %9311 = vst [vmem:[%s17831_s16] sm:$0xff] %v11648_v54  ;;  %v18547_v54 = vld [vmem:[#allocation24_spill] sm:$0xff] }
 0xcd8   :  { %9312 = vst [vmem:[%s17831_s16 + $0x8] sm:$0xff] %v11650_v46  ;;  %v18548_v46 = vld [vmem:[#allocation14_spill] sm:$0xff] }
 0xce6   :  { %v8717_v62 = vpop.f32.mrb[212].mxu1 }
 0xce7   :  { %v10693_v19 = vpop.f32.mrb[213].mxu1 }
 0xce8   :  { %v8720_v22 = vpop.f32.mrb[214].mxu1  ;;  %v18550_v19 = vld [vmem:[#allocation25_spill] sm:$0xff] }
 0xce9   :  { %v8726_v33 = vpack.c.bf16 %v8720_v22, %v8717_v62  ;;  %v10694_v7 = vpop.f32.mrb[215].mxu1  ;;  %v18549_v62 = vld [vmem:[#allocation11_spill] sm:$0xff]  ;;  %v18551_v22 = vld [vmem:[#allocation21_spill] sm:$0xff] }
 0xcea   :  { %v18553_v7 = vld [vmem:[#allocation30_spill] sm:$0xff] }
 0xceb   :  { %10142 = vmatmul.mubr.msk.bf16.vlgmr.msra.gmra.mrb[216].mxu1 %vm7264_vm3, %v8726_v33  ;;  %v18552_v33 = vld [vmem:[#allocation18_spill] sm:$0xff] }
 0xcec   :  { %8820 = vmatpush1.bf16.msra.mxu1 %v16670_v30  ;;  %8851 = vmatprep.mubr.bf16.mxu1 %v18534_v14  ;;  %v8990_v30 = vpack.c.bf16 %v8945_v60, %v8941_v23  ;;  %v18554_v14 = vld [vmem:[#allocation26_spill] sm:$0xff]  ;;  %v18555_v23 = vld [vmem:[#allocation31_spill] sm:$0xff]  ;;  %v18556_v60 = vpack.c.bf16 %v17374_v44, %v17364_v47  ;;  %v18564_v44 = vld [vmem:[#allocation5_spill] sm:$0xff] }
 0xced   :  { %8821 = vmatprep.subr.bf16.mxu1 %v16675_v38  ;;  %v17642_v38 = vpop.f32.mrb[20].mxu0  ;;  %v18563_v47 = vld [vmem:[#allocation3_spill] sm:$0xff] }
 0xcf0   :  { %8822 = vmatpush1.bf16.msra.mxu1 %v16684_v32  ;;  %v10703_v32 = vpop.f32.mrb[21].mxu0 }
 0xcf1   :  { %8823 = vmatprep.subr.bf16.mxu1 %v16691_v51  ;;  %v17646_v4 = vpop.f32.mrb[22].mxu0  ;;  %v18535_v51 = vld [vmem:[#allocation8_spill] sm:$0xff]  ;;  %v18557_v32 = vld [vmem:[#allocation34_spill] sm:$0xff] }
 0xcf4   :  { %8824 = vmatpush1.bf16.msra.mxu1 %v16703_v20  ;;  %v8991_v20 = vpack.c.bf16 %v17646_v4, %v17642_v38 }
 0xcf5   :  { %8825 = vmatprep.subr.bf16.mxu1 %v16709_v52  ;;  %v10704_v52 = vpop.f32.mrb[23].mxu0 }
 0xcf6   :  { %v18559_v52 = vld [vmem:[#allocation13_spill] sm:$0xff] }
 0xcf8   :  { %8826 = vmatpush1.bf16.msra.mxu1 %v16716_v27  ;;  %v18536_v27 = vld [vmem:[#allocation9_spill] sm:$0xff] }
 0xcf9   :  { %8827 = vmatprep.subr.bf16.mxu1 %v16723_v59  ;;  %v18537_v59 = vld [vmem:[#allocation12_spill] sm:$0xff] }
 0xcfc   :  { %8828 = vmatpush1.bf16.msra.mxu1 %v16733_v35  ;;  %v18538_v35 = vld [vmem:[#allocation10_spill] sm:$0xff] }
 0xcfd   :  { %8829 = vmatprep.subr.bf16.mxu1 %v16741_v5  ;;  %v18540_v5 = vld [vmem:[#allocation19_spill] sm:$0xff] }
 0xd00   :  { %8830 = vmatpush1.bf16.msra.mxu1 %v16754_v42  ;;  %v18542_v42 = vld [vmem:[#allocation38_spill] sm:$0xff] }
 0xd01   :  { %8831 = vmatprep.subr.bf16.mxu1 %v18535_v51  ;;  %v18558_v51 = vld [vmem:[#allocation15_spill] sm:$0xff] }
 0xd04   :  { %8832 = vmatpush1.bf16.msra.mxu1 %v18536_v27  ;;  %v18560_v27 = vld [vmem:[#allocation20_spill] sm:$0xff] }
 0xd05   :  { %8833 = vmatprep.subr.bf16.mxu1 %v18537_v59  ;;  %v18561_v59 = vld [vmem:[#allocation32_spill] sm:$0xff] }
 0xd08   :  { %8834 = vmatpush1.bf16.msra.mxu1 %v18538_v35  ;;  %v18562_v35 = vld [vmem:[#allocation4_spill] sm:$0xff] }
 0xd09   :  { %8835 = vmatprep.subr.bf16.mxu1 %v18539_v10  ;;  %v17688_v10 = vpop.f32.mrb[24].mxu0 }
 0xd0c   :  { %8836 = vmatpush1.bf16.msra.mxu1 %v18540_v5  ;;  %v18565_v5 = vld [vmem:[#allocation33_spill] sm:$0xff] }
 0xd0d   :  { %8837 = vmatprep.subr.bf16.mxu1 %v18541_v6  ;;  %v9121_v6 = vpop.f32.mrb[25].mxu0 }
 0xd10   :  { %8838 = vmatpush1.bf16.msra.mxu1 %v18542_v42  ;;  %v18566_v42 = vld [vmem:[#allocation23_spill] sm:$0xff] }
 0xd11   :  { %8839 = vmatprep.subr.bf16.mxu1 %v18543_v12  ;;  %v17692_v12 = vpop.f32.mrb[26].mxu0 }
 0xd12   :  { %v9125_v58 = vpop.f32.mrb[27].mxu0 }
 0xd13   :  { %v9170_v21 = vpack.c.bf16 %v9125_v58, %v9121_v6  ;;  %v18583_v6 = vld [vmem:[#allocation50_spill] sm:$0xff]  ;;  %v18585_v58 = vld [vmem:[#allocation52_spill] sm:$0xff] }
 0xd14   :  { %8840 = vmatpush1.bf16.msra.mxu1 %v18544_v17  ;;  %v9169_v17 = vpack.c.bf16 %v17692_v12, %v17688_v10 }
 0xd15   :  { %8841 = vmatprep.subr.bf16.mxu1 %v18545_v48  ;;  %v18568_v48 = vld [vmem:[#allocation28_spill] sm:$0xff] }
 0xd18   :  { %8842 = vmatpush1.bf16.msra.mxu1 %v18546_v0  ;;  %v18570_v0 = vld [vmem:[#allocation27_spill] sm:$0xff] }
 0xd19   :  { %8843 = vmatprep.subr.bf16.mxu1 %v18547_v54  ;;  %v18571_v54 = vld [vmem:[#allocation7_spill] sm:$0xff] }
 0xd1c   :  { %8844 = vmatpush1.bf16.msra.mxu1 %v18548_v46  ;;  %v17701_v46 = vpop.f32.mrb[28].mxu0 }
 0xd1d   :  { %8845 = vmatprep.subr.bf16.mxu1 %v18549_v62  ;;  %v18572_v62 = vld [vmem:[#allocation40_spill] sm:$0xff] }
 0xd20   :  { %8846 = vmatpush1.bf16.msra.mxu1 %v18550_v19  ;;  %v10713_v19 = vpop.f32.mrb[29].mxu0 }
 0xd21   :  { %8847 = vmatprep.subr.bf16.mxu1 %v18551_v22  ;;  %v17704_v22 = vpop.f32.mrb[30].mxu0  ;;  %v18592_v19 = vld [vmem:[#allocation59_spill] sm:$0xff] }
 0xd24   :  { %8848 = vmatpush1.bf16.msra.mxu1 %v18552_v33  ;;  %v9171_v33 = vpack.c.bf16 %v17704_v22, %v17701_v46 }
 0xd25   :  { %8849 = vmatprep.subr.bf16.mxu1 %v18553_v7  ;;  %v10714_v7 = vpop.f32.mrb[31].mxu0 }
 0xd26   :  { %v18593_v7 = vld [vmem:[#allocation60_spill] sm:$0xff] }
 0xd28   :  { %8850 = vmatpush1.bf16.msra.mxu1 %v18554_v14  ;;  %v18573_v14 = vld [vmem:[#allocation37_spill] sm:$0xff] }
 0xd29   :  { %8862 = vmatprep.subr.bf16.mxu1 %v18555_v23  ;;  %v18574_v23 = vld [vmem:[#allocation39_spill] sm:$0xff] }
 0xd2b   :  { %8852 = vmatmul.mubr.bf16.vlgmr.msra.gmra.mrb[216].mxu1 %v18556_v60  ;;  %v9282_v60 = vld [vmem:[%s17830_s15 + $0x8] sm:$0xff] }
 0xd2c   :  { %8863 = vmatpush1.bf16.msra.mxu1 %v18557_v32  ;;  %8894 = vmatprep.mubr.bf16.mxu1 %v18447_v1  ;;  %v9283_v32 = vld [vmem:[%s17830_s15 + $0x10] sm:$0xff] }
 0xd2d   :  { %8864 = vmatprep.subr.bf16.mxu1 %v18558_v51  ;;  %v18575_v51 = vld [vmem:[#allocation42_spill] sm:$0xff]  ;;  %9291 = vperm.xlu0 %11068, %v9282_v60  }
 0xd2e   :  { %9296 = vperm.xlu1 %11069, %v9283_v32  }
 0xd30   :  { %8865 = vmatpush1.bf16.msra.mxu1 %v18559_v52  ;;  %v18576_v52 = vld [vmem:[#allocation43_spill] sm:$0xff] }
 0xd31   :  { %10143 = vmatprep.subr.msk.bf16.mxu1 %vm7268_vm2, %v18560_v27  ;;  %v18577_v27 = vld [vmem:[#allocation44_spill] sm:$0xff] }
 0xd34   :  { %8867 = vmatpush1.bf16.msra.mxu1 %v18561_v59  ;;  %v18578_v59 = vld [vmem:[#allocation45_spill] sm:$0xff] }
 0xd35   :  { %8995 = vmatprep.subr.bf16.mxu1 %v18562_v35  ;;  %v18579_v35 = vld [vmem:[#allocation46_spill] sm:$0xff] }
 0xd37   :  { %10144 = vmatmul.mubr.msk.bf16.vlgmr.msra.gmra.mrb[216].mxu1 %vm7264_vm3, %v8639_v31  ;;  %v18567_v31 = vld [vmem:[#allocation6_spill] sm:$0xff] }
 0xd38   :  { %8996 = vmatpush1.bf16.msra.mxu1 %v18563_v47  ;;  %9027 = vmatprep.mubr.bf16.mxu1 %v8990_v30  ;;  %v18569_v30 = vld [vmem:[#allocation29_spill] sm:$0xff]  ;;  %v18580_v47 = vld [vmem:[#allocation47_spill] sm:$0xff] }
 0xd39   :  { %8997 = vmatprep.subr.bf16.mxu1 %v18564_v44  ;;  %v18581_v44 = vld [vmem:[#allocation48_spill] sm:$0xff] }
 0xd3c   :  { %8998 = vmatpush1.bf16.msra.mxu1 %v18565_v5  ;;  %v18582_v5 = vld [vmem:[#allocation49_spill] sm:$0xff] }
 0xd3d   :  { %8999 = vmatprep.subr.bf16.mxu1 %v18566_v42  ;;  %v18584_v42 = vld [vmem:[#allocation51_spill] sm:$0xff] }
 0xd40   :  { %9000 = vmatpush1.bf16.msra.mxu1 %v18567_v31  ;;  %v18586_v31 = vld [vmem:[#allocation53_spill] sm:$0xff] }
 0xd41   :  { %9001 = vmatprep.subr.bf16.mxu1 %v18568_v48  ;;  %v18587_v48 = vld [vmem:[#allocation54_spill] sm:$0xff] }
 0xd44   :  { %9002 = vmatpush1.bf16.msra.mxu1 %v18569_v30  ;;  %v18588_v30 = vld [vmem:[#allocation55_spill] sm:$0xff] }
 0xd45   :  { %9003 = vmatprep.subr.bf16.mxu1 %v18570_v0  ;;  %v18589_v0 = vld [vmem:[#allocation56_spill] sm:$0xff] }
 0xd48   :  { %9004 = vmatpush1.bf16.msra.mxu1 %v18571_v54  ;;  %v18590_v54 = vld [vmem:[#allocation57_spill] sm:$0xff] }
 0xd49   :  { %9005 = vmatprep.subr.bf16.mxu1 %v18572_v62  ;;  %v18591_v62 = vld [vmem:[#allocation58_spill] sm:$0xff] }
 0xd4c   :  { %9006 = vmatpush1.bf16.msra.mxu1 %v18573_v14  ;;  %v18594_v14 = vld [vmem:[#allocation61_spill] sm:$0xff] }
 0xd4d   :  { %9007 = vmatprep.subr.bf16.mxu1 %v18574_v23 }
 0xd50   :  { %9008 = vmatpush1.bf16.msra.mxu1 %v18575_v51 }
 0xd51   :  { %9009 = vmatprep.subr.bf16.mxu1 %v18576_v52 }
 0xd54   :  { %9010 = vmatpush1.bf16.msra.mxu1 %v18577_v27 }
 0xd55   :  { %9011 = vmatprep.subr.bf16.mxu1 %v18578_v59 }
 0xd58   :  { %9012 = vmatpush1.bf16.msra.mxu1 %v18579_v35 }
 0xd59   :  { %9013 = vmatprep.subr.bf16.mxu1 %v18580_v47 }
 0xd5c   :  { %9014 = vmatpush1.bf16.msra.mxu1 %v18581_v44 }
 0xd5d   :  { %9015 = vmatprep.subr.bf16.mxu1 %v18582_v5 }
 0xd60   :  { %9016 = vmatpush1.bf16.msra.mxu1 %v18583_v6 }
 0xd61   :  { %9017 = vmatprep.subr.bf16.mxu1 %v18584_v42 }
 0xd64   :  { %9018 = vmatpush1.bf16.msra.mxu1 %v18585_v58 }
 0xd65   :  { %9019 = vmatprep.subr.bf16.mxu1 %v18586_v31 }
 0xd68   :  { %9020 = vmatpush1.bf16.msra.mxu1 %v18587_v48 }
 0xd69   :  { %9021 = vmatprep.subr.bf16.mxu1 %v18588_v30 }
 0xd6c   :  { %9022 = vmatpush1.bf16.msra.mxu1 %v18589_v0 }
 0xd6d   :  { %9023 = vmatprep.subr.bf16.mxu1 %v18590_v54 }
 0xd70   :  { %9024 = vmatpush1.bf16.msra.mxu1 %v18591_v62 }
 0xd71   :  { %9025 = vmatprep.subr.bf16.mxu1 %v18592_v19 }
 0xd74   :  { %9026 = vmatpush1.bf16.msra.mxu1 %v18593_v7 }
 0xd75   :  { %9038 = vmatprep.subr.bf16.mxu1 %v18594_v14 }
 0xd77   :  { %9028 = vmatmul.mubr.bf16.vlgmr.msra.gmra.mrb[216].mxu1 %v8989_v24 }
 0xd78   :  { %9039 = vmatpush1.bf16.msra.mxu1 %v17188_v28  ;;  %9070 = vmatprep.mubr.bf16.mxu1 %v18447_v1  ;;  %v18598_v28 = vld [vmem:[#allocation65_spill] sm:$0xff] }
 0xd79   :  { %9040 = vmatprep.subr.bf16.mxu1 %v17194_v15  ;;  %v18597_v15 = vld [vmem:[#allocation64_spill] sm:$0xff] }
 0xd7c   :  { %9041 = vmatpush1.bf16.msra.mxu1 %v17207_v18  ;;  %v18596_v18 = vld [vmem:[#allocation63_spill] sm:$0xff] }
 0xd7d   :  { %10145 = vmatprep.subr.msk.bf16.mxu1 %vm7268_vm2, %v17211_v49  ;;  %v18595_v49 = vld [vmem:[#allocation62_spill] sm:$0xff] }
 0xd80   :  { %9043 = vmatpush1.bf16.msra.mxu1 %v17219_v8  ;;  %v18599_v8 = vld [vmem:[#allocation66_spill] sm:$0xff] }
 0xd81   :  { %9175 = vmatprep.subr.bf16.mxu1 %v17224_v43  ;;  %v18600_v43 = vld [vmem:[#allocation67_spill] sm:$0xff] }
 0xd83   :  { %10146 = vmatmul.mubr.msk.bf16.vlgmr.msra.gmra.mrb[216].mxu1 %vm7264_vm3, %v8991_v20 }
 0xd84   :  { %9176 = vmatpush1.bf16.msra.mxu1 %v17230_v26  ;;  %9207 = vmatprep.mubr.bf16.mxu1 %v9170_v21  ;;  %v18601_v26 = vld [vmem:[#allocation68_spill] sm:$0xff] }
 0xd85   :  { %9177 = vmatprep.subr.bf16.mxu1 %v17236_v2  ;;  %v18602_v2 = vld [vmem:[#allocation69_spill] sm:$0xff] }
 0xd88   :  { %9178 = vmatpush1.bf16.msra.mxu1 %v17247_v57  ;;  %v18603_v57 = vld [vmem:[#allocation70_spill] sm:$0xff] }
 0xd89   :  { %9179 = vmatprep.subr.bf16.mxu1 %v17254_v45  ;;  %v18604_v45 = vld [vmem:[#allocation71_spill] sm:$0xff] }
 0xd8c   :  { %9180 = vmatpush1.bf16.msra.mxu1 %v17264_v61  ;;  %v18605_v61 = vld [vmem:[#allocation72_spill] sm:$0xff] }
 0xd8d   :  { %9181 = vmatprep.subr.bf16.mxu1 %v17270_v53  ;;  %v18606_v53 = vld [vmem:[#allocation73_spill] sm:$0xff] }
 0xd90   :  { %9182 = vmatpush1.bf16.msra.mxu1 %v17277_v11  ;;  %v18607_v11 = vld [vmem:[#allocation74_spill] sm:$0xff] }
 0xd91   :  { %9183 = vmatprep.subr.bf16.mxu1 %v17284_v63  ;;  %v18608_v63 = vld [vmem:[#allocation75_spill] sm:$0xff] }
 0xd94   :  { %9184 = vmatpush1.bf16.msra.mxu1 %v17290_v36  ;;  %v18609_v36 = vld [vmem:[#allocation76_spill] sm:$0xff] }
 0xd95   :  { %9185 = vmatprep.subr.bf16.mxu1 %v17296_v9  ;;  %v18610_v9 = vld [vmem:[#allocation77_spill] sm:$0xff] }
 0xd98   :  { %9186 = vmatpush1.bf16.msra.mxu1 %v17303_v29  ;;  %v18611_v29 = vld [vmem:[#allocation78_spill] sm:$0xff] }
 0xd99   :  { %9187 = vmatprep.subr.bf16.mxu1 %v18595_v49 }
 0xd9c   :  { %9188 = vmatpush1.bf16.msra.mxu1 %v18596_v18 }
 0xd9d   :  { %9189 = vmatprep.subr.bf16.mxu1 %v18597_v15 }
 0xda0   :  { %9190 = vmatpush1.bf16.msra.mxu1 %v18598_v28 }
 0xda1   :  { %9191 = vmatprep.subr.bf16.mxu1 %v18599_v8 }
 0xda4   :  { %9192 = vmatpush1.bf16.msra.mxu1 %v18600_v43 }
 0xda5   :  { %9193 = vmatprep.subr.bf16.mxu1 %v18601_v26 }
 0xda8   :  { %9194 = vmatpush1.bf16.msra.mxu1 %v18602_v2 }
 0xda9   :  { %9195 = vmatprep.subr.bf16.mxu1 %v18603_v57 }
 0xdac   :  { %9196 = vmatpush1.bf16.msra.mxu1 %v17372_v56  ;;  %v18612_v56 = vld [vmem:[#allocation79_spill] sm:$0xff] }
 0xdad   :  { %9197 = vmatprep.subr.bf16.mxu1 %v17380_v25  ;;  %v9297_v38 = vpop.permute.xlu1 %9296 }
 0xdb0   :  { %9198 = vmatpush1.bf16.msra.mxu1 %v17393_v13 }
 0xdb1   :  { %9199 = vmatprep.subr.bf16.mxu1 %v18604_v45 }
 0xdb4   :  { %9200 = vmatpush1.bf16.msra.mxu1 %v18605_v61 }
 0xdb5   :  { %9201 = vmatprep.subr.bf16.mxu1 %v18606_v53 }
 0xdb8   :  { %9202 = vmatpush1.bf16.msra.mxu1 %v18607_v11 }
 0xdb9   :  { %9203 = vmatprep.subr.bf16.mxu1 %v18608_v63 }
 0xdbc   :  { %9204 = vmatpush1.bf16.msra.mxu1 %v18609_v36 }
 0xdbd   :  { %9205 = vmatprep.subr.bf16.mxu1 %v18610_v9 }
 0xdc0   :  { %9206 = vmatpush1.bf16.msra.mxu1 %v18611_v29 }
 0xdc1   :  { %9218 = vmatprep.subr.bf16.mxu1 %v18612_v56 }
 0xdc3   :  { %9208 = vmatmul.mubr.bf16.vlgmr.msra.gmra.mrb[216].mxu1 %v9169_v17 }
 0xdc4   :  { %9219 = vmatpush1.bf16.msra.mxu1 %v17458_v37  ;;  %9250 = vmatprep.mubr.bf16.mxu1 %v18447_v1  ;;  %v9292_v37 = vpop.permute.xlu0 %9291 }
 0xdc5   :  { %9220 = vmatprep.subr.bf16.mxu1 %v17464_v40 }
 0xdc8   :  { %9221 = vmatpush1.bf16.msra.mxu1 %v17480_v3 }
 0xdc9   :  { %10147 = vmatprep.subr.msk.bf16.mxu1 %vm7268_vm2, %v17483_v55 }
 0xdcc   :  { %9223 = vmatpush1.bf16.msra.mxu1 %v17493_v39 }
 0xdcf   :  { %10148 = vmatmul.mubr.msk.bf16.vlgmr.msra.gmra.mrb[216].mxu1 %vm7264_vm3, %v9171_v33 }
 0xea2   :  { %v9252_v13 = vpop.f32.mrb[216].mxu1 }
 0xea3   :  { %v9269_v25 = vrot.slane %v9252_v13, 4  ;;  %v9254_v16 = vpop.f32.mrb[217].mxu1 }
 0xea4   :  { %v9270_v50 = vrot.slane %v9254_v16, 4  ;;  %v9256_v1 = vpop.f32.mrb[218].mxu1 }
 0xea5   :  { %v9271_v24 = vrot.slane %v9256_v1, 4  ;;  %v9279_v3 = vsel %vm7268_vm2, %v17613_v34, %v9269_v25  ;;  %v9258_v40 = vpop.f32.mrb[219].mxu1 }
 0xea6   :  { %v9280_v55 = vsel %vm7268_vm2, %v17615_v41, %v9270_v50  ;;  %v9301_v39 = vadd.f32 %v9292_v37, %v9279_v3  ;;  %v9273_v4 = vrot.slane %v9258_v40, 4 }
 0xea7   :  { %v9302_v20 = vadd.f32 %v9292_v37, %v9280_v55  ;;  %v9272_v10 = vsel %vm7268_vm2, %v9269_v25, %v9271_v24 }
 0xea8   :  { %11651 = vtanh.f32 %v9301_v39  ;;  %v9274_v12 = vsel %vm7268_vm2, %v9270_v50, %v9273_v4  ;;  %v9303_v17 = vadd.f32 %v9297_v38, %v9272_v10 }
 0xea9   :  { %11653 = vtanh.f32 %v9302_v20  ;;  %v9304_v21 = vadd.f32 %v9297_v38, %v9274_v12 }
 0xeaa   :  { %11655 = vtanh.f32 %v9303_v17 }
 0xeab   :  { %11657 = vtanh.f32 %v9304_v21 }
 0xeb2   :  { %v11652_v46 = vpop.eup %11651 }
 0xeb3   :  { %v11654_v34 = vpop.eup %11653  ;;  %9313 = vst [vmem:[%s17831_s16 + $0x10] sm:$0xff] %v11652_v46 }
 0xeb4   :  { %v11656_v41 = vpop.eup %11655  ;;  %9314 = vst [vmem:[%s17831_s16 + $0x18] sm:$0xff] %v11654_v34 }
 0xeb5   :  { %v11658_v22 = vpop.eup %11657  ;;  %9315 = vst [vmem:[%s17831_s16 + $0x20] sm:$0xff] %v11656_v41 }
 0xeb6   :  { %9316 = vst [vmem:[%s17831_s16 + $0x28] sm:$0xff] %v11658_v22 }

</bundles_post_ra>
